<compile_context>
chip_gen: v7x
topology: tpu7x:2x2x1
jax: 0.10.0
libtpu: 0.0.40
codegen_flags: <defaults>
</compile_context>

<pallas_src>
import jax
import jax.numpy as jnp
from jax.experimental import pallas as pl
from jax.experimental.pallas import tpu as pltpu

_BN_EPS = 1e-5
_LANE = 128
_VMEM_LIMIT = 48 * 1024 * 1024  # explicit scoped-VMEM budget (fits all gens)


def _round_up(x, m):
    return (x + m - 1) // m * m


# ----------------------------------------------------------------------------
# Kernel 1: tiled per-channel batch-statistics reduction (two-pass BatchNorm)
# ----------------------------------------------------------------------------

def _bn_stats_kernel(x_ref, sum_ref, sq_ref):
    @pl.when(pl.program_id(0) == 0)
    def _init():
        sum_ref[...] = jnp.zeros_like(sum_ref)
        sq_ref[...] = jnp.zeros_like(sq_ref)

    x = x_ref[...].astype(jnp.float32)
    sum_ref[...] += jnp.sum(x, axis=0, keepdims=True)
    sq_ref[...] += jnp.sum(x * x, axis=0, keepdims=True)


def _pick_row_tile(m, cap=1024):
    """Largest row tile <= cap that divides m (falls back to whole slab)."""
    if m <= cap:
        return m
    for t in range(cap - cap % 8, 7, -8):
        if m % t == 0:
            return t
    return m


def bn_batch_stats(x2d):
    """Per-channel (sum, sum_sq) over the rows of an (M, C) slab, row-tiled."""
    M, C = x2d.shape
    tm = _pick_row_tile(M)
    sums, sqs = pl.pallas_call(
        _bn_stats_kernel,
        out_shape=(jax.ShapeDtypeStruct((1, C), jnp.float32),
                   jax.ShapeDtypeStruct((1, C), jnp.float32)),
        grid=(M // tm,),
        in_specs=[pl.BlockSpec((tm, C), lambda i: (i, 0))],
        out_specs=(pl.BlockSpec((1, C), lambda i: (0, 0)),
                   pl.BlockSpec((1, C), lambda i: (0, 0))),
        compiler_params=pltpu.CompilerParams(
            dimension_semantics=("arbitrary",),
            vmem_limit_bytes=_VMEM_LIMIT),
    )(x2d)
    return sums[0], sqs[0]


def bn_scale_shift(x2d, gamma, beta):
    """Training-mode BN folded to per-channel (scale, shift); C-length glue math."""
    M, C = x2d.shape
    s, sq = bn_batch_stats(x2d)
    mean = s / M
    var = jnp.maximum(sq / M - mean * mean, 0.0)          # biased variance
    scale = gamma * jax.lax.rsqrt(var + _BN_EPS)
    shift = beta - mean * scale
    return scale.reshape(1, C), shift.reshape(1, C)


# ----------------------------------------------------------------------------
# Kernel 2: fused BN+ReLU -> 3x3 conv (direct 9-tap) -> bias [-> shortcut+add]
# ----------------------------------------------------------------------------

def _make_conv_kernel(H, W, stride, with_shortcut, out_dtype):
    Hp, Wp = H + 2, W + 2
    M = H * Wp                              # rows of the full-res accumulator
    Ho = (H - 1) // stride + 1
    Wo = (W - 1) // stride + 1

    def kernel(*refs):
        if with_shortcut:
            (x_ref, scale_ref, shift_ref, w_ref, b_ref, xsc_ref, wsc_ref,
             o_ref, a_ref, acc_ref) = refs
        else:
            (x_ref, scale_ref, shift_ref, w_ref, b_ref,
             o_ref, a_ref, acc_ref) = refs

        # --- BN + ReLU prologue into a zero-padded, row-flattened VMEM buffer.
        # a_ref row hp*Wp + wp  <->  padded pixel (hp, wp); the border rows stay
        # zero, which is exactly the conv's 'same' padding of relu(bn(x)).
        a_ref[...] = jnp.zeros_like(a_ref)
        scale = scale_ref[...]
        shift = shift_ref[...]
        for h in range(H):
            act = jnp.maximum(
                x_ref[0, h].astype(jnp.float32) * scale + shift, 0.0)
            a_ref[pl.ds((h + 1) * Wp + 1, W), :] = act

        # --- 3x3 conv as 9 constant-offset taps: out[h, w] lives at acc row
        # h*Wp + w and tap (kh, kw) reads a_ref shifted by kh*Wp + kw.  Each
        # tap is one big (M, Cin)x(Cin, Cout) MXU matmul (bf16 in, f32 acc).
        acc = None
        for kh in range(3):
            for kw in range(3):
                slab = a_ref[pl.ds(kh * Wp + kw, M), :].astype(jnp.bfloat16)
                part = jnp.dot(slab, w_ref[kh * 3 + kw],
                               preferred_element_type=jnp.float32)
                acc = part if acc is None else acc + part
        acc_ref[...] = acc + b_ref[...]

        # --- fused 1x1 shortcut conv + residual add (on the raw input x),
        # only for the rows that survive the stride.
        if with_shortcut:
            for h in range(0, H, stride):
                xrow = xsc_ref[0, h].astype(jnp.bfloat16)
                acc_ref[pl.ds(h * Wp, W), :] += jnp.dot(
                    xrow, wsc_ref[...], preferred_element_type=jnp.float32)

        # --- stride-subsampled store straight from VMEM (no oversized HBM
        # writeback and no glue-side strided slicing of the output).
        for ho in range(Ho):
            r0 = ho * stride * Wp
            if stride == 1:
                row = acc_ref[pl.ds(r0, W), :]
            else:
                row = acc_ref[pl.ds(r0, Wo, stride=stride), :]
            o_ref[0, ho, :, :] = row.astype(out_dtype)

    return kernel, Hp, Wp, M, Ho, Wo


def fused_bn_relu_conv3x3(x_nhwc, scale, shift, w9, bias, *, stride=1,
                          shortcut=None, out_dtype=jnp.float32):
    """conv3x3(relu(scale*x+shift), stride) + bias  [+ 1x1-stride shortcut on x_sc].

    x_nhwc : (N, H, W, Cin)   conv input, pre-BN (channels lane-padded)
    w9     : (9, Cin, Cout)   bf16 tap weights, tap index = kh*3 + kw
    bias   : (1, Cout)        f32 (conv bias, shortcut bias already folded in)
    shortcut : None or (x_sc (N, H, W, Csc), wsc (Csc, Cout) bf16)
    """
    N, H, W, Cin = x_nhwc.shape
    Cout = w9.shape[-1]
    kernel, Hp, Wp, M, Ho, Wo = _make_conv_kernel(
        H, W, stride, shortcut is not None, out_dtype)

    in_specs = [
        pl.BlockSpec((1, H, W, Cin), lambda n: (n, 0, 0, 0)),
        pl.BlockSpec((1, Cin), lambda n: (0, 0)),
        pl.BlockSpec((1, Cin), lambda n: (0, 0)),
        pl.BlockSpec((9, Cin, Cout), lambda n: (0, 0, 0)),
        pl.BlockSpec((1, Cout), lambda n: (0, 0)),
    ]
    args = [x_nhwc, scale, shift, w9, bias]
    if shortcut is not None:
        x_sc, wsc = shortcut
        Csc = x_sc.shape[-1]
        in_specs += [
            pl.BlockSpec((1, H, W, Csc), lambda n: (n, 0, 0, 0)),
            pl.BlockSpec((Csc, Cout), lambda n: (0, 0)),
        ]
        args += [x_sc, wsc]

    a_rows = _round_up(Hp * Wp + 2, 8)      # +2: taps of garbage rows peek past

    return pl.pallas_call(
        kernel,
        out_shape=jax.ShapeDtypeStruct((N, Ho, Wo, Cout), out_dtype),
        grid=(N,),
        in_specs=in_specs,
        out_specs=pl.BlockSpec((1, Ho, Wo, Cout), lambda n: (n, 0, 0, 0)),
        scratch_shapes=[
            pltpu.VMEM((a_rows, Cin), jnp.float32),   # padded activation
            pltpu.VMEM((M, Cout), jnp.float32),       # full-res accumulator
        ],
        compiler_params=pltpu.CompilerParams(
            dimension_semantics=("parallel",),        # megacore split over images
            vmem_limit_bytes=_VMEM_LIMIT),
    )(*args)


# ----------------------------------------------------------------------------
# Parameter preparation (PyTorch layouts -> lane-dense padded kernel layouts)
# ----------------------------------------------------------------------------

def init_params(key, in_planes, planes):
    Cin_p = _round_up(in_planes, _LANE)
    Cp = _round_up(planes, _LANE)
    ks = jax.random.split(key, 10)

    def nrm(k, shape, s=0.1):
        return s * jax.random.normal(k, shape, jnp.float32)

    w1 = nrm(ks[0], (planes, in_planes, 3, 3))
    b1 = nrm(ks[1], (planes,))
    w2 = nrm(ks[2], (planes, planes, 3, 3))
    b2 = nrm(ks[3], (planes,))
    wsc = nrm(ks[4], (planes, in_planes, 1, 1))
    bsc = nrm(ks[5], (planes,))
    gamma1 = 1.0 + nrm(ks[6], (in_planes,))
    beta1 = nrm(ks[7], (in_planes,))
    gamma2 = 1.0 + nrm(ks[8], (planes,))
    beta2 = nrm(ks[9], (planes,))

    def pad_vec(v, c):
        return jnp.pad(v, (0, c - v.shape[0]))

    def conv3x3_taps(w_oihw, ci_p, co_p):
        co, ci = w_oihw.shape[0], w_oihw.shape[1]
        w9 = jnp.transpose(w_oihw, (2, 3, 1, 0)).reshape(9, ci, co)
        w9 = jnp.pad(w9, ((0, 0), (0, ci_p - ci), (0, co_p - co)))
        return w9.astype(jnp.bfloat16)

    wsc_mat = jnp.transpose(wsc[:, :, 0, 0])                       # (Cin, Cout)
    wsc_mat = jnp.pad(wsc_mat, ((0, Cin_p - in_planes),
                                (0, Cp - planes))).astype(jnp.bfloat16)

    return dict(
        gamma1=pad_vec(gamma1, Cin_p), beta1=pad_vec(beta1, Cin_p),
        w1=conv3x3_taps(w1, Cin_p, Cp), b1=pad_vec(b1, Cp).reshape(1, Cp),
        gamma2=pad_vec(gamma2, Cp), beta2=pad_vec(beta2, Cp),
        w2=conv3x3_taps(w2, Cp, Cp), b2=pad_vec(b2, Cp).reshape(1, Cp),
        wsc=wsc_mat, bsc=pad_vec(bsc, Cp).reshape(1, Cp),
    )


# ----------------------------------------------------------------------------
# wide_basic forward
# ----------------------------------------------------------------------------

def wide_basic_forward(x_nchw, params, in_planes, planes, stride):
    N, Cin, H, W = x_nchw.shape
    assert Cin == in_planes
    Cin_p = params["w1"].shape[1]
    Cp = params["w1"].shape[2]

    # NCHW -> NHWC at the module boundary; zero-pad channels to lane width.
    x = jnp.transpose(x_nchw, (0, 2, 3, 1)).astype(jnp.float32)
    x = jnp.pad(x, ((0, 0), (0, 0), (0, 0), (0, Cin_p - Cin)))

    # ---- conv1(relu(bn1(x))), stride 1 ----
    scale1, shift1 = bn_scale_shift(x.reshape(N * H * W, Cin_p),
                                    params["gamma1"], params["beta1"])
    h1 = fused_bn_relu_conv3x3(x, scale1, shift1, params["w1"], params["b1"],
                               stride=1, shortcut=None,
                               out_dtype=jnp.bfloat16)          # bf16 in HBM

    # ---- conv2(relu(bn2(h1))), stride s, shortcut + residual fused in ----
    scale2, shift2 = bn_scale_shift(h1.reshape(N * H * W, Cp),
                                    params["gamma2"], params["beta2"])
    if stride != 1 or in_planes != planes:
        shortcut = (x, params["wsc"])
        bias2 = params["b2"] + params["bsc"]      # fold shortcut bias in
    else:
        shortcut = None                            # module adds no residual here
        bias2 = params["b2"]
    out = fused_bn_relu_conv3x3(h1, scale2, shift2, params["w2"], bias2,
                                stride=stride, shortcut=shortcut,
                                out_dtype=jnp.float32)

    # Drop channel padding, back to NCHW at the module boundary.
    out = out[:, :, :, :planes]
    return jnp.transpose(out, (0, 3, 1, 2))


# ----------------------------------------------------------------------------
# Main
# ----------------------------------------------------------------------------

if __name__ == "__main__":
    key = jax.random.PRNGKey(0)
    k_x, k_p = jax.random.split(key)

    N, in_planes, H, W = 2, 4, 16, 16
    planes, stride = 8, 2

    x = jax.random.normal(k_x, (N, in_planes, H, W), jnp.float32)
    params = init_params(k_p, in_planes, planes)

    fwd = jax.jit(wide_basic_forward, static_argnums=(2, 3, 4))
    out = jax.block_until_ready(fwd(x, params, in_planes, planes, stride))

    assert out.shape == (N, planes, H // stride, W // stride), out.shape
    assert out.dtype == jnp.float32
    print("KERNEL_OK")
</pallas_src>

<mosaic_0001>
module attributes {stable_mosaic.version = 11 : i64} {
  func.func @_bn_stats_kernel(%arg0: i32, %arg1: memref<512x128xf32, #tpu.memory_space<vmem>>, %arg2: memref<1x128xf32, #tpu.memory_space<vmem>>, %arg3: memref<1x128xf32, #tpu.memory_space<vmem>>) attributes {dimension_semantics = [#tpu.dimension_semantics<arbitrary>], iteration_bounds = array<i64: 1>, scalar_prefetch = 0 : i64, scratch_operands = 0 : i64, tpu.core_type = #tpu.core_type<tc>, window_params = [{transform_indices = @transform_0, window_bounds = array<i64: 512, 128>}, {pipeline_mode = #tpu.pipeline_mode<synchronous>, transform_indices = @transform_1, window_bounds = array<i64: 1, 128>}, {pipeline_mode = #tpu.pipeline_mode<synchronous>, transform_indices = @transform_2, window_bounds = array<i64: 1, 128>}]} {
    %c0_i32 = arith.constant 0 : i32
    %0 = arith.cmpi eq, %arg0, %c0_i32 : i32
    %1 = arith.extui %0 : i1 to i32
    %c0_i32_0 = arith.constant 0 : i32
    %2 = arith.cmpi ne, %1, %c0_i32_0 : i32
    scf.if %2 {
      %cst_11 = arith.constant 0.000000e+00 : f32
      %15 = vector.broadcast %cst_11 : f32 to vector<1x128xf32>
      %c0_12 = arith.constant 0 : index
      %c0_13 = arith.constant 0 : index
      %16 = vector.load %arg2[%c0_12, %c0_13] : memref<1x128xf32, #tpu.memory_space<vmem>>, vector<1x128xf32>
      tpu.vector_store %arg2[%c0_12, %c0_13], %15 {strides = array<i32>} : memref<1x128xf32, #tpu.memory_space<vmem>>, vector<1x128xf32>,
      %cst_14 = arith.constant 0.000000e+00 : f32
      %17 = vector.broadcast %cst_14 : f32 to vector<1x128xf32>
      %c0_15 = arith.constant 0 : index
      %c0_16 = arith.constant 0 : index
      %18 = vector.load %arg3[%c0_15, %c0_16] : memref<1x128xf32, #tpu.memory_space<vmem>>, vector<1x128xf32>
      tpu.vector_store %arg3[%c0_15, %c0_16], %17 {strides = array<i32>} : memref<1x128xf32, #tpu.memory_space<vmem>>, vector<1x128xf32>,
    } else {
    }
    %c0 = arith.constant 0 : index
    %c0_1 = arith.constant 0 : index
    %3 = vector.load %arg1[%c0, %c0_1] : memref<512x128xf32, #tpu.memory_space<vmem>>, vector<512x128xf32>
    %c0_2 = arith.constant 0 : index
    %c0_3 = arith.constant 0 : index
    %4 = vector.load %arg2[%c0_2, %c0_3] : memref<1x128xf32, #tpu.memory_space<vmem>>, vector<1x128xf32>
    %cst = arith.constant dense<0.000000e+00> : vector<128xf32>
    %5 = vector.multi_reduction <add>, %3, %cst [0] : vector<512x128xf32> to vector<128xf32>
    %6 = vector.shape_cast %5 : vector<128xf32> to vector<1x128xf32>
    %7 = arith.addf %4, %6 : vector<1x128xf32>
    %c0_4 = arith.constant 0 : index
    %c0_5 = arith.constant 0 : index
    %8 = vector.load %arg2[%c0_4, %c0_5] : memref<1x128xf32, #tpu.memory_space<vmem>>, vector<1x128xf32>
    tpu.vector_store %arg2[%c0_4, %c0_5], %7 {strides = array<i32>} : memref<1x128xf32, #tpu.memory_space<vmem>>, vector<1x128xf32>,
    %c0_6 = arith.constant 0 : index
    %c0_7 = arith.constant 0 : index
    %9 = vector.load %arg3[%c0_6, %c0_7] : memref<1x128xf32, #tpu.memory_space<vmem>>, vector<1x128xf32>
    %10 = arith.mulf %3, %3 : vector<512x128xf32>
    %cst_8 = arith.constant dense<0.000000e+00> : vector<128xf32>
    %11 = vector.multi_reduction <add>, %10, %cst_8 [0] : vector<512x128xf32> to vector<128xf32>
    %12 = vector.shape_cast %11 : vector<128xf32> to vector<1x128xf32>
    %13 = arith.addf %9, %12 : vector<1x128xf32>
    %c0_9 = arith.constant 0 : index
    %c0_10 = arith.constant 0 : index
    %14 = vector.load %arg3[%c0_9, %c0_10] : memref<1x128xf32, #tpu.memory_space<vmem>>, vector<1x128xf32>
    tpu.vector_store %arg3[%c0_9, %c0_10], %13 {strides = array<i32>} : memref<1x128xf32, #tpu.memory_space<vmem>>, vector<1x128xf32>,
    return
  }
  func.func @transform_0(%arg0: i32) -> (i32, i32) {
    %c0_i32 = arith.constant 0 : i32
    %c0_i32_0 = arith.constant 0 : i32
    return %arg0, %c0_i32 : i32, i32
  }
  func.func @transform_1(%arg0: i32) -> (i32, i32) {
    %c0_i32 = arith.constant 0 : i32
    %c0_i32_0 = arith.constant 0 : i32
    %c0_i32_1 = arith.constant 0 : i32
    return %c0_i32, %c0_i32_0 : i32, i32
  }
  func.func @transform_2(%arg0: i32) -> (i32, i32) {
    %c0_i32 = arith.constant 0 : i32
    %c0_i32_0 = arith.constant 0 : i32
    %c0_i32_1 = arith.constant 0 : i32
    return %c0_i32, %c0_i32_0 : i32, i32
  }
}

module attributes {stable_mosaic.version = 11 : i64} {
  func.func @_bn_stats_kernel(%arg0: i32, %arg1: memref<512x128xbf16, #tpu.memory_space<vmem>>, %arg2: memref<1x128xf32, #tpu.memory_space<vmem>>, %arg3: memref<1x128xf32, #tpu.memory_space<vmem>>) attributes {dimension_semantics = [#tpu.dimension_semantics<arbitrary>], iteration_bounds = array<i64: 1>, scalar_prefetch = 0 : i64, scratch_operands = 0 : i64, tpu.core_type = #tpu.core_type<tc>, window_params = [{transform_indices = @transform_0, window_bounds = array<i64: 512, 128>}, {pipeline_mode = #tpu.pipeline_mode<synchronous>, transform_indices = @transform_1, window_bounds = array<i64: 1, 128>}, {pipeline_mode = #tpu.pipeline_mode<synchronous>, transform_indices = @transform_2, window_bounds = array<i64: 1, 128>}]} {
    %c0_i32 = arith.constant 0 : i32
    %0 = arith.cmpi eq, %arg0, %c0_i32 : i32
    %1 = arith.extui %0 : i1 to i32
    %c0_i32_0 = arith.constant 0 : i32
    %2 = arith.cmpi ne, %1, %c0_i32_0 : i32
    scf.if %2 {
      %cst_11 = arith.constant 0.000000e+00 : f32
      %16 = vector.broadcast %cst_11 : f32 to vector<1x128xf32>
      %c0_12 = arith.constant 0 : index
      %c0_13 = arith.constant 0 : index
      %17 = vector.load %arg2[%c0_12, %c0_13] : memref<1x128xf32, #tpu.memory_space<vmem>>, vector<1x128xf32>
      tpu.vector_store %arg2[%c0_12, %c0_13], %16 {strides = array<i32>} : memref<1x128xf32, #tpu.memory_space<vmem>>, vector<1x128xf32>,
      %cst_14 = arith.constant 0.000000e+00 : f32
      %18 = vector.broadcast %cst_14 : f32 to vector<1x128xf32>
      %c0_15 = arith.constant 0 : index
      %c0_16 = arith.constant 0 : index
      %19 = vector.load %arg3[%c0_15, %c0_16] : memref<1x128xf32, #tpu.memory_space<vmem>>, vector<1x128xf32>
      tpu.vector_store %arg3[%c0_15, %c0_16], %18 {strides = array<i32>} : memref<1x128xf32, #tpu.memory_space<vmem>>, vector<1x128xf32>,
    } else {
    }
    %c0 = arith.constant 0 : index
    %c0_1 = arith.constant 0 : index
    %3 = vector.load %arg1[%c0, %c0_1] : memref<512x128xbf16, #tpu.memory_space<vmem>>, vector<512x128xbf16>
    %4 = arith.extf %3 : vector<512x128xbf16> to vector<512x128xf32>
    %c0_2 = arith.constant 0 : index
    %c0_3 = arith.constant 0 : index
    %5 = vector.load %arg2[%c0_2, %c0_3] : memref<1x128xf32, #tpu.memory_space<vmem>>, vector<1x128xf32>
    %cst = arith.constant dense<0.000000e+00> : vector<128xf32>
    %6 = vector.multi_reduction <add>, %4, %cst [0] : vector<512x128xf32> to vector<128xf32>
    %7 = vector.shape_cast %6 : vector<128xf32> to vector<1x128xf32>
    %8 = arith.addf %5, %7 : vector<1x128xf32>
    %c0_4 = arith.constant 0 : index
    %c0_5 = arith.constant 0 : index
    %9 = vector.load %arg2[%c0_4, %c0_5] : memref<1x128xf32, #tpu.memory_space<vmem>>, vector<1x128xf32>
    tpu.vector_store %arg2[%c0_4, %c0_5], %8 {strides = array<i32>} : memref<1x128xf32, #tpu.memory_space<vmem>>, vector<1x128xf32>,
    %c0_6 = arith.constant 0 : index
    %c0_7 = arith.constant 0 : index
    %10 = vector.load %arg3[%c0_6, %c0_7] : memref<1x128xf32, #tpu.memory_space<vmem>>, vector<1x128xf32>
    %11 = arith.mulf %4, %4 : vector<512x128xf32>
    %cst_8 = arith.constant dense<0.000000e+00> : vector<128xf32>
    %12 = vector.multi_reduction <add>, %11, %cst_8 [0] : vector<512x128xf32> to vector<128xf32>
    %13 = vector.shape_cast %12 : vector<128xf32> to vector<1x128xf32>
    %14 = arith.addf %10, %13 : vector<1x128xf32>
    %c0_9 = arith.constant 0 : index
    %c0_10 = arith.constant 0 : index
    %15 = vector.load %arg3[%c0_9, %c0_10] : memref<1x128xf32, #tpu.memory_space<vmem>>, vector<1x128xf32>
    tpu.vector_store %arg3[%c0_9, %c0_10], %14 {strides = array<i32>} : memref<1x128xf32, #tpu.memory_space<vmem>>, vector<1x128xf32>,
    return
  }
  func.func @transform_0(%arg0: i32) -> (i32, i32) {
    %c0_i32 = arith.constant 0 : i32
    %c0_i32_0 = arith.constant 0 : i32
    return %arg0, %c0_i32 : i32, i32
  }
  func.func @transform_1(%arg0: i32) -> (i32, i32) {
    %c0_i32 = arith.constant 0 : i32
    %c0_i32_0 = arith.constant 0 : i32
    %c0_i32_1 = arith.constant 0 : i32
    return %c0_i32, %c0_i32_0 : i32, i32
  }
  func.func @transform_2(%arg0: i32) -> (i32, i32) {
    %c0_i32 = arith.constant 0 : i32
    %c0_i32_0 = arith.constant 0 : i32
    %c0_i32_1 = arith.constant 0 : i32
    return %c0_i32, %c0_i32_0 : i32, i32
  }
}

module attributes {stable_mosaic.version = 11 : i64} {
  func.func @kernel(%arg0: i32, %arg1: memref<1x16x16x128xf32, #tpu.memory_space<vmem>>, %arg2: memref<1x128xf32, #tpu.memory_space<vmem>>, %arg3: memref<1x128xf32, #tpu.memory_space<vmem>>, %arg4: memref<9x128x128xbf16, #tpu.memory_space<vmem>>, %arg5: memref<1x128xf32, #tpu.memory_space<vmem>>, %arg6: memref<1x16x16x128xbf16, #tpu.memory_space<vmem>>, %arg7: memref<328x128xf32, #tpu.memory_space<vmem>>, %arg8: memref<288x128xf32, #tpu.memory_space<vmem>>) attributes {dimension_semantics = [#tpu.dimension_semantics<parallel>], iteration_bounds = array<i64: 2>, scalar_prefetch = 0 : i64, scratch_operands = 2 : i64, tpu.core_type = #tpu.core_type<tc>, window_params = [{transform_indices = @transform_0, window_bounds = array<i64: 1, 16, 16, 128>}, {pipeline_mode = #tpu.pipeline_mode<synchronous>, transform_indices = @transform_1, window_bounds = array<i64: 1, 128>}, {pipeline_mode = #tpu.pipeline_mode<synchronous>, transform_indices = @transform_2, window_bounds = array<i64: 1, 128>}, {pipeline_mode = #tpu.pipeline_mode<synchronous>, transform_indices = @transform_3, window_bounds = array<i64: 9, 128, 128>}, {pipeline_mode = #tpu.pipeline_mode<synchronous>, transform_indices = @transform_4, window_bounds = array<i64: 1, 128>}, {transform_indices = @transform_5, window_bounds = array<i64: 1, 16, 16, 128>}]} {
    %cst = arith.constant 0.000000e+00 : f32
    %0 = vector.broadcast %cst : f32 to vector<328x128xf32>
    %c0 = arith.constant 0 : index
    %c0_0 = arith.constant 0 : index
    %1 = vector.load %arg7[%c0, %c0_0] : memref<328x128xf32, #tpu.memory_space<vmem>>, vector<328x128xf32>
    tpu.vector_store %arg7[%c0, %c0_0], %0 {strides = array<i32>} : memref<328x128xf32, #tpu.memory_space<vmem>>, vector<328x128xf32>,
    %c0_1 = arith.constant 0 : index
    %c0_2 = arith.constant 0 : index
    %2 = vector.load %arg2[%c0_1, %c0_2] : memref<1x128xf32, #tpu.memory_space<vmem>>, vector<1x128xf32>
    %c0_3 = arith.constant 0 : index
    %c0_4 = arith.constant 0 : index
    %3 = vector.load %arg3[%c0_3, %c0_4] : memref<1x128xf32, #tpu.memory_space<vmem>>, vector<1x128xf32>
    %c0_5 = arith.constant 0 : index
    %c0_6 = arith.constant 0 : index
    %c0_7 = arith.constant 0 : index
    %c0_8 = arith.constant 0 : index
    %4 = vector.load %arg1[%c0_5, %c0_6, %c0_7, %c0_8] : memref<1x16x16x128xf32, #tpu.memory_space<vmem>>, vector<1x1x16x128xf32>
    %5 = vector.shape_cast %4 : vector<1x1x16x128xf32> to vector<16x128xf32>
    %6 = vector.broadcast %2 : vector<1x128xf32> to vector<16x128xf32>
    %7 = arith.mulf %5, %6 : vector<16x128xf32>
    %8 = vector.broadcast %3 : vector<1x128xf32> to vector<16x128xf32>
    %9 = arith.addf %7, %8 : vector<16x128xf32>
    %cst_9 = arith.constant 0.000000e+00 : f32
    %10 = vector.broadcast %cst_9 : f32 to vector<16x128xf32>
    %11 = arith.maximumf %9, %10 : vector<16x128xf32>
    %c19 = arith.constant 19 : index
    %c0_10 = arith.constant 0 : index
    %12 = vector.load %arg7[%c19, %c0_10] : memref<328x128xf32, #tpu.memory_space<vmem>>, vector<16x128xf32>
    tpu.vector_store %arg7[%c19, %c0_10], %11 {strides = array<i32>} : memref<328x128xf32, #tpu.memory_space<vmem>>, vector<16x128xf32>,
    %c0_11 = arith.constant 0 : index
    %c1 = arith.constant 1 : index
    %c0_12 = arith.constant 0 : index
    %c0_13 = arith.constant 0 : index
    %13 = vector.load %arg1[%c0_11, %c1, %c0_12, %c0_13] : memref<1x16x16x128xf32, #tpu.memory_space<vmem>>, vector<1x1x16x128xf32>
    %14 = vector.shape_cast %13 : vector<1x1x16x128xf32> to vector<16x128xf32>
    %15 = vector.broadcast %2 : vector<1x128xf32> to vector<16x128xf32>
    %16 = arith.mulf %14, %15 : vector<16x128xf32>
    %17 = vector.broadcast %3 : vector<1x128xf32> to vector<16x128xf32>
    %18 = arith.addf %16, %17 : vector<16x128xf32>
    %cst_14 = arith.constant 0.000000e+00 : f32
    %19 = vector.broadcast %cst_14 : f32 to vector<16x128xf32>
    %20 = arith.maximumf %18, %19 : vector<16x128xf32>
    %c37 = arith.constant 37 : index
    %c0_15 = arith.constant 0 : index
    %21 = vector.load %arg7[%c37, %c0_15] : memref<328x128xf32, #tpu.memory_space<vmem>>, vector<16x128xf32>
    tpu.vector_store %arg7[%c37, %c0_15], %20 {strides = array<i32>} : memref<328x128xf32, #tpu.memory_space<vmem>>, vector<16x128xf32>,
    %c0_16 = arith.constant 0 : index
    %c2 = arith.constant 2 : index
    %c0_17 = arith.constant 0 : index
    %c0_18 = arith.constant 0 : index
    %22 = vector.load %arg1[%c0_16, %c2, %c0_17, %c0_18] : memref<1x16x16x128xf32, #tpu.memory_space<vmem>>, vector<1x1x16x128xf32>
    %23 = vector.shape_cast %22 : vector<1x1x16x128xf32> to vector<16x128xf32>
    %24 = vector.broadcast %2 : vector<1x128xf32> to vector<16x128xf32>
    %25 = arith.mulf %23, %24 : vector<16x128xf32>
    %26 = vector.broadcast %3 : vector<1x128xf32> to vector<16x128xf32>
    %27 = arith.addf %25, %26 : vector<16x128xf32>
    %cst_19 = arith.constant 0.000000e+00 : f32
    %28 = vector.broadcast %cst_19 : f32 to vector<16x128xf32>
    %29 = arith.maximumf %27, %28 : vector<16x128xf32>
    %c55 = arith.constant 55 : index
    %c0_20 = arith.constant 0 : index
    %30 = vector.load %arg7[%c55, %c0_20] : memref<328x128xf32, #tpu.memory_space<vmem>>, vector<16x128xf32>
    tpu.vector_store %arg7[%c55, %c0_20], %29 {strides = array<i32>} : memref<328x128xf32, #tpu.memory_space<vmem>>, vector<16x128xf32>,
    %c0_21 = arith.constant 0 : index
    %c3 = arith.constant 3 : index
    %c0_22 = arith.constant 0 : index
    %c0_23 = arith.constant 0 : index
    %31 = vector.load %arg1[%c0_21, %c3, %c0_22, %c0_23] : memref<1x16x16x128xf32, #tpu.memory_space<vmem>>, vector<1x1x16x128xf32>
    %32 = vector.shape_cast %31 : vector<1x1x16x128xf32> to vector<16x128xf32>
    %33 = vector.broadcast %2 : vector<1x128xf32> to vector<16x128xf32>
    %34 = arith.mulf %32, %33 : vector<16x128xf32>
    %35 = vector.broadcast %3 : vector<1x128xf32> to vector<16x128xf32>
    %36 = arith.addf %34, %35 : vector<16x128xf32>
    %cst_24 = arith.constant 0.000000e+00 : f32
    %37 = vector.broadcast %cst_24 : f32 to vector<16x128xf32>
    %38 = arith.maximumf %36, %37 : vector<16x128xf32>
    %c73 = arith.constant 73 : index
    %c0_25 = arith.constant 0 : index
    %39 = vector.load %arg7[%c73, %c0_25] : memref<328x128xf32, #tpu.memory_space<vmem>>, vector<16x128xf32>
    tpu.vector_store %arg7[%c73, %c0_25], %38 {strides = array<i32>} : memref<328x128xf32, #tpu.memory_space<vmem>>, vector<16x128xf32>,
    %c0_26 = arith.constant 0 : index
    %c4 = arith.constant 4 : index
    %c0_27 = arith.constant 0 : index
    %c0_28 = arith.constant 0 : index
    %40 = vector.load %arg1[%c0_26, %c4, %c0_27, %c0_28] : memref<1x16x16x128xf32, #tpu.memory_space<vmem>>, vector<1x1x16x128xf32>
    %41 = vector.shape_cast %40 : vector<1x1x16x128xf32> to vector<16x128xf32>
    %42 = vector.broadcast %2 : vector<1x128xf32> to vector<16x128xf32>
    %43 = arith.mulf %41, %42 : vector<16x128xf32>
    %44 = vector.broadcast %3 : vector<1x128xf32> to vector<16x128xf32>
    %45 = arith.addf %43, %44 : vector<16x128xf32>
    %cst_29 = arith.constant 0.000000e+00 : f32
    %46 = vector.broadcast %cst_29 : f32 to vector<16x128xf32>
    %47 = arith.maximumf %45, %46 : vector<16x128xf32>
    %c91 = arith.constant 91 : index
    %c0_30 = arith.constant 0 : index
    %48 = vector.load %arg7[%c91, %c0_30] : memref<328x128xf32, #tpu.memory_space<vmem>>, vector<16x128xf32>
    tpu.vector_store %arg7[%c91, %c0_30], %47 {strides = array<i32>} : memref<328x128xf32, #tpu.memory_space<vmem>>, vector<16x128xf32>,
    %c0_31 = arith.constant 0 : index
    %c5 = arith.constant 5 : index
    %c0_32 = arith.constant 0 : index
    %c0_33 = arith.constant 0 : index
    %49 = vector.load %arg1[%c0_31, %c5, %c0_32, %c0_33] : memref<1x16x16x128xf32, #tpu.memory_space<vmem>>, vector<1x1x16x128xf32>
    %50 = vector.shape_cast %49 : vector<1x1x16x128xf32> to vector<16x128xf32>
    %51 = vector.broadcast %2 : vector<1x128xf32> to vector<16x128xf32>
    %52 = arith.mulf %50, %51 : vector<16x128xf32>
    %53 = vector.broadcast %3 : vector<1x128xf32> to vector<16x128xf32>
    %54 = arith.addf %52, %53 : vector<16x128xf32>
    %cst_34 = arith.constant 0.000000e+00 : f32
    %55 = vector.broadcast %cst_34 : f32 to vector<16x128xf32>
    %56 = arith.maximumf %54, %55 : vector<16x128xf32>
    %c109 = arith.constant 109 : index
    %c0_35 = arith.constant 0 : index
    %57 = vector.load %arg7[%c109, %c0_35] : memref<328x128xf32, #tpu.memory_space<vmem>>, vector<16x128xf32>
    tpu.vector_store %arg7[%c109, %c0_35], %56 {strides = array<i32>} : memref<328x128xf32, #tpu.memory_space<vmem>>, vector<16x128xf32>,
    %c0_36 = arith.constant 0 : index
    %c6 = arith.constant 6 : index
    %c0_37 = arith.constant 0 : index
    %c0_38 = arith.constant 0 : index
    %58 = vector.load %arg1[%c0_36, %c6, %c0_37, %c0_38] : memref<1x16x16x128xf32, #tpu.memory_space<vmem>>, vector<1x1x16x128xf32>
    %59 = vector.shape_cast %58 : vector<1x1x16x128xf32> to vector<16x128xf32>
    %60 = vector.broadcast %2 : vector<1x128xf32> to vector<16x128xf32>
    %61 = arith.mulf %59, %60 : vector<16x128xf32>
    %62 = vector.broadcast %3 : vector<1x128xf32> to vector<16x128xf32>
    %63 = arith.addf %61, %62 : vector<16x128xf32>
    %cst_39 = arith.constant 0.000000e+00 : f32
    %64 = vector.broadcast %cst_39 : f32 to vector<16x128xf32>
    %65 = arith.maximumf %63, %64 : vector<16x128xf32>
    %c127 = arith.constant 127 : index
    %c0_40 = arith.constant 0 : index
    %66 = vector.load %arg7[%c127, %c0_40] : memref<328x128xf32, #tpu.memory_space<vmem>>, vector<16x128xf32>
    tpu.vector_store %arg7[%c127, %c0_40], %65 {strides = array<i32>} : memref<328x128xf32, #tpu.memory_space<vmem>>, vector<16x128xf32>,
    %c0_41 = arith.constant 0 : index
    %c7 = arith.constant 7 : index
    %c0_42 = arith.constant 0 : index
    %c0_43 = arith.constant 0 : index
    %67 = vector.load %arg1[%c0_41, %c7, %c0_42, %c0_43] : memref<1x16x16x128xf32, #tpu.memory_space<vmem>>, vector<1x1x16x128xf32>
    %68 = vector.shape_cast %67 : vector<1x1x16x128xf32> to vector<16x128xf32>
    %69 = vector.broadcast %2 : vector<1x128xf32> to vector<16x128xf32>
    %70 = arith.mulf %68, %69 : vector<16x128xf32>
    %71 = vector.broadcast %3 : vector<1x128xf32> to vector<16x128xf32>
    %72 = arith.addf %70, %71 : vector<16x128xf32>
    %cst_44 = arith.constant 0.000000e+00 : f32
    %73 = vector.broadcast %cst_44 : f32 to vector<16x128xf32>
    %74 = arith.maximumf %72, %73 : vector<16x128xf32>
    %c145 = arith.constant 145 : index
    %c0_45 = arith.constant 0 : index
    %75 = vector.load %arg7[%c145, %c0_45] : memref<328x128xf32, #tpu.memory_space<vmem>>, vector<16x128xf32>
    tpu.vector_store %arg7[%c145, %c0_45], %74 {strides = array<i32>} : memref<328x128xf32, #tpu.memory_space<vmem>>, vector<16x128xf32>,
    %c0_46 = arith.constant 0 : index
    %c8 = arith.constant 8 : index
    %c0_47 = arith.constant 0 : index
    %c0_48 = arith.constant 0 : index
    %76 = vector.load %arg1[%c0_46, %c8, %c0_47, %c0_48] : memref<1x16x16x128xf32, #tpu.memory_space<vmem>>, vector<1x1x16x128xf32>
    %77 = vector.shape_cast %76 : vector<1x1x16x128xf32> to vector<16x128xf32>
    %78 = vector.broadcast %2 : vector<1x128xf32> to vector<16x128xf32>
    %79 = arith.mulf %77, %78 : vector<16x128xf32>
    %80 = vector.broadcast %3 : vector<1x128xf32> to vector<16x128xf32>
    %81 = arith.addf %79, %80 : vector<16x128xf32>
    %cst_49 = arith.constant 0.000000e+00 : f32
    %82 = vector.broadcast %cst_49 : f32 to vector<16x128xf32>
    %83 = arith.maximumf %81, %82 : vector<16x128xf32>
    %c163 = arith.constant 163 : index
    %c0_50 = arith.constant 0 : index
    %84 = vector.load %arg7[%c163, %c0_50] : memref<328x128xf32, #tpu.memory_space<vmem>>, vector<16x128xf32>
    tpu.vector_store %arg7[%c163, %c0_50], %83 {strides = array<i32>} : memref<328x128xf32, #tpu.memory_space<vmem>>, vector<16x128xf32>,
    %c0_51 = arith.constant 0 : index
    %c9 = arith.constant 9 : index
    %c0_52 = arith.constant 0 : index
    %c0_53 = arith.constant 0 : index
    %85 = vector.load %arg1[%c0_51, %c9, %c0_52, %c0_53] : memref<1x16x16x128xf32, #tpu.memory_space<vmem>>, vector<1x1x16x128xf32>
    %86 = vector.shape_cast %85 : vector<1x1x16x128xf32> to vector<16x128xf32>
    %87 = vector.broadcast %2 : vector<1x128xf32> to vector<16x128xf32>
    %88 = arith.mulf %86, %87 : vector<16x128xf32>
    %89 = vector.broadcast %3 : vector<1x128xf32> to vector<16x128xf32>
    %90 = arith.addf %88, %89 : vector<16x128xf32>
    %cst_54 = arith.constant 0.000000e+00 : f32
    %91 = vector.broadcast %cst_54 : f32 to vector<16x128xf32>
    %92 = arith.maximumf %90, %91 : vector<16x128xf32>
    %c181 = arith.constant 181 : index
    %c0_55 = arith.constant 0 : index
    %93 = vector.load %arg7[%c181, %c0_55] : memref<328x128xf32, #tpu.memory_space<vmem>>, vector<16x128xf32>
    tpu.vector_store %arg7[%c181, %c0_55], %92 {strides = array<i32>} : memref<328x128xf32, #tpu.memory_space<vmem>>, vector<16x128xf32>,
    %c0_56 = arith.constant 0 : index
    %c10 = arith.constant 10 : index
    %c0_57 = arith.constant 0 : index
    %c0_58 = arith.constant 0 : index
    %94 = vector.load %arg1[%c0_56, %c10, %c0_57, %c0_58] : memref<1x16x16x128xf32, #tpu.memory_space<vmem>>, vector<1x1x16x128xf32>
    %95 = vector.shape_cast %94 : vector<1x1x16x128xf32> to vector<16x128xf32>
    %96 = vector.broadcast %2 : vector<1x128xf32> to vector<16x128xf32>
    %97 = arith.mulf %95, %96 : vector<16x128xf32>
    %98 = vector.broadcast %3 : vector<1x128xf32> to vector<16x128xf32>
    %99 = arith.addf %97, %98 : vector<16x128xf32>
    %cst_59 = arith.constant 0.000000e+00 : f32
    %100 = vector.broadcast %cst_59 : f32 to vector<16x128xf32>
    %101 = arith.maximumf %99, %100 : vector<16x128xf32>
    %c199 = arith.constant 199 : index
    %c0_60 = arith.constant 0 : index
    %102 = vector.load %arg7[%c199, %c0_60] : memref<328x128xf32, #tpu.memory_space<vmem>>, vector<16x128xf32>
    tpu.vector_store %arg7[%c199, %c0_60], %101 {strides = array<i32>} : memref<328x128xf32, #tpu.memory_space<vmem>>, vector<16x128xf32>,
    %c0_61 = arith.constant 0 : index
    %c11 = arith.constant 11 : index
    %c0_62 = arith.constant 0 : index
    %c0_63 = arith.constant 0 : index
    %103 = vector.load %arg1[%c0_61, %c11, %c0_62, %c0_63] : memref<1x16x16x128xf32, #tpu.memory_space<vmem>>, vector<1x1x16x128xf32>
    %104 = vector.shape_cast %103 : vector<1x1x16x128xf32> to vector<16x128xf32>
    %105 = vector.broadcast %2 : vector<1x128xf32> to vector<16x128xf32>
    %106 = arith.mulf %104, %105 : vector<16x128xf32>
    %107 = vector.broadcast %3 : vector<1x128xf32> to vector<16x128xf32>
    %108 = arith.addf %106, %107 : vector<16x128xf32>
    %cst_64 = arith.constant 0.000000e+00 : f32
    %109 = vector.broadcast %cst_64 : f32 to vector<16x128xf32>
    %110 = arith.maximumf %108, %109 : vector<16x128xf32>
    %c217 = arith.constant 217 : index
    %c0_65 = arith.constant 0 : index
    %111 = vector.load %arg7[%c217, %c0_65] : memref<328x128xf32, #tpu.memory_space<vmem>>, vector<16x128xf32>
    tpu.vector_store %arg7[%c217, %c0_65], %110 {strides = array<i32>} : memref<328x128xf32, #tpu.memory_space<vmem>>, vector<16x128xf32>,
    %c0_66 = arith.constant 0 : index
    %c12 = arith.constant 12 : index
    %c0_67 = arith.constant 0 : index
    %c0_68 = arith.constant 0 : index
    %112 = vector.load %arg1[%c0_66, %c12, %c0_67, %c0_68] : memref<1x16x16x128xf32, #tpu.memory_space<vmem>>, vector<1x1x16x128xf32>
    %113 = vector.shape_cast %112 : vector<1x1x16x128xf32> to vector<16x128xf32>
    %114 = vector.broadcast %2 : vector<1x128xf32> to vector<16x128xf32>
    %115 = arith.mulf %113, %114 : vector<16x128xf32>
    %116 = vector.broadcast %3 : vector<1x128xf32> to vector<16x128xf32>
    %117 = arith.addf %115, %116 : vector<16x128xf32>
    %cst_69 = arith.constant 0.000000e+00 : f32
    %118 = vector.broadcast %cst_69 : f32 to vector<16x128xf32>
    %119 = arith.maximumf %117, %118 : vector<16x128xf32>
    %c235 = arith.constant 235 : index
    %c0_70 = arith.constant 0 : index
    %120 = vector.load %arg7[%c235, %c0_70] : memref<328x128xf32, #tpu.memory_space<vmem>>, vector<16x128xf32>
    tpu.vector_store %arg7[%c235, %c0_70], %119 {strides = array<i32>} : memref<328x128xf32, #tpu.memory_space<vmem>>, vector<16x128xf32>,
    %c0_71 = arith.constant 0 : index
    %c13 = arith.constant 13 : index
    %c0_72 = arith.constant 0 : index
    %c0_73 = arith.constant 0 : index
    %121 = vector.load %arg1[%c0_71, %c13, %c0_72, %c0_73] : memref<1x16x16x128xf32, #tpu.memory_space<vmem>>, vector<1x1x16x128xf32>
    %122 = vector.shape_cast %121 : vector<1x1x16x128xf32> to vector<16x128xf32>
    %123 = vector.broadcast %2 : vector<1x128xf32> to vector<16x128xf32>
    %124 = arith.mulf %122, %123 : vector<16x128xf32>
    %125 = vector.broadcast %3 : vector<1x128xf32> to vector<16x128xf32>
    %126 = arith.addf %124, %125 : vector<16x128xf32>
    %cst_74 = arith.constant 0.000000e+00 : f32
    %127 = vector.broadcast %cst_74 : f32 to vector<16x128xf32>
    %128 = arith.maximumf %126, %127 : vector<16x128xf32>
    %c253 = arith.constant 253 : index
    %c0_75 = arith.constant 0 : index
    %129 = vector.load %arg7[%c253, %c0_75] : memref<328x128xf32, #tpu.memory_space<vmem>>, vector<16x128xf32>
    tpu.vector_store %arg7[%c253, %c0_75], %128 {strides = array<i32>} : memref<328x128xf32, #tpu.memory_space<vmem>>, vector<16x128xf32>,
    %c0_76 = arith.constant 0 : index
    %c14 = arith.constant 14 : index
    %c0_77 = arith.constant 0 : index
    %c0_78 = arith.constant 0 : index
    %130 = vector.load %arg1[%c0_76, %c14, %c0_77, %c0_78] : memref<1x16x16x128xf32, #tpu.memory_space<vmem>>, vector<1x1x16x128xf32>
    %131 = vector.shape_cast %130 : vector<1x1x16x128xf32> to vector<16x128xf32>
    %132 = vector.broadcast %2 : vector<1x128xf32> to vector<16x128xf32>
    %133 = arith.mulf %131, %132 : vector<16x128xf32>
    %134 = vector.broadcast %3 : vector<1x128xf32> to vector<16x128xf32>
    %135 = arith.addf %133, %134 : vector<16x128xf32>
    %cst_79 = arith.constant 0.000000e+00 : f32
    %136 = vector.broadcast %cst_79 : f32 to vector<16x128xf32>
    %137 = arith.maximumf %135, %136 : vector<16x128xf32>
    %c271 = arith.constant 271 : index
    %c0_80 = arith.constant 0 : index
    %138 = vector.load %arg7[%c271, %c0_80] : memref<328x128xf32, #tpu.memory_space<vmem>>, vector<16x128xf32>
    tpu.vector_store %arg7[%c271, %c0_80], %137 {strides = array<i32>} : memref<328x128xf32, #tpu.memory_space<vmem>>, vector<16x128xf32>,
    %c0_81 = arith.constant 0 : index
    %c15 = arith.constant 15 : index
    %c0_82 = arith.constant 0 : index
    %c0_83 = arith.constant 0 : index
    %139 = vector.load %arg1[%c0_81, %c15, %c0_82, %c0_83] : memref<1x16x16x128xf32, #tpu.memory_space<vmem>>, vector<1x1x16x128xf32>
    %140 = vector.shape_cast %139 : vector<1x1x16x128xf32> to vector<16x128xf32>
    %141 = vector.broadcast %2 : vector<1x128xf32> to vector<16x128xf32>
    %142 = arith.mulf %140, %141 : vector<16x128xf32>
    %143 = vector.broadcast %3 : vector<1x128xf32> to vector<16x128xf32>
    %144 = arith.addf %142, %143 : vector<16x128xf32>
    %cst_84 = arith.constant 0.000000e+00 : f32
    %145 = vector.broadcast %cst_84 : f32 to vector<16x128xf32>
    %146 = arith.maximumf %144, %145 : vector<16x128xf32>
    %c289 = arith.constant 289 : index
    %c0_85 = arith.constant 0 : index
    %147 = vector.load %arg7[%c289, %c0_85] : memref<328x128xf32, #tpu.memory_space<vmem>>, vector<16x128xf32>
    tpu.vector_store %arg7[%c289, %c0_85], %146 {strides = array<i32>} : memref<328x128xf32, #tpu.memory_space<vmem>>, vector<16x128xf32>,
    %c0_86 = arith.constant 0 : index
    %c0_87 = arith.constant 0 : index
    %148 = vector.load %arg7[%c0_86, %c0_87] : memref<328x128xf32, #tpu.memory_space<vmem>>, vector<288x128xf32>
    %149 = arith.truncf %148 : vector<288x128xf32> to vector<288x128xbf16>
    %c0_88 = arith.constant 0 : index
    %c0_89 = arith.constant 0 : index
    %c0_90 = arith.constant 0 : index
    %150 = vector.load %arg4[%c0_88, %c0_89, %c0_90] : memref<9x128x128xbf16, #tpu.memory_space<vmem>>, vector<1x128x128xbf16>
    %151 = vector.shape_cast %150 : vector<1x128x128xbf16> to vector<128x128xbf16>
    %cst_91 = arith.constant dense<0.000000e+00> : vector<288x128xf32>
    %152 = tpu.matmul %149, %151, %cst_91 {dimension_numbers = #tpu.dot_dimension_numbers<[1], [0], [0], [1], [0, 0, 1, 1], [], []>} : vector<288x128xbf16>, vector<128x128xbf16>, vector<288x128xf32> -> vector<288x128xf32>
    %c1_92 = arith.constant 1 : index
    %c0_93 = arith.constant 0 : index
    %153 = vector.load %arg7[%c1_92, %c0_93] : memref<328x128xf32, #tpu.memory_space<vmem>>, vector<288x128xf32>
    %154 = arith.truncf %153 : vector<288x128xf32> to vector<288x128xbf16>
    %c1_94 = arith.constant 1 : index
    %c0_95 = arith.constant 0 : index
    %c0_96 = arith.constant 0 : index
    %155 = vector.load %arg4[%c1_94, %c0_95, %c0_96] : memref<9x128x128xbf16, #tpu.memory_space<vmem>>, vector<1x128x128xbf16>
    %156 = vector.shape_cast %155 : vector<1x128x128xbf16> to vector<128x128xbf16>
    %cst_97 = arith.constant dense<0.000000e+00> : vector<288x128xf32>
    %157 = tpu.matmul %154, %156, %cst_97 {dimension_numbers = #tpu.dot_dimension_numbers<[1], [0], [0], [1], [0, 0, 1, 1], [], []>} : vector<288x128xbf16>, vector<128x128xbf16>, vector<288x128xf32> -> vector<288x128xf32>
    %158 = arith.addf %152, %157 : vector<288x128xf32>
    %c2_98 = arith.constant 2 : index
    %c0_99 = arith.constant 0 : index
    %159 = vector.load %arg7[%c2_98, %c0_99] : memref<328x128xf32, #tpu.memory_space<vmem>>, vector<288x128xf32>
    %160 = arith.truncf %159 : vector<288x128xf32> to vector<288x128xbf16>
    %c2_100 = arith.constant 2 : index
    %c0_101 = arith.constant 0 : index
    %c0_102 = arith.constant 0 : index
    %161 = vector.load %arg4[%c2_100, %c0_101, %c0_102] : memref<9x128x128xbf16, #tpu.memory_space<vmem>>, vector<1x128x128xbf16>
    %162 = vector.shape_cast %161 : vector<1x128x128xbf16> to vector<128x128xbf16>
    %cst_103 = arith.constant dense<0.000000e+00> : vector<288x128xf32>
    %163 = tpu.matmul %160, %162, %cst_103 {dimension_numbers = #tpu.dot_dimension_numbers<[1], [0], [0], [1], [0, 0, 1, 1], [], []>} : vector<288x128xbf16>, vector<128x128xbf16>, vector<288x128xf32> -> vector<288x128xf32>
    %164 = arith.addf %158, %163 : vector<288x128xf32>
    %c18 = arith.constant 18 : index
    %c0_104 = arith.constant 0 : index
    %165 = vector.load %arg7[%c18, %c0_104] : memref<328x128xf32, #tpu.memory_space<vmem>>, vector<288x128xf32>
    %166 = arith.truncf %165 : vector<288x128xf32> to vector<288x128xbf16>
    %c3_105 = arith.constant 3 : index
    %c0_106 = arith.constant 0 : index
    %c0_107 = arith.constant 0 : index
    %167 = vector.load %arg4[%c3_105, %c0_106, %c0_107] : memref<9x128x128xbf16, #tpu.memory_space<vmem>>, vector<1x128x128xbf16>
    %168 = vector.shape_cast %167 : vector<1x128x128xbf16> to vector<128x128xbf16>
    %cst_108 = arith.constant dense<0.000000e+00> : vector<288x128xf32>
    %169 = tpu.matmul %166, %168, %cst_108 {dimension_numbers = #tpu.dot_dimension_numbers<[1], [0], [0], [1], [0, 0, 1, 1], [], []>} : vector<288x128xbf16>, vector<128x128xbf16>, vector<288x128xf32> -> vector<288x128xf32>
    %170 = arith.addf %164, %169 : vector<288x128xf32>
    %c19_109 = arith.constant 19 : index
    %c0_110 = arith.constant 0 : index
    %171 = vector.load %arg7[%c19_109, %c0_110] : memref<328x128xf32, #tpu.memory_space<vmem>>, vector<288x128xf32>
    %172 = arith.truncf %171 : vector<288x128xf32> to vector<288x128xbf16>
    %c4_111 = arith.constant 4 : index
    %c0_112 = arith.constant 0 : index
    %c0_113 = arith.constant 0 : index
    %173 = vector.load %arg4[%c4_111, %c0_112, %c0_113] : memref<9x128x128xbf16, #tpu.memory_space<vmem>>, vector<1x128x128xbf16>
    %174 = vector.shape_cast %173 : vector<1x128x128xbf16> to vector<128x128xbf16>
    %cst_114 = arith.constant dense<0.000000e+00> : vector<288x128xf32>
    %175 = tpu.matmul %172, %174, %cst_114 {dimension_numbers = #tpu.dot_dimension_numbers<[1], [0], [0], [1], [0, 0, 1, 1], [], []>} : vector<288x128xbf16>, vector<128x128xbf16>, vector<288x128xf32> -> vector<288x128xf32>
    %176 = arith.addf %170, %175 : vector<288x128xf32>
    %c20 = arith.constant 20 : index
    %c0_115 = arith.constant 0 : index
    %177 = vector.load %arg7[%c20, %c0_115] : memref<328x128xf32, #tpu.memory_space<vmem>>, vector<288x128xf32>
    %178 = arith.truncf %177 : vector<288x128xf32> to vector<288x128xbf16>
    %c5_116 = arith.constant 5 : index
    %c0_117 = arith.constant 0 : index
    %c0_118 = arith.constant 0 : index
    %179 = vector.load %arg4[%c5_116, %c0_117, %c0_118] : memref<9x128x128xbf16, #tpu.memory_space<vmem>>, vector<1x128x128xbf16>
    %180 = vector.shape_cast %179 : vector<1x128x128xbf16> to vector<128x128xbf16>
    %cst_119 = arith.constant dense<0.000000e+00> : vector<288x128xf32>
    %181 = tpu.matmul %178, %180, %cst_119 {dimension_numbers = #tpu.dot_dimension_numbers<[1], [0], [0], [1], [0, 0, 1, 1], [], []>} : vector<288x128xbf16>, vector<128x128xbf16>, vector<288x128xf32> -> vector<288x128xf32>
    %182 = arith.addf %176, %181 : vector<288x128xf32>
    %c36 = arith.constant 36 : index
    %c0_120 = arith.constant 0 : index
    %183 = vector.load %arg7[%c36, %c0_120] : memref<328x128xf32, #tpu.memory_space<vmem>>, vector<288x128xf32>
    %184 = arith.truncf %183 : vector<288x128xf32> to vector<288x128xbf16>
    %c6_121 = arith.constant 6 : index
    %c0_122 = arith.constant 0 : index
    %c0_123 = arith.constant 0 : index
    %185 = vector.load %arg4[%c6_121, %c0_122, %c0_123] : memref<9x128x128xbf16, #tpu.memory_space<vmem>>, vector<1x128x128xbf16>
    %186 = vector.shape_cast %185 : vector<1x128x128xbf16> to vector<128x128xbf16>
    %cst_124 = arith.constant dense<0.000000e+00> : vector<288x128xf32>
    %187 = tpu.matmul %184, %186, %cst_124 {dimension_numbers = #tpu.dot_dimension_numbers<[1], [0], [0], [1], [0, 0, 1, 1], [], []>} : vector<288x128xbf16>, vector<128x128xbf16>, vector<288x128xf32> -> vector<288x128xf32>
    %188 = arith.addf %182, %187 : vector<288x128xf32>
    %c37_125 = arith.constant 37 : index
    %c0_126 = arith.constant 0 : index
    %189 = vector.load %arg7[%c37_125, %c0_126] : memref<328x128xf32, #tpu.memory_space<vmem>>, vector<288x128xf32>
    %190 = arith.truncf %189 : vector<288x128xf32> to vector<288x128xbf16>
    %c7_127 = arith.constant 7 : index
    %c0_128 = arith.constant 0 : index
    %c0_129 = arith.constant 0 : index
    %191 = vector.load %arg4[%c7_127, %c0_128, %c0_129] : memref<9x128x128xbf16, #tpu.memory_space<vmem>>, vector<1x128x128xbf16>
    %192 = vector.shape_cast %191 : vector<1x128x128xbf16> to vector<128x128xbf16>
    %cst_130 = arith.constant dense<0.000000e+00> : vector<288x128xf32>
    %193 = tpu.matmul %190, %192, %cst_130 {dimension_numbers = #tpu.dot_dimension_numbers<[1], [0], [0], [1], [0, 0, 1, 1], [], []>} : vector<288x128xbf16>, vector<128x128xbf16>, vector<288x128xf32> -> vector<288x128xf32>
    %194 = arith.addf %188, %193 : vector<288x128xf32>
    %c38 = arith.constant 38 : index
    %c0_131 = arith.constant 0 : index
    %195 = vector.load %arg7[%c38, %c0_131] : memref<328x128xf32, #tpu.memory_space<vmem>>, vector<288x128xf32>
    %196 = arith.truncf %195 : vector<288x128xf32> to vector<288x128xbf16>
    %c8_132 = arith.constant 8 : index
    %c0_133 = arith.constant 0 : index
    %c0_134 = arith.constant 0 : index
    %197 = vector.load %arg4[%c8_132, %c0_133, %c0_134] : memref<9x128x128xbf16, #tpu.memory_space<vmem>>, vector<1x128x128xbf16>
    %198 = vector.shape_cast %197 : vector<1x128x128xbf16> to vector<128x128xbf16>
    %cst_135 = arith.constant dense<0.000000e+00> : vector<288x128xf32>
    %199 = tpu.matmul %196, %198, %cst_135 {dimension_numbers = #tpu.dot_dimension_numbers<[1], [0], [0], [1], [0, 0, 1, 1], [], []>} : vector<288x128xbf16>, vector<128x128xbf16>, vector<288x128xf32> -> vector<288x128xf32>
    %200 = arith.addf %194, %199 : vector<288x128xf32>
    %c0_136 = arith.constant 0 : index
    %c0_137 = arith.constant 0 : index
    %201 = vector.load %arg5[%c0_136, %c0_137] : memref<1x128xf32, #tpu.memory_space<vmem>>, vector<1x128xf32>
    %202 = vector.broadcast %201 : vector<1x128xf32> to vector<288x128xf32>
    %203 = arith.addf %200, %202 : vector<288x128xf32>
    %c0_138 = arith.constant 0 : index
    %c0_139 = arith.constant 0 : index
    %204 = vector.load %arg8[%c0_138, %c0_139] : memref<288x128xf32, #tpu.memory_space<vmem>>, vector<288x128xf32>
    tpu.vector_store %arg8[%c0_138, %c0_139], %203 {strides = array<i32>} : memref<288x128xf32, #tpu.memory_space<vmem>>, vector<288x128xf32>,
    %c0_140 = arith.constant 0 : index
    %c0_141 = arith.constant 0 : index
    %205 = vector.load %arg8[%c0_140, %c0_141] : memref<288x128xf32, #tpu.memory_space<vmem>>, vector<16x128xf32>
    %206 = arith.truncf %205 : vector<16x128xf32> to vector<16x128xbf16>
    %c0_142 = arith.constant 0 : index
    %c0_143 = arith.constant 0 : index
    %c0_144 = arith.constant 0 : index
    %c0_145 = arith.constant 0 : index
    %207 = vector.load %arg6[%c0_142, %c0_143, %c0_144, %c0_145] : memref<1x16x16x128xbf16, #tpu.memory_space<vmem>>, vector<1x1x16x128xbf16>
    %208 = vector.shape_cast %207 : vector<1x1x16x128xbf16> to vector<16x128xbf16>
    %209 = vector.shape_cast %206 : vector<16x128xbf16> to vector<1x1x16x128xbf16>
    tpu.vector_store %arg6[%c0_142, %c0_143, %c0_144, %c0_145], %209 {strides = array<i32>} : memref<1x16x16x128xbf16, #tpu.memory_space<vmem>>, vector<1x1x16x128xbf16>,
    %c18_146 = arith.constant 18 : index
    %c0_147 = arith.constant 0 : index
    %210 = vector.load %arg8[%c18_146, %c0_147] : memref<288x128xf32, #tpu.memory_space<vmem>>, vector<16x128xf32>
    %211 = arith.truncf %210 : vector<16x128xf32> to vector<16x128xbf16>
    %c0_148 = arith.constant 0 : index
    %c1_149 = arith.constant 1 : index
    %c0_150 = arith.constant 0 : index
    %c0_151 = arith.constant 0 : index
    %212 = vector.load %arg6[%c0_148, %c1_149, %c0_150, %c0_151] : memref<1x16x16x128xbf16, #tpu.memory_space<vmem>>, vector<1x1x16x128xbf16>
    %213 = vector.shape_cast %212 : vector<1x1x16x128xbf16> to vector<16x128xbf16>
    %214 = vector.shape_cast %211 : vector<16x128xbf16> to vector<1x1x16x128xbf16>
    tpu.vector_store %arg6[%c0_148, %c1_149, %c0_150, %c0_151], %214 {strides = array<i32>} : memref<1x16x16x128xbf16, #tpu.memory_space<vmem>>, vector<1x1x16x128xbf16>,
    %c36_152 = arith.constant 36 : index
    %c0_153 = arith.constant 0 : index
    %215 = vector.load %arg8[%c36_152, %c0_153] : memref<288x128xf32, #tpu.memory_space<vmem>>, vector<16x128xf32>
    %216 = arith.truncf %215 : vector<16x128xf32> to vector<16x128xbf16>
    %c0_154 = arith.constant 0 : index
    %c2_155 = arith.constant 2 : index
    %c0_156 = arith.constant 0 : index
    %c0_157 = arith.constant 0 : index
    %217 = vector.load %arg6[%c0_154, %c2_155, %c0_156, %c0_157] : memref<1x16x16x128xbf16, #tpu.memory_space<vmem>>, vector<1x1x16x128xbf16>
    %218 = vector.shape_cast %217 : vector<1x1x16x128xbf16> to vector<16x128xbf16>
    %219 = vector.shape_cast %216 : vector<16x128xbf16> to vector<1x1x16x128xbf16>
    tpu.vector_store %arg6[%c0_154, %c2_155, %c0_156, %c0_157], %219 {strides = array<i32>} : memref<1x16x16x128xbf16, #tpu.memory_space<vmem>>, vector<1x1x16x128xbf16>,
    %c54 = arith.constant 54 : index
    %c0_158 = arith.constant 0 : index
    %220 = vector.load %arg8[%c54, %c0_158] : memref<288x128xf32, #tpu.memory_space<vmem>>, vector<16x128xf32>
    %221 = arith.truncf %220 : vector<16x128xf32> to vector<16x128xbf16>
    %c0_159 = arith.constant 0 : index
    %c3_160 = arith.constant 3 : index
    %c0_161 = arith.constant 0 : index
    %c0_162 = arith.constant 0 : index
    %222 = vector.load %arg6[%c0_159, %c3_160, %c0_161, %c0_162] : memref<1x16x16x128xbf16, #tpu.memory_space<vmem>>, vector<1x1x16x128xbf16>
    %223 = vector.shape_cast %222 : vector<1x1x16x128xbf16> to vector<16x128xbf16>
    %224 = vector.shape_cast %221 : vector<16x128xbf16> to vector<1x1x16x128xbf16>
    tpu.vector_store %arg6[%c0_159, %c3_160, %c0_161, %c0_162], %224 {strides = array<i32>} : memref<1x16x16x128xbf16, #tpu.memory_space<vmem>>, vector<1x1x16x128xbf16>,
    %c72 = arith.constant 72 : index
    %c0_163 = arith.constant 0 : index
    %225 = vector.load %arg8[%c72, %c0_163] : memref<288x128xf32, #tpu.memory_space<vmem>>, vector<16x128xf32>
    %226 = arith.truncf %225 : vector<16x128xf32> to vector<16x128xbf16>
    %c0_164 = arith.constant 0 : index
    %c4_165 = arith.constant 4 : index
    %c0_166 = arith.constant 0 : index
    %c0_167 = arith.constant 0 : index
    %227 = vector.load %arg6[%c0_164, %c4_165, %c0_166, %c0_167] : memref<1x16x16x128xbf16, #tpu.memory_space<vmem>>, vector<1x1x16x128xbf16>
    %228 = vector.shape_cast %227 : vector<1x1x16x128xbf16> to vector<16x128xbf16>
    %229 = vector.shape_cast %226 : vector<16x128xbf16> to vector<1x1x16x128xbf16>
    tpu.vector_store %arg6[%c0_164, %c4_165, %c0_166, %c0_167], %229 {strides = array<i32>} : memref<1x16x16x128xbf16, #tpu.memory_space<vmem>>, vector<1x1x16x128xbf16>,
    %c90 = arith.constant 90 : index
    %c0_168 = arith.constant 0 : index
    %230 = vector.load %arg8[%c90, %c0_168] : memref<288x128xf32, #tpu.memory_space<vmem>>, vector<16x128xf32>
    %231 = arith.truncf %230 : vector<16x128xf32> to vector<16x128xbf16>
    %c0_169 = arith.constant 0 : index
    %c5_170 = arith.constant 5 : index
    %c0_171 = arith.constant 0 : index
    %c0_172 = arith.constant 0 : index
    %232 = vector.load %arg6[%c0_169, %c5_170, %c0_171, %c0_172] : memref<1x16x16x128xbf16, #tpu.memory_space<vmem>>, vector<1x1x16x128xbf16>
    %233 = vector.shape_cast %232 : vector<1x1x16x128xbf16> to vector<16x128xbf16>
    %234 = vector.shape_cast %231 : vector<16x128xbf16> to vector<1x1x16x128xbf16>
    tpu.vector_store %arg6[%c0_169, %c5_170, %c0_171, %c0_172], %234 {strides = array<i32>} : memref<1x16x16x128xbf16, #tpu.memory_space<vmem>>, vector<1x1x16x128xbf16>,
    %c108 = arith.constant 108 : index
    %c0_173 = arith.constant 0 : index
    %235 = vector.load %arg8[%c108, %c0_173] : memref<288x128xf32, #tpu.memory_space<vmem>>, vector<16x128xf32>
    %236 = arith.truncf %235 : vector<16x128xf32> to vector<16x128xbf16>
    %c0_174 = arith.constant 0 : index
    %c6_175 = arith.constant 6 : index
    %c0_176 = arith.constant 0 : index
    %c0_177 = arith.constant 0 : index
    %237 = vector.load %arg6[%c0_174, %c6_175, %c0_176, %c0_177] : memref<1x16x16x128xbf16, #tpu.memory_space<vmem>>, vector<1x1x16x128xbf16>
    %238 = vector.shape_cast %237 : vector<1x1x16x128xbf16> to vector<16x128xbf16>
    %239 = vector.shape_cast %236 : vector<16x128xbf16> to vector<1x1x16x128xbf16>
    tpu.vector_store %arg6[%c0_174, %c6_175, %c0_176, %c0_177], %239 {strides = array<i32>} : memref<1x16x16x128xbf16, #tpu.memory_space<vmem>>, vector<1x1x16x128xbf16>,
    %c126 = arith.constant 126 : index
    %c0_178 = arith.constant 0 : index
    %240 = vector.load %arg8[%c126, %c0_178] : memref<288x128xf32, #tpu.memory_space<vmem>>, vector<16x128xf32>
    %241 = arith.truncf %240 : vector<16x128xf32> to vector<16x128xbf16>
    %c0_179 = arith.constant 0 : index
    %c7_180 = arith.constant 7 : index
    %c0_181 = arith.constant 0 : index
    %c0_182 = arith.constant 0 : index
    %242 = vector.load %arg6[%c0_179, %c7_180, %c0_181, %c0_182] : memref<1x16x16x128xbf16, #tpu.memory_space<vmem>>, vector<1x1x16x128xbf16>
    %243 = vector.shape_cast %242 : vector<1x1x16x128xbf16> to vector<16x128xbf16>
    %244 = vector.shape_cast %241 : vector<16x128xbf16> to vector<1x1x16x128xbf16>
    tpu.vector_store %arg6[%c0_179, %c7_180, %c0_181, %c0_182], %244 {strides = array<i32>} : memref<1x16x16x128xbf16, #tpu.memory_space<vmem>>, vector<1x1x16x128xbf16>,
    %c144 = arith.constant 144 : index
    %c0_183 = arith.constant 0 : index
    %245 = vector.load %arg8[%c144, %c0_183] : memref<288x128xf32, #tpu.memory_space<vmem>>, vector<16x128xf32>
    %246 = arith.truncf %245 : vector<16x128xf32> to vector<16x128xbf16>
    %c0_184 = arith.constant 0 : index
    %c8_185 = arith.constant 8 : index
    %c0_186 = arith.constant 0 : index
    %c0_187 = arith.constant 0 : index
    %247 = vector.load %arg6[%c0_184, %c8_185, %c0_186, %c0_187] : memref<1x16x16x128xbf16, #tpu.memory_space<vmem>>, vector<1x1x16x128xbf16>
    %248 = vector.shape_cast %247 : vector<1x1x16x128xbf16> to vector<16x128xbf16>
    %249 = vector.shape_cast %246 : vector<16x128xbf16> to vector<1x1x16x128xbf16>
    tpu.vector_store %arg6[%c0_184, %c8_185, %c0_186, %c0_187], %249 {strides = array<i32>} : memref<1x16x16x128xbf16, #tpu.memory_space<vmem>>, vector<1x1x16x128xbf16>,
    %c162 = arith.constant 162 : index
    %c0_188 = arith.constant 0 : index
    %250 = vector.load %arg8[%c162, %c0_188] : memref<288x128xf32, #tpu.memory_space<vmem>>, vector<16x128xf32>
    %251 = arith.truncf %250 : vector<16x128xf32> to vector<16x128xbf16>
    %c0_189 = arith.constant 0 : index
    %c9_190 = arith.constant 9 : index
    %c0_191 = arith.constant 0 : index
    %c0_192 = arith.constant 0 : index
    %252 = vector.load %arg6[%c0_189, %c9_190, %c0_191, %c0_192] : memref<1x16x16x128xbf16, #tpu.memory_space<vmem>>, vector<1x1x16x128xbf16>
    %253 = vector.shape_cast %252 : vector<1x1x16x128xbf16> to vector<16x128xbf16>
    %254 = vector.shape_cast %251 : vector<16x128xbf16> to vector<1x1x16x128xbf16>
    tpu.vector_store %arg6[%c0_189, %c9_190, %c0_191, %c0_192], %254 {strides = array<i32>} : memref<1x16x16x128xbf16, #tpu.memory_space<vmem>>, vector<1x1x16x128xbf16>,
    %c180 = arith.constant 180 : index
    %c0_193 = arith.constant 0 : index
    %255 = vector.load %arg8[%c180, %c0_193] : memref<288x128xf32, #tpu.memory_space<vmem>>, vector<16x128xf32>
    %256 = arith.truncf %255 : vector<16x128xf32> to vector<16x128xbf16>
    %c0_194 = arith.constant 0 : index
    %c10_195 = arith.constant 10 : index
    %c0_196 = arith.constant 0 : index
    %c0_197 = arith.constant 0 : index
    %257 = vector.load %arg6[%c0_194, %c10_195, %c0_196, %c0_197] : memref<1x16x16x128xbf16, #tpu.memory_space<vmem>>, vector<1x1x16x128xbf16>
    %258 = vector.shape_cast %257 : vector<1x1x16x128xbf16> to vector<16x128xbf16>
    %259 = vector.shape_cast %256 : vector<16x128xbf16> to vector<1x1x16x128xbf16>
    tpu.vector_store %arg6[%c0_194, %c10_195, %c0_196, %c0_197], %259 {strides = array<i32>} : memref<1x16x16x128xbf16, #tpu.memory_space<vmem>>, vector<1x1x16x128xbf16>,
    %c198 = arith.constant 198 : index
    %c0_198 = arith.constant 0 : index
    %260 = vector.load %arg8[%c198, %c0_198] : memref<288x128xf32, #tpu.memory_space<vmem>>, vector<16x128xf32>
    %261 = arith.truncf %260 : vector<16x128xf32> to vector<16x128xbf16>
    %c0_199 = arith.constant 0 : index
    %c11_200 = arith.constant 11 : index
    %c0_201 = arith.constant 0 : index
    %c0_202 = arith.constant 0 : index
    %262 = vector.load %arg6[%c0_199, %c11_200, %c0_201, %c0_202] : memref<1x16x16x128xbf16, #tpu.memory_space<vmem>>, vector<1x1x16x128xbf16>
    %263 = vector.shape_cast %262 : vector<1x1x16x128xbf16> to vector<16x128xbf16>
    %264 = vector.shape_cast %261 : vector<16x128xbf16> to vector<1x1x16x128xbf16>
    tpu.vector_store %arg6[%c0_199, %c11_200, %c0_201, %c0_202], %264 {strides = array<i32>} : memref<1x16x16x128xbf16, #tpu.memory_space<vmem>>, vector<1x1x16x128xbf16>,
    %c216 = arith.constant 216 : index
    %c0_203 = arith.constant 0 : index
    %265 = vector.load %arg8[%c216, %c0_203] : memref<288x128xf32, #tpu.memory_space<vmem>>, vector<16x128xf32>
    %266 = arith.truncf %265 : vector<16x128xf32> to vector<16x128xbf16>
    %c0_204 = arith.constant 0 : index
    %c12_205 = arith.constant 12 : index
    %c0_206 = arith.constant 0 : index
    %c0_207 = arith.constant 0 : index
    %267 = vector.load %arg6[%c0_204, %c12_205, %c0_206, %c0_207] : memref<1x16x16x128xbf16, #tpu.memory_space<vmem>>, vector<1x1x16x128xbf16>
    %268 = vector.shape_cast %267 : vector<1x1x16x128xbf16> to vector<16x128xbf16>
    %269 = vector.shape_cast %266 : vector<16x128xbf16> to vector<1x1x16x128xbf16>
    tpu.vector_store %arg6[%c0_204, %c12_205, %c0_206, %c0_207], %269 {strides = array<i32>} : memref<1x16x16x128xbf16, #tpu.memory_space<vmem>>, vector<1x1x16x128xbf16>,
    %c234 = arith.constant 234 : index
    %c0_208 = arith.constant 0 : index
    %270 = vector.load %arg8[%c234, %c0_208] : memref<288x128xf32, #tpu.memory_space<vmem>>, vector<16x128xf32>
    %271 = arith.truncf %270 : vector<16x128xf32> to vector<16x128xbf16>
    %c0_209 = arith.constant 0 : index
    %c13_210 = arith.constant 13 : index
    %c0_211 = arith.constant 0 : index
    %c0_212 = arith.constant 0 : index
    %272 = vector.load %arg6[%c0_209, %c13_210, %c0_211, %c0_212] : memref<1x16x16x128xbf16, #tpu.memory_space<vmem>>, vector<1x1x16x128xbf16>
    %273 = vector.shape_cast %272 : vector<1x1x16x128xbf16> to vector<16x128xbf16>
    %274 = vector.shape_cast %271 : vector<16x128xbf16> to vector<1x1x16x128xbf16>
    tpu.vector_store %arg6[%c0_209, %c13_210, %c0_211, %c0_212], %274 {strides = array<i32>} : memref<1x16x16x128xbf16, #tpu.memory_space<vmem>>, vector<1x1x16x128xbf16>,
    %c252 = arith.constant 252 : index
    %c0_213 = arith.constant 0 : index
    %275 = vector.load %arg8[%c252, %c0_213] : memref<288x128xf32, #tpu.memory_space<vmem>>, vector<16x128xf32>
    %276 = arith.truncf %275 : vector<16x128xf32> to vector<16x128xbf16>
    %c0_214 = arith.constant 0 : index
    %c14_215 = arith.constant 14 : index
    %c0_216 = arith.constant 0 : index
    %c0_217 = arith.constant 0 : index
    %277 = vector.load %arg6[%c0_214, %c14_215, %c0_216, %c0_217] : memref<1x16x16x128xbf16, #tpu.memory_space<vmem>>, vector<1x1x16x128xbf16>
    %278 = vector.shape_cast %277 : vector<1x1x16x128xbf16> to vector<16x128xbf16>
    %279 = vector.shape_cast %276 : vector<16x128xbf16> to vector<1x1x16x128xbf16>
    tpu.vector_store %arg6[%c0_214, %c14_215, %c0_216, %c0_217], %279 {strides = array<i32>} : memref<1x16x16x128xbf16, #tpu.memory_space<vmem>>, vector<1x1x16x128xbf16>,
    %c270 = arith.constant 270 : index
    %c0_218 = arith.constant 0 : index
    %280 = vector.load %arg8[%c270, %c0_218] : memref<288x128xf32, #tpu.memory_space<vmem>>, vector<16x128xf32>
    %281 = arith.truncf %280 : vector<16x128xf32> to vector<16x128xbf16>
    %c0_219 = arith.constant 0 : index
    %c15_220 = arith.constant 15 : index
    %c0_221 = arith.constant 0 : index
    %c0_222 = arith.constant 0 : index
    %282 = vector.load %arg6[%c0_219, %c15_220, %c0_221, %c0_222] : memref<1x16x16x128xbf16, #tpu.memory_space<vmem>>, vector<1x1x16x128xbf16>
    %283 = vector.shape_cast %282 : vector<1x1x16x128xbf16> to vector<16x128xbf16>
    %284 = vector.shape_cast %281 : vector<16x128xbf16> to vector<1x1x16x128xbf16>
    tpu.vector_store %arg6[%c0_219, %c15_220, %c0_221, %c0_222], %284 {strides = array<i32>} : memref<1x16x16x128xbf16, #tpu.memory_space<vmem>>, vector<1x1x16x128xbf16>,
    return
  }
  func.func @transform_0(%arg0: i32) -> (i32, i32, i32, i32) {
    %c0_i32 = arith.constant 0 : i32
    %c0_i32_0 = arith.constant 0 : i32
    %c0_i32_1 = arith.constant 0 : i32
    %c0_i32_2 = arith.constant 0 : i32
    return %arg0, %c0_i32, %c0_i32_0, %c0_i32_1 : i32, i32, i32, i32
  }
  func.func @transform_1(%arg0: i32) -> (i32, i32) {
    %c0_i32 = arith.constant 0 : i32
    %c0_i32_0 = arith.constant 0 : i32
    %c0_i32_1 = arith.constant 0 : i32
    return %c0_i32, %c0_i32_0 : i32, i32
  }
  func.func @transform_2(%arg0: i32) -> (i32, i32) {
    %c0_i32 = arith.constant 0 : i32
    %c0_i32_0 = arith.constant 0 : i32
    %c0_i32_1 = arith.constant 0 : i32
    return %c0_i32, %c0_i32_0 : i32, i32
  }
  func.func @transform_3(%arg0: i32) -> (i32, i32, i32) {
    %c0_i32 = arith.constant 0 : i32
    %c0_i32_0 = arith.constant 0 : i32
    %c0_i32_1 = arith.constant 0 : i32
    %c0_i32_2 = arith.constant 0 : i32
    return %c0_i32, %c0_i32_0, %c0_i32_1 : i32, i32, i32
  }
  func.func @transform_4(%arg0: i32) -> (i32, i32) {
    %c0_i32 = arith.constant 0 : i32
    %c0_i32_0 = arith.constant 0 : i32
    %c0_i32_1 = arith.constant 0 : i32
    return %c0_i32, %c0_i32_0 : i32, i32
  }
  func.func @transform_5(%arg0: i32) -> (i32, i32, i32, i32) {
    %c0_i32 = arith.constant 0 : i32
    %c0_i32_0 = arith.constant 0 : i32
    %c0_i32_1 = arith.constant 0 : i32
    %c0_i32_2 = arith.constant 0 : i32
    return %arg0, %c0_i32, %c0_i32_0, %c0_i32_1 : i32, i32, i32, i32
  }
}

module attributes {stable_mosaic.version = 11 : i64} {
  func.func @kernel(%arg0: i32, %arg1: memref<1x16x16x128xbf16, #tpu.memory_space<vmem>>, %arg2: memref<1x128xf32, #tpu.memory_space<vmem>>, %arg3: memref<1x128xf32, #tpu.memory_space<vmem>>, %arg4: memref<9x128x128xbf16, #tpu.memory_space<vmem>>, %arg5: memref<1x128xf32, #tpu.memory_space<vmem>>, %arg6: memref<1x16x16x128xf32, #tpu.memory_space<vmem>>, %arg7: memref<128x128xbf16, #tpu.memory_space<vmem>>, %arg8: memref<1x8x8x128xf32, #tpu.memory_space<vmem>>, %arg9: memref<328x128xf32, #tpu.memory_space<vmem>>, %arg10: memref<288x128xf32, #tpu.memory_space<vmem>>) attributes {dimension_semantics = [#tpu.dimension_semantics<parallel>], iteration_bounds = array<i64: 2>, scalar_prefetch = 0 : i64, scratch_operands = 2 : i64, tpu.core_type = #tpu.core_type<tc>, window_params = [{transform_indices = @transform_0, window_bounds = array<i64: 1, 16, 16, 128>}, {pipeline_mode = #tpu.pipeline_mode<synchronous>, transform_indices = @transform_1, window_bounds = array<i64: 1, 128>}, {pipeline_mode = #tpu.pipeline_mode<synchronous>, transform_indices = @transform_2, window_bounds = array<i64: 1, 128>}, {pipeline_mode = #tpu.pipeline_mode<synchronous>, transform_indices = @transform_3, window_bounds = array<i64: 9, 128, 128>}, {pipeline_mode = #tpu.pipeline_mode<synchronous>, transform_indices = @transform_4, window_bounds = array<i64: 1, 128>}, {transform_indices = @transform_5, window_bounds = array<i64: 1, 16, 16, 128>}, {pipeline_mode = #tpu.pipeline_mode<synchronous>, transform_indices = @transform_6, window_bounds = array<i64: 128, 128>}, {transform_indices = @transform_7, window_bounds = array<i64: 1, 8, 8, 128>}]} {
    %cst = arith.constant 0.000000e+00 : f32
    %0 = vector.broadcast %cst : f32 to vector<328x128xf32>
    %c0 = arith.constant 0 : index
    %c0_0 = arith.constant 0 : index
    %1 = vector.load %arg9[%c0, %c0_0] : memref<328x128xf32, #tpu.memory_space<vmem>>, vector<328x128xf32>
    tpu.vector_store %arg9[%c0, %c0_0], %0 {strides = array<i32>} : memref<328x128xf32, #tpu.memory_space<vmem>>, vector<328x128xf32>,
    %c0_1 = arith.constant 0 : index
    %c0_2 = arith.constant 0 : index
    %2 = vector.load %arg2[%c0_1, %c0_2] : memref<1x128xf32, #tpu.memory_space<vmem>>, vector<1x128xf32>
    %c0_3 = arith.constant 0 : index
    %c0_4 = arith.constant 0 : index
    %3 = vector.load %arg3[%c0_3, %c0_4] : memref<1x128xf32, #tpu.memory_space<vmem>>, vector<1x128xf32>
    %c0_5 = arith.constant 0 : index
    %c0_6 = arith.constant 0 : index
    %c0_7 = arith.constant 0 : index
    %c0_8 = arith.constant 0 : index
    %4 = vector.load %arg1[%c0_5, %c0_6, %c0_7, %c0_8] : memref<1x16x16x128xbf16, #tpu.memory_space<vmem>>, vector<1x1x16x128xbf16>
    %5 = vector.shape_cast %4 : vector<1x1x16x128xbf16> to vector<16x128xbf16>
    %6 = arith.extf %5 : vector<16x128xbf16> to vector<16x128xf32>
    %7 = vector.broadcast %2 : vector<1x128xf32> to vector<16x128xf32>
    %8 = arith.mulf %6, %7 : vector<16x128xf32>
    %9 = vector.broadcast %3 : vector<1x128xf32> to vector<16x128xf32>
    %10 = arith.addf %8, %9 : vector<16x128xf32>
    %cst_9 = arith.constant 0.000000e+00 : f32
    %11 = vector.broadcast %cst_9 : f32 to vector<16x128xf32>
    %12 = arith.maximumf %10, %11 : vector<16x128xf32>
    %c19 = arith.constant 19 : index
    %c0_10 = arith.constant 0 : index
    %13 = vector.load %arg9[%c19, %c0_10] : memref<328x128xf32, #tpu.memory_space<vmem>>, vector<16x128xf32>
    tpu.vector_store %arg9[%c19, %c0_10], %12 {strides = array<i32>} : memref<328x128xf32, #tpu.memory_space<vmem>>, vector<16x128xf32>,
    %c0_11 = arith.constant 0 : index
    %c1 = arith.constant 1 : index
    %c0_12 = arith.constant 0 : index
    %c0_13 = arith.constant 0 : index
    %14 = vector.load %arg1[%c0_11, %c1, %c0_12, %c0_13] : memref<1x16x16x128xbf16, #tpu.memory_space<vmem>>, vector<1x1x16x128xbf16>
    %15 = vector.shape_cast %14 : vector<1x1x16x128xbf16> to vector<16x128xbf16>
    %16 = arith.extf %15 : vector<16x128xbf16> to vector<16x128xf32>
    %17 = vector.broadcast %2 : vector<1x128xf32> to vector<16x128xf32>
    %18 = arith.mulf %16, %17 : vector<16x128xf32>
    %19 = vector.broadcast %3 : vector<1x128xf32> to vector<16x128xf32>
    %20 = arith.addf %18, %19 : vector<16x128xf32>
    %cst_14 = arith.constant 0.000000e+00 : f32
    %21 = vector.broadcast %cst_14 : f32 to vector<16x128xf32>
    %22 = arith.maximumf %20, %21 : vector<16x128xf32>
    %c37 = arith.constant 37 : index
    %c0_15 = arith.constant 0 : index
    %23 = vector.load %arg9[%c37, %c0_15] : memref<328x128xf32, #tpu.memory_space<vmem>>, vector<16x128xf32>
    tpu.vector_store %arg9[%c37, %c0_15], %22 {strides = array<i32>} : memref<328x128xf32, #tpu.memory_space<vmem>>, vector<16x128xf32>,
    %c0_16 = arith.constant 0 : index
    %c2 = arith.constant 2 : index
    %c0_17 = arith.constant 0 : index
    %c0_18 = arith.constant 0 : index
    %24 = vector.load %arg1[%c0_16, %c2, %c0_17, %c0_18] : memref<1x16x16x128xbf16, #tpu.memory_space<vmem>>, vector<1x1x16x128xbf16>
    %25 = vector.shape_cast %24 : vector<1x1x16x128xbf16> to vector<16x128xbf16>
    %26 = arith.extf %25 : vector<16x128xbf16> to vector<16x128xf32>
    %27 = vector.broadcast %2 : vector<1x128xf32> to vector<16x128xf32>
    %28 = arith.mulf %26, %27 : vector<16x128xf32>
    %29 = vector.broadcast %3 : vector<1x128xf32> to vector<16x128xf32>
    %30 = arith.addf %28, %29 : vector<16x128xf32>
    %cst_19 = arith.constant 0.000000e+00 : f32
    %31 = vector.broadcast %cst_19 : f32 to vector<16x128xf32>
    %32 = arith.maximumf %30, %31 : vector<16x128xf32>
    %c55 = arith.constant 55 : index
    %c0_20 = arith.constant 0 : index
    %33 = vector.load %arg9[%c55, %c0_20] : memref<328x128xf32, #tpu.memory_space<vmem>>, vector<16x128xf32>
    tpu.vector_store %arg9[%c55, %c0_20], %32 {strides = array<i32>} : memref<328x128xf32, #tpu.memory_space<vmem>>, vector<16x128xf32>,
    %c0_21 = arith.constant 0 : index
    %c3 = arith.constant 3 : index
    %c0_22 = arith.constant 0 : index
    %c0_23 = arith.constant 0 : index
    %34 = vector.load %arg1[%c0_21, %c3, %c0_22, %c0_23] : memref<1x16x16x128xbf16, #tpu.memory_space<vmem>>, vector<1x1x16x128xbf16>
    %35 = vector.shape_cast %34 : vector<1x1x16x128xbf16> to vector<16x128xbf16>
    %36 = arith.extf %35 : vector<16x128xbf16> to vector<16x128xf32>
    %37 = vector.broadcast %2 : vector<1x128xf32> to vector<16x128xf32>
    %38 = arith.mulf %36, %37 : vector<16x128xf32>
    %39 = vector.broadcast %3 : vector<1x128xf32> to vector<16x128xf32>
    %40 = arith.addf %38, %39 : vector<16x128xf32>
    %cst_24 = arith.constant 0.000000e+00 : f32
    %41 = vector.broadcast %cst_24 : f32 to vector<16x128xf32>
    %42 = arith.maximumf %40, %41 : vector<16x128xf32>
    %c73 = arith.constant 73 : index
    %c0_25 = arith.constant 0 : index
    %43 = vector.load %arg9[%c73, %c0_25] : memref<328x128xf32, #tpu.memory_space<vmem>>, vector<16x128xf32>
    tpu.vector_store %arg9[%c73, %c0_25], %42 {strides = array<i32>} : memref<328x128xf32, #tpu.memory_space<vmem>>, vector<16x128xf32>,
    %c0_26 = arith.constant 0 : index
    %c4 = arith.constant 4 : index
    %c0_27 = arith.constant 0 : index
    %c0_28 = arith.constant 0 : index
    %44 = vector.load %arg1[%c0_26, %c4, %c0_27, %c0_28] : memref<1x16x16x128xbf16, #tpu.memory_space<vmem>>, vector<1x1x16x128xbf16>
    %45 = vector.shape_cast %44 : vector<1x1x16x128xbf16> to vector<16x128xbf16>
    %46 = arith.extf %45 : vector<16x128xbf16> to vector<16x128xf32>
    %47 = vector.broadcast %2 : vector<1x128xf32> to vector<16x128xf32>
    %48 = arith.mulf %46, %47 : vector<16x128xf32>
    %49 = vector.broadcast %3 : vector<1x128xf32> to vector<16x128xf32>
    %50 = arith.addf %48, %49 : vector<16x128xf32>
    %cst_29 = arith.constant 0.000000e+00 : f32
    %51 = vector.broadcast %cst_29 : f32 to vector<16x128xf32>
    %52 = arith.maximumf %50, %51 : vector<16x128xf32>
    %c91 = arith.constant 91 : index
    %c0_30 = arith.constant 0 : index
    %53 = vector.load %arg9[%c91, %c0_30] : memref<328x128xf32, #tpu.memory_space<vmem>>, vector<16x128xf32>
    tpu.vector_store %arg9[%c91, %c0_30], %52 {strides = array<i32>} : memref<328x128xf32, #tpu.memory_space<vmem>>, vector<16x128xf32>,
    %c0_31 = arith.constant 0 : index
    %c5 = arith.constant 5 : index
    %c0_32 = arith.constant 0 : index
    %c0_33 = arith.constant 0 : index
    %54 = vector.load %arg1[%c0_31, %c5, %c0_32, %c0_33] : memref<1x16x16x128xbf16, #tpu.memory_space<vmem>>, vector<1x1x16x128xbf16>
    %55 = vector.shape_cast %54 : vector<1x1x16x128xbf16> to vector<16x128xbf16>
    %56 = arith.extf %55 : vector<16x128xbf16> to vector<16x128xf32>
    %57 = vector.broadcast %2 : vector<1x128xf32> to vector<16x128xf32>
    %58 = arith.mulf %56, %57 : vector<16x128xf32>
    %59 = vector.broadcast %3 : vector<1x128xf32> to vector<16x128xf32>
    %60 = arith.addf %58, %59 : vector<16x128xf32>
    %cst_34 = arith.constant 0.000000e+00 : f32
    %61 = vector.broadcast %cst_34 : f32 to vector<16x128xf32>
    %62 = arith.maximumf %60, %61 : vector<16x128xf32>
    %c109 = arith.constant 109 : index
    %c0_35 = arith.constant 0 : index
    %63 = vector.load %arg9[%c109, %c0_35] : memref<328x128xf32, #tpu.memory_space<vmem>>, vector<16x128xf32>
    tpu.vector_store %arg9[%c109, %c0_35], %62 {strides = array<i32>} : memref<328x128xf32, #tpu.memory_space<vmem>>, vector<16x128xf32>,
    %c0_36 = arith.constant 0 : index
    %c6 = arith.constant 6 : index
    %c0_37 = arith.constant 0 : index
    %c0_38 = arith.constant 0 : index
    %64 = vector.load %arg1[%c0_36, %c6, %c0_37, %c0_38] : memref<1x16x16x128xbf16, #tpu.memory_space<vmem>>, vector<1x1x16x128xbf16>
    %65 = vector.shape_cast %64 : vector<1x1x16x128xbf16> to vector<16x128xbf16>
    %66 = arith.extf %65 : vector<16x128xbf16> to vector<16x128xf32>
    %67 = vector.broadcast %2 : vector<1x128xf32> to vector<16x128xf32>
    %68 = arith.mulf %66, %67 : vector<16x128xf32>
    %69 = vector.broadcast %3 : vector<1x128xf32> to vector<16x128xf32>
    %70 = arith.addf %68, %69 : vector<16x128xf32>
    %cst_39 = arith.constant 0.000000e+00 : f32
    %71 = vector.broadcast %cst_39 : f32 to vector<16x128xf32>
    %72 = arith.maximumf %70, %71 : vector<16x128xf32>
    %c127 = arith.constant 127 : index
    %c0_40 = arith.constant 0 : index
    %73 = vector.load %arg9[%c127, %c0_40] : memref<328x128xf32, #tpu.memory_space<vmem>>, vector<16x128xf32>
    tpu.vector_store %arg9[%c127, %c0_40], %72 {strides = array<i32>} : memref<328x128xf32, #tpu.memory_space<vmem>>, vector<16x128xf32>,
    %c0_41 = arith.constant 0 : index
    %c7 = arith.constant 7 : index
    %c0_42 = arith.constant 0 : index
    %c0_43 = arith.constant 0 : index
    %74 = vector.load %arg1[%c0_41, %c7, %c0_42, %c0_43] : memref<1x16x16x128xbf16, #tpu.memory_space<vmem>>, vector<1x1x16x128xbf16>
    %75 = vector.shape_cast %74 : vector<1x1x16x128xbf16> to vector<16x128xbf16>
    %76 = arith.extf %75 : vector<16x128xbf16> to vector<16x128xf32>
    %77 = vector.broadcast %2 : vector<1x128xf32> to vector<16x128xf32>
    %78 = arith.mulf %76, %77 : vector<16x128xf32>
    %79 = vector.broadcast %3 : vector<1x128xf32> to vector<16x128xf32>
    %80 = arith.addf %78, %79 : vector<16x128xf32>
    %cst_44 = arith.constant 0.000000e+00 : f32
    %81 = vector.broadcast %cst_44 : f32 to vector<16x128xf32>
    %82 = arith.maximumf %80, %81 : vector<16x128xf32>
    %c145 = arith.constant 145 : index
    %c0_45 = arith.constant 0 : index
    %83 = vector.load %arg9[%c145, %c0_45] : memref<328x128xf32, #tpu.memory_space<vmem>>, vector<16x128xf32>
    tpu.vector_store %arg9[%c145, %c0_45], %82 {strides = array<i32>} : memref<328x128xf32, #tpu.memory_space<vmem>>, vector<16x128xf32>,
    %c0_46 = arith.constant 0 : index
    %c8 = arith.constant 8 : index
    %c0_47 = arith.constant 0 : index
    %c0_48 = arith.constant 0 : index
    %84 = vector.load %arg1[%c0_46, %c8, %c0_47, %c0_48] : memref<1x16x16x128xbf16, #tpu.memory_space<vmem>>, vector<1x1x16x128xbf16>
    %85 = vector.shape_cast %84 : vector<1x1x16x128xbf16> to vector<16x128xbf16>
    %86 = arith.extf %85 : vector<16x128xbf16> to vector<16x128xf32>
    %87 = vector.broadcast %2 : vector<1x128xf32> to vector<16x128xf32>
    %88 = arith.mulf %86, %87 : vector<16x128xf32>
    %89 = vector.broadcast %3 : vector<1x128xf32> to vector<16x128xf32>
    %90 = arith.addf %88, %89 : vector<16x128xf32>
    %cst_49 = arith.constant 0.000000e+00 : f32
    %91 = vector.broadcast %cst_49 : f32 to vector<16x128xf32>
    %92 = arith.maximumf %90, %91 : vector<16x128xf32>
    %c163 = arith.constant 163 : index
    %c0_50 = arith.constant 0 : index
    %93 = vector.load %arg9[%c163, %c0_50] : memref<328x128xf32, #tpu.memory_space<vmem>>, vector<16x128xf32>
    tpu.vector_store %arg9[%c163, %c0_50], %92 {strides = array<i32>} : memref<328x128xf32, #tpu.memory_space<vmem>>, vector<16x128xf32>,
    %c0_51 = arith.constant 0 : index
    %c9 = arith.constant 9 : index
    %c0_52 = arith.constant 0 : index
    %c0_53 = arith.constant 0 : index
    %94 = vector.load %arg1[%c0_51, %c9, %c0_52, %c0_53] : memref<1x16x16x128xbf16, #tpu.memory_space<vmem>>, vector<1x1x16x128xbf16>
    %95 = vector.shape_cast %94 : vector<1x1x16x128xbf16> to vector<16x128xbf16>
    %96 = arith.extf %95 : vector<16x128xbf16> to vector<16x128xf32>
    %97 = vector.broadcast %2 : vector<1x128xf32> to vector<16x128xf32>
    %98 = arith.mulf %96, %97 : vector<16x128xf32>
    %99 = vector.broadcast %3 : vector<1x128xf32> to vector<16x128xf32>
    %100 = arith.addf %98, %99 : vector<16x128xf32>
    %cst_54 = arith.constant 0.000000e+00 : f32
    %101 = vector.broadcast %cst_54 : f32 to vector<16x128xf32>
    %102 = arith.maximumf %100, %101 : vector<16x128xf32>
    %c181 = arith.constant 181 : index
    %c0_55 = arith.constant 0 : index
    %103 = vector.load %arg9[%c181, %c0_55] : memref<328x128xf32, #tpu.memory_space<vmem>>, vector<16x128xf32>
    tpu.vector_store %arg9[%c181, %c0_55], %102 {strides = array<i32>} : memref<328x128xf32, #tpu.memory_space<vmem>>, vector<16x128xf32>,
    %c0_56 = arith.constant 0 : index
    %c10 = arith.constant 10 : index
    %c0_57 = arith.constant 0 : index
    %c0_58 = arith.constant 0 : index
    %104 = vector.load %arg1[%c0_56, %c10, %c0_57, %c0_58] : memref<1x16x16x128xbf16, #tpu.memory_space<vmem>>, vector<1x1x16x128xbf16>
    %105 = vector.shape_cast %104 : vector<1x1x16x128xbf16> to vector<16x128xbf16>
    %106 = arith.extf %105 : vector<16x128xbf16> to vector<16x128xf32>
    %107 = vector.broadcast %2 : vector<1x128xf32> to vector<16x128xf32>
    %108 = arith.mulf %106, %107 : vector<16x128xf32>
    %109 = vector.broadcast %3 : vector<1x128xf32> to vector<16x128xf32>
    %110 = arith.addf %108, %109 : vector<16x128xf32>
    %cst_59 = arith.constant 0.000000e+00 : f32
    %111 = vector.broadcast %cst_59 : f32 to vector<16x128xf32>
    %112 = arith.maximumf %110, %111 : vector<16x128xf32>
    %c199 = arith.constant 199 : index
    %c0_60 = arith.constant 0 : index
    %113 = vector.load %arg9[%c199, %c0_60] : memref<328x128xf32, #tpu.memory_space<vmem>>, vector<16x128xf32>
    tpu.vector_store %arg9[%c199, %c0_60], %112 {strides = array<i32>} : memref<328x128xf32, #tpu.memory_space<vmem>>, vector<16x128xf32>,
    %c0_61 = arith.constant 0 : index
    %c11 = arith.constant 11 : index
    %c0_62 = arith.constant 0 : index
    %c0_63 = arith.constant 0 : index
    %114 = vector.load %arg1[%c0_61, %c11, %c0_62, %c0_63] : memref<1x16x16x128xbf16, #tpu.memory_space<vmem>>, vector<1x1x16x128xbf16>
    %115 = vector.shape_cast %114 : vector<1x1x16x128xbf16> to vector<16x128xbf16>
    %116 = arith.extf %115 : vector<16x128xbf16> to vector<16x128xf32>
    %117 = vector.broadcast %2 : vector<1x128xf32> to vector<16x128xf32>
    %118 = arith.mulf %116, %117 : vector<16x128xf32>
    %119 = vector.broadcast %3 : vector<1x128xf32> to vector<16x128xf32>
    %120 = arith.addf %118, %119 : vector<16x128xf32>
    %cst_64 = arith.constant 0.000000e+00 : f32
    %121 = vector.broadcast %cst_64 : f32 to vector<16x128xf32>
    %122 = arith.maximumf %120, %121 : vector<16x128xf32>
    %c217 = arith.constant 217 : index
    %c0_65 = arith.constant 0 : index
    %123 = vector.load %arg9[%c217, %c0_65] : memref<328x128xf32, #tpu.memory_space<vmem>>, vector<16x128xf32>
    tpu.vector_store %arg9[%c217, %c0_65], %122 {strides = array<i32>} : memref<328x128xf32, #tpu.memory_space<vmem>>, vector<16x128xf32>,
    %c0_66 = arith.constant 0 : index
    %c12 = arith.constant 12 : index
    %c0_67 = arith.constant 0 : index
    %c0_68 = arith.constant 0 : index
    %124 = vector.load %arg1[%c0_66, %c12, %c0_67, %c0_68] : memref<1x16x16x128xbf16, #tpu.memory_space<vmem>>, vector<1x1x16x128xbf16>
    %125 = vector.shape_cast %124 : vector<1x1x16x128xbf16> to vector<16x128xbf16>
    %126 = arith.extf %125 : vector<16x128xbf16> to vector<16x128xf32>
    %127 = vector.broadcast %2 : vector<1x128xf32> to vector<16x128xf32>
    %128 = arith.mulf %126, %127 : vector<16x128xf32>
    %129 = vector.broadcast %3 : vector<1x128xf32> to vector<16x128xf32>
    %130 = arith.addf %128, %129 : vector<16x128xf32>
    %cst_69 = arith.constant 0.000000e+00 : f32
    %131 = vector.broadcast %cst_69 : f32 to vector<16x128xf32>
    %132 = arith.maximumf %130, %131 : vector<16x128xf32>
    %c235 = arith.constant 235 : index
    %c0_70 = arith.constant 0 : index
    %133 = vector.load %arg9[%c235, %c0_70] : memref<328x128xf32, #tpu.memory_space<vmem>>, vector<16x128xf32>
    tpu.vector_store %arg9[%c235, %c0_70], %132 {strides = array<i32>} : memref<328x128xf32, #tpu.memory_space<vmem>>, vector<16x128xf32>,
    %c0_71 = arith.constant 0 : index
    %c13 = arith.constant 13 : index
    %c0_72 = arith.constant 0 : index
    %c0_73 = arith.constant 0 : index
    %134 = vector.load %arg1[%c0_71, %c13, %c0_72, %c0_73] : memref<1x16x16x128xbf16, #tpu.memory_space<vmem>>, vector<1x1x16x128xbf16>
    %135 = vector.shape_cast %134 : vector<1x1x16x128xbf16> to vector<16x128xbf16>
    %136 = arith.extf %135 : vector<16x128xbf16> to vector<16x128xf32>
    %137 = vector.broadcast %2 : vector<1x128xf32> to vector<16x128xf32>
    %138 = arith.mulf %136, %137 : vector<16x128xf32>
    %139 = vector.broadcast %3 : vector<1x128xf32> to vector<16x128xf32>
    %140 = arith.addf %138, %139 : vector<16x128xf32>
    %cst_74 = arith.constant 0.000000e+00 : f32
    %141 = vector.broadcast %cst_74 : f32 to vector<16x128xf32>
    %142 = arith.maximumf %140, %141 : vector<16x128xf32>
    %c253 = arith.constant 253 : index
    %c0_75 = arith.constant 0 : index
    %143 = vector.load %arg9[%c253, %c0_75] : memref<328x128xf32, #tpu.memory_space<vmem>>, vector<16x128xf32>
    tpu.vector_store %arg9[%c253, %c0_75], %142 {strides = array<i32>} : memref<328x128xf32, #tpu.memory_space<vmem>>, vector<16x128xf32>,
    %c0_76 = arith.constant 0 : index
    %c14 = arith.constant 14 : index
    %c0_77 = arith.constant 0 : index
    %c0_78 = arith.constant 0 : index
    %144 = vector.load %arg1[%c0_76, %c14, %c0_77, %c0_78] : memref<1x16x16x128xbf16, #tpu.memory_space<vmem>>, vector<1x1x16x128xbf16>
    %145 = vector.shape_cast %144 : vector<1x1x16x128xbf16> to vector<16x128xbf16>
    %146 = arith.extf %145 : vector<16x128xbf16> to vector<16x128xf32>
    %147 = vector.broadcast %2 : vector<1x128xf32> to vector<16x128xf32>
    %148 = arith.mulf %146, %147 : vector<16x128xf32>
    %149 = vector.broadcast %3 : vector<1x128xf32> to vector<16x128xf32>
    %150 = arith.addf %148, %149 : vector<16x128xf32>
    %cst_79 = arith.constant 0.000000e+00 : f32
    %151 = vector.broadcast %cst_79 : f32 to vector<16x128xf32>
    %152 = arith.maximumf %150, %151 : vector<16x128xf32>
    %c271 = arith.constant 271 : index
    %c0_80 = arith.constant 0 : index
    %153 = vector.load %arg9[%c271, %c0_80] : memref<328x128xf32, #tpu.memory_space<vmem>>, vector<16x128xf32>
    tpu.vector_store %arg9[%c271, %c0_80], %152 {strides = array<i32>} : memref<328x128xf32, #tpu.memory_space<vmem>>, vector<16x128xf32>,
    %c0_81 = arith.constant 0 : index
    %c15 = arith.constant 15 : index
    %c0_82 = arith.constant 0 : index
    %c0_83 = arith.constant 0 : index
    %154 = vector.load %arg1[%c0_81, %c15, %c0_82, %c0_83] : memref<1x16x16x128xbf16, #tpu.memory_space<vmem>>, vector<1x1x16x128xbf16>
    %155 = vector.shape_cast %154 : vector<1x1x16x128xbf16> to vector<16x128xbf16>
    %156 = arith.extf %155 : vector<16x128xbf16> to vector<16x128xf32>
    %157 = vector.broadcast %2 : vector<1x128xf32> to vector<16x128xf32>
    %158 = arith.mulf %156, %157 : vector<16x128xf32>
    %159 = vector.broadcast %3 : vector<1x128xf32> to vector<16x128xf32>
    %160 = arith.addf %158, %159 : vector<16x128xf32>
    %cst_84 = arith.constant 0.000000e+00 : f32
    %161 = vector.broadcast %cst_84 : f32 to vector<16x128xf32>
    %162 = arith.maximumf %160, %161 : vector<16x128xf32>
    %c289 = arith.constant 289 : index
    %c0_85 = arith.constant 0 : index
    %163 = vector.load %arg9[%c289, %c0_85] : memref<328x128xf32, #tpu.memory_space<vmem>>, vector<16x128xf32>
    tpu.vector_store %arg9[%c289, %c0_85], %162 {strides = array<i32>} : memref<328x128xf32, #tpu.memory_space<vmem>>, vector<16x128xf32>,
    %c0_86 = arith.constant 0 : index
    %c0_87 = arith.constant 0 : index
    %164 = vector.load %arg9[%c0_86, %c0_87] : memref<328x128xf32, #tpu.memory_space<vmem>>, vector<288x128xf32>
    %165 = arith.truncf %164 : vector<288x128xf32> to vector<288x128xbf16>
    %c0_88 = arith.constant 0 : index
    %c0_89 = arith.constant 0 : index
    %c0_90 = arith.constant 0 : index
    %166 = vector.load %arg4[%c0_88, %c0_89, %c0_90] : memref<9x128x128xbf16, #tpu.memory_space<vmem>>, vector<1x128x128xbf16>
    %167 = vector.shape_cast %166 : vector<1x128x128xbf16> to vector<128x128xbf16>
    %cst_91 = arith.constant dense<0.000000e+00> : vector<288x128xf32>
    %168 = tpu.matmul %165, %167, %cst_91 {dimension_numbers = #tpu.dot_dimension_numbers<[1], [0], [0], [1], [0, 0, 1, 1], [], []>} : vector<288x128xbf16>, vector<128x128xbf16>, vector<288x128xf32> -> vector<288x128xf32>
    %c1_92 = arith.constant 1 : index
    %c0_93 = arith.constant 0 : index
    %169 = vector.load %arg9[%c1_92, %c0_93] : memref<328x128xf32, #tpu.memory_space<vmem>>, vector<288x128xf32>
    %170 = arith.truncf %169 : vector<288x128xf32> to vector<288x128xbf16>
    %c1_94 = arith.constant 1 : index
    %c0_95 = arith.constant 0 : index
    %c0_96 = arith.constant 0 : index
    %171 = vector.load %arg4[%c1_94, %c0_95, %c0_96] : memref<9x128x128xbf16, #tpu.memory_space<vmem>>, vector<1x128x128xbf16>
    %172 = vector.shape_cast %171 : vector<1x128x128xbf16> to vector<128x128xbf16>
    %cst_97 = arith.constant dense<0.000000e+00> : vector<288x128xf32>
    %173 = tpu.matmul %170, %172, %cst_97 {dimension_numbers = #tpu.dot_dimension_numbers<[1], [0], [0], [1], [0, 0, 1, 1], [], []>} : vector<288x128xbf16>, vector<128x128xbf16>, vector<288x128xf32> -> vector<288x128xf32>
    %174 = arith.addf %168, %173 : vector<288x128xf32>
    %c2_98 = arith.constant 2 : index
    %c0_99 = arith.constant 0 : index
    %175 = vector.load %arg9[%c2_98, %c0_99] : memref<328x128xf32, #tpu.memory_space<vmem>>, vector<288x128xf32>
    %176 = arith.truncf %175 : vector<288x128xf32> to vector<288x128xbf16>
    %c2_100 = arith.constant 2 : index
    %c0_101 = arith.constant 0 : index
    %c0_102 = arith.constant 0 : index
    %177 = vector.load %arg4[%c2_100, %c0_101, %c0_102] : memref<9x128x128xbf16, #tpu.memory_space<vmem>>, vector<1x128x128xbf16>
    %178 = vector.shape_cast %177 : vector<1x128x128xbf16> to vector<128x128xbf16>
    %cst_103 = arith.constant dense<0.000000e+00> : vector<288x128xf32>
    %179 = tpu.matmul %176, %178, %cst_103 {dimension_numbers = #tpu.dot_dimension_numbers<[1], [0], [0], [1], [0, 0, 1, 1], [], []>} : vector<288x128xbf16>, vector<128x128xbf16>, vector<288x128xf32> -> vector<288x128xf32>
    %180 = arith.addf %174, %179 : vector<288x128xf32>
    %c18 = arith.constant 18 : index
    %c0_104 = arith.constant 0 : index
    %181 = vector.load %arg9[%c18, %c0_104] : memref<328x128xf32, #tpu.memory_space<vmem>>, vector<288x128xf32>
    %182 = arith.truncf %181 : vector<288x128xf32> to vector<288x128xbf16>
    %c3_105 = arith.constant 3 : index
    %c0_106 = arith.constant 0 : index
    %c0_107 = arith.constant 0 : index
    %183 = vector.load %arg4[%c3_105, %c0_106, %c0_107] : memref<9x128x128xbf16, #tpu.memory_space<vmem>>, vector<1x128x128xbf16>
    %184 = vector.shape_cast %183 : vector<1x128x128xbf16> to vector<128x128xbf16>
    %cst_108 = arith.constant dense<0.000000e+00> : vector<288x128xf32>
    %185 = tpu.matmul %182, %184, %cst_108 {dimension_numbers = #tpu.dot_dimension_numbers<[1], [0], [0], [1], [0, 0, 1, 1], [], []>} : vector<288x128xbf16>, vector<128x128xbf16>, vector<288x128xf32> -> vector<288x128xf32>
    %186 = arith.addf %180, %185 : vector<288x128xf32>
    %c19_109 = arith.constant 19 : index
    %c0_110 = arith.constant 0 : index
    %187 = vector.load %arg9[%c19_109, %c0_110] : memref<328x128xf32, #tpu.memory_space<vmem>>, vector<288x128xf32>
    %188 = arith.truncf %187 : vector<288x128xf32> to vector<288x128xbf16>
    %c4_111 = arith.constant 4 : index
    %c0_112 = arith.constant 0 : index
    %c0_113 = arith.constant 0 : index
    %189 = vector.load %arg4[%c4_111, %c0_112, %c0_113] : memref<9x128x128xbf16, #tpu.memory_space<vmem>>, vector<1x128x128xbf16>
    %190 = vector.shape_cast %189 : vector<1x128x128xbf16> to vector<128x128xbf16>
    %cst_114 = arith.constant dense<0.000000e+00> : vector<288x128xf32>
    %191 = tpu.matmul %188, %190, %cst_114 {dimension_numbers = #tpu.dot_dimension_numbers<[1], [0], [0], [1], [0, 0, 1, 1], [], []>} : vector<288x128xbf16>, vector<128x128xbf16>, vector<288x128xf32> -> vector<288x128xf32>
    %192 = arith.addf %186, %191 : vector<288x128xf32>
    %c20 = arith.constant 20 : index
    %c0_115 = arith.constant 0 : index
    %193 = vector.load %arg9[%c20, %c0_115] : memref<328x128xf32, #tpu.memory_space<vmem>>, vector<288x128xf32>
    %194 = arith.truncf %193 : vector<288x128xf32> to vector<288x128xbf16>
    %c5_116 = arith.constant 5 : index
    %c0_117 = arith.constant 0 : index
    %c0_118 = arith.constant 0 : index
    %195 = vector.load %arg4[%c5_116, %c0_117, %c0_118] : memref<9x128x128xbf16, #tpu.memory_space<vmem>>, vector<1x128x128xbf16>
    %196 = vector.shape_cast %195 : vector<1x128x128xbf16> to vector<128x128xbf16>
    %cst_119 = arith.constant dense<0.000000e+00> : vector<288x128xf32>
    %197 = tpu.matmul %194, %196, %cst_119 {dimension_numbers = #tpu.dot_dimension_numbers<[1], [0], [0], [1], [0, 0, 1, 1], [], []>} : vector<288x128xbf16>, vector<128x128xbf16>, vector<288x128xf32> -> vector<288x128xf32>
    %198 = arith.addf %192, %197 : vector<288x128xf32>
    %c36 = arith.constant 36 : index
    %c0_120 = arith.constant 0 : index
    %199 = vector.load %arg9[%c36, %c0_120] : memref<328x128xf32, #tpu.memory_space<vmem>>, vector<288x128xf32>
    %200 = arith.truncf %199 : vector<288x128xf32> to vector<288x128xbf16>
    %c6_121 = arith.constant 6 : index
    %c0_122 = arith.constant 0 : index
    %c0_123 = arith.constant 0 : index
    %201 = vector.load %arg4[%c6_121, %c0_122, %c0_123] : memref<9x128x128xbf16, #tpu.memory_space<vmem>>, vector<1x128x128xbf16>
    %202 = vector.shape_cast %201 : vector<1x128x128xbf16> to vector<128x128xbf16>
    %cst_124 = arith.constant dense<0.000000e+00> : vector<288x128xf32>
    %203 = tpu.matmul %200, %202, %cst_124 {dimension_numbers = #tpu.dot_dimension_numbers<[1], [0], [0], [1], [0, 0, 1, 1], [], []>} : vector<288x128xbf16>, vector<128x128xbf16>, vector<288x128xf32> -> vector<288x128xf32>
    %204 = arith.addf %198, %203 : vector<288x128xf32>
    %c37_125 = arith.constant 37 : index
    %c0_126 = arith.constant 0 : index
    %205 = vector.load %arg9[%c37_125, %c0_126] : memref<328x128xf32, #tpu.memory_space<vmem>>, vector<288x128xf32>
    %206 = arith.truncf %205 : vector<288x128xf32> to vector<288x128xbf16>
    %c7_127 = arith.constant 7 : index
    %c0_128 = arith.constant 0 : index
    %c0_129 = arith.constant 0 : index
    %207 = vector.load %arg4[%c7_127, %c0_128, %c0_129] : memref<9x128x128xbf16, #tpu.memory_space<vmem>>, vector<1x128x128xbf16>
    %208 = vector.shape_cast %207 : vector<1x128x128xbf16> to vector<128x128xbf16>
    %cst_130 = arith.constant dense<0.000000e+00> : vector<288x128xf32>
    %209 = tpu.matmul %206, %208, %cst_130 {dimension_numbers = #tpu.dot_dimension_numbers<[1], [0], [0], [1], [0, 0, 1, 1], [], []>} : vector<288x128xbf16>, vector<128x128xbf16>, vector<288x128xf32> -> vector<288x128xf32>
    %210 = arith.addf %204, %209 : vector<288x128xf32>
    %c38 = arith.constant 38 : index
    %c0_131 = arith.constant 0 : index
    %211 = vector.load %arg9[%c38, %c0_131] : memref<328x128xf32, #tpu.memory_space<vmem>>, vector<288x128xf32>
    %212 = arith.truncf %211 : vector<288x128xf32> to vector<288x128xbf16>
    %c8_132 = arith.constant 8 : index
    %c0_133 = arith.constant 0 : index
    %c0_134 = arith.constant 0 : index
    %213 = vector.load %arg4[%c8_132, %c0_133, %c0_134] : memref<9x128x128xbf16, #tpu.memory_space<vmem>>, vector<1x128x128xbf16>
    %214 = vector.shape_cast %213 : vector<1x128x128xbf16> to vector<128x128xbf16>
    %cst_135 = arith.constant dense<0.000000e+00> : vector<288x128xf32>
    %215 = tpu.matmul %212, %214, %cst_135 {dimension_numbers = #tpu.dot_dimension_numbers<[1], [0], [0], [1], [0, 0, 1, 1], [], []>} : vector<288x128xbf16>, vector<128x128xbf16>, vector<288x128xf32> -> vector<288x128xf32>
    %216 = arith.addf %210, %215 : vector<288x128xf32>
    %c0_136 = arith.constant 0 : index
    %c0_137 = arith.constant 0 : index
    %217 = vector.load %arg5[%c0_136, %c0_137] : memref<1x128xf32, #tpu.memory_space<vmem>>, vector<1x128xf32>
    %218 = vector.broadcast %217 : vector<1x128xf32> to vector<288x128xf32>
    %219 = arith.addf %216, %218 : vector<288x128xf32>
    %c0_138 = arith.constant 0 : index
    %c0_139 = arith.constant 0 : index
    %220 = vector.load %arg10[%c0_138, %c0_139] : memref<288x128xf32, #tpu.memory_space<vmem>>, vector<288x128xf32>
    tpu.vector_store %arg10[%c0_138, %c0_139], %219 {strides = array<i32>} : memref<288x128xf32, #tpu.memory_space<vmem>>, vector<288x128xf32>,
    %c0_140 = arith.constant 0 : index
    %c0_141 = arith.constant 0 : index
    %c0_142 = arith.constant 0 : index
    %c0_143 = arith.constant 0 : index
    %221 = vector.load %arg6[%c0_140, %c0_141, %c0_142, %c0_143] : memref<1x16x16x128xf32, #tpu.memory_space<vmem>>, vector<1x1x16x128xf32>
    %222 = vector.shape_cast %221 : vector<1x1x16x128xf32> to vector<16x128xf32>
    %223 = arith.truncf %222 : vector<16x128xf32> to vector<16x128xbf16>
    %c0_144 = arith.constant 0 : index
    %c0_145 = arith.constant 0 : index
    %224 = vector.load %arg10[%c0_144, %c0_145] : memref<288x128xf32, #tpu.memory_space<vmem>>, vector<16x128xf32>
    %c0_146 = arith.constant 0 : index
    %c0_147 = arith.constant 0 : index
    %225 = vector.load %arg7[%c0_146, %c0_147] : memref<128x128xbf16, #tpu.memory_space<vmem>>, vector<128x128xbf16>
    %cst_148 = arith.constant dense<0.000000e+00> : vector<16x128xf32>
    %226 = tpu.matmul %223, %225, %cst_148 {dimension_numbers = #tpu.dot_dimension_numbers<[1], [0], [0], [1], [0, 0, 1, 1], [], []>} : vector<16x128xbf16>, vector<128x128xbf16>, vector<16x128xf32> -> vector<16x128xf32>
    %227 = arith.addf %224, %226 : vector<16x128xf32>
    %c0_149 = arith.constant 0 : index
    %c0_150 = arith.constant 0 : index
    %228 = vector.load %arg10[%c0_149, %c0_150] : memref<288x128xf32, #tpu.memory_space<vmem>>, vector<16x128xf32>
    tpu.vector_store %arg10[%c0_149, %c0_150], %227 {strides = array<i32>} : memref<288x128xf32, #tpu.memory_space<vmem>>, vector<16x128xf32>,
    %c0_151 = arith.constant 0 : index
    %c2_152 = arith.constant 2 : index
    %c0_153 = arith.constant 0 : index
    %c0_154 = arith.constant 0 : index
    %229 = vector.load %arg6[%c0_151, %c2_152, %c0_153, %c0_154] : memref<1x16x16x128xf32, #tpu.memory_space<vmem>>, vector<1x1x16x128xf32>
    %230 = vector.shape_cast %229 : vector<1x1x16x128xf32> to vector<16x128xf32>
    %231 = arith.truncf %230 : vector<16x128xf32> to vector<16x128xbf16>
    %c36_155 = arith.constant 36 : index
    %c0_156 = arith.constant 0 : index
    %232 = vector.load %arg10[%c36_155, %c0_156] : memref<288x128xf32, #tpu.memory_space<vmem>>, vector<16x128xf32>
    %c0_157 = arith.constant 0 : index
    %c0_158 = arith.constant 0 : index
    %233 = vector.load %arg7[%c0_157, %c0_158] : memref<128x128xbf16, #tpu.memory_space<vmem>>, vector<128x128xbf16>
    %cst_159 = arith.constant dense<0.000000e+00> : vector<16x128xf32>
    %234 = tpu.matmul %231, %233, %cst_159 {dimension_numbers = #tpu.dot_dimension_numbers<[1], [0], [0], [1], [0, 0, 1, 1], [], []>} : vector<16x128xbf16>, vector<128x128xbf16>, vector<16x128xf32> -> vector<16x128xf32>
    %235 = arith.addf %232, %234 : vector<16x128xf32>
    %c36_160 = arith.constant 36 : index
    %c0_161 = arith.constant 0 : index
    %236 = vector.load %arg10[%c36_160, %c0_161] : memref<288x128xf32, #tpu.memory_space<vmem>>, vector<16x128xf32>
    tpu.vector_store %arg10[%c36_160, %c0_161], %235 {strides = array<i32>} : memref<288x128xf32, #tpu.memory_space<vmem>>, vector<16x128xf32>,
    %c0_162 = arith.constant 0 : index
    %c4_163 = arith.constant 4 : index
    %c0_164 = arith.constant 0 : index
    %c0_165 = arith.constant 0 : index
    %237 = vector.load %arg6[%c0_162, %c4_163, %c0_164, %c0_165] : memref<1x16x16x128xf32, #tpu.memory_space<vmem>>, vector<1x1x16x128xf32>
    %238 = vector.shape_cast %237 : vector<1x1x16x128xf32> to vector<16x128xf32>
    %239 = arith.truncf %238 : vector<16x128xf32> to vector<16x128xbf16>
    %c72 = arith.constant 72 : index
    %c0_166 = arith.constant 0 : index
    %240 = vector.load %arg10[%c72, %c0_166] : memref<288x128xf32, #tpu.memory_space<vmem>>, vector<16x128xf32>
    %c0_167 = arith.constant 0 : index
    %c0_168 = arith.constant 0 : index
    %241 = vector.load %arg7[%c0_167, %c0_168] : memref<128x128xbf16, #tpu.memory_space<vmem>>, vector<128x128xbf16>
    %cst_169 = arith.constant dense<0.000000e+00> : vector<16x128xf32>
    %242 = tpu.matmul %239, %241, %cst_169 {dimension_numbers = #tpu.dot_dimension_numbers<[1], [0], [0], [1], [0, 0, 1, 1], [], []>} : vector<16x128xbf16>, vector<128x128xbf16>, vector<16x128xf32> -> vector<16x128xf32>
    %243 = arith.addf %240, %242 : vector<16x128xf32>
    %c72_170 = arith.constant 72 : index
    %c0_171 = arith.constant 0 : index
    %244 = vector.load %arg10[%c72_170, %c0_171] : memref<288x128xf32, #tpu.memory_space<vmem>>, vector<16x128xf32>
    tpu.vector_store %arg10[%c72_170, %c0_171], %243 {strides = array<i32>} : memref<288x128xf32, #tpu.memory_space<vmem>>, vector<16x128xf32>,
    %c0_172 = arith.constant 0 : index
    %c6_173 = arith.constant 6 : index
    %c0_174 = arith.constant 0 : index
    %c0_175 = arith.constant 0 : index
    %245 = vector.load %arg6[%c0_172, %c6_173, %c0_174, %c0_175] : memref<1x16x16x128xf32, #tpu.memory_space<vmem>>, vector<1x1x16x128xf32>
    %246 = vector.shape_cast %245 : vector<1x1x16x128xf32> to vector<16x128xf32>
    %247 = arith.truncf %246 : vector<16x128xf32> to vector<16x128xbf16>
    %c108 = arith.constant 108 : index
    %c0_176 = arith.constant 0 : index
    %248 = vector.load %arg10[%c108, %c0_176] : memref<288x128xf32, #tpu.memory_space<vmem>>, vector<16x128xf32>
    %c0_177 = arith.constant 0 : index
    %c0_178 = arith.constant 0 : index
    %249 = vector.load %arg7[%c0_177, %c0_178] : memref<128x128xbf16, #tpu.memory_space<vmem>>, vector<128x128xbf16>
    %cst_179 = arith.constant dense<0.000000e+00> : vector<16x128xf32>
    %250 = tpu.matmul %247, %249, %cst_179 {dimension_numbers = #tpu.dot_dimension_numbers<[1], [0], [0], [1], [0, 0, 1, 1], [], []>} : vector<16x128xbf16>, vector<128x128xbf16>, vector<16x128xf32> -> vector<16x128xf32>
    %251 = arith.addf %248, %250 : vector<16x128xf32>
    %c108_180 = arith.constant 108 : index
    %c0_181 = arith.constant 0 : index
    %252 = vector.load %arg10[%c108_180, %c0_181] : memref<288x128xf32, #tpu.memory_space<vmem>>, vector<16x128xf32>
    tpu.vector_store %arg10[%c108_180, %c0_181], %251 {strides = array<i32>} : memref<288x128xf32, #tpu.memory_space<vmem>>, vector<16x128xf32>,
    %c0_182 = arith.constant 0 : index
    %c8_183 = arith.constant 8 : index
    %c0_184 = arith.constant 0 : index
    %c0_185 = arith.constant 0 : index
    %253 = vector.load %arg6[%c0_182, %c8_183, %c0_184, %c0_185] : memref<1x16x16x128xf32, #tpu.memory_space<vmem>>, vector<1x1x16x128xf32>
    %254 = vector.shape_cast %253 : vector<1x1x16x128xf32> to vector<16x128xf32>
    %255 = arith.truncf %254 : vector<16x128xf32> to vector<16x128xbf16>
    %c144 = arith.constant 144 : index
    %c0_186 = arith.constant 0 : index
    %256 = vector.load %arg10[%c144, %c0_186] : memref<288x128xf32, #tpu.memory_space<vmem>>, vector<16x128xf32>
    %c0_187 = arith.constant 0 : index
    %c0_188 = arith.constant 0 : index
    %257 = vector.load %arg7[%c0_187, %c0_188] : memref<128x128xbf16, #tpu.memory_space<vmem>>, vector<128x128xbf16>
    %cst_189 = arith.constant dense<0.000000e+00> : vector<16x128xf32>
    %258 = tpu.matmul %255, %257, %cst_189 {dimension_numbers = #tpu.dot_dimension_numbers<[1], [0], [0], [1], [0, 0, 1, 1], [], []>} : vector<16x128xbf16>, vector<128x128xbf16>, vector<16x128xf32> -> vector<16x128xf32>
    %259 = arith.addf %256, %258 : vector<16x128xf32>
    %c144_190 = arith.constant 144 : index
    %c0_191 = arith.constant 0 : index
    %260 = vector.load %arg10[%c144_190, %c0_191] : memref<288x128xf32, #tpu.memory_space<vmem>>, vector<16x128xf32>
    tpu.vector_store %arg10[%c144_190, %c0_191], %259 {strides = array<i32>} : memref<288x128xf32, #tpu.memory_space<vmem>>, vector<16x128xf32>,
    %c0_192 = arith.constant 0 : index
    %c10_193 = arith.constant 10 : index
    %c0_194 = arith.constant 0 : index
    %c0_195 = arith.constant 0 : index
    %261 = vector.load %arg6[%c0_192, %c10_193, %c0_194, %c0_195] : memref<1x16x16x128xf32, #tpu.memory_space<vmem>>, vector<1x1x16x128xf32>
    %262 = vector.shape_cast %261 : vector<1x1x16x128xf32> to vector<16x128xf32>
    %263 = arith.truncf %262 : vector<16x128xf32> to vector<16x128xbf16>
    %c180 = arith.constant 180 : index
    %c0_196 = arith.constant 0 : index
    %264 = vector.load %arg10[%c180, %c0_196] : memref<288x128xf32, #tpu.memory_space<vmem>>, vector<16x128xf32>
    %c0_197 = arith.constant 0 : index
    %c0_198 = arith.constant 0 : index
    %265 = vector.load %arg7[%c0_197, %c0_198] : memref<128x128xbf16, #tpu.memory_space<vmem>>, vector<128x128xbf16>
    %cst_199 = arith.constant dense<0.000000e+00> : vector<16x128xf32>
    %266 = tpu.matmul %263, %265, %cst_199 {dimension_numbers = #tpu.dot_dimension_numbers<[1], [0], [0], [1], [0, 0, 1, 1], [], []>} : vector<16x128xbf16>, vector<128x128xbf16>, vector<16x128xf32> -> vector<16x128xf32>
    %267 = arith.addf %264, %266 : vector<16x128xf32>
    %c180_200 = arith.constant 180 : index
    %c0_201 = arith.constant 0 : index
    %268 = vector.load %arg10[%c180_200, %c0_201] : memref<288x128xf32, #tpu.memory_space<vmem>>, vector<16x128xf32>
    tpu.vector_store %arg10[%c180_200, %c0_201], %267 {strides = array<i32>} : memref<288x128xf32, #tpu.memory_space<vmem>>, vector<16x128xf32>,
    %c0_202 = arith.constant 0 : index
    %c12_203 = arith.constant 12 : index
    %c0_204 = arith.constant 0 : index
    %c0_205 = arith.constant 0 : index
    %269 = vector.load %arg6[%c0_202, %c12_203, %c0_204, %c0_205] : memref<1x16x16x128xf32, #tpu.memory_space<vmem>>, vector<1x1x16x128xf32>
    %270 = vector.shape_cast %269 : vector<1x1x16x128xf32> to vector<16x128xf32>
    %271 = arith.truncf %270 : vector<16x128xf32> to vector<16x128xbf16>
    %c216 = arith.constant 216 : index
    %c0_206 = arith.constant 0 : index
    %272 = vector.load %arg10[%c216, %c0_206] : memref<288x128xf32, #tpu.memory_space<vmem>>, vector<16x128xf32>
    %c0_207 = arith.constant 0 : index
    %c0_208 = arith.constant 0 : index
    %273 = vector.load %arg7[%c0_207, %c0_208] : memref<128x128xbf16, #tpu.memory_space<vmem>>, vector<128x128xbf16>
    %cst_209 = arith.constant dense<0.000000e+00> : vector<16x128xf32>
    %274 = tpu.matmul %271, %273, %cst_209 {dimension_numbers = #tpu.dot_dimension_numbers<[1], [0], [0], [1], [0, 0, 1, 1], [], []>} : vector<16x128xbf16>, vector<128x128xbf16>, vector<16x128xf32> -> vector<16x128xf32>
    %275 = arith.addf %272, %274 : vector<16x128xf32>
    %c216_210 = arith.constant 216 : index
    %c0_211 = arith.constant 0 : index
    %276 = vector.load %arg10[%c216_210, %c0_211] : memref<288x128xf32, #tpu.memory_space<vmem>>, vector<16x128xf32>
    tpu.vector_store %arg10[%c216_210, %c0_211], %275 {strides = array<i32>} : memref<288x128xf32, #tpu.memory_space<vmem>>, vector<16x128xf32>,
    %c0_212 = arith.constant 0 : index
    %c14_213 = arith.constant 14 : index
    %c0_214 = arith.constant 0 : index
    %c0_215 = arith.constant 0 : index
    %277 = vector.load %arg6[%c0_212, %c14_213, %c0_214, %c0_215] : memref<1x16x16x128xf32, #tpu.memory_space<vmem>>, vector<1x1x16x128xf32>
    %278 = vector.shape_cast %277 : vector<1x1x16x128xf32> to vector<16x128xf32>
    %279 = arith.truncf %278 : vector<16x128xf32> to vector<16x128xbf16>
    %c252 = arith.constant 252 : index
    %c0_216 = arith.constant 0 : index
    %280 = vector.load %arg10[%c252, %c0_216] : memref<288x128xf32, #tpu.memory_space<vmem>>, vector<16x128xf32>
    %c0_217 = arith.constant 0 : index
    %c0_218 = arith.constant 0 : index
    %281 = vector.load %arg7[%c0_217, %c0_218] : memref<128x128xbf16, #tpu.memory_space<vmem>>, vector<128x128xbf16>
    %cst_219 = arith.constant dense<0.000000e+00> : vector<16x128xf32>
    %282 = tpu.matmul %279, %281, %cst_219 {dimension_numbers = #tpu.dot_dimension_numbers<[1], [0], [0], [1], [0, 0, 1, 1], [], []>} : vector<16x128xbf16>, vector<128x128xbf16>, vector<16x128xf32> -> vector<16x128xf32>
    %283 = arith.addf %280, %282 : vector<16x128xf32>
    %c252_220 = arith.constant 252 : index
    %c0_221 = arith.constant 0 : index
    %284 = vector.load %arg10[%c252_220, %c0_221] : memref<288x128xf32, #tpu.memory_space<vmem>>, vector<16x128xf32>
    tpu.vector_store %arg10[%c252_220, %c0_221], %283 {strides = array<i32>} : memref<288x128xf32, #tpu.memory_space<vmem>>, vector<16x128xf32>,
    %c0_222 = arith.constant 0 : index
    %c0_223 = arith.constant 0 : index
    %285 = tpu.strided_load %arg10[%c0_222, %c0_223] {strides = array<i32: 2, 1>} : memref<288x128xf32, #tpu.memory_space<vmem>>, vector<8x128xf32>
    %c0_224 = arith.constant 0 : index
    %c0_225 = arith.constant 0 : index
    %c0_226 = arith.constant 0 : index
    %c0_227 = arith.constant 0 : index
    %286 = vector.load %arg8[%c0_224, %c0_225, %c0_226, %c0_227] : memref<1x8x8x128xf32, #tpu.memory_space<vmem>>, vector<1x1x8x128xf32>
    %287 = vector.shape_cast %286 : vector<1x1x8x128xf32> to vector<8x128xf32>
    %288 = vector.shape_cast %285 : vector<8x128xf32> to vector<1x1x8x128xf32>
    tpu.vector_store %arg8[%c0_224, %c0_225, %c0_226, %c0_227], %288 {strides = array<i32>} : memref<1x8x8x128xf32, #tpu.memory_space<vmem>>, vector<1x1x8x128xf32>,
    %c36_228 = arith.constant 36 : index
    %c0_229 = arith.constant 0 : index
    %289 = tpu.strided_load %arg10[%c36_228, %c0_229] {strides = array<i32: 2, 1>} : memref<288x128xf32, #tpu.memory_space<vmem>>, vector<8x128xf32>
    %c0_230 = arith.constant 0 : index
    %c1_231 = arith.constant 1 : index
    %c0_232 = arith.constant 0 : index
    %c0_233 = arith.constant 0 : index
    %290 = vector.load %arg8[%c0_230, %c1_231, %c0_232, %c0_233] : memref<1x8x8x128xf32, #tpu.memory_space<vmem>>, vector<1x1x8x128xf32>
    %291 = vector.shape_cast %290 : vector<1x1x8x128xf32> to vector<8x128xf32>
    %292 = vector.shape_cast %289 : vector<8x128xf32> to vector<1x1x8x128xf32>
    tpu.vector_store %arg8[%c0_230, %c1_231, %c0_232, %c0_233], %292 {strides = array<i32>} : memref<1x8x8x128xf32, #tpu.memory_space<vmem>>, vector<1x1x8x128xf32>,
    %c72_234 = arith.constant 72 : index
    %c0_235 = arith.constant 0 : index
    %293 = tpu.strided_load %arg10[%c72_234, %c0_235] {strides = array<i32: 2, 1>} : memref<288x128xf32, #tpu.memory_space<vmem>>, vector<8x128xf32>
    %c0_236 = arith.constant 0 : index
    %c2_237 = arith.constant 2 : index
    %c0_238 = arith.constant 0 : index
    %c0_239 = arith.constant 0 : index
    %294 = vector.load %arg8[%c0_236, %c2_237, %c0_238, %c0_239] : memref<1x8x8x128xf32, #tpu.memory_space<vmem>>, vector<1x1x8x128xf32>
    %295 = vector.shape_cast %294 : vector<1x1x8x128xf32> to vector<8x128xf32>
    %296 = vector.shape_cast %293 : vector<8x128xf32> to vector<1x1x8x128xf32>
    tpu.vector_store %arg8[%c0_236, %c2_237, %c0_238, %c0_239], %296 {strides = array<i32>} : memref<1x8x8x128xf32, #tpu.memory_space<vmem>>, vector<1x1x8x128xf32>,
    %c108_240 = arith.constant 108 : index
    %c0_241 = arith.constant 0 : index
    %297 = tpu.strided_load %arg10[%c108_240, %c0_241] {strides = array<i32: 2, 1>} : memref<288x128xf32, #tpu.memory_space<vmem>>, vector<8x128xf32>
    %c0_242 = arith.constant 0 : index
    %c3_243 = arith.constant 3 : index
    %c0_244 = arith.constant 0 : index
    %c0_245 = arith.constant 0 : index
    %298 = vector.load %arg8[%c0_242, %c3_243, %c0_244, %c0_245] : memref<1x8x8x128xf32, #tpu.memory_space<vmem>>, vector<1x1x8x128xf32>
    %299 = vector.shape_cast %298 : vector<1x1x8x128xf32> to vector<8x128xf32>
    %300 = vector.shape_cast %297 : vector<8x128xf32> to vector<1x1x8x128xf32>
    tpu.vector_store %arg8[%c0_242, %c3_243, %c0_244, %c0_245], %300 {strides = array<i32>} : memref<1x8x8x128xf32, #tpu.memory_space<vmem>>, vector<1x1x8x128xf32>,
    %c144_246 = arith.constant 144 : index
    %c0_247 = arith.constant 0 : index
    %301 = tpu.strided_load %arg10[%c144_246, %c0_247] {strides = array<i32: 2, 1>} : memref<288x128xf32, #tpu.memory_space<vmem>>, vector<8x128xf32>
    %c0_248 = arith.constant 0 : index
    %c4_249 = arith.constant 4 : index
    %c0_250 = arith.constant 0 : index
    %c0_251 = arith.constant 0 : index
    %302 = vector.load %arg8[%c0_248, %c4_249, %c0_250, %c0_251] : memref<1x8x8x128xf32, #tpu.memory_space<vmem>>, vector<1x1x8x128xf32>
    %303 = vector.shape_cast %302 : vector<1x1x8x128xf32> to vector<8x128xf32>
    %304 = vector.shape_cast %301 : vector<8x128xf32> to vector<1x1x8x128xf32>
    tpu.vector_store %arg8[%c0_248, %c4_249, %c0_250, %c0_251], %304 {strides = array<i32>} : memref<1x8x8x128xf32, #tpu.memory_space<vmem>>, vector<1x1x8x128xf32>,
    %c180_252 = arith.constant 180 : index
    %c0_253 = arith.constant 0 : index
    %305 = tpu.strided_load %arg10[%c180_252, %c0_253] {strides = array<i32: 2, 1>} : memref<288x128xf32, #tpu.memory_space<vmem>>, vector<8x128xf32>
    %c0_254 = arith.constant 0 : index
    %c5_255 = arith.constant 5 : index
    %c0_256 = arith.constant 0 : index
    %c0_257 = arith.constant 0 : index
    %306 = vector.load %arg8[%c0_254, %c5_255, %c0_256, %c0_257] : memref<1x8x8x128xf32, #tpu.memory_space<vmem>>, vector<1x1x8x128xf32>
    %307 = vector.shape_cast %306 : vector<1x1x8x128xf32> to vector<8x128xf32>
    %308 = vector.shape_cast %305 : vector<8x128xf32> to vector<1x1x8x128xf32>
    tpu.vector_store %arg8[%c0_254, %c5_255, %c0_256, %c0_257], %308 {strides = array<i32>} : memref<1x8x8x128xf32, #tpu.memory_space<vmem>>, vector<1x1x8x128xf32>,
    %c216_258 = arith.constant 216 : index
    %c0_259 = arith.constant 0 : index
    %309 = tpu.strided_load %arg10[%c216_258, %c0_259] {strides = array<i32: 2, 1>} : memref<288x128xf32, #tpu.memory_space<vmem>>, vector<8x128xf32>
    %c0_260 = arith.constant 0 : index
    %c6_261 = arith.constant 6 : index
    %c0_262 = arith.constant 0 : index
    %c0_263 = arith.constant 0 : index
    %310 = vector.load %arg8[%c0_260, %c6_261, %c0_262, %c0_263] : memref<1x8x8x128xf32, #tpu.memory_space<vmem>>, vector<1x1x8x128xf32>
    %311 = vector.shape_cast %310 : vector<1x1x8x128xf32> to vector<8x128xf32>
    %312 = vector.shape_cast %309 : vector<8x128xf32> to vector<1x1x8x128xf32>
    tpu.vector_store %arg8[%c0_260, %c6_261, %c0_262, %c0_263], %312 {strides = array<i32>} : memref<1x8x8x128xf32, #tpu.memory_space<vmem>>, vector<1x1x8x128xf32>,
    %c252_264 = arith.constant 252 : index
    %c0_265 = arith.constant 0 : index
    %313 = tpu.strided_load %arg10[%c252_264, %c0_265] {strides = array<i32: 2, 1>} : memref<288x128xf32, #tpu.memory_space<vmem>>, vector<8x128xf32>
    %c0_266 = arith.constant 0 : index
    %c7_267 = arith.constant 7 : index
    %c0_268 = arith.constant 0 : index
    %c0_269 = arith.constant 0 : index
    %314 = vector.load %arg8[%c0_266, %c7_267, %c0_268, %c0_269] : memref<1x8x8x128xf32, #tpu.memory_space<vmem>>, vector<1x1x8x128xf32>
    %315 = vector.shape_cast %314 : vector<1x1x8x128xf32> to vector<8x128xf32>
    %316 = vector.shape_cast %313 : vector<8x128xf32> to vector<1x1x8x128xf32>
    tpu.vector_store %arg8[%c0_266, %c7_267, %c0_268, %c0_269], %316 {strides = array<i32>} : memref<1x8x8x128xf32, #tpu.memory_space<vmem>>, vector<1x1x8x128xf32>,
    return
  }
  func.func @transform_0(%arg0: i32) -> (i32, i32, i32, i32) {
    %c0_i32 = arith.constant 0 : i32
    %c0_i32_0 = arith.constant 0 : i32
    %c0_i32_1 = arith.constant 0 : i32
    %c0_i32_2 = arith.constant 0 : i32
    return %arg0, %c0_i32, %c0_i32_0, %c0_i32_1 : i32, i32, i32, i32
  }
  func.func @transform_1(%arg0: i32) -> (i32, i32) {
    %c0_i32 = arith.constant 0 : i32
    %c0_i32_0 = arith.constant 0 : i32
    %c0_i32_1 = arith.constant 0 : i32
    return %c0_i32, %c0_i32_0 : i32, i32
  }
  func.func @transform_2(%arg0: i32) -> (i32, i32) {
    %c0_i32 = arith.constant 0 : i32
    %c0_i32_0 = arith.constant 0 : i32
    %c0_i32_1 = arith.constant 0 : i32
    return %c0_i32, %c0_i32_0 : i32, i32
  }
  func.func @transform_3(%arg0: i32) -> (i32, i32, i32) {
    %c0_i32 = arith.constant 0 : i32
    %c0_i32_0 = arith.constant 0 : i32
    %c0_i32_1 = arith.constant 0 : i32
    %c0_i32_2 = arith.constant 0 : i32
    return %c0_i32, %c0_i32_0, %c0_i32_1 : i32, i32, i32
  }
  func.func @transform_4(%arg0: i32) -> (i32, i32) {
    %c0_i32 = arith.constant 0 : i32
    %c0_i32_0 = arith.constant 0 : i32
    %c0_i32_1 = arith.constant 0 : i32
    return %c0_i32, %c0_i32_0 : i32, i32
  }
  func.func @transform_5(%arg0: i32) -> (i32, i32, i32, i32) {
    %c0_i32 = arith.constant 0 : i32
    %c0_i32_0 = arith.constant 0 : i32
    %c0_i32_1 = arith.constant 0 : i32
    %c0_i32_2 = arith.constant 0 : i32
    return %arg0, %c0_i32, %c0_i32_0, %c0_i32_1 : i32, i32, i32, i32
  }
  func.func @transform_6(%arg0: i32) -> (i32, i32) {
    %c0_i32 = arith.constant 0 : i32
    %c0_i32_0 = arith.constant 0 : i32
    %c0_i32_1 = arith.constant 0 : i32
    return %c0_i32, %c0_i32_0 : i32, i32
  }
  func.func @transform_7(%arg0: i32) -> (i32, i32, i32, i32) {
    %c0_i32 = arith.constant 0 : i32
    %c0_i32_0 = arith.constant 0 : i32
    %c0_i32_1 = arith.constant 0 : i32
    %c0_i32_2 = arith.constant 0 : i32
    return %arg0, %c0_i32, %c0_i32_0, %c0_i32_1 : i32, i32, i32, i32
  }
}

</mosaic_0001>

<bundles_post_ra>
// kernel: wide_basic_forward.4
= control target key start
LH: loop header
LB: loop body
LE: loop exit
PB: predicated region body
PF: predicated region fallthrough
CT: control target
= control target key end

     0   :  { %v297_v0 = vmov 0.0   ;;  %s523_s0 = inlined_call_operand.vmem [shape: f32[512,128], index: 0, kind: input, shape index: {}]   ;;  %s524_s1 = inlined_call_operand.vmem [shape: f32[1,128], index: 1, kind: output, shape index: {0}]   ;;  %s525_s2 = inlined_call_operand.vmem [shape: f32[1,128], index: 2, kind: output, shape index: {1}]  }
   0x1   :  { %14 = vst [vmem:[%s524_s1] sm:$0x1] %v297_v0  ;;  %15 = vst [vmem:[%s525_s2] sm:$0x1] %v297_v0  ;;  %v16_v1 = vld [vmem:[%s523_s0] sm:$0xff]  ;;  %v17_v2 = vld [vmem:[%s523_s0 + $0x8] sm:$0xff] }
   0x2   :  { %v18_v3 = vld [vmem:[%s523_s0 + $0x10] sm:$0xff]  ;;  %v19_v4 = vld [vmem:[%s523_s0 + $0x18] sm:$0xff]  ;;  %v81_v5 = vadd.f32 %v17_v2, %v16_v1  ;;  %v153_v6 = vmul.f32 %v16_v1, %v16_v1  ;;  %v154_v7 = vmul.f32 %v17_v2, %v17_v2  ;;  %v20_v9 = vld [vmem:[%s523_s0 + $0x20] sm:$0xff] }
   0x3   :  { %v155_v8 = vmul.f32 %v18_v3, %v18_v3  ;;  %v156_v11 = vmul.f32 %v19_v4, %v19_v4  ;;  %v21_v13 = vld [vmem:[%s523_s0 + $0x28] sm:$0xff]  ;;  %v157_v15 = vmul.f32 %v20_v9, %v20_v9  ;;  %v22_v17 = vld [vmem:[%s523_s0 + $0x30] sm:$0xff]  ;;  %v23_v21 = vld [vmem:[%s523_s0 + $0x38] sm:$0xff] }
   0x4   :  { %v82_v10 = vadd.f32 %v81_v5, %v18_v3  ;;  %v217_v12 = vadd.f32 %v154_v7, %v153_v6  ;;  %v158_v19 = vmul.f32 %v21_v13, %v21_v13  ;;  %v159_v23 = vmul.f32 %v22_v17, %v22_v17  ;;  %v24_v25 = vld [vmem:[%s523_s0 + $0x40] sm:$0xff]  ;;  %v25_v29 = vld [vmem:[%s523_s0 + $0x48] sm:$0xff]  ;;  %v26_v33 = vld [vmem:[%s523_s0 + $0x50] sm:$0xff] }
   0x5   :  { %v160_v27 = vmul.f32 %v23_v21, %v23_v21  ;;  %v161_v31 = vmul.f32 %v24_v25, %v24_v25  ;;  %v162_v35 = vmul.f32 %v25_v29, %v25_v29  ;;  %v27_v37 = vld [vmem:[%s523_s0 + $0x58] sm:$0xff]  ;;  %v163_v39 = vmul.f32 %v26_v33, %v26_v33  ;;  %v28_v41 = vld [vmem:[%s523_s0 + $0x60] sm:$0xff]  ;;  %v29_v45 = vld [vmem:[%s523_s0 + $0x68] sm:$0xff] }
   0x6   :  { %v83_v14 = vadd.f32 %v82_v10, %v19_v4  ;;  %v218_v16 = vadd.f32 %v217_v12, %v155_v8  ;;  %v164_v43 = vmul.f32 %v27_v37, %v27_v37  ;;  %v165_v47 = vmul.f32 %v28_v41, %v28_v41  ;;  %v30_v49 = vld [vmem:[%s523_s0 + $0x70] sm:$0xff]  ;;  %v31_v53 = vld [vmem:[%s523_s0 + $0x78] sm:$0xff]  ;;  %v32_v57 = vld [vmem:[%s523_s0 + $0x80] sm:$0xff] }
   0x7   :  { %v166_v51 = vmul.f32 %v29_v45, %v29_v45  ;;  %v167_v55 = vmul.f32 %v30_v49, %v30_v49  ;;  %v168_v59 = vmul.f32 %v31_v53, %v31_v53  ;;  %v33_v61 = vld [vmem:[%s523_s0 + $0x88] sm:$0xff]  ;;  %v169_v63 = vmul.f32 %v32_v57, %v32_v57  ;;  %v34_v1 = vld [vmem:[%s523_s0 + $0x90] sm:$0xff]  ;;  %v35_v5 = vld [vmem:[%s523_s0 + $0x98] sm:$0xff] }
   0x8   :  { %v84_v18 = vadd.f32 %v83_v14, %v20_v9  ;;  %v219_v20 = vadd.f32 %v218_v16, %v156_v11  ;;  %v170_v3 = vmul.f32 %v33_v61, %v33_v61  ;;  %v171_v7 = vmul.f32 %v34_v1, %v34_v1  ;;  %v36_v9 = vld [vmem:[%s523_s0 + $0xa0] sm:$0xff] }
   0x9   :  { %v172_v11 = vmul.f32 %v35_v5, %v35_v5 }
   0xa   :  { %v85_v22 = vadd.f32 %v84_v18, %v21_v13  ;;  %v220_v24 = vadd.f32 %v219_v20, %v157_v15  ;;  %v37_v13 = vld [vmem:[%s523_s0 + $0xa8] sm:$0xff]  ;;  %v173_v15 = vmul.f32 %v36_v9, %v36_v9 }
   0xc   :  { %v86_v26 = vadd.f32 %v85_v22, %v22_v17  ;;  %v221_v28 = vadd.f32 %v220_v24, %v158_v19  ;;  %v38_v17 = vld [vmem:[%s523_s0 + $0xb0] sm:$0xff]  ;;  %v174_v19 = vmul.f32 %v37_v13, %v37_v13 }
   0xe   :  { %v87_v30 = vadd.f32 %v86_v26, %v23_v21  ;;  %v222_v32 = vadd.f32 %v221_v28, %v159_v23  ;;  %v39_v21 = vld [vmem:[%s523_s0 + $0xb8] sm:$0xff]  ;;  %v175_v23 = vmul.f32 %v38_v17, %v38_v17 }
  0x10   :  { %v88_v34 = vadd.f32 %v87_v30, %v24_v25  ;;  %v223_v36 = vadd.f32 %v222_v32, %v160_v27  ;;  %v40_v25 = vld [vmem:[%s523_s0 + $0xc0] sm:$0xff]  ;;  %v176_v27 = vmul.f32 %v39_v21, %v39_v21 }
  0x12   :  { %v89_v38 = vadd.f32 %v88_v34, %v25_v29  ;;  %v224_v40 = vadd.f32 %v223_v36, %v161_v31  ;;  %v41_v29 = vld [vmem:[%s523_s0 + $0xc8] sm:$0xff]  ;;  %v177_v31 = vmul.f32 %v40_v25, %v40_v25 }
  0x14   :  { %v90_v42 = vadd.f32 %v89_v38, %v26_v33  ;;  %v225_v44 = vadd.f32 %v224_v40, %v162_v35  ;;  %v42_v33 = vld [vmem:[%s523_s0 + $0xd0] sm:$0xff]  ;;  %v178_v35 = vmul.f32 %v41_v29, %v41_v29 }
  0x16   :  { %v91_v46 = vadd.f32 %v90_v42, %v27_v37  ;;  %v226_v48 = vadd.f32 %v225_v44, %v163_v39  ;;  %v43_v37 = vld [vmem:[%s523_s0 + $0xd8] sm:$0xff]  ;;  %v179_v39 = vmul.f32 %v42_v33, %v42_v33 }
  0x18   :  { %v92_v50 = vadd.f32 %v91_v46, %v28_v41  ;;  %v227_v52 = vadd.f32 %v226_v48, %v164_v43  ;;  %v44_v41 = vld [vmem:[%s523_s0 + $0xe0] sm:$0xff]  ;;  %v180_v43 = vmul.f32 %v43_v37, %v43_v37 }
  0x1a   :  { %v93_v54 = vadd.f32 %v92_v50, %v29_v45  ;;  %v228_v56 = vadd.f32 %v227_v52, %v165_v47  ;;  %v45_v45 = vld [vmem:[%s523_s0 + $0xe8] sm:$0xff]  ;;  %v181_v47 = vmul.f32 %v44_v41, %v44_v41 }
  0x1c   :  { %v94_v58 = vadd.f32 %v93_v54, %v30_v49  ;;  %v229_v60 = vadd.f32 %v228_v56, %v166_v51  ;;  %v46_v49 = vld [vmem:[%s523_s0 + $0xf0] sm:$0xff]  ;;  %v182_v51 = vmul.f32 %v45_v45, %v45_v45 }
  0x1e   :  { %v95_v62 = vadd.f32 %v94_v58, %v31_v53  ;;  %v230_v0 = vadd.f32 %v229_v60, %v167_v55  ;;  %v47_v53 = vld [vmem:[%s523_s0 + $0xf8] sm:$0xff]  ;;  %v183_v55 = vmul.f32 %v46_v49, %v46_v49 }
  0x20   :  { %v96_v2 = vadd.f32 %v95_v62, %v32_v57  ;;  %v231_v4 = vadd.f32 %v230_v0, %v168_v59  ;;  %v48_v57 = vld [vmem:[%s523_s0 + $0x100] sm:$0xff]  ;;  %v184_v59 = vmul.f32 %v47_v53, %v47_v53 }
  0x22   :  { %v97_v6 = vadd.f32 %v96_v2, %v33_v61  ;;  %v232_v8 = vadd.f32 %v231_v4, %v169_v63  ;;  %v49_v61 = vld [vmem:[%s523_s0 + $0x108] sm:$0xff]  ;;  %v185_v63 = vmul.f32 %v48_v57, %v48_v57 }
  0x24   :  { %v98_v10 = vadd.f32 %v97_v6, %v34_v1  ;;  %v233_v12 = vadd.f32 %v232_v8, %v170_v3  ;;  %v50_v1 = vld [vmem:[%s523_s0 + $0x110] sm:$0xff]  ;;  %v186_v3 = vmul.f32 %v49_v61, %v49_v61 }
  0x26   :  { %v99_v14 = vadd.f32 %v98_v10, %v35_v5  ;;  %v234_v16 = vadd.f32 %v233_v12, %v171_v7  ;;  %v51_v5 = vld [vmem:[%s523_s0 + $0x118] sm:$0xff]  ;;  %v187_v7 = vmul.f32 %v50_v1, %v50_v1 }
  0x28   :  { %v100_v18 = vadd.f32 %v99_v14, %v36_v9  ;;  %v235_v20 = vadd.f32 %v234_v16, %v172_v11  ;;  %v52_v9 = vld [vmem:[%s523_s0 + $0x120] sm:$0xff]  ;;  %v188_v11 = vmul.f32 %v51_v5, %v51_v5 }
  0x2a   :  { %v101_v22 = vadd.f32 %v100_v18, %v37_v13  ;;  %v236_v24 = vadd.f32 %v235_v20, %v173_v15  ;;  %v53_v13 = vld [vmem:[%s523_s0 + $0x128] sm:$0xff]  ;;  %v189_v15 = vmul.f32 %v52_v9, %v52_v9 }
  0x2c   :  { %v102_v26 = vadd.f32 %v101_v22, %v38_v17  ;;  %v237_v28 = vadd.f32 %v236_v24, %v174_v19  ;;  %v54_v17 = vld [vmem:[%s523_s0 + $0x130] sm:$0xff]  ;;  %v190_v19 = vmul.f32 %v53_v13, %v53_v13 }
  0x2e   :  { %v103_v30 = vadd.f32 %v102_v26, %v39_v21  ;;  %v238_v32 = vadd.f32 %v237_v28, %v175_v23  ;;  %v55_v21 = vld [vmem:[%s523_s0 + $0x138] sm:$0xff]  ;;  %v191_v23 = vmul.f32 %v54_v17, %v54_v17 }
  0x30   :  { %v104_v34 = vadd.f32 %v103_v30, %v40_v25  ;;  %v239_v36 = vadd.f32 %v238_v32, %v176_v27  ;;  %v56_v25 = vld [vmem:[%s523_s0 + $0x140] sm:$0xff]  ;;  %v192_v27 = vmul.f32 %v55_v21, %v55_v21 }
  0x32   :  { %v105_v38 = vadd.f32 %v104_v34, %v41_v29  ;;  %v240_v40 = vadd.f32 %v239_v36, %v177_v31  ;;  %v57_v29 = vld [vmem:[%s523_s0 + $0x148] sm:$0xff]  ;;  %v193_v31 = vmul.f32 %v56_v25, %v56_v25 }
  0x34   :  { %v106_v42 = vadd.f32 %v105_v38, %v42_v33  ;;  %v241_v44 = vadd.f32 %v240_v40, %v178_v35  ;;  %v58_v33 = vld [vmem:[%s523_s0 + $0x150] sm:$0xff]  ;;  %v194_v35 = vmul.f32 %v57_v29, %v57_v29 }
  0x36   :  { %v107_v46 = vadd.f32 %v106_v42, %v43_v37  ;;  %v242_v48 = vadd.f32 %v241_v44, %v179_v39  ;;  %v59_v37 = vld [vmem:[%s523_s0 + $0x158] sm:$0xff]  ;;  %v195_v39 = vmul.f32 %v58_v33, %v58_v33 }
  0x38   :  { %v108_v50 = vadd.f32 %v107_v46, %v44_v41  ;;  %v243_v52 = vadd.f32 %v242_v48, %v180_v43  ;;  %v60_v41 = vld [vmem:[%s523_s0 + $0x160] sm:$0xff]  ;;  %v196_v43 = vmul.f32 %v59_v37, %v59_v37 }
  0x3a   :  { %v109_v54 = vadd.f32 %v108_v50, %v45_v45  ;;  %v244_v56 = vadd.f32 %v243_v52, %v181_v47  ;;  %v61_v45 = vld [vmem:[%s523_s0 + $0x168] sm:$0xff]  ;;  %v197_v47 = vmul.f32 %v60_v41, %v60_v41 }
  0x3c   :  { %v110_v58 = vadd.f32 %v109_v54, %v46_v49  ;;  %v245_v60 = vadd.f32 %v244_v56, %v182_v51  ;;  %v62_v49 = vld [vmem:[%s523_s0 + $0x170] sm:$0xff]  ;;  %v198_v51 = vmul.f32 %v61_v45, %v61_v45 }
  0x3e   :  { %v111_v62 = vadd.f32 %v110_v58, %v47_v53  ;;  %v246_v0 = vadd.f32 %v245_v60, %v183_v55  ;;  %v63_v53 = vld [vmem:[%s523_s0 + $0x178] sm:$0xff]  ;;  %v199_v55 = vmul.f32 %v62_v49, %v62_v49 }
  0x40   :  { %v112_v2 = vadd.f32 %v111_v62, %v48_v57  ;;  %v247_v4 = vadd.f32 %v246_v0, %v184_v59  ;;  %v64_v57 = vld [vmem:[%s523_s0 + $0x180] sm:$0xff]  ;;  %v200_v59 = vmul.f32 %v63_v53, %v63_v53 }
  0x42   :  { %v113_v6 = vadd.f32 %v112_v2, %v49_v61  ;;  %v248_v8 = vadd.f32 %v247_v4, %v185_v63  ;;  %v65_v61 = vld [vmem:[%s523_s0 + $0x188] sm:$0xff]  ;;  %v201_v63 = vmul.f32 %v64_v57, %v64_v57 }
  0x44   :  { %v114_v10 = vadd.f32 %v113_v6, %v50_v1  ;;  %v249_v12 = vadd.f32 %v248_v8, %v186_v3  ;;  %v66_v1 = vld [vmem:[%s523_s0 + $0x190] sm:$0xff]  ;;  %v202_v3 = vmul.f32 %v65_v61, %v65_v61 }
  0x46   :  { %v115_v14 = vadd.f32 %v114_v10, %v51_v5  ;;  %v250_v16 = vadd.f32 %v249_v12, %v187_v7  ;;  %v67_v5 = vld [vmem:[%s523_s0 + $0x198] sm:$0xff]  ;;  %v203_v7 = vmul.f32 %v66_v1, %v66_v1 }
  0x48   :  { %v116_v18 = vadd.f32 %v115_v14, %v52_v9  ;;  %v251_v20 = vadd.f32 %v250_v16, %v188_v11  ;;  %v68_v9 = vld [vmem:[%s523_s0 + $0x1a0] sm:$0xff]  ;;  %v204_v11 = vmul.f32 %v67_v5, %v67_v5 }
  0x4a   :  { %v117_v22 = vadd.f32 %v116_v18, %v53_v13  ;;  %v252_v24 = vadd.f32 %v251_v20, %v189_v15  ;;  %v69_v13 = vld [vmem:[%s523_s0 + $0x1a8] sm:$0xff]  ;;  %v205_v15 = vmul.f32 %v68_v9, %v68_v9 }
  0x4c   :  { %v118_v26 = vadd.f32 %v117_v22, %v54_v17  ;;  %v253_v28 = vadd.f32 %v252_v24, %v190_v19  ;;  %v70_v17 = vld [vmem:[%s523_s0 + $0x1b0] sm:$0xff]  ;;  %v206_v19 = vmul.f32 %v69_v13, %v69_v13 }
  0x4e   :  { %v119_v30 = vadd.f32 %v118_v26, %v55_v21  ;;  %v254_v32 = vadd.f32 %v253_v28, %v191_v23  ;;  %v71_v21 = vld [vmem:[%s523_s0 + $0x1b8] sm:$0xff]  ;;  %v207_v23 = vmul.f32 %v70_v17, %v70_v17 }
  0x50   :  { %v120_v34 = vadd.f32 %v119_v30, %v56_v25  ;;  %v255_v36 = vadd.f32 %v254_v32, %v192_v27  ;;  %v72_v25 = vld [vmem:[%s523_s0 + $0x1c0] sm:$0xff]  ;;  %v208_v27 = vmul.f32 %v71_v21, %v71_v21 }
  0x52   :  { %v121_v38 = vadd.f32 %v120_v34, %v57_v29  ;;  %v256_v40 = vadd.f32 %v255_v36, %v193_v31  ;;  %v73_v29 = vld [vmem:[%s523_s0 + $0x1c8] sm:$0xff]  ;;  %v209_v31 = vmul.f32 %v72_v25, %v72_v25 }
  0x54   :  { %v122_v42 = vadd.f32 %v121_v38, %v58_v33  ;;  %v257_v44 = vadd.f32 %v256_v40, %v194_v35  ;;  %v74_v33 = vld [vmem:[%s523_s0 + $0x1d0] sm:$0xff]  ;;  %v210_v35 = vmul.f32 %v73_v29, %v73_v29 }
  0x56   :  { %v123_v46 = vadd.f32 %v122_v42, %v59_v37  ;;  %v258_v48 = vadd.f32 %v257_v44, %v195_v39  ;;  %v75_v37 = vld [vmem:[%s523_s0 + $0x1d8] sm:$0xff]  ;;  %v211_v39 = vmul.f32 %v74_v33, %v74_v33 }
  0x58   :  { %v124_v50 = vadd.f32 %v123_v46, %v60_v41  ;;  %v259_v52 = vadd.f32 %v258_v48, %v196_v43  ;;  %v76_v41 = vld [vmem:[%s523_s0 + $0x1e0] sm:$0xff]  ;;  %v212_v43 = vmul.f32 %v75_v37, %v75_v37 }
  0x5a   :  { %v125_v54 = vadd.f32 %v124_v50, %v61_v45  ;;  %v260_v56 = vadd.f32 %v259_v52, %v197_v47  ;;  %v77_v45 = vld [vmem:[%s523_s0 + $0x1e8] sm:$0xff]  ;;  %v213_v47 = vmul.f32 %v76_v41, %v76_v41 }
  0x5c   :  { %v126_v58 = vadd.f32 %v125_v54, %v62_v49  ;;  %v261_v60 = vadd.f32 %v260_v56, %v198_v51  ;;  %v78_v49 = vld [vmem:[%s523_s0 + $0x1f0] sm:$0xff]  ;;  %v214_v51 = vmul.f32 %v77_v45, %v77_v45 }
  0x5e   :  { %v127_v62 = vadd.f32 %v126_v58, %v63_v53  ;;  %v262_v0 = vadd.f32 %v261_v60, %v199_v55  ;;  %v79_v53 = vld [vmem:[%s523_s0 + $0x1f8] sm:$0xff]  ;;  %v215_v55 = vmul.f32 %v78_v49, %v78_v49 }
  0x5f   :  { %v216_v58 = vmul.f32 %v79_v53, %v79_v53 }
  0x60   :  { %v128_v2 = vadd.f32 %v127_v62, %v64_v57  ;;  %v263_v4 = vadd.f32 %v262_v0, %v200_v59 }
  0x62   :  { %v129_v6 = vadd.f32 %v128_v2, %v65_v61  ;;  %v264_v8 = vadd.f32 %v263_v4, %v201_v63 }
  0x64   :  { %v130_v10 = vadd.f32 %v129_v6, %v66_v1  ;;  %v265_v12 = vadd.f32 %v264_v8, %v202_v3 }
  0x66   :  { %v131_v14 = vadd.f32 %v130_v10, %v67_v5  ;;  %v266_v16 = vadd.f32 %v265_v12, %v203_v7  ;;  %v80_v7 = vld [vmem:[%s524_s1] sm:$0x1] }
  0x67   :  { %v152_v12 = vld [vmem:[%s525_s2] sm:$0x1] }
  0x68   :  { %v132_v18 = vadd.f32 %v131_v14, %v68_v9  ;;  %v267_v20 = vadd.f32 %v266_v16, %v204_v11 }
  0x6a   :  { %v133_v22 = vadd.f32 %v132_v18, %v69_v13  ;;  %v268_v24 = vadd.f32 %v267_v20, %v205_v15 }
  0x6c   :  { %v134_v26 = vadd.f32 %v133_v22, %v70_v17  ;;  %v269_v28 = vadd.f32 %v268_v24, %v206_v19 }
  0x6e   :  { %v135_v30 = vadd.f32 %v134_v26, %v71_v21  ;;  %v270_v32 = vadd.f32 %v269_v28, %v207_v23 }
  0x70   :  { %v136_v34 = vadd.f32 %v135_v30, %v72_v25  ;;  %v271_v36 = vadd.f32 %v270_v32, %v208_v27 }
  0x72   :  { %v137_v38 = vadd.f32 %v136_v34, %v73_v29  ;;  %v272_v40 = vadd.f32 %v271_v36, %v209_v31 }
  0x74   :  { %v138_v42 = vadd.f32 %v137_v38, %v74_v33  ;;  %v273_v44 = vadd.f32 %v272_v40, %v210_v35 }
  0x76   :  { %v139_v46 = vadd.f32 %v138_v42, %v75_v37  ;;  %v274_v48 = vadd.f32 %v273_v44, %v211_v39 }
  0x78   :  { %v140_v50 = vadd.f32 %v139_v46, %v76_v41  ;;  %v275_v52 = vadd.f32 %v274_v48, %v212_v43 }
  0x7a   :  { %v141_v54 = vadd.f32 %v140_v50, %v77_v45  ;;  %v276_v56 = vadd.f32 %v275_v52, %v213_v47 }
  0x7c   :  { %v142_v57 = vadd.f32 %v141_v54, %v78_v49  ;;  %v277_v59 = vadd.f32 %v276_v56, %v214_v51 }
  0x7e   :  { %v143_v60 = vadd.f32 %v142_v57, %v79_v53  ;;  %v278_v61 = vadd.f32 %v277_v59, %v215_v55 }
  0x80   :  { %v144_v62 = vrot.slane %v143_v60, 4  ;;  %v279_v63 = vadd.f32 %v278_v61, %v216_v58 }
  0x82   :  { %v145_v0 = vadd.f32 %v144_v62, %v143_v60  ;;  %v280_v1 = vrot.slane %v279_v63, 4 }
  0x84   :  { %v146_v2 = vrot.slane %v145_v0, 2  ;;  %v281_v3 = vadd.f32 %v280_v1, %v279_v63 }
  0x86   :  { %v147_v4 = vadd.f32 %v146_v2, %v145_v0  ;;  %v282_v5 = vrot.slane %v281_v3, 2 }
  0x88   :  { %v148_v6 = vrot.slane %v147_v4, 1  ;;  %v283_v8 = vadd.f32 %v282_v5, %v281_v3 }
  0x8a   :  { %v149_v9 = vadd.f32 %v148_v6, %v147_v4  ;;  %v284_v10 = vrot.slane %v283_v8, 1 }
  0x8c   :  { %v150_v11 = vadd.f32 %v149_v9, %v80_v7  ;;  %v285_v13 = vadd.f32 %v284_v10, %v283_v8 }
  0x8e   :  { %151 = vst [vmem:[%s524_s1] sm:$0x1] %v150_v11  ;;  %v286_v14 = vadd.f32 %v285_v13, %v152_v12 }
  0x90   :  { %287 = vst [vmem:[%s525_s2] sm:$0x1] %v286_v14 }

// kernel: wide_basic_forward.6
= control target key start
LH: loop header
LB: loop body
LE: loop exit
PB: predicated region body
PF: predicated region fallthrough
CT: control target
= control target key end

     0   :  { %v520_v0 = vmov 0.0   ;;  %s650_s1 = inlined_call_operand.vmem [shape: f32[1,128], index: 1, kind: output, shape index: {0}]   ;;  %s651_s2 = inlined_call_operand.vmem [shape: f32[1,128], index: 2, kind: output, shape index: {1}]   ;;  %s652_s0 = inlined_call_operand.vmem [shape: bf16[512,128], index: 0, kind: input, shape index: {}]  }
   0x1   :  { %14 = vst [vmem:[%s650_s1] sm:$0x1] %v520_v0  ;;  %15 = vst [vmem:[%s651_s2] sm:$0x1] %v520_v0  ;;  %v361_v1 = vld [vmem:[%s652_s0] sm:$0xff]   ;;  %v488_v2 = vld [vmem:[%s652_s0 + $0x8] sm:$0xff]  }
   0x2   :  { %v362_v3 = vunpack.c.l.bf16 %v361_v1  ;;  %v363_v4 = vunpack.c.h.bf16 %v361_v1  ;;  %v366_v5 = vunpack.c.l.bf16 %v488_v2  ;;  %v489_v7 = vld [vmem:[%s652_s0 + $0x10] sm:$0xff]   ;;  %v367_v8 = vunpack.c.h.bf16 %v488_v2  ;;  %v490_v12 = vld [vmem:[%s652_s0 + $0x18] sm:$0xff]   ;;  %v491_v17 = vld [vmem:[%s652_s0 + $0x20] sm:$0xff]  }
   0x3   :  { %v370_v10 = vunpack.c.l.bf16 %v489_v7  ;;  %v371_v13 = vunpack.c.h.bf16 %v489_v7  ;;  %v374_v15 = vunpack.c.l.bf16 %v490_v12  ;;  %v375_v18 = vunpack.c.h.bf16 %v490_v12  ;;  %v492_v22 = vld [vmem:[%s652_s0 + $0x28] sm:$0xff]   ;;  %v493_v30 = vld [vmem:[%s652_s0 + $0x30] sm:$0xff]   ;;  %v494_v39 = vld [vmem:[%s652_s0 + $0x38] sm:$0xff]  }
   0x4   :  { %v145_v6 = vadd.f32 %v363_v4, %v362_v3  ;;  %v378_v20 = vunpack.c.l.bf16 %v491_v17  ;;  %v379_v23 = vunpack.c.h.bf16 %v491_v17  ;;  %v217_v25 = vmul.f32 %v362_v3, %v362_v3  ;;  %v495_v48 = vld [vmem:[%s652_s0 + $0x40] sm:$0xff]   ;;  %v496_v57 = vld [vmem:[%s652_s0 + $0x48] sm:$0xff]   ;;  %v497_v2 = vld [vmem:[%s652_s0 + $0x50] sm:$0xff]  }
   0x5   :  { %v218_v26 = vmul.f32 %v363_v4, %v363_v4  ;;  %v382_v27 = vunpack.c.l.bf16 %v492_v22  ;;  %v219_v29 = vmul.f32 %v366_v5, %v366_v5  ;;  %v383_v31 = vunpack.c.h.bf16 %v492_v22 }
   0x6   :  { %v146_v9 = vadd.f32 %v366_v5, %v145_v6  ;;  %v220_v33 = vmul.f32 %v367_v8, %v367_v8  ;;  %v386_v35 = vunpack.c.l.bf16 %v493_v30  ;;  %v221_v37 = vmul.f32 %v370_v10, %v370_v10 }
   0x7   :  { %v281_v34 = vadd.f32 %v218_v26, %v217_v25  ;;  %v387_v40 = vunpack.c.h.bf16 %v493_v30  ;;  %v222_v42 = vmul.f32 %v371_v13, %v371_v13  ;;  %v390_v44 = vunpack.c.l.bf16 %v494_v39 }
   0x8   :  { %v147_v11 = vadd.f32 %v367_v8, %v146_v9  ;;  %v223_v46 = vmul.f32 %v374_v15, %v374_v15  ;;  %v391_v49 = vunpack.c.h.bf16 %v494_v39  ;;  %v224_v51 = vmul.f32 %v375_v18, %v375_v18 }
   0x9   :  { %v282_v38 = vadd.f32 %v281_v34, %v219_v29  ;;  %v394_v53 = vunpack.c.l.bf16 %v495_v48  ;;  %v225_v55 = vmul.f32 %v378_v20, %v378_v20  ;;  %v395_v58 = vunpack.c.h.bf16 %v495_v48  ;;  %v500_v29 = vld [vmem:[%s652_s0 + $0x68] sm:$0xff]  }
   0xa   :  { %v148_v14 = vadd.f32 %v370_v10, %v147_v11  ;;  %v226_v60 = vmul.f32 %v379_v23, %v379_v23  ;;  %v398_v62 = vunpack.c.l.bf16 %v496_v57  ;;  %v227_v0 = vmul.f32 %v382_v27, %v382_v27  ;;  %v498_v11 = vld [vmem:[%s652_s0 + $0x58] sm:$0xff]  }
   0xb   :  { %v283_v43 = vadd.f32 %v282_v38, %v220_v33  ;;  %v399_v3 = vunpack.c.h.bf16 %v496_v57  ;;  %v228_v5 = vmul.f32 %v383_v31, %v383_v31  ;;  %v402_v7 = vunpack.c.l.bf16 %v497_v2  ;;  %v501_v38 = vld [vmem:[%s652_s0 + $0x70] sm:$0xff]  }
   0xc   :  { %v149_v16 = vadd.f32 %v371_v13, %v148_v14  ;;  %v229_v9 = vmul.f32 %v386_v35, %v386_v35  ;;  %v403_v12 = vunpack.c.h.bf16 %v497_v2  ;;  %v230_v14 = vmul.f32 %v387_v40, %v387_v40 }
   0xd   :  { %v284_v47 = vadd.f32 %v283_v43, %v221_v37  ;;  %v414_v34 = vunpack.c.l.bf16 %v500_v29  ;;  %v415_v39 = vunpack.c.h.bf16 %v500_v29  ;;  %v418_v43 = vunpack.c.l.bf16 %v501_v38 }
   0xe   :  { %v150_v19 = vadd.f32 %v374_v15, %v149_v16  ;;  %v406_v16 = vunpack.c.l.bf16 %v498_v11  ;;  %v419_v48 = vunpack.c.h.bf16 %v501_v38 }
   0xf   :  { %v285_v52 = vadd.f32 %v284_v47, %v222_v42  ;;  %v502_v47 = vld [vmem:[%s652_s0 + $0x78] sm:$0xff]  }
  0x10   :  { %v151_v21 = vadd.f32 %v375_v18, %v150_v19  ;;  %v231_v18 = vmul.f32 %v390_v44, %v390_v44  ;;  %v423_v57 = vunpack.c.h.bf16 %v502_v47 }
  0x11   :  { %v286_v56 = vadd.f32 %v285_v52, %v223_v46  ;;  %v422_v52 = vunpack.c.l.bf16 %v502_v47 }
  0x12   :  { %v152_v24 = vadd.f32 %v378_v20, %v151_v21  ;;  %v499_v20 = vld [vmem:[%s652_s0 + $0x60] sm:$0xff]   ;;  %v407_v21 = vunpack.c.h.bf16 %v498_v11 }
  0x13   :  { %v287_v61 = vadd.f32 %v286_v56, %v224_v51  ;;  %v410_v25 = vunpack.c.l.bf16 %v499_v20  ;;  %v411_v30 = vunpack.c.h.bf16 %v499_v20  ;;  %v503_v56 = vld [vmem:[%s652_s0 + $0x80] sm:$0xff]  }
  0x14   :  { %v153_v28 = vadd.f32 %v379_v23, %v152_v24  ;;  %v232_v23 = vmul.f32 %v391_v49, %v391_v49  ;;  %v427_v2 = vunpack.c.h.bf16 %v503_v56 }
  0x15   :  { %v288_v1 = vadd.f32 %v287_v61, %v225_v55  ;;  %v426_v61 = vunpack.c.l.bf16 %v503_v56 }
  0x16   :  { %v154_v32 = vadd.f32 %v382_v27, %v153_v28  ;;  %v233_v27 = vmul.f32 %v394_v53, %v394_v53 }
  0x17   :  { %v289_v6 = vadd.f32 %v288_v1, %v226_v60  ;;  %v504_v1 = vld [vmem:[%s652_s0 + $0x88] sm:$0xff]  }
  0x18   :  { %v155_v36 = vadd.f32 %v383_v31, %v154_v32  ;;  %v234_v32 = vmul.f32 %v395_v58, %v395_v58  ;;  %v431_v11 = vunpack.c.h.bf16 %v504_v1 }
  0x19   :  { %v290_v10 = vadd.f32 %v289_v6, %v227_v0  ;;  %v430_v6 = vunpack.c.l.bf16 %v504_v1 }
  0x1a   :  { %v156_v41 = vadd.f32 %v386_v35, %v155_v36  ;;  %v235_v36 = vmul.f32 %v398_v62, %v398_v62 }
  0x1b   :  { %v291_v15 = vadd.f32 %v290_v10, %v228_v5  ;;  %v505_v10 = vld [vmem:[%s652_s0 + $0x90] sm:$0xff]  }
  0x1c   :  { %v157_v45 = vadd.f32 %v387_v40, %v156_v41  ;;  %v236_v41 = vmul.f32 %v399_v3, %v399_v3  ;;  %v435_v20 = vunpack.c.h.bf16 %v505_v10 }
  0x1d   :  { %v292_v19 = vadd.f32 %v291_v15, %v229_v9  ;;  %v434_v15 = vunpack.c.l.bf16 %v505_v10 }
  0x1e   :  { %v158_v50 = vadd.f32 %v390_v44, %v157_v45  ;;  %v237_v45 = vmul.f32 %v402_v7, %v402_v7 }
  0x1f   :  { %v293_v24 = vadd.f32 %v292_v19, %v230_v14  ;;  %v506_v19 = vld [vmem:[%s652_s0 + $0x98] sm:$0xff]  }
  0x20   :  { %v159_v54 = vadd.f32 %v391_v49, %v158_v50  ;;  %v238_v50 = vmul.f32 %v403_v12, %v403_v12  ;;  %v439_v29 = vunpack.c.h.bf16 %v506_v19 }
  0x21   :  { %v294_v28 = vadd.f32 %v293_v24, %v231_v18  ;;  %v438_v24 = vunpack.c.l.bf16 %v506_v19 }
  0x22   :  { %v160_v59 = vadd.f32 %v394_v53, %v159_v54  ;;  %v239_v54 = vmul.f32 %v406_v16, %v406_v16 }
  0x23   :  { %v295_v33 = vadd.f32 %v294_v28, %v232_v23  ;;  %v507_v28 = vld [vmem:[%s652_s0 + $0xa0] sm:$0xff]  }
  0x24   :  { %v161_v63 = vadd.f32 %v395_v58, %v160_v59  ;;  %v240_v59 = vmul.f32 %v407_v21, %v407_v21  ;;  %v443_v38 = vunpack.c.h.bf16 %v507_v28 }
  0x25   :  { %v296_v37 = vadd.f32 %v295_v33, %v233_v27  ;;  %v442_v33 = vunpack.c.l.bf16 %v507_v28 }
  0x26   :  { %v162_v4 = vadd.f32 %v398_v62, %v161_v63  ;;  %v241_v63 = vmul.f32 %v410_v25, %v410_v25 }
  0x27   :  { %v297_v42 = vadd.f32 %v296_v37, %v234_v32  ;;  %v508_v37 = vld [vmem:[%s652_s0 + $0xa8] sm:$0xff]  }
  0x28   :  { %v163_v8 = vadd.f32 %v399_v3, %v162_v4  ;;  %v242_v4 = vmul.f32 %v411_v30, %v411_v30  ;;  %v447_v47 = vunpack.c.h.bf16 %v508_v37 }
  0x29   :  { %v298_v46 = vadd.f32 %v297_v42, %v235_v36  ;;  %v446_v42 = vunpack.c.l.bf16 %v508_v37 }
  0x2a   :  { %v164_v13 = vadd.f32 %v402_v7, %v163_v8  ;;  %v243_v8 = vmul.f32 %v414_v34, %v414_v34 }
  0x2b   :  { %v299_v51 = vadd.f32 %v298_v46, %v236_v41  ;;  %v509_v46 = vld [vmem:[%s652_s0 + $0xb0] sm:$0xff]  }
  0x2c   :  { %v165_v17 = vadd.f32 %v403_v12, %v164_v13  ;;  %v244_v13 = vmul.f32 %v415_v39, %v415_v39  ;;  %v451_v56 = vunpack.c.h.bf16 %v509_v46 }
  0x2d   :  { %v300_v55 = vadd.f32 %v299_v51, %v237_v45  ;;  %v450_v51 = vunpack.c.l.bf16 %v509_v46 }
  0x2e   :  { %v166_v22 = vadd.f32 %v406_v16, %v165_v17  ;;  %v245_v17 = vmul.f32 %v418_v43, %v418_v43 }
  0x2f   :  { %v301_v60 = vadd.f32 %v300_v55, %v238_v50  ;;  %v510_v55 = vld [vmem:[%s652_s0 + $0xb8] sm:$0xff]  }
  0x30   :  { %v167_v26 = vadd.f32 %v407_v21, %v166_v22  ;;  %v246_v22 = vmul.f32 %v419_v48, %v419_v48  ;;  %v455_v1 = vunpack.c.h.bf16 %v510_v55 }
  0x31   :  { %v302_v0 = vadd.f32 %v301_v60, %v239_v54  ;;  %v454_v60 = vunpack.c.l.bf16 %v510_v55 }
  0x32   :  { %v168_v31 = vadd.f32 %v410_v25, %v167_v26  ;;  %v247_v26 = vmul.f32 %v422_v52, %v422_v52 }
  0x33   :  { %v303_v5 = vadd.f32 %v302_v0, %v240_v59  ;;  %v511_v0 = vld [vmem:[%s652_s0 + $0xc0] sm:$0xff]  }
  0x34   :  { %v169_v35 = vadd.f32 %v411_v30, %v168_v31  ;;  %v248_v31 = vmul.f32 %v423_v57, %v423_v57  ;;  %v459_v10 = vunpack.c.h.bf16 %v511_v0 }
  0x35   :  { %v304_v9 = vadd.f32 %v303_v5, %v241_v63  ;;  %v458_v5 = vunpack.c.l.bf16 %v511_v0 }
  0x36   :  { %v170_v40 = vadd.f32 %v414_v34, %v169_v35  ;;  %v249_v35 = vmul.f32 %v426_v61, %v426_v61 }
  0x37   :  { %v305_v14 = vadd.f32 %v304_v9, %v242_v4  ;;  %v512_v9 = vld [vmem:[%s652_s0 + $0xc8] sm:$0xff]  }
  0x38   :  { %v171_v44 = vadd.f32 %v415_v39, %v170_v40  ;;  %v250_v40 = vmul.f32 %v427_v2, %v427_v2  ;;  %v463_v19 = vunpack.c.h.bf16 %v512_v9 }
  0x39   :  { %v306_v18 = vadd.f32 %v305_v14, %v243_v8  ;;  %v462_v14 = vunpack.c.l.bf16 %v512_v9 }
  0x3a   :  { %v172_v49 = vadd.f32 %v418_v43, %v171_v44  ;;  %v251_v44 = vmul.f32 %v430_v6, %v430_v6 }
  0x3b   :  { %v307_v23 = vadd.f32 %v306_v18, %v244_v13  ;;  %v513_v18 = vld [vmem:[%s652_s0 + $0xd0] sm:$0xff]  }
  0x3c   :  { %v173_v53 = vadd.f32 %v419_v48, %v172_v49  ;;  %v252_v49 = vmul.f32 %v431_v11, %v431_v11  ;;  %v467_v28 = vunpack.c.h.bf16 %v513_v18 }
  0x3d   :  { %v308_v27 = vadd.f32 %v307_v23, %v245_v17  ;;  %v466_v23 = vunpack.c.l.bf16 %v513_v18 }
  0x3e   :  { %v174_v58 = vadd.f32 %v422_v52, %v173_v53  ;;  %v253_v53 = vmul.f32 %v434_v15, %v434_v15 }
  0x3f   :  { %v309_v32 = vadd.f32 %v308_v27, %v246_v22  ;;  %v514_v27 = vld [vmem:[%s652_s0 + $0xd8] sm:$0xff]  }
  0x40   :  { %v175_v62 = vadd.f32 %v423_v57, %v174_v58  ;;  %v254_v58 = vmul.f32 %v435_v20, %v435_v20  ;;  %v471_v37 = vunpack.c.h.bf16 %v514_v27 }
  0x41   :  { %v310_v36 = vadd.f32 %v309_v32, %v247_v26  ;;  %v470_v32 = vunpack.c.l.bf16 %v514_v27 }
  0x42   :  { %v176_v3 = vadd.f32 %v426_v61, %v175_v62  ;;  %v255_v62 = vmul.f32 %v438_v24, %v438_v24 }
  0x43   :  { %v311_v41 = vadd.f32 %v310_v36, %v248_v31  ;;  %v515_v36 = vld [vmem:[%s652_s0 + $0xe0] sm:$0xff]  }
  0x44   :  { %v177_v7 = vadd.f32 %v427_v2, %v176_v3  ;;  %v256_v3 = vmul.f32 %v439_v29, %v439_v29  ;;  %v475_v46 = vunpack.c.h.bf16 %v515_v36 }
  0x45   :  { %v312_v45 = vadd.f32 %v311_v41, %v249_v35  ;;  %v474_v41 = vunpack.c.l.bf16 %v515_v36 }
  0x46   :  { %v178_v12 = vadd.f32 %v430_v6, %v177_v7  ;;  %v257_v7 = vmul.f32 %v442_v33, %v442_v33 }
  0x47   :  { %v313_v50 = vadd.f32 %v312_v45, %v250_v40  ;;  %v516_v45 = vld [vmem:[%s652_s0 + $0xe8] sm:$0xff]  }
  0x48   :  { %v179_v16 = vadd.f32 %v431_v11, %v178_v12  ;;  %v258_v12 = vmul.f32 %v443_v38, %v443_v38  ;;  %v479_v55 = vunpack.c.h.bf16 %v516_v45 }
  0x49   :  { %v314_v54 = vadd.f32 %v313_v50, %v251_v44  ;;  %v478_v50 = vunpack.c.l.bf16 %v516_v45 }
  0x4a   :  { %v180_v21 = vadd.f32 %v434_v15, %v179_v16  ;;  %v259_v16 = vmul.f32 %v446_v42, %v446_v42 }
  0x4b   :  { %v315_v59 = vadd.f32 %v314_v54, %v252_v49  ;;  %v517_v54 = vld [vmem:[%s652_s0 + $0xf0] sm:$0xff]  }
  0x4c   :  { %v181_v25 = vadd.f32 %v435_v20, %v180_v21  ;;  %v260_v21 = vmul.f32 %v447_v47, %v447_v47  ;;  %v483_v0 = vunpack.c.h.bf16 %v517_v54 }
  0x4d   :  { %v316_v63 = vadd.f32 %v315_v59, %v253_v53  ;;  %v482_v59 = vunpack.c.l.bf16 %v517_v54 }
  0x4e   :  { %v182_v30 = vadd.f32 %v438_v24, %v181_v25  ;;  %v261_v25 = vmul.f32 %v450_v51, %v450_v51 }
  0x4f   :  { %v317_v4 = vadd.f32 %v316_v63, %v254_v58  ;;  %v518_v63 = vld [vmem:[%s652_s0 + $0xf8] sm:$0xff]  }
  0x50   :  { %v183_v34 = vadd.f32 %v439_v29, %v182_v30  ;;  %v262_v30 = vmul.f32 %v451_v56, %v451_v56 }
  0x51   :  { %v318_v8 = vadd.f32 %v317_v4, %v255_v62  ;;  %v486_v4 = vunpack.c.l.bf16 %v518_v63 }
  0x52   :  { %v184_v39 = vadd.f32 %v442_v33, %v183_v34  ;;  %v263_v34 = vmul.f32 %v454_v60, %v454_v60 }
  0x53   :  { %v319_v13 = vadd.f32 %v318_v8, %v256_v3  ;;  %v487_v8 = vunpack.c.h.bf16 %v518_v63 }
  0x54   :  { %v185_v43 = vadd.f32 %v443_v38, %v184_v39  ;;  %v264_v39 = vmul.f32 %v455_v1, %v455_v1 }
  0x55   :  { %v320_v17 = vadd.f32 %v319_v13, %v257_v7  ;;  %v273_v13 = vmul.f32 %v474_v41, %v474_v41 }
  0x56   :  { %v186_v48 = vadd.f32 %v446_v42, %v185_v43  ;;  %v265_v43 = vmul.f32 %v458_v5, %v458_v5 }
  0x57   :  { %v321_v22 = vadd.f32 %v320_v17, %v258_v12 }
  0x58   :  { %v187_v52 = vadd.f32 %v447_v47, %v186_v48  ;;  %v266_v48 = vmul.f32 %v459_v10, %v459_v10 }
  0x59   :  { %v322_v26 = vadd.f32 %v321_v22, %v259_v16  ;;  %v274_v16 = vmul.f32 %v475_v46, %v475_v46  ;;  %v276_v22 = vmul.f32 %v479_v55, %v479_v55 }
  0x5a   :  { %v188_v57 = vadd.f32 %v450_v51, %v187_v52  ;;  %v267_v52 = vmul.f32 %v462_v14, %v462_v14 }
  0x5b   :  { %v323_v31 = vadd.f32 %v322_v26, %v260_v21 }
  0x5c   :  { %v189_v61 = vadd.f32 %v451_v56, %v188_v57  ;;  %v268_v57 = vmul.f32 %v463_v19, %v463_v19 }
  0x5d   :  { %v324_v35 = vadd.f32 %v323_v31, %v261_v25  ;;  %v277_v25 = vmul.f32 %v482_v59, %v482_v59 }
  0x5e   :  { %v190_v2 = vadd.f32 %v454_v60, %v189_v61  ;;  %v269_v61 = vmul.f32 %v466_v23, %v466_v23 }
  0x5f   :  { %v325_v40 = vadd.f32 %v324_v35, %v262_v30  ;;  %v144_v30 = vld [vmem:[%s650_s1] sm:$0x1]  ;;  %v280_v35 = vmul.f32 %v487_v8, %v487_v8 }
  0x60   :  { %v191_v6 = vadd.f32 %v455_v1, %v190_v2  ;;  %v270_v2 = vmul.f32 %v467_v28, %v467_v28 }
  0x61   :  { %v326_v44 = vadd.f32 %v325_v40, %v263_v34 }
  0x62   :  { %v192_v11 = vadd.f32 %v458_v5, %v191_v6  ;;  %v271_v6 = vmul.f32 %v470_v32, %v470_v32 }
  0x63   :  { %v327_v49 = vadd.f32 %v326_v44, %v264_v39  ;;  %v216_v44 = vld [vmem:[%s651_s2] sm:$0x1] }
  0x64   :  { %v193_v15 = vadd.f32 %v459_v10, %v192_v11  ;;  %v272_v10 = vmul.f32 %v471_v37, %v471_v37 }
  0x65   :  { %v328_v53 = vadd.f32 %v327_v49, %v265_v43 }
  0x66   :  { %v194_v20 = vadd.f32 %v462_v14, %v193_v15 }
  0x67   :  { %v329_v58 = vadd.f32 %v328_v53, %v266_v48 }
  0x68   :  { %v195_v24 = vadd.f32 %v463_v19, %v194_v20  ;;  %v275_v19 = vmul.f32 %v478_v50, %v478_v50 }
  0x69   :  { %v330_v62 = vadd.f32 %v329_v58, %v267_v52 }
  0x6a   :  { %v196_v29 = vadd.f32 %v466_v23, %v195_v24 }
  0x6b   :  { %v331_v3 = vadd.f32 %v330_v62, %v268_v57 }
  0x6c   :  { %v197_v33 = vadd.f32 %v467_v28, %v196_v29  ;;  %v278_v28 = vmul.f32 %v483_v0, %v483_v0 }
  0x6d   :  { %v332_v7 = vadd.f32 %v331_v3, %v269_v61 }
  0x6e   :  { %v198_v38 = vadd.f32 %v470_v32, %v197_v33  ;;  %v279_v32 = vmul.f32 %v486_v4, %v486_v4 }
  0x6f   :  { %v333_v11 = vadd.f32 %v332_v7, %v270_v2 }
  0x70   :  { %v199_v42 = vadd.f32 %v471_v37, %v198_v38 }
  0x71   :  { %v334_v14 = vadd.f32 %v333_v11, %v271_v6 }
  0x72   :  { %v200_v47 = vadd.f32 %v474_v41, %v199_v42 }
  0x73   :  { %v335_v17 = vadd.f32 %v334_v14, %v272_v10 }
  0x74   :  { %v201_v51 = vadd.f32 %v475_v46, %v200_v47 }
  0x75   :  { %v336_v20 = vadd.f32 %v335_v17, %v273_v13 }
  0x76   :  { %v202_v56 = vadd.f32 %v478_v50, %v201_v51 }
  0x77   :  { %v337_v23 = vadd.f32 %v336_v20, %v274_v16 }
  0x78   :  { %v203_v60 = vadd.f32 %v479_v55, %v202_v56 }
  0x79   :  { %v338_v26 = vadd.f32 %v337_v23, %v275_v19 }
  0x7a   :  { %v204_v1 = vadd.f32 %v482_v59, %v203_v60 }
  0x7b   :  { %v339_v29 = vadd.f32 %v338_v26, %v276_v22 }
  0x7c   :  { %v205_v5 = vadd.f32 %v483_v0, %v204_v1 }
  0x7d   :  { %v340_v33 = vadd.f32 %v339_v29, %v277_v25 }
  0x7e   :  { %v206_v9 = vadd.f32 %v486_v4, %v205_v5 }
  0x7f   :  { %v341_v36 = vadd.f32 %v340_v33, %v278_v28 }
  0x80   :  { %v207_v12 = vadd.f32 %v487_v8, %v206_v9 }
  0x81   :  { %v342_v37 = vadd.f32 %v341_v36, %v279_v32 }
  0x82   :  { %v208_v15 = vrot.slane %v207_v12, 4 }
  0x83   :  { %v343_v38 = vadd.f32 %v342_v37, %v280_v35 }
  0x84   :  { %v209_v18 = vadd.f32 %v208_v15, %v207_v12 }
  0x85   :  { %v344_v39 = vrot.slane %v343_v38, 4 }
  0x86   :  { %v210_v21 = vrot.slane %v209_v18, 2 }
  0x87   :  { %v345_v40 = vadd.f32 %v344_v39, %v343_v38 }
  0x88   :  { %v211_v24 = vadd.f32 %v210_v21, %v209_v18 }
  0x89   :  { %v346_v41 = vrot.slane %v345_v40, 2 }
  0x8a   :  { %v212_v27 = vrot.slane %v211_v24, 1 }
  0x8b   :  { %v347_v42 = vadd.f32 %v346_v41, %v345_v40 }
  0x8c   :  { %v213_v31 = vadd.f32 %v212_v27, %v211_v24 }
  0x8d   :  { %v348_v43 = vrot.slane %v347_v42, 1 }
  0x8e   :  { %v214_v34 = vadd.f32 %v213_v31, %v144_v30 }
  0x8f   :  { %v349_v45 = vadd.f32 %v348_v43, %v347_v42 }
  0x90   :  { %215 = vst [vmem:[%s650_s1] sm:$0x1] %v214_v34 }
  0x91   :  { %v350_v46 = vadd.f32 %v349_v45, %v216_v44 }
  0x93   :  { %351 = vst [vmem:[%s651_s2] sm:$0x1] %v350_v46 }

// kernel: wide_basic_forward.5
= control target key start
LH: loop header
LB: loop body
LE: loop exit
PB: predicated region body
PF: predicated region fallthrough
CT: control target
= control target key end

     0   :  { %s5282_s18 = smov 0   ;;  %s5935_s0 = inlined_call_operand.vmem [shape: f32[2,16,16,128], index: 0, kind: input, shape index: {}]   ;;  %s5936_s1 = inlined_call_operand.vmem [shape: f32[1,128], index: 1, kind: input, shape index: {}]   ;;  %s5937_s2 = inlined_call_operand.vmem [shape: f32[1,128], index: 2, kind: input, shape index: {}]   ;;  %s5938_s3 = inlined_call_operand.vmem [shape: bf16[9,128,128], index: 3, kind: input, shape index: {}]   ;;  %s5939_s4 = inlined_call_operand.vmem [shape: f32[1,128], index: 4, kind: input, shape index: {}]   ;;  %s5940_s5 = inlined_call_operand.vmem [shape: bf16[2,16,16,128], index: 5, kind: output, shape index: {}]  }
   0x1 LB: > { %s3712_s19 = sadd.s32 4294967295, %s5249_s18   ;;  %p3716_p0 = scmp.ge.s32.totalorder %s5249_s18, 1  ;;  %s5249_s18 = sphi %s5282_s18, %s15_s18  }
   0x2   : > { %p187_p1 = scmp.lt.s32.totalorder %s5249_s18, 3 }
   0x4   : > { %p188_p2 = pnand %p3716_p0, %p187_p1 }
   0x5   : > { %v5162_v0 = vld [vmem:[%s5938_s3 + $0x40] sm:$0xff] (!%p188_p2)   ;;  %v5251_v2 = vmov (!%p188_p2), 0.0   ;;  %v5164_v3 = vld [vmem:[%s5938_s3 + $0x48] sm:$0xff] (!%p188_p2)   ;;  %p215_p3 = scmp.lt.s32.totalorder (!%p188_p2), %s3712_s19, 1  ;;  %v5166_v5 = vld [vmem:[%s5938_s3 + $0x50] sm:$0xff] (!%p188_p2)  }
   0x6   : > { %191 = sbr.rel (%p188_p2) target bundleno = 588 (0x24c), region = 40  ;;  %v5163_v1 = vld [vmem:[%s5938_s3 + $0x100] sm:$0xff] (!%p188_p2)   ;;  %226 = vst [vmem:[#allocation2] sm:$0xff] (!%p188_p2), %v5251_v2  ;;  %227 = vst [vmem:[#allocation2 + $0x8] sm:$0xff] (!%p188_p2), %v5251_v2  ;;  %4381 = vmatprep.subr.bf16.mxu1 (!%p188_p2), %v5162_v0  ;;  %v5165_v4 = vld [vmem:[%s5938_s3 + $0x108] sm:$0xff] (!%p188_p2)  }
   0x7   : > { %228 = vst [vmem:[#allocation2 + $0x10] sm:$0xff] (!%p188_p2), %v5251_v2  ;;  %229 = vst [vmem:[#allocation2 + $0x18] sm:$0xff] (!%p188_p2), %v5251_v2  ;;  %4589 = vmatprep.subr.bf16.mxu0 (!%p188_p2), %v5163_v1  ;;  %4382 = vmatpush3.bf16.msra.mxu1 (!%p188_p2), %v5162_v0  ;;  %v5167_v6 = vld [vmem:[%s5938_s3 + $0x110] sm:$0xff] (!%p188_p2)   ;;  %v5168_v7 = vld [vmem:[%s5938_s3 + $0x58] sm:$0xff] (!%p188_p2)  }
   0x8   : > { %230 = vst [vmem:[#allocation2 + $0x20] sm:$0xff] (!%p188_p2), %v5251_v2  ;;  %231 = vst [vmem:[#allocation2 + $0x28] sm:$0xff] (!%p188_p2), %v5251_v2  ;;  %4590 = vmatpush3.bf16.msra.mxu0 (!%p188_p2), %v5163_v1  ;;  %4383 = vmatprep.subr.bf16.mxu1 (!%p188_p2), %v5164_v3  ;;  %v5169_v8 = vld [vmem:[%s5938_s3 + $0x118] sm:$0xff] (!%p188_p2)   ;;  %v5170_v9 = vld [vmem:[%s5938_s3 + $0x60] sm:$0xff] (!%p188_p2)  }
   0x9   : > { %232 = vst [vmem:[#allocation2 + $0x30] sm:$0xff] (!%p188_p2), %v5251_v2  ;;  %233 = vst [vmem:[#allocation2 + $0x38] sm:$0xff] (!%p188_p2), %v5251_v2  ;;  %4591 = vmatprep.subr.bf16.mxu0 (!%p188_p2), %v5165_v4  ;;  %v5171_v10 = vld [vmem:[%s5938_s3 + $0x120] sm:$0xff] (!%p188_p2)   ;;  %v5172_v11 = vld [vmem:[%s5938_s3 + $0x68] sm:$0xff] (!%p188_p2)  }
   0xa   : > { %234 = vst [vmem:[#allocation2 + $0x40] sm:$0xff] (!%p188_p2), %v5251_v2  ;;  %235 = vst [vmem:[#allocation2 + $0x48] sm:$0xff] (!%p188_p2), %v5251_v2  ;;  %v5173_v12 = vld [vmem:[%s5938_s3 + $0x128] sm:$0xff] (!%p188_p2)   ;;  %v5341_v15 = vld [vmem:[%s5936_s1] ss:$0 sm:$0xff] (!%p188_p2) }
   0xb   : > { %236 = vst [vmem:[#allocation2 + $0x50] sm:$0xff] (!%p188_p2), %v5251_v2  ;;  %237 = vst [vmem:[#allocation2 + $0x58] sm:$0xff] (!%p188_p2), %v5251_v2  ;;  %4384 = vmatpush3.bf16.msra.mxu1 (!%p188_p2), %v5164_v3  ;;  %v5346_v17 = vld [vmem:[%s5937_s2] ss:$0 sm:$0xff] (!%p188_p2)  ;;  %v5174_v24 = vld [vmem:[%s5938_s3 + $0x70] sm:$0xff] (!%p188_p2)  }
   0xc   : > { %238 = vst [vmem:[#allocation2 + $0x60] sm:$0xff] (!%p188_p2), %v5251_v2  ;;  %239 = vst [vmem:[#allocation2 + $0x68] sm:$0xff] (!%p188_p2), %v5251_v2  ;;  %4592 = vmatpush3.bf16.msra.mxu0 (!%p188_p2), %v5165_v4  ;;  %4385 = vmatprep.subr.bf16.mxu1 (!%p188_p2), %v5166_v5  ;;  %v5175_v28 = vld [vmem:[%s5938_s3 + $0x130] sm:$0xff] (!%p188_p2)   ;;  %v5176_v42 = vld [vmem:[%s5938_s3 + $0x78] sm:$0xff] (!%p188_p2)  }
   0xd   : > { %240 = vst [vmem:[#allocation2 + $0x70] sm:$0xff] %v5251_v2  ;;  %241 = vst [vmem:[#allocation2 + $0x78] sm:$0xff] %v5251_v2  ;;  %s5942_s19 = smov (!%p215_p3, %s3712_s19), 1  ;;  %4593 = vmatprep.subr.bf16.mxu0 %v5167_v6  ;;  %v526_v13 = vld [vmem:[#allocation2 + $0x1] sm:$0xff]  ;;  %v5177_v46 = vld [vmem:[%s5938_s3 + $0x138] sm:$0xff]  }
   0xe   : > { %242 = vst [vmem:[#allocation2 + $0x80] sm:$0xff] %v5251_v2  ;;  %243 = vst [vmem:[#allocation2 + $0x88] sm:$0xff] %v5251_v2  ;;  %s4018_s11 = sshll.u32 %s5942_s19, 8  ;;  %v527_v14 = vld [vmem:[#allocation2 + $0x9] sm:$0xff]  ;;  %v5178_v55 = vld [vmem:[%s5938_s3] sm:$0xff]   ;;  %s4019_s6 = sshll.u32 %s5942_s19, 7 }
   0xf   : > { %244 = vst [vmem:[#allocation2 + $0x90] sm:$0xff] %v5251_v2  ;;  %245 = vst [vmem:[#allocation2 + $0x98] sm:$0xff] %v5251_v2  ;;  %4386 = vmatpush3.bf16.msra.mxu1 %v5166_v5  ;;  %s5333_s22 = scalar_lea.vmem %s5935_s0, %s4018_s11  ;;  %v562_v16 = vpack.c.bf16 %v527_v14, %v526_v13  ;;  %v5179_v62 = vld [vmem:[%s5938_s3 + $0x140] sm:$0xff]   ;;  %s5879_s9 = scalar_lea.vmem %s5940_s5, %s4019_s6 }
  0x10   : > { %246 = vst [vmem:[#allocation2 + $0xa0] sm:$0xff] %v5251_v2  ;;  %247 = vst [vmem:[#allocation2 + $0xa8] sm:$0xff] %v5251_v2  ;;  %4594 = vmatpush3.bf16.msra.mxu0 %v5167_v6  ;;  %4387 = vmatprep.subr.bf16.mxu1 %v5168_v7  ;;  %v269_v18 = vld [vmem:[%s5333_s22] sm:$0xff]  ;;  %v270_v19 = vld [vmem:[%s5333_s22 + $0x8] sm:$0xff] }
  0x11   : > { %248 = vst [vmem:[#allocation2 + $0xb0] sm:$0xff] %v5251_v2  ;;  %249 = vst [vmem:[#allocation2 + $0xb8] sm:$0xff] %v5251_v2  ;;  %4595 = vmatprep.subr.bf16.mxu0 %v5169_v8  ;;  %v277_v20 = vmul.f32 %v5341_v15, %v269_v18  ;;  %v278_v21 = vmul.f32 %v5341_v15, %v270_v19  ;;  %4397 = vmatprep.mubr.bf16.mxu1 %v562_v16  ;;  %v3723_v22 = vld [vmem:[%s5333_s22 + $0x10] sm:$0xff]  ;;  %v3724_v23 = vld [vmem:[%s5333_s22 + $0x18] sm:$0xff] }
  0x12   : > { %250 = vst [vmem:[#allocation2 + $0xc0] sm:$0xff] %v5251_v2  ;;  %251 = vst [vmem:[#allocation2 + $0xc8] sm:$0xff] %v5251_v2  ;;  %v294_v27 = vmul.f32 %v3723_v22, %v5341_v15  ;;  %v295_v29 = vmul.f32 %v3724_v23, %v5341_v15  ;;  %v3725_v30 = vld [vmem:[%s5333_s22 + $0x20] sm:$0xff]  ;;  %v3726_v34 = vld [vmem:[%s5333_s22 + $0x28] sm:$0xff] }
  0x13   : > { %252 = vst [vmem:[#allocation2 + $0xd0] sm:$0xff] %v5251_v2  ;;  %253 = vst [vmem:[#allocation2 + $0xd8] sm:$0xff] %v5251_v2  ;;  %4388 = vmatpush3.bf16.msra.mxu1 %v5168_v7  ;;  %v285_v25 = vadd.f32 %v5346_v17, %v277_v20  ;;  %v286_v26 = vadd.f32 %v5346_v17, %v278_v21  ;;  %v305_v35 = vmul.f32 %v3725_v30, %v5341_v15  ;;  %v3727_v36 = vld [vmem:[%s5333_s22 + $0x30] sm:$0xff]  ;;  %v3728_v37 = vld [vmem:[%s5333_s22 + $0x38] sm:$0xff] }
  0x14   : > { %254 = vst [vmem:[#allocation2 + $0xe0] sm:$0xff] %v5251_v2  ;;  %255 = vst [vmem:[#allocation2 + $0xe8] sm:$0xff] %v5251_v2  ;;  %4596 = vmatpush3.bf16.msra.mxu0 %v5169_v8  ;;  %4389 = vmatprep.subr.bf16.mxu1 %v5170_v9  ;;  %v296_v33 = vadd.f32 %v5346_v17, %v294_v27  ;;  %v297_v38 = vadd.f32 %v5346_v17, %v295_v29  ;;  %v3729_v52 = vld [vmem:[%s5333_s22 + $0x40] sm:$0xff]  ;;  %v3730_v53 = vld [vmem:[%s5333_s22 + $0x48] sm:$0xff] }
  0x15   : > { %256 = vst [vmem:[#allocation2 + $0xf0] sm:$0xff] %v5251_v2  ;;  %257 = vst [vmem:[#allocation2 + $0xf8] sm:$0xff] %v5251_v2  ;;  %4597 = vmatprep.subr.bf16.mxu0 %v5171_v10  ;;  %v287_v31 = vmax.f32 %v285_v25, 0.0  ;;  %v288_v32 = vmax.f32 %v286_v26, 0.0  ;;  %v306_v39 = vmul.f32 %v3726_v34, %v5341_v15  ;;  %v316_v40 = vmul.f32 %v3727_v36, %v5341_v15  ;;  %v3731_v54 = vld [vmem:[%s5333_s22 + $0x50] sm:$0xff]  ;;  %v3733_v3 = vld [vmem:[%s5333_s22 + $0x60] sm:$0xff] }
  0x16   : > { %258 = vst [vmem:[#allocation2 + $0x100] sm:$0xff] %v5251_v2  ;;  %259 = vst [vmem:[#allocation2 + $0x108] sm:$0xff] %v5251_v2  ;;  %v317_v41 = vmul.f32 %v3728_v37, %v5341_v15  ;;  %v298_v44 = vmax.f32 %v296_v33, 0.0  ;;  %v307_v45 = vadd.f32 %v5346_v17, %v305_v35  ;;  %v299_v47 = vmax.f32 %v297_v38, 0.0  ;;  %v3735_v16 = vld [vmem:[%s5333_s22 + $0x70] sm:$0xff]  ;;  %v5180_v19 = vld [vmem:[%s5938_s3 + $0x148] sm:$0xff]  }
  0x17   : > { %260 = vst [vmem:[#allocation2 + $0x110] sm:$0xff] %v5251_v2  ;;  %261 = vst [vmem:[#allocation2 + $0x118] sm:$0xff] %v5251_v2  ;;  %4390 = vmatpush3.bf16.msra.mxu1 %v5170_v9  ;;  %v1747_v43 = vpack.c.bf16 %v288_v32, %v287_v31  ;;  %v308_v48 = vadd.f32 %v5346_v17, %v306_v39  ;;  %v5383_v49 = vadd.f32 %v5346_v17, %v316_v40  ;;  %v3734_v9 = vld [vmem:[%s5333_s22 + $0x68] sm:$0xff]  ;;  %v5185_v40 = vld [vmem:[%s5938_s3 + $0x10] sm:$0xff]  }
  0x18   : > { %262 = vst [vmem:[#allocation2 + $0x120] sm:$0xff] %v5251_v2  ;;  %263 = vst [vmem:[#allocation2 + $0x128] sm:$0xff] %v5251_v2  ;;  %4598 = vmatpush3.bf16.msra.mxu0 %v5171_v10  ;;  %4391 = vmatprep.subr.bf16.mxu1 %v5172_v11  ;;  %v5386_v50 = vadd.f32 %v5346_v17, %v317_v41  ;;  %v309_v51 = vmax.f32 %v307_v45, 0.0  ;;  %v327_v59 = vmul.f32 %v3729_v52, %v5341_v15 }
  0x19   : > { %264 = vst [vmem:[#allocation2 + $0x130] sm:$0xff] %v5251_v2  ;;  %265 = vst [vmem:[#allocation2 + $0x138] sm:$0xff] %v5251_v2  ;;  %4599 = vmatprep.subr.bf16.mxu0 %v5173_v12  ;;  %4605 = vmatprep.mubr.bf16.mxu0 %v1747_v43  ;;  %v310_v56 = vmax.f32 %v308_v48, 0.0  ;;  %v320_v57 = vmax.f32 %v5383_v49, 0.0  ;;  %v328_v60 = vmul.f32 %v3730_v53, %v5341_v15  ;;  %v5183_v49 = vld [vmem:[%s5938_s3 + $0x158] sm:$0xff]  }
  0x1a   : > { %266 = vst [vmem:[#allocation2 + $0x140] sm:$0xff] %v5251_v2  ;;  %289 = vst [vmem:[#allocation2 + $0x13] sm:$0xff] %v287_v31  ;;  %v321_v58 = vmax.f32 %v5386_v50, 0.0  ;;  %v338_v61 = vmul.f32 %v3731_v54, %v5341_v15  ;;  %v5407_v63 = vadd.f32 %v5346_v17, %v327_v59  ;;  %v3732_v2 = vld [vmem:[%s5333_s22 + $0x58] sm:$0xff]  ;;  %v349_v8 = vmul.f32 %v3733_v3, %v5341_v15 }
  0x1b   : > { %4392 = vmatpush3.bf16.msra.mxu1 %v5172_v11  ;;  %290 = vst [vmem:[#allocation2 + $0x1b] sm:$0xff] %v288_v32  ;;  %300 = vst [vmem:[#allocation2 + $0x25] sm:$0xff] %v298_v44  ;;  %v5410_v0 = vadd.f32 %v5346_v17, %v328_v60  ;;  %v339_v7 = vmul.f32 %v3732_v2, %v5341_v15  ;;  %v5182_v11 = vld [vmem:[%s5938_s3 + $0x8] sm:$0xff]   ;;  %v350_v14 = vmul.f32 %v3734_v9, %v5341_v15  ;;  %v5181_v44 = vld [vmem:[%s5938_s3 + $0x150] sm:$0xff]  }
  0x1c   : > { %4600 = vmatpush3.bf16.msra.mxu0 %v5173_v12  ;;  %4393 = vmatprep.subr.bf16.mxu1 %v5174_v24  ;;  %301 = vst [vmem:[#allocation2 + $0x2d] sm:$0xff] %v299_v47  ;;  %311 = vst [vmem:[#allocation2 + $0x37] sm:$0xff] %v309_v51  ;;  %v340_v1 = vadd.f32 %v5346_v17, %v338_v61  ;;  %v331_v6 = vmax.f32 %v5407_v63, 0.0  ;;  %v351_v22 = vadd.f32 %v5346_v17, %v349_v8  ;;  %v3736_v47 = vld [vmem:[%s5333_s22 + $0x78] sm:$0xff] }
  0x1d   : > { %4601 = vmatprep.subr.bf16.mxu0 %v5175_v28  ;;  %312 = vst [vmem:[#allocation2 + $0x3f] sm:$0xff] %v310_v56  ;;  %322 = vst [vmem:[#allocation2 + $0x49] sm:$0xff] %v320_v57  ;;  %v332_v12 = vmax.f32 %v5410_v0, 0.0  ;;  %v341_v21 = vadd.f32 %v5346_v17, %v339_v7  ;;  %v360_v23 = vmul.f32 %v3735_v16, %v5341_v15  ;;  %v5188_v51 = vld [vmem:[%s5938_s3 + $0x18] sm:$0xff]   ;;  %v3737_v56 = vld [vmem:[%s5333_s22 + $0x80] sm:$0xff] }
  0x1e   : > { %323 = vst [vmem:[#allocation2 + $0x51] sm:$0xff] %v321_v58  ;;  %v342_v13 = vmax.f32 %v340_v1, 0.0  ;;  %333 = vst [vmem:[#allocation2 + $0x5b] sm:$0xff] %v331_v6  ;;  %v352_v26 = vadd.f32 %v5346_v17, %v350_v14  ;;  %v353_v32 = vmax.f32 %v351_v22, 0.0  ;;  %v361_v52 = vmul.f32 %v3736_v47, %v5341_v15  ;;  %v5190_v1 = vld [vmem:[%s5938_s3 + $0x20] sm:$0xff]   ;;  %v5186_v16 = vld [vmem:[%s5938_s3 + $0x168] sm:$0xff]  }
  0x1f   : > { %4394 = vmatpush3.bf16.msra.mxu1 %v5174_v24  ;;  %334 = vst [vmem:[#allocation2 + $0x63] sm:$0xff] %v332_v12  ;;  %v343_v31 = vmax.f32 %v341_v21, 0.0  ;;  %v5437_v36 = vadd.f32 %v5346_v17, %v360_v23  ;;  %v371_v61 = vmul.f32 %v3737_v56, %v5341_v15  ;;  %v5192_v0 = vld [vmem:[%s5938_s3 + $0x28] sm:$0xff]   ;;  %v3744_v47 = vld [vmem:[%s5333_s22 + $0xb8] sm:$0xff] }
  0x20   : > { %4602 = vmatpush3.bf16.msra.mxu0 %v5175_v28  ;;  %4395 = vmatprep.subr.bf16.mxu1 %v5176_v42  ;;  %344 = vst [vmem:[#allocation2 + $0x6d] sm:$0xff] %v342_v13  ;;  %v354_v35 = vmax.f32 %v352_v26, 0.0  ;;  %355 = vst [vmem:[#allocation2 + $0x7f] sm:$0xff] %v353_v32 }
  0x21   : > { %4603 = vmatprep.subr.bf16.mxu0 %v5177_v46  ;;  %v528_v4 = vld [vmem:[#allocation2 + $0x11] sm:$0xff]  ;;  %345 = vst [vmem:[#allocation2 + $0x75] sm:$0xff] %v343_v31  ;;  %v364_v43 = vmax.f32 %v5437_v36, 0.0  ;;  %v5191_v36 = vld [vmem:[%s5938_s3 + $0x180] sm:$0xff]  }
  0x22   : > { %v529_v5 = vld [vmem:[#allocation2 + $0x19] sm:$0xff]  ;;  %v1713_v18 = vld [vmem:[#allocation2 + $0x23] sm:$0xff]  ;;  %356 = vst [vmem:[#allocation2 + $0x87] sm:$0xff] %v354_v35  ;;  %v3743_v31 = vld [vmem:[%s5333_s22 + $0xb0] sm:$0xff] }
  0x23   : > { %4396 = vmatpush3.bf16.msra.mxu1 %v5176_v42  ;;  %v563_v10 = vpack.c.bf16 %v529_v5, %v528_v4  ;;  %v530_v20 = vld [vmem:[#allocation2 + $0x21] sm:$0xff]  ;;  %v1714_v24 = vld [vmem:[#allocation2 + $0x2b] sm:$0xff]  ;;  %v1715_v29 = vld [vmem:[#allocation2 + $0x33] sm:$0xff]  ;;  %366 = vst [vmem:[#allocation2 + $0x91] sm:$0xff] %v364_v43 }
  0x24   : > { %4604 = vmatpush3.bf16.msra.mxu0 %v5177_v46  ;;  %4433 = vmatprep.subr.bf16.mxu1 %v5178_v55  ;;  %v531_v25 = vld [vmem:[#allocation2 + $0x29] sm:$0xff]  ;;  %v1748_v27 = vpack.c.bf16 %v1714_v24, %v1713_v18  ;;  %v532_v30 = vld [vmem:[#allocation2 + $0x31] sm:$0xff]  ;;  %v1716_v33 = vld [vmem:[#allocation2 + $0x3b] sm:$0xff] }
  0x25   : > { %4641 = vmatprep.subr.bf16.mxu0 %v5179_v62  ;;  %v564_v28 = vpack.c.bf16 %v531_v25, %v530_v20  ;;  %v533_v34 = vld [vmem:[#allocation2 + $0x39] sm:$0xff]  ;;  %v1749_v37 = vpack.c.bf16 %v1716_v33, %v1715_v29  ;;  %v1717_v38 = vld [vmem:[#allocation2 + $0x43] sm:$0xff]  ;;  %v1718_v42 = vld [vmem:[#allocation2 + $0x4b] sm:$0xff] }
  0x26   : > { %4398 = vmatmul.mubr.bf16.vlgmr.msra.gmra.mrb[0].mxu1 %v563_v10  ;;  %v534_v39 = vld [vmem:[#allocation2 + $0x41] sm:$0xff]  ;;  %v565_v41 = vpack.c.bf16 %v533_v34, %v532_v30  ;;  %v1719_v46 = vld [vmem:[#allocation2 + $0x53] sm:$0xff]  ;;  %v1750_v48 = vpack.c.bf16 %v1718_v42, %v1717_v38  ;;  %v404_v38 = vmul.f32 %v3743_v31, %v5341_v15 }
  0x27   : > { %4434 = vmatpush3.bf16.msra.mxu1 %v5178_v55  ;;  %4606 = vmatmul.mubr.bf16.vlgmr.msra.gmra.mrb[0].mxu0 %v1748_v27  ;;  %v566_v45 = vpack.c.bf16 %v320_v57, %v534_v39  ;;  %v1751_v53 = vpack.c.bf16 %v331_v6, %v1719_v46  ;;  %v537_v54 = vld [vmem:[#allocation2 + $0x59] sm:$0xff]  ;;  %v5461_v55 = vadd.f32 %v5346_v17, %v361_v52  ;;  %v3738_v57 = vld [vmem:[%s5333_s22 + $0x88] sm:$0xff]  ;;  %v3739_v10 = vld [vmem:[%s5333_s22 + $0x90] sm:$0xff] }
  0x28   : > { %4435 = vmatprep.subr.bf16.mxu1 %v5182_v11  ;;  %4401 = vmatprep.mubr.bf16.mxu1 %v564_v28  ;;  %v538_v59 = vld [vmem:[#allocation2 + $0x61] sm:$0xff]  ;;  %v539_v60 = vld [vmem:[#allocation2 + $0x69] sm:$0xff]  ;;  %v567_v2 = vpack.c.bf16 %v537_v54, %v321_v58  ;;  %v1723_v5 = vld [vmem:[#allocation2 + $0x73] sm:$0xff]  ;;  %v373_v6 = vadd.f32 %v5346_v17, %v371_v61  ;;  %v382_v13 = vmul.f32 %v3739_v10, %v5341_v15 }
  0x29   : > { %4642 = vmatpush3.bf16.msra.mxu0 %v5179_v62  ;;  %4609 = vmatprep.mubr.bf16.mxu0 %v1749_v37  ;;  %v372_v62 = vmul.f32 %v3738_v57, %v5341_v15  ;;  %v365_v63 = vmax.f32 %v5461_v55, 0.0  ;;  %v1722_v3 = vld [vmem:[#allocation2 + $0x6b] sm:$0xff]  ;;  %v5184_v4 = vld [vmem:[%s5938_s3 + $0x160] sm:$0xff]   ;;  %v568_v8 = vpack.c.bf16 %v539_v60, %v538_v59  ;;  %v2043_v34 = vld [vmem:[#allocation2 + $0x14] sm:$0xff]  ;;  %v5509_v46 = vadd.f32 %v5346_v17, %v404_v38 }
  0x2a   : > { %4643 = vmatprep.subr.bf16.mxu0 %v5180_v19  ;;  %v1724_v9 = vld [vmem:[#allocation2 + $0x7b] sm:$0xff]  ;;  %v375_v50 = vmax.f32 %v373_v6, 0.0  ;;  %v1752_v14 = vpack.c.bf16 %v1722_v3, %v332_v12  ;;  %v384_v20 = vadd.f32 %v5346_v17, %v382_v13  ;;  %v540_v21 = vld [vmem:[#allocation2 + $0x71] sm:$0xff]  ;;  %v3742_v24 = vld [vmem:[%s5333_s22 + $0xa8] sm:$0xff]  ;;  %v405_v52 = vmul.f32 %v3744_v47, %v5341_v15 }
  0x2b   : > { %4436 = vmatpush3.bf16.msra.mxu1 %v5182_v11  ;;  %v374_v7 = vadd.f32 %v5346_v17, %v372_v62  ;;  %367 = vst [vmem:[#allocation2 + $0x99] sm:$0xff] %v365_v63  ;;  %v3740_v11 = vld [vmem:[%s5333_s22 + $0x98] sm:$0xff]  ;;  %v3741_v12 = vld [vmem:[%s5333_s22 + $0xa0] sm:$0xff]  ;;  %v543_v28 = vld [vmem:[#allocation2 + $0x89] sm:$0xff]  ;;  %v394_v30 = vmul.f32 %v3742_v24, %v5341_v15  ;;  %v408_v59 = vmax.f32 %v5509_v46, 0.0 }
  0x2c   : > { %4437 = vmatprep.subr.bf16.mxu1 %v5185_v40  ;;  %v383_v18 = vmul.f32 %v3740_v11, %v5341_v15  ;;  %377 = vst [vmem:[#allocation2 + $0xa3] sm:$0xff] %v375_v50  ;;  %v541_v22 = vld [vmem:[#allocation2 + $0x79] sm:$0xff]  ;;  %v393_v25 = vmul.f32 %v3741_v12, %v5341_v15  ;;  %v1725_v26 = vld [vmem:[#allocation2 + $0x83] sm:$0xff]  ;;  %v386_v29 = vmax.f32 %v384_v20, 0.0  ;;  %v1726_v32 = vld [vmem:[#allocation2 + $0x8b] sm:$0xff] }
  0x2d   : > { %4644 = vmatpush3.bf16.msra.mxu0 %v5180_v19  ;;  %v376_v58 = vmax.f32 %v374_v7, 0.0  ;;  %v1753_v19 = vpack.c.bf16 %v1724_v9, %v1723_v5  ;;  %v542_v27 = vld [vmem:[#allocation2 + $0x81] sm:$0xff]  ;;  %v5187_v33 = vld [vmem:[%s5938_s3 + $0x170] sm:$0xff]   ;;  %v569_v39 = vpack.c.bf16 %v541_v22, %v540_v21  ;;  %v1754_v56 = vpack.c.bf16 %v1726_v32, %v1725_v26  ;;  %v5189_v57 = vld [vmem:[%s5938_s3 + $0x178] sm:$0xff]   ;;  %410 = vst [vmem:[#allocation2 + $0xd9] sm:$0xff] %v408_v59 }
  0x2e   : > { %4402 = vmatmul.mubr.bf16.gmra.mrb[4].mxu1 %v565_v41  ;;  %4645 = vmatprep.subr.bf16.mxu0 %v5181_v44  ;;  %v385_v23 = vadd.f32 %v5346_v17, %v383_v18  ;;  %v395_v37 = vadd.f32 %v5346_v17, %v393_v25  ;;  %388 = vst [vmem:[#allocation2 + $0xb5] sm:$0xff] %v386_v29  ;;  %v5194_v41 = vld [vmem:[%s5938_s3 + $0x30] sm:$0xff]   ;;  %v3748_v7 = vld [vmem:[%s5333_s22 + $0xd8] sm:$0xff]  ;;  %v3750_v21 = vld [vmem:[%s5333_s22 + $0xe8] sm:$0xff] }
  0x2f   : > { %4405 = vmatprep.mubr.bf16.mxu1 %v566_v45  ;;  %4438 = vmatpush3.bf16.msra.mxu1 %v5185_v40  ;;  %378 = vst [vmem:[#allocation2 + $0xab] sm:$0xff] %v376_v58  ;;  %v396_v40 = vadd.f32 %v5346_v17, %v394_v30  ;;  %v570_v42 = vpack.c.bf16 %v543_v28, %v542_v27  ;;  %v3747_v54 = vld [vmem:[%s5333_s22 + $0xd0] sm:$0xff]  ;;  %v2045_v58 = vld [vmem:[#allocation2 + $0x24] sm:$0xff] }
  0x30   : > { %4610 = vmatmul.mubr.bf16.gmra.mrb[4].mxu0 %v1750_v48  ;;  %4439 = vmatprep.subr.bf16.mxu1 %v5188_v51  ;;  %v387_v35 = vmax.f32 %v385_v23, 0.0  ;;  %v397_v45 = vmax.f32 %v395_v37, 0.0  ;;  %v3745_v48 = vld [vmem:[%s5333_s22 + $0xc0] sm:$0xff]  ;;  %v426_v61 = vmul.f32 %v3747_v54, %v5341_v15  ;;  %v427_v11 = vmul.f32 %v3748_v7, %v5341_v15  ;;  %v2047_v20 = vld [vmem:[#allocation2 + $0x34] sm:$0xff]  ;;  %v5193_v29 = vld [vmem:[%s5938_s3 + $0x188] sm:$0xff]  }
  0x31   : > { %4646 = vmatpush3.bf16.msra.mxu0 %v5181_v44  ;;  %4613 = vmatprep.mubr.bf16.mxu0 %v1751_v53  ;;  %v2044_v44 = vld [vmem:[#allocation2 + $0x1c] sm:$0xff]  ;;  %v3746_v53 = vld [vmem:[%s5333_s22 + $0xc8] sm:$0xff]  ;;  %v571_v18 = vpack.c.bf16 %v365_v63, %v364_v43  ;;  %v438_v43 = vmul.f32 %v3750_v21, %v5341_v15 }
  0x32   : > { %4647 = vmatprep.subr.bf16.mxu0 %v5183_v49  ;;  %389 = vst [vmem:[#allocation2 + $0xbd] sm:$0xff] %v387_v35  ;;  %399 = vst [vmem:[#allocation2 + $0xc7] sm:$0xff] %v397_v45  ;;  %v416_v60 = vmul.f32 %v3746_v53, %v5341_v15  ;;  %v2079_v62 = vpack.c.bf16 %v2044_v44, %v2043_v34  ;;  %v428_v6 = vadd.f32 %v5346_v17, %v426_v61  ;;  %v2048_v23 = vld [vmem:[#allocation2 + $0x3c] sm:$0xff]  ;;  %v2049_v35 = vld [vmem:[#allocation2 + $0x44] sm:$0xff] }
  0x33   : > { %4440 = vmatpush3.bf16.msra.mxu1 %v5188_v51  ;;  %v398_v51 = vmax.f32 %v396_v40, 0.0  ;;  %v440_v25 = vadd.f32 %v5346_v17, %v438_v43  ;;  %v5555_v26 = vpack.c.bf16 %v2048_v23, %v2047_v20  ;;  %v5563_v31 = vld [vmem:[%s5938_s3 + $0x80] sm:$0xff]   ;;  %v2050_v37 = vld [vmem:[#allocation2 + $0x4c] sm:$0xff]  ;;  %v5197_v45 = vld [vmem:[%s5938_s3 + $0x198] sm:$0xff]  }
  0x34   : > { %4441 = vmatprep.subr.bf16.mxu1 %v5190_v1  ;;  %v418_v5 = vadd.f32 %v5346_v17, %v416_v60  ;;  %v2052_v40 = vld [vmem:[#allocation2 + $0x5c] sm:$0xff]  ;;  %v2055_v53 = vld [vmem:[#allocation2 + $0x74] sm:$0xff]  ;;  %v2057_v7 = vld [vmem:[#allocation2 + $0x84] sm:$0xff] }
  0x35   : > { %4648 = vmatpush3.bf16.msra.mxu0 %v5183_v49  ;;  %v415_v49 = vmul.f32 %v3745_v48, %v5341_v15  ;;  %400 = vst [vmem:[#allocation2 + $0xcf] sm:$0xff] %v398_v51  ;;  %v442_v30 = vmax.f32 %v440_v25, 0.0  ;;  %v2053_v51 = vld [vmem:[#allocation2 + $0x64] sm:$0xff]  ;;  %v2056_v54 = vld [vmem:[#allocation2 + $0x7c] sm:$0xff]  ;;  %v2063_v43 = vld [vmem:[#allocation2 + $0xb4] sm:$0xff] }
  0x36   : > { %4406 = vmatmul.mubr.bf16.gmra.mrb[8].mxu1 %v567_v2  ;;  %4649 = vmatprep.subr.bf16.mxu0 %v5184_v4  ;;  %v5524_v2 = vadd.f32 %v5346_v17, %v405_v52  ;;  %v420_v13 = vmax.f32 %v418_v5, 0.0  ;;  %v548_v27 = vld [vmem:[#allocation2 + $0xb1] sm:$0xff]  ;;  %v5589_v46 = vpack.c.bf16 %v2056_v54, %v2055_v53  ;;  %v2061_v21 = vld [vmem:[#allocation2 + $0xa4] sm:$0xff] }
  0x37   : > { %4409 = vmatprep.mubr.bf16.mxu1 %v568_v8  ;;  %4442 = vmatpush3.bf16.msra.mxu1 %v5190_v1  ;;  %v546_v1 = vld [vmem:[#allocation2 + $0xa1] sm:$0xff]  ;;  %v417_v3 = vadd.f32 %v5346_v17, %v415_v49  ;;  %444 = vst [vmem:[#allocation2 + $0x117] sm:$0xff] %v442_v30  ;;  %v2054_v49 = vld [vmem:[#allocation2 + $0x6c] sm:$0xff] }
  0x38   : > { %4614 = vmatmul.mubr.bf16.gmra.mrb[8].mxu0 %v1752_v14  ;;  %4443 = vmatprep.subr.bf16.mxu1 %v5192_v0  ;;  %v3749_v8 = vld [vmem:[%s5333_s22 + $0xe0] sm:$0xff]  ;;  %v409_v9 = vmax.f32 %v5524_v2, 0.0  ;;  %v430_v14 = vmax.f32 %v428_v6, 0.0  ;;  %422 = vst [vmem:[#allocation2 + $0xf3] sm:$0xff] %v420_v13  ;;  %v5587_v60 = vpack.c.bf16 %v2054_v49, %v2053_v51  ;;  %v5201_v2 = vld [vmem:[%s5938_s3 + $0x1a8] sm:$0xff]   ;;  %v5202_v49 = vld [vmem:[%s5938_s3 + $0x90] sm:$0xff]  }
  0x39   : > { %4650 = vmatpush3.bf16.msra.mxu0 %v5184_v4  ;;  %4617 = vmatprep.mubr.bf16.mxu0 %v1753_v19  ;;  %v547_v4 = vld [vmem:[#allocation2 + $0xa9] sm:$0xff]  ;;  %v419_v10 = vmax.f32 %v417_v3, 0.0  ;;  %v437_v50 = vmul.f32 %v3749_v8, %v5341_v15  ;;  %v549_v28 = vld [vmem:[#allocation2 + $0xb9] sm:$0xff]  ;;  %v550_v32 = vld [vmem:[#allocation2 + $0xc1] sm:$0xff] }
  0x3a   : > { %4651 = vmatprep.subr.bf16.mxu0 %v5186_v16  ;;  %v2046_v19 = vld [vmem:[#allocation2 + $0x2c] sm:$0xff]  ;;  %411 = vst [vmem:[#allocation2 + $0xe1] sm:$0xff] %v409_v9  ;;  %v572_v22 = vpack.c.bf16 %v547_v4, %v546_v1  ;;  %432 = vst [vmem:[#allocation2 + $0xfd] sm:$0xff] %v430_v14  ;;  %v573_v34 = vpack.c.bf16 %v549_v28, %v548_v27  ;;  %v3752_v4 = vld [vmem:[%s5333_s22 + $0xf8] sm:$0xff] }
  0x3b   : > { %4444 = vmatpush3.bf16.msra.mxu1 %v5192_v0  ;;  %421 = vst [vmem:[#allocation2 + $0xeb] sm:$0xff] %v419_v10  ;;  %v429_v0 = vadd.f32 %v5346_v17, %v427_v11  ;;  %v439_v12 = vadd.f32 %v5346_v17, %v437_v50  ;;  %v5552_v24 = vpack.c.bf16 %v2046_v19, %v2045_v58  ;;  %v3751_v1 = vld [vmem:[%s5333_s22 + $0xf0] sm:$0xff]  ;;  %v2060_v50 = vld [vmem:[#allocation2 + $0x9c] sm:$0xff] }
  0x3c   : > { %4445 = vmatprep.subr.bf16.mxu1 %v5194_v41  ;;  %v552_v47 = vld [vmem:[#allocation2 + $0xd1] sm:$0xff]  ;;  %v448_v3 = vmul.f32 %v3751_v1, %v5341_v15  ;;  %v449_v6 = vmul.f32 %v3752_v4, %v5341_v15  ;;  %v5234_v23 = vld [vmem:[#allocation2] sm:$0xff] }
  0x3d   : > { %4652 = vmatpush3.bf16.msra.mxu0 %v5186_v16  ;;  %v5196_v16 = vld [vmem:[%s5938_s3 + $0x38] sm:$0xff]   ;;  %v431_v55 = vmax.f32 %v429_v0, 0.0  ;;  %v441_v63 = vmax.f32 %v439_v12, 0.0  ;;  %v575_v52 = vpack.c.bf16 %v408_v59, %v552_v47  ;;  %v2058_v10 = vld [vmem:[#allocation2 + $0x8c] sm:$0xff]  ;;  %v460_v30 = vld [vmem:[#allocation2 + $0x20] sm:$0xff] }
  0x3e   : > { %4410 = vmatmul.mubr.bf16.gmra.mrb[12].mxu1 %v569_v39  ;;  %4653 = vmatprep.subr.bf16.mxu0 %v5187_v33  ;;  %v2051_v39 = vld [vmem:[#allocation2 + $0x54] sm:$0xff]  ;;  %v450_v8 = vadd.f32 %v5346_v17, %v448_v3  ;;  %v451_v58 = vadd.f32 %v5346_v17, %v449_v6  ;;  %v464_v51 = vld [vmem:[#allocation2 + $0x40] sm:$0xff] }
  0x3f   : > { %4413 = vmatprep.mubr.bf16.mxu1 %v570_v42  ;;  %4446 = vmatpush3.bf16.msra.mxu1 %v5194_v41  ;;  %433 = vst [vmem:[#allocation2 + $0x105] sm:$0xff] %v431_v55  ;;  %443 = vst [vmem:[#allocation2 + $0x10f] sm:$0xff] %v441_v63  ;;  %v5195_v41 = vld [vmem:[%s5938_s3 + $0x190] sm:$0xff]   ;;  %v5571_v42 = vpack.c.bf16 %v2050_v37, %v2049_v35  ;;  %v5573_v44 = vpack.c.bf16 %v2052_v40, %v2051_v39  ;;  %v561_v0 = vld [vmem:[#allocation2 + $0x119] sm:$0xff] }
  0x40   : > { %4618 = vmatmul.mubr.bf16.gmra.mrb[12].mxu0 %v1754_v56  ;;  %4447 = vmatprep.subr.bf16.mxu1 %v5196_v16  ;;  %v2059_v11 = vld [vmem:[#allocation2 + $0x94] sm:$0xff]  ;;  %v452_v14 = vmax.f32 %v450_v8, 0.0  ;;  %v2064_v55 = vld [vmem:[#allocation2 + $0xbc] sm:$0xff]  ;;  %v2066_v35 = vld [vmem:[#allocation2 + $0xcc] sm:$0xff] }
  0x41   : > { %4654 = vmatpush3.bf16.msra.mxu0 %v5187_v33  ;;  %4657 = vmatprep.mubr.bf16.mxu0 %v2079_v62  ;;  %v551_v33 = vld [vmem:[#allocation2 + $0xc9] sm:$0xff]  ;;  %v557_v59 = vld [vmem:[#allocation2 + $0xf9] sm:$0xff]  ;;  %v5607_v19 = vpack.c.bf16 %v2060_v50, %v2059_v11  ;;  %v5621_v27 = vpack.c.bf16 %v2064_v55, %v2063_v43 }
  0x42   : > { %4655 = vmatprep.subr.bf16.mxu0 %v5189_v57  ;;  %v574_v38 = vpack.c.bf16 %v551_v33, %v550_v32  ;;  %v555_v48 = vld [vmem:[#allocation2 + $0xe9] sm:$0xff]  ;;  %v556_v61 = vld [vmem:[#allocation2 + $0xf1] sm:$0xff]  ;;  %454 = vst [vmem:[#allocation2 + $0x121] sm:$0xff] %v452_v14  ;;  %v5617_v63 = vld [vmem:[%s5938_s3 + $0x1c0] sm:$0xff]  }
  0x43   : > { %4448 = vmatpush3.bf16.msra.mxu1 %v5196_v16  ;;  %v576_v56 = vpack.c.bf16 %v555_v48, %v409_v9  ;;  %v577_v9 = vpack.c.bf16 %v557_v59, %v556_v61  ;;  %v5203_v15 = vld [vmem:[%s5938_s3 + $0x1b0] sm:$0xff]   ;;  %v453_v16 = vmax.f32 %v451_v58, 0.0  ;;  %v5205_v17 = vld [vmem:[%s5938_s3 + $0x1b8] sm:$0xff]   ;;  %v461_v32 = vld [vmem:[#allocation2 + $0x28] sm:$0xff] }
  0x44   : > { %4485 = vmatprep.subr.bf16.mxu1 %v5563_v31  ;;  %v458_v28 = vld [vmem:[#allocation2 + $0x10] sm:$0xff]  ;;  %v2065_v33 = vld [vmem:[#allocation2 + $0xc4] sm:$0xff]  ;;  %v2068_v39 = vld [vmem:[#allocation2 + $0xdc] sm:$0xff] }
  0x45   : > { %4656 = vmatpush3.bf16.msra.mxu0 %v5189_v57  ;;  %v5199_v57 = vld [vmem:[%s5938_s3 + $0x1a0] sm:$0xff]   ;;  %455 = vst [vmem:[#allocation2 + $0x129] sm:$0xff] %v453_v16  ;;  %v2067_v37 = vld [vmem:[#allocation2 + $0xd4] sm:$0xff]  ;;  %v5200_v40 = vld [vmem:[%s5938_s3 + $0x88] sm:$0xff]  }
  0x46   : > { %4414 = vmatmul.mubr.bf16.gmra.mrb[16].mxu1 %v571_v18  ;;  %4693 = vmatprep.subr.bf16.mxu0 %v5191_v36  ;;  %v558_v62 = vld [vmem:[#allocation2 + $0x101] sm:$0xff]  ;;  %v559_v5 = vld [vmem:[#allocation2 + $0x109] sm:$0xff]  ;;  %v5605_v18 = vpack.c.bf16 %v2058_v10, %v2057_v7  ;;  %v560_v20 = vld [vmem:[#allocation2 + $0x111] sm:$0xff] }
  0x47   : > { %4417 = vmatprep.mubr.bf16.mxu1 %v572_v22  ;;  %v578_v13 = vpack.c.bf16 %v559_v5, %v558_v62  ;;  %v579_v12 = vpack.c.bf16 %v561_v0, %v560_v20  ;;  %v2062_v22 = vld [vmem:[#allocation2 + $0xac] sm:$0xff]  ;;  %v463_v48 = vld [vmem:[#allocation2 + $0x38] sm:$0xff]  ;;  %v2069_v53 = vld [vmem:[#allocation2 + $0xe4] sm:$0xff] }
  0x48   : > { %4658 = vmatmul.mubr.bf16.vlgmr.msra.gmra.mrb[0].mxu0 %v5552_v24  ;;  %v5619_v25 = vpack.c.bf16 %v2062_v22, %v2061_v21  ;;  %v462_v47 = vld [vmem:[#allocation2 + $0x30] sm:$0xff]  ;;  %v5204_v59 = vld [vmem:[%s5938_s3 + $0x98] sm:$0xff]   ;;  %v468_v4 = vld [vmem:[#allocation2 + $0x60] sm:$0xff] }
  0x49   : > { %4661 = vmatprep.mubr.bf16.mxu0 %v5555_v26  ;;  %4694 = vmatpush3.bf16.msra.mxu0 %v5191_v36  ;;  %v492_v36 = vpack.c.bf16 %v5234_v23, %v5234_v23  ;;  %v495_v54 = vpack.c.bf16 %v463_v48, %v462_v47  ;;  %v2071_v61 = vld [vmem:[#allocation2 + $0xf4] sm:$0xff]  ;;  %v469_v5 = vld [vmem:[#allocation2 + $0x68] sm:$0xff]  ;;  %v5206_v6 = vld [vmem:[%s5938_s3 + $0xa0] sm:$0xff]  }
  0x4a   : > { %4695 = vmatprep.subr.bf16.mxu0 %v5193_v29  ;;  %v467_v3 = vld [vmem:[#allocation2 + $0x58] sm:$0xff]  ;;  %v2073_v7 = vld [vmem:[#allocation2 + $0x104] sm:$0xff]  ;;  %v498_v10 = vpack.c.bf16 %v469_v5, %v468_v4  ;;  %v470_v14 = vld [vmem:[#allocation2 + $0x70] sm:$0xff] }
  0x4b   : > { %v2075_v11 = vld [vmem:[#allocation2 + $0x114] sm:$0xff]  ;;  %v2076_v50 = vld [vmem:[#allocation2 + $0x11c] sm:$0xff]  ;;  %v5208_v58 = vld [vmem:[%s5938_s3 + $0xa8] sm:$0xff]  }
  0x4c   : > { %v471_v16 = vld [vmem:[#allocation2 + $0x78] sm:$0xff]  ;;  %v472_v20 = vld [vmem:[#allocation2 + $0x80] sm:$0xff]  ;;  %v473_v0 = vld [vmem:[#allocation2 + $0x88] sm:$0xff] }
  0x4d   : > { %4696 = vmatpush3.bf16.msra.mxu0 %v5193_v29  ;;  %v459_v29 = vld [vmem:[#allocation2 + $0x18] sm:$0xff]  ;;  %v499_v21 = vpack.c.bf16 %v471_v16, %v470_v14  ;;  %v2078_v22 = vld [vmem:[#allocation2 + $0x12c] sm:$0xff]  ;;  %v500_v23 = vpack.c.bf16 %v473_v0, %v472_v20  ;;  %v1047_v5 = vld [vmem:[#allocation2 + $0x2] sm:$0xff] }
  0x4e   : > { %4418 = vmatmul.mubr.bf16.gmra.mrb[20].mxu1 %v573_v34  ;;  %4697 = vmatprep.subr.bf16.mxu0 %v5195_v41  ;;  %v493_v34 = vpack.c.bf16 %v459_v29, %v458_v28  ;;  %v474_v55 = vld [vmem:[#allocation2 + $0x90] sm:$0xff]  ;;  %v475_v28 = vld [vmem:[#allocation2 + $0x98] sm:$0xff]  ;;  %v476_v29 = vld [vmem:[#allocation2 + $0xa0] sm:$0xff] }
  0x4f   : > { %4421 = vmatprep.mubr.bf16.mxu1 %v574_v38  ;;  %v494_v38 = vpack.c.bf16 %v461_v32, %v460_v30  ;;  %v477_v30 = vld [vmem:[#allocation2 + $0xa8] sm:$0xff]  ;;  %v5671_v32 = vld [vmem:[%s5938_s3 + $0xc0] sm:$0xff]   ;;  %v5211_v48 = vld [vmem:[%s5938_s3 + $0x1d0] sm:$0xff]  }
  0x50   : > { %4662 = vmatmul.mubr.bf16.gmra.mrb[4].mxu0 %v5571_v42  ;;  %v491_v4 = vld [vmem:[#allocation2 + $0x118] sm:$0xff]  ;;  %v1056_v20 = vld [vmem:[#allocation2 + $0x4a] sm:$0xff] }
  0x51   : > { %4665 = vmatprep.mubr.bf16.mxu0 %v5573_v44  ;;  %4698 = vmatpush3.bf16.msra.mxu0 %v5195_v41  ;;  %v5629_v41 = vpack.c.bf16 %v2066_v35, %v2065_v33  ;;  %v501_v33 = vpack.c.bf16 %v475_v28, %v474_v55  ;;  %v478_v35 = vld [vmem:[#allocation2 + $0xb0] sm:$0xff]  ;;  %v1054_v16 = vld [vmem:[#allocation2 + $0x3a] sm:$0xff]  ;;  %v5224_v28 = vld [vmem:[%s5938_s3 + $0xe8] sm:$0xff]  }
  0x52   : > { %4699 = vmatprep.subr.bf16.mxu0 %v5197_v45  ;;  %v1053_v14 = vld [vmem:[#allocation2 + $0x32] sm:$0xff] }
  0x53   : > { %v5729_v0 = vpack.c.bf16 %v1054_v16, %v1053_v14  ;;  %v2717_v16 = vld [vmem:[#allocation2 + $0x75] sm:$0xff] }
  0x55   : > { %4700 = vmatpush3.bf16.msra.mxu0 %v5197_v45  ;;  %v5631_v45 = vpack.c.bf16 %v2068_v39, %v2067_v37  ;;  %v479_v37 = vld [vmem:[#allocation2 + $0xb8] sm:$0xff]  ;;  %v5209_v39 = vld [vmem:[%s5938_s3 + $0x1c8] sm:$0xff]  }
  0x56   : > { %4422 = vmatmul.mubr.bf16.gmra.mrb[24].mxu1 %v575_v52  ;;  %4701 = vmatprep.subr.bf16.mxu0 %v5199_v57  ;;  %v465_v52 = vld [vmem:[#allocation2 + $0x48] sm:$0xff] }
  0x57   : > { %4425 = vmatprep.mubr.bf16.mxu1 %v576_v56  ;;  %v2070_v56 = vld [vmem:[#allocation2 + $0xec] sm:$0xff] }
  0x58   : > { %4666 = vmatmul.mubr.bf16.gmra.mrb[8].mxu0 %v5587_v60  ;;  %v5642_v62 = vpack.c.bf16 %v2070_v56, %v2069_v53  ;;  %v486_v56 = vld [vmem:[#allocation2 + $0xf0] sm:$0xff] }
  0x59   : > { %4669 = vmatprep.mubr.bf16.mxu0 %v5589_v46  ;;  %4702 = vmatpush3.bf16.msra.mxu0 %v5199_v57  ;;  %v496_v57 = vpack.c.bf16 %v465_v52, %v464_v51  ;;  %v482_v51 = vld [vmem:[#allocation2 + $0xd0] sm:$0xff]  ;;  %v483_v52 = vld [vmem:[#allocation2 + $0xd8] sm:$0xff] }
  0x5a   : > { %4703 = vmatprep.subr.bf16.mxu0 %v5201_v2 }
  0x5d   : > { %4704 = vmatpush3.bf16.msra.mxu0 %v5201_v2  ;;  %v466_v2 = vld [vmem:[#allocation2 + $0x50] sm:$0xff] }
  0x5e   : > { %4426 = vmatmul.mubr.bf16.gmra.mrb[28].mxu1 %v577_v9  ;;  %4705 = vmatprep.subr.bf16.mxu0 %v5203_v15  ;;  %v497_v8 = vpack.c.bf16 %v467_v3, %v466_v2  ;;  %v2074_v9 = vld [vmem:[#allocation2 + $0x10c] sm:$0xff] }
  0x5f   : > { %4429 = vmatprep.mubr.bf16.mxu1 %v578_v13  ;;  %v5654_v13 = vpack.c.bf16 %v2074_v9, %v2073_v7  ;;  %v5219_v2 = vld [vmem:[%s5938_s3 + $0x1f0] sm:$0xff]  }
  0x60   : > { %4670 = vmatmul.mubr.bf16.gmra.mrb[12].mxu0 %v5605_v18  ;;  %v490_v3 = vld [vmem:[#allocation2 + $0x110] sm:$0xff] }
  0x61   : > { %4673 = vmatprep.mubr.bf16.mxu0 %v5607_v19  ;;  %4706 = vmatpush3.bf16.msra.mxu0 %v5203_v15  ;;  %v5656_v15 = vpack.c.bf16 %v2076_v50, %v2075_v11  ;;  %v1049_v9 = vld [vmem:[#allocation2 + $0x12] sm:$0xff]  ;;  %v1051_v11 = vld [vmem:[#allocation2 + $0x22] sm:$0xff] }
  0x62   : > { %4707 = vmatprep.subr.bf16.mxu0 %v5205_v17 }
  0x65   : > { %4708 = vmatpush3.bf16.msra.mxu0 %v5205_v17  ;;  %v5210_v17 = vld [vmem:[%s5938_s3 + $0xb0] sm:$0xff]  }
  0x66   : > { %4430 = vmatmul.mubr.bf16.gmra.mrb[32].mxu1 %v579_v12  ;;  %4745 = vmatprep.subr.bf16.mxu0 %v5617_v63  ;;  %v2077_v12 = vld [vmem:[#allocation2 + $0x124] sm:$0xff] }
  0x67   : > { %4449 = vmatprep.mubr.bf16.mxu1 %v492_v36  ;;  %v5212_v36 = vld [vmem:[%s5938_s3 + $0xb8] sm:$0xff]   ;;  %v5666_v43 = vpack.c.bf16 %v2078_v22, %v2077_v12 }
  0x68   : > { %4674 = vmatmul.mubr.bf16.gmra.mrb[16].mxu0 %v5619_v25  ;;  %v5220_v12 = vld [vmem:[%s5938_s3 + $0xd8] sm:$0xff]  }
  0x69   : > { %4677 = vmatprep.mubr.bf16.mxu0 %v5621_v27  ;;  %v1058_v22 = vld [vmem:[#allocation2 + $0x5a] sm:$0xff] }
  0x6e   : > { %4450 = vmatmul.mubr.bf16.vlgmr.msra.gmra.mrb[0].mxu1 %v493_v34  ;;  %v502_v34 = vpack.c.bf16 %v477_v30, %v476_v29  ;;  %v1061_v29 = vld [vmem:[#allocation2 + $0x72] sm:$0xff]  ;;  %v1062_v30 = vld [vmem:[#allocation2 + $0x7a] sm:$0xff] }
  0x6f   : > { %4486 = vmatpush3.bf16.msra.mxu1 %v5563_v31  ;;  %4453 = vmatprep.mubr.bf16.mxu1 %v494_v38  ;;  %v2072_v31 = vld [vmem:[#allocation2 + $0xfc] sm:$0xff] }
  0x70   : > { %4487 = vmatprep.subr.bf16.mxu1 %v5200_v40  ;;  %4678 = vmatmul.mubr.bf16.gmra.mrb[20].mxu0 %v5629_v41  ;;  %v5644_v1 = vpack.c.bf16 %v2072_v31, %v2071_v61  ;;  %v480_v38 = vld [vmem:[#allocation2 + $0xc0] sm:$0xff] }
  0x71   : > { %4681 = vmatprep.mubr.bf16.mxu0 %v5631_v45  ;;  %v488_v61 = vld [vmem:[#allocation2 + $0x100] sm:$0xff] }
  0x73   : > { %4488 = vmatpush3.bf16.msra.mxu1 %v5200_v40  ;;  %v481_v40 = vld [vmem:[#allocation2 + $0xc8] sm:$0xff] }
  0x74   : > { %4489 = vmatprep.subr.bf16.mxu1 %v5202_v49  ;;  %v504_v47 = vpack.c.bf16 %v481_v40, %v480_v38  ;;  %v2707_v38 = vld [vmem:[#allocation2 + $0x25] sm:$0xff]  ;;  %v5228_v40 = vld [vmem:[%s5938_s3 + $0xf8] sm:$0xff]  }
  0x76   : > { %4454 = vmatmul.mubr.bf16.gmra.mrb[4].mxu1 %v495_v54  ;;  %v5215_v54 = vld [vmem:[%s5938_s3 + $0x1e0] sm:$0xff]  }
  0x77   : > { %4457 = vmatprep.mubr.bf16.mxu1 %v496_v57  ;;  %4490 = vmatpush3.bf16.msra.mxu1 %v5202_v49  ;;  %v485_v49 = vld [vmem:[#allocation2 + $0xe8] sm:$0xff]  ;;  %v487_v57 = vld [vmem:[#allocation2 + $0xf8] sm:$0xff] }
  0x78   : > { %4491 = vmatprep.subr.bf16.mxu1 %v5204_v59  ;;  %4682 = vmatmul.mubr.bf16.gmra.mrb[24].mxu0 %v5642_v62  ;;  %v507_v31 = vpack.c.bf16 %v487_v57, %v486_v56 }
  0x79   : > { %4685 = vmatprep.mubr.bf16.mxu0 %v5644_v1 }
  0x7b   : > { %4492 = vmatpush3.bf16.msra.mxu1 %v5204_v59 }
  0x7c   : > { %4493 = vmatprep.subr.bf16.mxu1 %v5206_v6 }
  0x7e   : > { %4458 = vmatmul.mubr.bf16.gmra.mrb[8].mxu1 %v497_v8  ;;  %v5709_v8 = vld [vmem:[%s5938_s3 + $0x200] sm:$0xff]  }
  0x7f   : > { %4461 = vmatprep.mubr.bf16.mxu1 %v498_v10  ;;  %4494 = vmatpush3.bf16.msra.mxu1 %v5206_v6  ;;  %v509_v6 = vpack.c.bf16 %v491_v4, %v490_v3  ;;  %v1050_v10 = vld [vmem:[#allocation2 + $0x1a] sm:$0xff] }
  0x80   : > { %4495 = vmatprep.subr.bf16.mxu1 %v5208_v58  ;;  %4686 = vmatmul.mubr.bf16.gmra.mrb[28].mxu0 %v5654_v13  ;;  %v2713_v3 = vld [vmem:[#allocation2 + $0x55] sm:$0xff]  ;;  %v2714_v4 = vld [vmem:[#allocation2 + $0x5d] sm:$0xff] }
  0x81   : > { %4689 = vmatprep.mubr.bf16.mxu0 %v5656_v15 }
  0x83   : > { %4496 = vmatpush3.bf16.msra.mxu1 %v5208_v58  ;;  %v5216_v58 = vld [vmem:[%s5938_s3 + $0xc8] sm:$0xff]  }
  0x84   : > { %4497 = vmatprep.subr.bf16.mxu1 %v5210_v17 }
  0x86   : > { %4462 = vmatmul.mubr.bf16.gmra.mrb[12].mxu1 %v499_v21  ;;  %v1057_v21 = vld [vmem:[#allocation2 + $0x52] sm:$0xff] }
  0x87   : > { %4465 = vmatprep.mubr.bf16.mxu1 %v500_v23  ;;  %4498 = vmatpush3.bf16.msra.mxu1 %v5210_v17  ;;  %v1060_v23 = vld [vmem:[#allocation2 + $0x6a] sm:$0xff] }
  0x88   : > { %4499 = vmatprep.subr.bf16.mxu1 %v5212_v36  ;;  %4690 = vmatmul.mubr.bf16.gmra.mrb[32].mxu0 %v5666_v43 }
  0x89   : > { %4709 = vmatprep.mubr.bf16.mxu0 %v5552_v24  ;;  %v503_v24 = vpack.c.bf16 %v479_v37, %v478_v35  ;;  %v2410_v35 = vld [vmem:[#allocation2 + $0x13c] sm:$0xff] }
  0x8b   : > { %4500 = vmatpush3.bf16.msra.mxu1 %v5212_v36  ;;  %v5743_v36 = vpack.c.bf16 %v1058_v22, %v1057_v21  ;;  %v5230_v21 = vld [vmem:[%s5938_s3 + $0x220] sm:$0xff]  }
  0x8c   : > { %4537 = vmatprep.subr.bf16.mxu1 %v5671_v32 }
  0x8e   : > { %4466 = vmatmul.mubr.bf16.gmra.mrb[16].mxu1 %v501_v33  ;;  %v5757_v33 = vpack.c.bf16 %v1062_v30, %v1061_v29  ;;  %v1079_v29 = vld [vmem:[#allocation2 + $0x102] sm:$0xff]  ;;  %v1080_v30 = vld [vmem:[#allocation2 + $0x10a] sm:$0xff] }
  0x8f   : > { %4469 = vmatprep.mubr.bf16.mxu1 %v502_v34  ;;  %v2409_v34 = vld [vmem:[#allocation2 + $0x134] sm:$0xff] }
  0x90   : > { %4710 = vmatmul.mubr.bf16.vlgmr.msra.gmra.mrb[0].mxu0 %v5555_v26  ;;  %v5213_v26 = vld [vmem:[%s5938_s3 + $0x1d8] sm:$0xff]  }
  0x91   : > { %4713 = vmatprep.mubr.bf16.mxu0 %v5571_v42  ;;  %4746 = vmatpush3.bf16.msra.mxu0 %v5617_v63  ;;  %v484_v42 = vld [vmem:[#allocation2 + $0xe0] sm:$0xff]  ;;  %v505_v63 = vpack.c.bf16 %v483_v52, %v482_v51  ;;  %v1068_v51 = vld [vmem:[#allocation2 + $0xaa] sm:$0xff] }
  0x92   : > { %4747 = vmatprep.subr.bf16.mxu0 %v5209_v39  ;;  %v506_v53 = vpack.c.bf16 %v485_v49, %v484_v42  ;;  %v2710_v42 = vld [vmem:[#allocation2 + $0x3d] sm:$0xff] }
  0x95   : > { %4748 = vmatpush3.bf16.msra.mxu0 %v5209_v39  ;;  %v2708_v39 = vld [vmem:[#allocation2 + $0x2d] sm:$0xff] }
  0x96   : > { %4470 = vmatmul.mubr.bf16.gmra.mrb[20].mxu1 %v503_v24  ;;  %4749 = vmatprep.subr.bf16.mxu0 %v5211_v48  ;;  %v2428_v24 = vpack.c.bf16 %v2410_v35, %v2409_v34  ;;  %v5808_v34 = vpack.c.bf16 %v1080_v30, %v1079_v29  ;;  %v2723_v35 = vld [vmem:[#allocation2 + $0xa5] sm:$0xff] }
  0x97   : > { %4473 = vmatprep.mubr.bf16.mxu1 %v504_v47  ;;  %v1066_v47 = vld [vmem:[#allocation2 + $0x9a] sm:$0xff]  ;;  %v3047_v30 = vld [vmem:[#allocation2 + $0x66] sm:$0xff] }
  0x98   : > { %4714 = vmatmul.mubr.bf16.gmra.mrb[4].mxu0 %v5573_v44  ;;  %v5217_v44 = vld [vmem:[%s5938_s3 + $0x1e8] sm:$0xff]   ;;  %v3046_v29 = vld [vmem:[#allocation2 + $0x5e] sm:$0xff] }
  0x99   : > { %4717 = vmatprep.mubr.bf16.mxu0 %v5587_v60  ;;  %4750 = vmatpush3.bf16.msra.mxu0 %v5211_v48  ;;  %v489_v60 = vld [vmem:[#allocation2 + $0x108] sm:$0xff] }
  0x9a   : > { %4751 = vmatprep.subr.bf16.mxu0 %v5213_v26  ;;  %v508_v59 = vpack.c.bf16 %v489_v60, %v488_v61  ;;  %v1067_v48 = vld [vmem:[#allocation2 + $0xa2] sm:$0xff]  ;;  %v1070_v61 = vld [vmem:[#allocation2 + $0xba] sm:$0xff] }
  0x9b   : > { %v5768_v49 = vpack.c.bf16 %v1068_v51, %v1067_v48  ;;  %v5225_v60 = vld [vmem:[%s5938_s3 + $0x208] sm:$0xff]   ;;  %v2725_v51 = vld [vmem:[#allocation2 + $0xb5] sm:$0xff] }
  0x9d   : > { %4752 = vmatpush3.bf16.msra.mxu0 %v5213_v26  ;;  %v2709_v26 = vld [vmem:[#allocation2 + $0x35] sm:$0xff] }
  0x9e   : > { %4474 = vmatmul.mubr.bf16.gmra.mrb[24].mxu1 %v505_v63  ;;  %4753 = vmatprep.subr.bf16.mxu0 %v5215_v54  ;;  %v2711_v63 = vld [vmem:[#allocation2 + $0x45] sm:$0xff]  ;;  %v2744_v56 = vpack.c.bf16 %v2710_v42, %v2709_v26  ;;  %v2726_v26 = vld [vmem:[#allocation2 + $0xbd] sm:$0xff] }
  0x9f   : > { %4477 = vmatprep.mubr.bf16.mxu1 %v506_v53  ;;  %v2712_v53 = vld [vmem:[#allocation2 + $0x4d] sm:$0xff]  ;;  %v2727_v42 = vld [vmem:[#allocation2 + $0xc5] sm:$0xff] }
  0xa0   : > { %4718 = vmatmul.mubr.bf16.gmra.mrb[8].mxu0 %v5589_v46  ;;  %v5221_v46 = vld [vmem:[%s5938_s3 + $0x1f8] sm:$0xff]   ;;  %v2745_v57 = vpack.c.bf16 %v2712_v53, %v2711_v63  ;;  %v2728_v63 = vld [vmem:[#allocation2 + $0xcd] sm:$0xff]  ;;  %v2752_v53 = vpack.c.bf16 %v2726_v26, %v2725_v51  ;;  %v1413_v26 = vld [vmem:[#allocation2 + $0x122] sm:$0xff] }
  0xa1   : > { %4721 = vmatprep.mubr.bf16.mxu0 %v5605_v18  ;;  %4754 = vmatpush3.bf16.msra.mxu0 %v5215_v54  ;;  %v1048_v18 = vld [vmem:[#allocation2 + $0xa] sm:$0xff]  ;;  %v5773_v54 = vld [vmem:[%s5938_s3 + $0x100] sm:$0xff]  }
  0xa2   : > { %4755 = vmatprep.subr.bf16.mxu0 %v5217_v44  ;;  %v1083_v7 = vpack.c.bf16 %v1048_v18, %v1047_v5  ;;  %v2715_v5 = vld [vmem:[#allocation2 + $0x65] sm:$0xff]  ;;  %v2716_v18 = vld [vmem:[#allocation2 + $0x6d] sm:$0xff] }
  0xa5   : > { %4756 = vmatpush3.bf16.msra.mxu0 %v5217_v44  ;;  %v1069_v44 = vld [vmem:[#allocation2 + $0xb2] sm:$0xff] }
  0xa6   : > { %4478 = vmatmul.mubr.bf16.gmra.mrb[28].mxu1 %v507_v31  ;;  %4757 = vmatprep.subr.bf16.mxu0 %v5219_v2  ;;  %v1071_v31 = vld [vmem:[#allocation2 + $0xc2] sm:$0xff] }
  0xa7   : > { %4481 = vmatprep.mubr.bf16.mxu1 %v508_v59  ;;  %v1072_v59 = vld [vmem:[#allocation2 + $0xca] sm:$0xff] }
  0xa8   : > { %4722 = vmatmul.mubr.bf16.gmra.mrb[12].mxu0 %v5607_v19  ;;  %v1052_v19 = vld [vmem:[#allocation2 + $0x2a] sm:$0xff] }
  0xa9   : > { %4725 = vmatprep.mubr.bf16.mxu0 %v5619_v25  ;;  %4758 = vmatpush3.bf16.msra.mxu0 %v5219_v2  ;;  %v5714_v25 = vpack.c.bf16 %v1050_v10, %v1049_v9  ;;  %v5716_v50 = vpack.c.bf16 %v1052_v19, %v1051_v11  ;;  %v5781_v2 = vpack.c.bf16 %v1070_v61, %v1069_v44  ;;  %v1073_v10 = vld [vmem:[#allocation2 + $0xd2] sm:$0xff]  ;;  %v1074_v11 = vld [vmem:[#allocation2 + $0xda] sm:$0xff]  ;;  %v1075_v19 = vld [vmem:[#allocation2 + $0xe2] sm:$0xff] }
  0xaa   : > { %4759 = vmatprep.subr.bf16.mxu0 %v5221_v46  ;;  %v2747_v9 = vpack.c.bf16 %v2716_v18, %v2715_v5  ;;  %v5794_v14 = vpack.c.bf16 %v1074_v11, %v1073_v10  ;;  %v2730_v44 = vld [vmem:[#allocation2 + $0xdd] sm:$0xff]  ;;  %v2731_v61 = vld [vmem:[#allocation2 + $0xe5] sm:$0xff]  ;;  %v2736_v18 = vld [vmem:[#allocation2 + $0x10d] sm:$0xff] }
  0xab   : > { %v2735_v5 = vld [vmem:[#allocation2 + $0x105] sm:$0xff]  ;;  %v2740_v11 = vld [vmem:[#allocation2 + $0x12d] sm:$0xff] }
  0xac   : > { %v2739_v10 = vld [vmem:[#allocation2 + $0x125] sm:$0xff] }
  0xad   : > { %4760 = vmatpush3.bf16.msra.mxu0 %v5221_v46  ;;  %v5784_v46 = vpack.c.bf16 %v1072_v59, %v1071_v31 }
  0xae   : > { %4482 = vmatmul.mubr.bf16.gmra.mrb[32].mxu1 %v509_v6  ;;  %4797 = vmatprep.subr.bf16.mxu0 %v5709_v8  ;;  %v5227_v6 = vld [vmem:[%s5938_s3 + $0x210] sm:$0xff]  }
  0xaf   : > { %4501 = vmatprep.mubr.bf16.mxu1 %v1083_v7  ;;  %v2746_v7 = vpack.c.bf16 %v2714_v4, %v2713_v3  ;;  %v5236_v3 = vld [vmem:[%s5938_s3 + $0x108] sm:$0xff]   ;;  %v2734_v4 = vld [vmem:[#allocation2 + $0xfd] sm:$0xff] }
  0xb0   : > { %4726 = vmatmul.mubr.bf16.gmra.mrb[16].mxu0 %v5621_v27  ;;  %v1055_v27 = vld [vmem:[#allocation2 + $0x42] sm:$0xff] }
  0xb1   : > { %4729 = vmatprep.mubr.bf16.mxu0 %v5629_v41  ;;  %v5218_v41 = vld [vmem:[%s5938_s3 + $0xd0] sm:$0xff]   ;;  %v5731_v17 = vpack.c.bf16 %v1056_v20, %v1055_v27  ;;  %v2718_v27 = vld [vmem:[#allocation2 + $0x7d] sm:$0xff] }
  0xb2   : > { %v2748_v22 = vpack.c.bf16 %v2718_v27, %v2717_v16  ;;  %v2742_v16 = vld [vmem:[#allocation2 + $0x13d] sm:$0xff]  ;;  %v3039_v27 = vld [vmem:[#allocation2 + $0x26] sm:$0xff] }
  0xb6   : > { %4502 = vmatmul.mubr.bf16.vlgmr.msra.gmra.mrb[0].mxu1 %v5714_v25 }
  0xb7   : > { %4538 = vmatpush3.bf16.msra.mxu1 %v5671_v32  ;;  %4505 = vmatprep.mubr.bf16.mxu1 %v5716_v50  ;;  %v1064_v32 = vld [vmem:[#allocation2 + $0x8a] sm:$0xff] }
  0xb8   : > { %4539 = vmatprep.subr.bf16.mxu1 %v5216_v58  ;;  %4730 = vmatmul.mubr.bf16.gmra.mrb[20].mxu0 %v5631_v45  ;;  %v1059_v45 = vld [vmem:[#allocation2 + $0x62] sm:$0xff] }
  0xb9   : > { %4733 = vmatprep.mubr.bf16.mxu0 %v5642_v62  ;;  %v5222_v62 = vld [vmem:[%s5938_s3 + $0xe0] sm:$0xff]   ;;  %v5745_v55 = vpack.c.bf16 %v1060_v23, %v1059_v45  ;;  %v1077_v23 = vld [vmem:[#allocation2 + $0xf2] sm:$0xff] }
  0xbb   : > { %4540 = vmatpush3.bf16.msra.mxu1 %v5216_v58  ;;  %v1076_v58 = vld [vmem:[#allocation2 + $0xea] sm:$0xff] }
  0xbc   : > { %4541 = vmatprep.subr.bf16.mxu1 %v5218_v41  ;;  %v5796_v20 = vpack.c.bf16 %v1076_v58, %v1075_v19  ;;  %v5240_v19 = vld [vmem:[%s5938_s3 + $0x128] sm:$0xff]   ;;  %v2741_v58 = vld [vmem:[#allocation2 + $0x135] sm:$0xff] }
  0xbe   : > { %4506 = vmatmul.mubr.bf16.gmra.mrb[4].mxu1 %v5729_v0 }
  0xbf   : > { %4509 = vmatprep.mubr.bf16.mxu1 %v5731_v17  ;;  %4542 = vmatpush3.bf16.msra.mxu1 %v5218_v41  ;;  %v2719_v41 = vld [vmem:[#allocation2 + $0x85] sm:$0xff] }
  0xc0   : > { %4543 = vmatprep.subr.bf16.mxu1 %v5220_v12  ;;  %4734 = vmatmul.mubr.bf16.gmra.mrb[24].mxu0 %v5644_v1  ;;  %v1063_v1 = vld [vmem:[#allocation2 + $0x82] sm:$0xff] }
  0xc1   : > { %4737 = vmatprep.mubr.bf16.mxu0 %v5654_v13  ;;  %v5226_v13 = vld [vmem:[%s5938_s3 + $0xf0] sm:$0xff]   ;;  %v5759_v37 = vpack.c.bf16 %v1064_v32, %v1063_v1 }
  0xc2   : > { %v2721_v32 = vld [vmem:[#allocation2 + $0x95] sm:$0xff] }
  0xc3   : > { %4544 = vmatpush3.bf16.msra.mxu1 %v5220_v12  ;;  %v2720_v12 = vld [vmem:[#allocation2 + $0x8d] sm:$0xff] }
  0xc4   : > { %4545 = vmatprep.subr.bf16.mxu1 %v5222_v62  ;;  %v2749_v45 = vpack.c.bf16 %v2720_v12, %v2719_v41  ;;  %v3040_v41 = vld [vmem:[#allocation2 + $0x2e] sm:$0xff]  ;;  %v2760_v12 = vpack.c.bf16 %v2742_v16, %v2741_v58  ;;  %v3067_v58 = vld [vmem:[#allocation2 + $0x106] sm:$0xff] }
  0xc5   : > { %v3068_v16 = vld [vmem:[#allocation2 + $0x10e] sm:$0xff] }
  0xc6   : > { %4510 = vmatmul.mubr.bf16.gmra.mrb[8].mxu1 %v5743_v36 }
  0xc7   : > { %4513 = vmatprep.mubr.bf16.mxu1 %v5745_v55  ;;  %4546 = vmatpush3.bf16.msra.mxu1 %v5222_v62  ;;  %v1078_v62 = vld [vmem:[#allocation2 + $0xfa] sm:$0xff] }
  0xc8   : > { %4547 = vmatprep.subr.bf16.mxu1 %v5224_v28  ;;  %4738 = vmatmul.mubr.bf16.gmra.mrb[28].mxu0 %v5656_v15  ;;  %v2743_v15 = vpack.c.bf16 %v2708_v39, %v2707_v38  ;;  %v5806_v1 = vpack.c.bf16 %v1078_v62, %v1077_v23  ;;  %v2724_v38 = vld [vmem:[#allocation2 + $0xad] sm:$0xff] }
  0xc9   : > { %4741 = vmatprep.mubr.bf16.mxu0 %v5666_v43  ;;  %v1065_v43 = vld [vmem:[#allocation2 + $0x92] sm:$0xff]  ;;  %v3043_v23 = vld [vmem:[#allocation2 + $0x46] sm:$0xff] }
  0xca   : > { %v5766_v52 = vpack.c.bf16 %v1066_v47, %v1065_v43  ;;  %v5232_v39 = vld [vmem:[%s5938_s3 + $0x230] sm:$0xff]   ;;  %v1082_v43 = vld [vmem:[#allocation2 + $0x11a] sm:$0xff] }
  0xcb   : > { %4548 = vmatpush3.bf16.msra.mxu1 %v5224_v28  ;;  %v5231_v28 = vld [vmem:[%s5938_s3 + $0x228] sm:$0xff]   ;;  %v5233_v47 = vld [vmem:[%s5938_s3 + $0x238] sm:$0xff]  }
  0xcc   : > { %4549 = vmatprep.subr.bf16.mxu1 %v5226_v13  ;;  %v3044_v62 = vld [vmem:[#allocation2 + $0x4e] sm:$0xff] }
  0xce   : > { %4514 = vmatmul.mubr.bf16.gmra.mrb[12].mxu1 %v5757_v33 }
  0xcf   : > { %4517 = vmatprep.mubr.bf16.mxu1 %v5759_v37  ;;  %4550 = vmatpush3.bf16.msra.mxu1 %v5226_v13  ;;  %v2722_v13 = vld [vmem:[#allocation2 + $0x9d] sm:$0xff] }
  0xd0   : > { %4551 = vmatprep.subr.bf16.mxu1 %v5228_v40  ;;  %4742 = vmatmul.mubr.bf16.gmra.mrb[32].mxu0 %v2428_v24  ;;  %v2751_v24 = vpack.c.bf16 %v2724_v38, %v2723_v35  ;;  %v3049_v38 = vld [vmem:[#allocation2 + $0x76] sm:$0xff] }
  0xd1   : > { %4761 = vmatprep.mubr.bf16.mxu0 %v2743_v15  ;;  %v1081_v15 = vld [vmem:[#allocation2 + $0x112] sm:$0xff] }
  0xd2   : > { %v5818_v48 = vpack.c.bf16 %v1082_v43, %v1081_v15  ;;  %v3053_v15 = vld [vmem:[#allocation2 + $0x96] sm:$0xff]  ;;  %v3054_v43 = vld [vmem:[#allocation2 + $0x9e] sm:$0xff] }
  0xd3   : > { %4552 = vmatpush3.bf16.msra.mxu1 %v5228_v40  ;;  %v2750_v40 = vpack.c.bf16 %v2722_v13, %v2721_v32  ;;  %v3048_v32 = vld [vmem:[#allocation2 + $0x6e] sm:$0xff]  ;;  %v3082_v51 = vpack.c.bf16 %v3054_v43, %v3053_v15 }
  0xd4   : > { %4849 = vmatprep.subr.bf16.mxu1 %v5773_v54  ;;  %v3079_v35 = vpack.c.bf16 %v3048_v32, %v3047_v30  ;;  %v1741_v30 = vld [vmem:[#allocation2 + $0x103] sm:$0xff]  ;;  %v1742_v32 = vld [vmem:[#allocation2 + $0x10b] sm:$0xff] }
  0xd5   : > { %v1746_v15 = vld [vmem:[#allocation2 + $0x12b] sm:$0xff] }
  0xd6   : > { %4518 = vmatmul.mubr.bf16.gmra.mrb[16].mxu1 %v5766_v52 }
  0xd7   : > { %4521 = vmatprep.mubr.bf16.mxu1 %v5768_v49 }
  0xd8   : > { %4762 = vmatmul.mubr.bf16.vlgmr.msra.gmra.mrb[0].mxu0 %v2744_v56  ;;  %v2753_v56 = vpack.c.bf16 %v2728_v63, %v2727_v42  ;;  %v1414_v42 = vld [vmem:[#allocation2 + $0x12a] sm:$0xff]  ;;  %v1727_v63 = vld [vmem:[#allocation2 + $0x93] sm:$0xff] }
  0xd9   : > { %4765 = vmatprep.mubr.bf16.mxu0 %v2745_v57  ;;  %4798 = vmatpush3.bf16.msra.mxu0 %v5709_v8  ;;  %v5229_v8 = vld [vmem:[%s5938_s3 + $0x218] sm:$0xff]  }
  0xda   : > { %4799 = vmatprep.subr.bf16.mxu0 %v5225_v60  ;;  %v2729_v57 = vld [vmem:[#allocation2 + $0xd5] sm:$0xff] }
  0xdb   : > { %v2754_v31 = vpack.c.bf16 %v2730_v44, %v2729_v57  ;;  %v3059_v44 = vld [vmem:[#allocation2 + $0xc6] sm:$0xff] }
  0xdd   : > { %4800 = vmatpush3.bf16.msra.mxu0 %v5225_v60  ;;  %v2732_v60 = vld [vmem:[#allocation2 + $0xed] sm:$0xff] }
  0xde   : > { %4522 = vmatmul.mubr.bf16.gmra.mrb[20].mxu1 %v5781_v2  ;;  %4801 = vmatprep.subr.bf16.mxu0 %v5227_v6  ;;  %v2755_v59 = vpack.c.bf16 %v2732_v60, %v2731_v61  ;;  %v3060_v61 = vld [vmem:[#allocation2 + $0xce] sm:$0xff] }
  0xdf   : > { %4525 = vmatprep.mubr.bf16.mxu1 %v5784_v46 }
  0xe0   : > { %4766 = vmatmul.mubr.bf16.gmra.mrb[4].mxu0 %v2746_v7  ;;  %v2737_v7 = vld [vmem:[#allocation2 + $0x115] sm:$0xff] }
  0xe1   : > { %4769 = vmatprep.mubr.bf16.mxu0 %v2747_v9  ;;  %4802 = vmatpush3.bf16.msra.mxu0 %v5227_v6  ;;  %v5238_v6 = vld [vmem:[%s5938_s3 + $0x118] sm:$0xff]  }
  0xe2   : > { %4803 = vmatprep.subr.bf16.mxu0 %v5229_v8  ;;  %v2738_v9 = vld [vmem:[#allocation2 + $0x11d] sm:$0xff] }
  0xe5   : > { %4804 = vmatpush3.bf16.msra.mxu0 %v5229_v8  ;;  %v2758_v8 = vpack.c.bf16 %v2738_v9, %v2737_v7  ;;  %v1733_v7 = vld [vmem:[#allocation2 + $0xc3] sm:$0xff]  ;;  %v1734_v9 = vld [vmem:[#allocation2 + $0xcb] sm:$0xff] }
  0xe6   : > { %4526 = vmatmul.mubr.bf16.gmra.mrb[24].mxu1 %v5794_v14  ;;  %4805 = vmatprep.subr.bf16.mxu0 %v5230_v21 }
  0xe7   : > { %4529 = vmatprep.mubr.bf16.mxu1 %v5796_v20 }
  0xe8   : > { %4770 = vmatmul.mubr.bf16.gmra.mrb[8].mxu0 %v2748_v22  ;;  %v3041_v22 = vld [vmem:[#allocation2 + $0x36] sm:$0xff] }
  0xe9   : > { %4773 = vmatprep.mubr.bf16.mxu0 %v2749_v45  ;;  %4806 = vmatpush3.bf16.msra.mxu0 %v5230_v21  ;;  %v5242_v21 = vld [vmem:[%s5938_s3 + $0x138] sm:$0xff]  }
  0xea   : > { %4807 = vmatprep.subr.bf16.mxu0 %v5231_v28  ;;  %v3042_v45 = vld [vmem:[#allocation2 + $0x3e] sm:$0xff] }
  0xed   : > { %4808 = vmatpush3.bf16.msra.mxu0 %v5231_v28  ;;  %v3076_v28 = vpack.c.bf16 %v3042_v45, %v3041_v22  ;;  %v3069_v45 = vld [vmem:[#allocation2 + $0x116] sm:$0xff] }
  0xee   : > { %4530 = vmatmul.mubr.bf16.gmra.mrb[28].mxu1 %v5806_v1  ;;  %4809 = vmatprep.subr.bf16.mxu0 %v5232_v39 }
  0xef   : > { %4533 = vmatprep.mubr.bf16.mxu1 %v5808_v34 }
  0xf0   : > { %4774 = vmatmul.mubr.bf16.gmra.mrb[12].mxu0 %v2750_v40  ;;  %v3052_v40 = vld [vmem:[#allocation2 + $0x8e] sm:$0xff] }
  0xf1   : > { %4777 = vmatprep.mubr.bf16.mxu0 %v2751_v24  ;;  %4810 = vmatpush3.bf16.msra.mxu0 %v5232_v39  ;;  %v3050_v39 = vld [vmem:[#allocation2 + $0x7e] sm:$0xff] }
  0xf2   : > { %4811 = vmatprep.subr.bf16.mxu0 %v5233_v47  ;;  %v3080_v24 = vpack.c.bf16 %v3050_v39, %v3049_v38  ;;  %v1762_v38 = vpack.c.bf16 %v1742_v32, %v1741_v30  ;;  %v3073_v39 = vld [vmem:[#allocation2 + $0x136] sm:$0xff] }
  0xf5   : > { %4812 = vmatpush3.bf16.msra.mxu0 %v5233_v47  ;;  %v3056_v47 = vld [vmem:[#allocation2 + $0xae] sm:$0xff] }
  0xf6   : > { %4534 = vmatmul.mubr.bf16.gmra.mrb[32].mxu1 %v5818_v48 }
  0xf7   : > { %4553 = vmatprep.mubr.bf16.mxu1 %v5714_v25  ;;  %v2733_v25 = vld [vmem:[#allocation2 + $0xf5] sm:$0xff] }
  0xf8   : > { %4778 = vmatmul.mubr.bf16.gmra.mrb[16].mxu0 %v2752_v53  ;;  %v1728_v53 = vld [vmem:[#allocation2 + $0x9b] sm:$0xff] }
  0xf9   : > { %4781 = vmatprep.mubr.bf16.mxu0 %v2753_v56  ;;  %v3058_v56 = vld [vmem:[#allocation2 + $0xbe] sm:$0xff]  ;;  %v1755_v57 = vpack.c.bf16 %v1728_v53, %v1727_v63 }
  0xfe   : > { %4554 = vmatmul.mubr.bf16.vlgmr.msra.gmra.mrb[0].mxu1 %v5716_v50  ;;  %v5237_v50 = vld [vmem:[%s5938_s3 + $0x110] sm:$0xff]  }
  0xff   : > { %4857 = vmatpush3.bf16.msra.mxu1 %v5773_v54  ;;  %4557 = vmatprep.mubr.bf16.mxu1 %v5729_v0  ;;  %v2756_v54 = vpack.c.bf16 %v2734_v4, %v2733_v25  ;;  %v2757_v0 = vpack.c.bf16 %v2736_v18, %v2735_v5  ;;  %v3061_v4 = vld [vmem:[#allocation2 + $0xd6] sm:$0xff]  ;;  %v3062_v5 = vld [vmem:[#allocation2 + $0xde] sm:$0xff] }
 0x100   : > { %4850 = vmatprep.subr.bf16.mxu1 %v5236_v3  ;;  %4782 = vmatmul.mubr.bf16.gmra.mrb[20].mxu0 %v2754_v31  ;;  %v3085_v31 = vpack.c.bf16 %v3060_v61, %v3059_v44 }
 0x101   : > { %4785 = vmatprep.mubr.bf16.mxu0 %v2755_v59  ;;  %v1730_v59 = vld [vmem:[#allocation2 + $0xab] sm:$0xff] }
 0x103   : > { %4858 = vmatpush3.bf16.msra.mxu1 %v5236_v3  ;;  %v1731_v3 = vld [vmem:[#allocation2 + $0xb3] sm:$0xff] }
 0x104   : > { %4851 = vmatprep.subr.bf16.mxu1 %v5237_v50 }
 0x106   : > { %4558 = vmatmul.mubr.bf16.gmra.mrb[4].mxu1 %v5731_v17  ;;  %v5239_v17 = vld [vmem:[%s5938_s3 + $0x120] sm:$0xff]  }
 0x107   : > { %4561 = vmatprep.mubr.bf16.mxu1 %v5743_v36  ;;  %4859 = vmatpush3.bf16.msra.mxu1 %v5237_v50  ;;  %v2759_v36 = vpack.c.bf16 %v2740_v11, %v2739_v10  ;;  %v3063_v50 = vld [vmem:[#allocation2 + $0xe6] sm:$0xff]  ;;  %v1735_v10 = vld [vmem:[#allocation2 + $0xd3] sm:$0xff]  ;;  %v1736_v11 = vld [vmem:[#allocation2 + $0xdb] sm:$0xff] }
 0x108   : > { %4852 = vmatprep.subr.bf16.mxu1 %v5238_v6  ;;  %4786 = vmatmul.mubr.bf16.gmra.mrb[24].mxu0 %v2756_v54  ;;  %v3064_v54 = vld [vmem:[#allocation2 + $0xee] sm:$0xff] }
 0x109   : > { %4789 = vmatprep.mubr.bf16.mxu0 %v2757_v0  ;;  %v3086_v0 = vpack.c.bf16 %v3062_v5, %v3061_v4 }
 0x10b   : > { %4860 = vmatpush3.bf16.msra.mxu1 %v5238_v6  ;;  %v3087_v6 = vpack.c.bf16 %v3064_v54, %v3063_v50 }
 0x10c   : > { %4853 = vmatprep.subr.bf16.mxu1 %v5239_v17 }
 0x10e   : > { %4562 = vmatmul.mubr.bf16.gmra.mrb[8].mxu1 %v5745_v55  ;;  %v5241_v55 = vld [vmem:[%s5938_s3 + $0x130] sm:$0xff]  }
 0x10f   : > { %4565 = vmatprep.mubr.bf16.mxu1 %v5757_v33  ;;  %4861 = vmatpush3.bf16.msra.mxu1 %v5239_v17  ;;  %v3075_v33 = vpack.c.bf16 %v3040_v41, %v3039_v27  ;;  %v1758_v17 = vpack.c.bf16 %v1734_v9, %v1733_v7  ;;  %v3089_v41 = vpack.c.bf16 %v3068_v16, %v3067_v58 }
 0x110   : > { %4854 = vmatprep.subr.bf16.mxu1 %v5240_v19  ;;  %4790 = vmatmul.mubr.bf16.gmra.mrb[28].mxu0 %v2758_v8  ;;  %v3065_v8 = vld [vmem:[#allocation2 + $0xf6] sm:$0xff] }
 0x111   : > { %4793 = vmatprep.mubr.bf16.mxu0 %v2759_v36  ;;  %v3066_v36 = vld [vmem:[#allocation2 + $0xfe] sm:$0xff] }
 0x112   : > { %v3088_v27 = vpack.c.bf16 %v3066_v36, %v3065_v8 }
 0x113   : > { %4862 = vmatpush3.bf16.msra.mxu1 %v5240_v19  ;;  %v1759_v19 = vpack.c.bf16 %v1736_v11, %v1735_v10 }
 0x114   : > { %4855 = vmatprep.subr.bf16.mxu1 %v5241_v55 }
 0x116   : > { %4566 = vmatmul.mubr.bf16.gmra.mrb[12].mxu1 %v5759_v37  ;;  %v3077_v37 = vpack.c.bf16 %v3044_v62, %v3043_v23  ;;  %v3070_v23 = vld [vmem:[#allocation2 + $0x11e] sm:$0xff] }
 0x117   : > { %4569 = vmatprep.mubr.bf16.mxu1 %v5766_v52  ;;  %4863 = vmatpush3.bf16.msra.mxu1 %v5241_v55  ;;  %v3045_v52 = vld [vmem:[#allocation2 + $0x56] sm:$0xff]  ;;  %v1737_v55 = vld [vmem:[#allocation2 + $0xe3] sm:$0xff] }
 0x118   : > { %4856 = vmatprep.subr.bf16.mxu1 %v5242_v21  ;;  %4794 = vmatmul.mubr.bf16.gmra.mrb[32].mxu0 %v2760_v12  ;;  %v3078_v13 = vpack.c.bf16 %v3046_v29, %v3045_v52  ;;  %v1738_v12 = vld [vmem:[#allocation2 + $0xeb] sm:$0xff]  ;;  %v3090_v52 = vpack.c.bf16 %v3070_v23, %v3069_v45 }
 0x119   : > { %4813 = vmatprep.mubr.bf16.mxu0 %v3075_v33  ;;  %v1739_v33 = vld [vmem:[#allocation2 + $0xf3] sm:$0xff]  ;;  %v1760_v22 = vpack.c.bf16 %v1738_v12, %v1737_v55 }
 0x11b   : > { %4864 = vmatpush3.bf16.msra.mxu1 %v5242_v21  ;;  %v1740_v21 = vld [vmem:[#allocation2 + $0xfb] sm:$0xff] }
 0x11c   : > { %v1761_v62 = vpack.c.bf16 %v1740_v21, %v1739_v33 }
 0x11e   : > { %4570 = vmatmul.mubr.bf16.gmra.mrb[16].mxu1 %v5768_v49  ;;  %v3051_v49 = vld [vmem:[#allocation2 + $0x86] sm:$0xff] }
 0x11f   : > { %4573 = vmatprep.mubr.bf16.mxu1 %v5781_v2  ;;  %v3081_v2 = vpack.c.bf16 %v3052_v40, %v3051_v49  ;;  %v3074_v49 = vld [vmem:[#allocation2 + $0x13e] sm:$0xff] }
 0x120   : > { %4814 = vmatmul.mubr.bf16.vlgmr.msra.gmra.mrb[0].mxu0 %v3076_v28  ;;  %v3071_v28 = vld [vmem:[#allocation2 + $0x126] sm:$0xff] }
 0x121   : > { %4817 = vmatprep.mubr.bf16.mxu0 %v3077_v37  ;;  %v3072_v37 = vld [vmem:[#allocation2 + $0x12e] sm:$0xff] }
 0x122   : > { %v3091_v29 = vpack.c.bf16 %v3072_v37, %v3071_v28 }
 0x126   : > { %4574 = vmatmul.mubr.bf16.gmra.mrb[20].mxu1 %v5784_v46  ;;  %v3055_v46 = vld [vmem:[#allocation2 + $0xa6] sm:$0xff] }
 0x127   : > { %4577 = vmatprep.mubr.bf16.mxu1 %v5794_v14  ;;  %v3083_v14 = vpack.c.bf16 %v3056_v47, %v3055_v46 }
 0x128   : > { %4818 = vmatmul.mubr.bf16.gmra.mrb[4].mxu0 %v3078_v13  ;;  %v1743_v13 = vld [vmem:[#allocation2 + $0x113] sm:$0xff] }
 0x129   : > { %4821 = vmatprep.mubr.bf16.mxu0 %v3079_v35  ;;  %v1744_v35 = vld [vmem:[#allocation2 + $0x11b] sm:$0xff] }
 0x12a   : > { %v1763_v40 = vpack.c.bf16 %v1744_v35, %v1743_v13 }
 0x12e   : > { %4578 = vmatmul.mubr.bf16.gmra.mrb[24].mxu1 %v5796_v20  ;;  %v1432_v20 = vpack.c.bf16 %v1414_v42, %v1413_v26 }
 0x12f   : > { %4581 = vmatprep.mubr.bf16.mxu1 %v5806_v1  ;;  %v3057_v1 = vld [vmem:[#allocation2 + $0xb6] sm:$0xff] }
 0x130   : > { %4822 = vmatmul.mubr.bf16.gmra.mrb[8].mxu0 %v3080_v24  ;;  %v3084_v60 = vpack.c.bf16 %v3058_v56, %v3057_v1  ;;  %v3092_v24 = vpack.c.bf16 %v3074_v49, %v3073_v39 }
 0x131   : > { %4825 = vmatprep.mubr.bf16.mxu0 %v3081_v2  ;;  %v1745_v2 = vld [vmem:[#allocation2 + $0x123] sm:$0xff] }
 0x132   : > { %v1764_v43 = vpack.c.bf16 %v1746_v15, %v1745_v2 }
 0x136   : > { %4582 = vmatmul.mubr.bf16.gmra.mrb[28].mxu1 %v5808_v34  ;;  %v1729_v34 = vld [vmem:[#allocation2 + $0xa3] sm:$0xff] }
 0x137   : > { %4585 = vmatprep.mubr.bf16.mxu1 %v5818_v48  ;;  %v1732_v48 = vld [vmem:[#allocation2 + $0xbb] sm:$0xff]  ;;  %v1756_v25 = vpack.c.bf16 %v1730_v59, %v1729_v34 }
 0x138   : > { %4826 = vmatmul.mubr.bf16.gmra.mrb[12].mxu0 %v3082_v51  ;;  %v1757_v18 = vpack.c.bf16 %v1732_v48, %v1731_v3  ;;  %v5869_v59 = vld [vmem:[%s5939_s4] ss:$0 sm:$0xff] }
 0x139   : > { %4829 = vmatprep.mubr.bf16.mxu0 %v3083_v14 }
 0x13e   : > { %4586 = vmatmul.mubr.bf16.gmra.mrb[32].mxu1 %v1432_v20 }
 0x13f   : > { %4621 = vmatprep.mubr.bf16.mxu1 %v1755_v57 }
 0x140   : > { %4830 = vmatmul.mubr.bf16.gmra.mrb[16].mxu0 %v3084_v60 }
 0x141   : > { %4833 = vmatprep.mubr.bf16.mxu0 %v3085_v31 }
 0x146   : > { %4622 = vmatmul.mubr.bf16.vlgmr.msra.gmra.mrb[16].mxu1 %v1756_v25 }
 0x147   : > { %4625 = vmatprep.mubr.bf16.mxu1 %v1757_v18 }
 0x148   : > { %4834 = vmatmul.mubr.bf16.gmra.mrb[20].mxu0 %v3086_v0 }
 0x149   : > { %4837 = vmatprep.mubr.bf16.mxu0 %v3087_v6 }
 0x14e   : > { %4626 = vmatmul.mubr.bf16.gmra.mrb[20].mxu1 %v1758_v17 }
 0x14f   : > { %4629 = vmatprep.mubr.bf16.mxu1 %v1759_v19 }
 0x150   : > { %4838 = vmatmul.mubr.bf16.gmra.mrb[24].mxu0 %v3088_v27 }
 0x151   : > { %4841 = vmatprep.mubr.bf16.mxu0 %v3089_v41 }
 0x156   : > { %4630 = vmatmul.mubr.bf16.gmra.mrb[24].mxu1 %v1760_v22 }
 0x157   : > { %4633 = vmatprep.mubr.bf16.mxu1 %v1761_v62 }
 0x158   : > { %4842 = vmatmul.mubr.bf16.gmra.mrb[28].mxu0 %v3090_v52 }
 0x159   : > { %4845 = vmatprep.mubr.bf16.mxu0 %v3091_v29 }
 0x15e   : > { %4634 = vmatmul.mubr.bf16.gmra.mrb[28].mxu1 %v1762_v38 }
 0x15f   : > { %4637 = vmatprep.mubr.bf16.mxu1 %v1763_v40 }
 0x160   : > { %4846 = vmatmul.mubr.bf16.gmra.mrb[32].mxu0 %v3092_v24 }
 0x166   : > { %4638 = vmatmul.mubr.bf16.gmra.mrb[32].mxu1 %v1764_v43 }
 0x1d1   : > { %v4555_v46 = vpop.f32.mrb[0].mxu1 }
 0x1d2   : > { %v1532_v47 = vpop.f32.mrb[1].mxu1 }
 0x1d3   : > { %v4556_v51 = vpop.f32.mrb[2].mxu1 }
 0x1d4   : > { %v1535_v14 = vpop.f32.mrb[3].mxu1 }
 0x1d9   : > { %v4559_v26 = vpop.f32.mrb[4].mxu1 }
 0x1da   : > { %v1548_v42 = vpop.f32.mrb[5].mxu1 }
 0x1db   : > { %v4560_v63 = vpop.f32.mrb[6].mxu1 }
 0x1dc   : > { %v1551_v53 = vpop.f32.mrb[7].mxu1 }
 0x1e1   : > { %v4563_v20 = vpop.f32.mrb[8].mxu1 }
 0x1e2   : > { %v1564_v1 = vpop.f32.mrb[9].mxu1 }
 0x1e3   : > { %v4564_v56 = vpop.f32.mrb[10].mxu1 }
 0x1e4   : > { %v1567_v57 = vpop.f32.mrb[11].mxu1 }
 0x1e9   : > { %v4567_v44 = vpop.f32.mrb[12].mxu1 }
 0x1ea   : > { %v5860_v61 = vpop.f32.mrb[13].mxu1 }
 0x1eb   : > { %v5862_v60 = vpop.f32.mrb[14].mxu1 }
 0x1ec   : > { %v5864_v31 = vpop.f32.mrb[15].mxu1 }
 0x1f3   : > { %v4815_v34 = vpop.f32.mrb[0].mxu0 }
 0x1f4   : > { %v4865_v3 = vadd.f32 %v4815_v34, %v4555_v46  ;;  %v3192_v48 = vpop.f32.mrb[1].mxu0 }
 0x1f5   : > { %v4866_v25 = vadd.f32 %v3192_v48, %v1532_v47  ;;  %v4816_v4 = vpop.f32.mrb[2].mxu0 }
 0x1f6   : > { %v3380_v5 = vadd.f32 %v4865_v3, %v5869_v59  ;;  %v4867_v18 = vadd.f32 %v4816_v4, %v4556_v51  ;;  %v3195_v50 = vpop.f32.mrb[3].mxu0 }
 0x1f7   : > { %v3378_v54 = vadd.f32 %v4866_v25, %v5869_v59  ;;  %v4868_v0 = vadd.f32 %v3195_v50, %v1535_v14 }
 0x1f8   : > { %3416 = vst [vmem:[#allocation3 + $0x10] sm:$0xff] %v3380_v5  ;;  %v3381_v6 = vadd.f32 %v4867_v18, %v5869_v59 }
 0x1f9   : > { %v3379_v7 = vadd.f32 %v4868_v0, %v5869_v59 }
 0x1fa   : > { %3417 = vst [vmem:[#allocation3 + $0x18] sm:$0xff] %v3381_v6 }
 0x1fb   : > { %v4055_v9 = vpack.c.bf16 %v3379_v7, %v3378_v54  ;;  %v4819_v10 = vpop.f32.mrb[4].mxu0 }
 0x1fc   : > { %v4869_v11 = vadd.f32 %v4819_v10, %v4559_v26  ;;  %v3208_v17 = vpop.f32.mrb[5].mxu0 }
 0x1fd   : > { %4056 = vst [vmem:[%s5879_s9] sm:$0xff] %v4055_v9   ;;  %v4870_v8 = vadd.f32 %v3208_v17, %v1548_v42  ;;  %v4820_v36 = vpop.f32.mrb[6].mxu0 }
 0x1fe   : > { %v3384_v19 = vadd.f32 %v4869_v11, %v5869_v59  ;;  %v4871_v58 = vadd.f32 %v4820_v36, %v4560_v63  ;;  %v3211_v16 = vpop.f32.mrb[7].mxu0 }
 0x1ff   : > { %v3382_v27 = vadd.f32 %v4870_v8, %v5869_v59  ;;  %v4872_v41 = vadd.f32 %v3211_v16, %v1551_v53 }
 0x200   : > { %3420 = vst [vmem:[#allocation3 + $0x30] sm:$0xff] %v3384_v19  ;;  %v3385_v55 = vadd.f32 %v4871_v58, %v5869_v59 }
 0x201   : > { %3418 = vst [vmem:[#allocation3 + $0x20] sm:$0xff] %v3382_v27  ;;  %v3383_v12 = vadd.f32 %v4872_v41, %v5869_v59  ;;  %v3462_v30 = vld [vmem:[#allocation3 + $0x12] sm:$0xff] }
 0x202   : > { %3421 = vst [vmem:[#allocation3 + $0x38] sm:$0xff] %v3385_v55 }
 0x203   : > { %3419 = vst [vmem:[#allocation3 + $0x28] sm:$0xff] %v3383_v12  ;;  %v4823_v33 = vpop.f32.mrb[8].mxu0 }
 0x204   : > { %v4873_v21 = vadd.f32 %v4823_v33, %v4563_v20  ;;  %v3224_v22 = vpop.f32.mrb[9].mxu0 }
 0x205   : > { %v4874_v45 = vadd.f32 %v3224_v22, %v1564_v1  ;;  %v4824_v23 = vpop.f32.mrb[10].mxu0 }
 0x206   : > { %v3388_v62 = vadd.f32 %v4873_v21, %v5869_v59  ;;  %v4875_v28 = vadd.f32 %v4824_v23, %v4564_v56  ;;  %v3227_v37 = vpop.f32.mrb[11].mxu0 }
 0x207   : > { %v3386_v52 = vadd.f32 %v4874_v45, %v5869_v59  ;;  %v4876_v29 = vadd.f32 %v3227_v37, %v1567_v57 }
 0x208   : > { %v3463_v32 = vld [vmem:[#allocation3 + $0x1a] sm:$0xff]  ;;  %v3389_v13 = vadd.f32 %v4875_v28, %v5869_v59 }
 0x209   : > { %v4060_v35 = vpack.c.bf16 %v3463_v32, %v3462_v30  ;;  %3422 = vst [vmem:[#allocation3 + $0x40] sm:$0xff] %v3386_v52  ;;  %v3387_v38 = vadd.f32 %v4876_v29, %v5869_v59  ;;  %v3488_v53 = vld [vmem:[#allocation3 + $0x36] sm:$0xff] }
 0x20a   : > { %v3475_v39 = vld [vmem:[#allocation3 + $0x24] sm:$0xff]  ;;  %v3476_v49 = vld [vmem:[#allocation3 + $0x2c] sm:$0xff]  ;;  %3425 = vst [vmem:[#allocation3 + $0x58] sm:$0xff] %v3389_v13 }
 0x20b   : > { %4132 = vst [vmem:[%s5879_s9 + $0x8] sm:$0xff] %v4060_v35   ;;  %v4065_v40 = vpack.c.bf16 %v3476_v49, %v3475_v39  ;;  %v4075_v24 = vpack.c.bf16 %v3388_v62, %v3387_v38  ;;  %v4827_v2 = vpop.f32.mrb[12].mxu0 }
 0x20c   : > { %v4877_v15 = vadd.f32 %v4827_v2, %v4567_v44  ;;  %v3240_v43 = vpop.f32.mrb[13].mxu0 }
 0x20d   : > { %4133 = vst [vmem:[%s5879_s9 + $0x10] sm:$0xff] %v4065_v40   ;;  %4135 = vst [vmem:[%s5879_s9 + $0x20] sm:$0xff] %v4075_v24   ;;  %v4878_v46 = vadd.f32 %v3240_v43, %v5860_v61  ;;  %v4828_v47 = vpop.f32.mrb[14].mxu0 }
 0x20e   : > { %v3392_v51 = vadd.f32 %v4877_v15, %v5869_v59  ;;  %v4879_v14 = vadd.f32 %v4828_v47, %v5862_v60  ;;  %v3243_v26 = vpop.f32.mrb[15].mxu0 }
 0x20f   : > { %v3390_v42 = vadd.f32 %v4878_v46, %v5869_v59  ;;  %v4880_v63 = vadd.f32 %v3243_v26, %v5864_v31 }
 0x210   : > { %v3489_v20 = vld [vmem:[#allocation3 + $0x3e] sm:$0xff]  ;;  %3428 = vst [vmem:[#allocation3 + $0x70] sm:$0xff] %v3392_v51  ;;  %v3393_v1 = vadd.f32 %v4879_v14, %v5869_v59 }
 0x211   : > { %v4070_v56 = vpack.c.bf16 %v3489_v20, %v3488_v53  ;;  %3426 = vst [vmem:[#allocation3 + $0x60] sm:$0xff] %v3390_v42  ;;  %v3391_v57 = vadd.f32 %v4880_v63, %v5869_v59 }
 0x212   : > { %3429 = vst [vmem:[#allocation3 + $0x78] sm:$0xff] %v3393_v1 }
 0x213   : > { %4134 = vst [vmem:[%s5879_s9 + $0x18] sm:$0xff] %v4070_v56   ;;  %3427 = vst [vmem:[#allocation3 + $0x68] sm:$0xff] %v3391_v57  ;;  %v4831_v44 = vpop.f32.mrb[16].mxu0 }
 0x214   : > { %v3256_v61 = vpop.f32.mrb[17].mxu0 }
 0x215   : > { %v4832_v60 = vpop.f32.mrb[18].mxu0 }
 0x216   : > { %v3259_v34 = vpop.f32.mrb[19].mxu0 }
 0x218   : > { %v3514_v4 = vld [vmem:[#allocation3 + $0x5a] sm:$0xff] }
 0x219   : > { %v4623_v3 = vpop.f32.mrb[16].mxu1  ;;  %v3528_v48 = vld [vmem:[#allocation3 + $0x74] sm:$0xff] }
 0x21a   : > { %v4881_v25 = vadd.f32 %v4831_v44, %v4623_v3  ;;  %v1928_v31 = vpop.f32.mrb[17].mxu1  ;;  %v3515_v5 = vld [vmem:[#allocation3 + $0x62] sm:$0xff]  ;;  %v3527_v18 = vld [vmem:[#allocation3 + $0x6c] sm:$0xff] }
 0x21b   : > { %v4882_v50 = vadd.f32 %v3256_v61, %v1928_v31  ;;  %v4624_v54 = vpop.f32.mrb[18].mxu1  ;;  %v4080_v0 = vpack.c.bf16 %v3515_v5, %v3514_v4  ;;  %v4085_v6 = vpack.c.bf16 %v3528_v48, %v3527_v18  ;;  %v4835_v9 = vpop.f32.mrb[20].mxu0 }
 0x21c   : > { %v3396_v7 = vadd.f32 %v4881_v25, %v5869_v59  ;;  %v4883_v10 = vadd.f32 %v4832_v60, %v4624_v54  ;;  %v1931_v11 = vpop.f32.mrb[19].mxu1  ;;  %v3272_v8 = vpop.f32.mrb[21].mxu0 }
 0x21d   : > { %v3394_v17 = vadd.f32 %v4882_v50, %v5869_v59  ;;  %v4884_v36 = vadd.f32 %v3259_v34, %v1931_v11  ;;  %4136 = vst [vmem:[%s5879_s9 + $0x28] sm:$0xff] %v4080_v0   ;;  %4137 = vst [vmem:[%s5879_s9 + $0x30] sm:$0xff] %v4085_v6   ;;  %v4836_v58 = vpop.f32.mrb[22].mxu0 }
 0x21e   : > { %v3397_v19 = vadd.f32 %v4883_v10, %v5869_v59  ;;  %v3275_v27 = vpop.f32.mrb[23].mxu0 }
 0x21f   : > { %3430 = vst [vmem:[#allocation3 + $0x80] sm:$0xff] %v3394_v17  ;;  %v3395_v16 = vadd.f32 %v4884_v36, %v5869_v59 }
 0x220   : > { %v4095_v41 = vpack.c.bf16 %v3397_v19, %v3396_v7 }
 0x221   : > { %3431 = vst [vmem:[#allocation3 + $0x88] sm:$0xff] %v3395_v16  ;;  %v4627_v55 = vpop.f32.mrb[20].mxu1 }
 0x222   : > { %4139 = vst [vmem:[%s5879_s9 + $0x40] sm:$0xff] %v4095_v41   ;;  %v4885_v12 = vadd.f32 %v4835_v9, %v4627_v55  ;;  %v1944_v33 = vpop.f32.mrb[21].mxu1 }
 0x223   : > { %v4886_v21 = vadd.f32 %v3272_v8, %v1944_v33  ;;  %v4628_v22 = vpop.f32.mrb[22].mxu1  ;;  %v4839_v23 = vpop.f32.mrb[24].mxu0 }
 0x224   : > { %v3400_v45 = vadd.f32 %v4885_v12, %v5869_v59  ;;  %v4887_v62 = vadd.f32 %v4836_v58, %v4628_v22  ;;  %v1947_v28 = vpop.f32.mrb[23].mxu1  ;;  %v3288_v52 = vpop.f32.mrb[25].mxu0 }
 0x225   : > { %v3398_v37 = vadd.f32 %v4886_v21, %v5869_v59  ;;  %v4888_v29 = vadd.f32 %v3275_v27, %v1947_v28  ;;  %v4840_v32 = vpop.f32.mrb[26].mxu0 }
 0x226   : > { %3436 = vst [vmem:[#allocation3 + $0xb0] sm:$0xff] %v3400_v45  ;;  %v3401_v30 = vadd.f32 %v4887_v62, %v5869_v59  ;;  %v3291_v35 = vpop.f32.mrb[27].mxu0  ;;  %v3540_v38 = vld [vmem:[#allocation3 + $0x7e] sm:$0xff] }
 0x227   : > { %3434 = vst [vmem:[#allocation3 + $0xa0] sm:$0xff] %v3398_v37  ;;  %v3399_v13 = vadd.f32 %v4888_v29, %v5869_v59 }
 0x228   : > { %v3541_v39 = vld [vmem:[#allocation3 + $0x86] sm:$0xff]  ;;  %3437 = vst [vmem:[#allocation3 + $0xb8] sm:$0xff] %v3401_v30 }
 0x229   : > { %v4090_v49 = vpack.c.bf16 %v3541_v39, %v3540_v38  ;;  %3435 = vst [vmem:[#allocation3 + $0xa8] sm:$0xff] %v3399_v13  ;;  %v4631_v40 = vpop.f32.mrb[24].mxu1 }
 0x22a   : > { %v4889_v24 = vadd.f32 %v4839_v23, %v4631_v40  ;;  %v1960_v2 = vpop.f32.mrb[25].mxu1 }
 0x22b   : > { %4138 = vst [vmem:[%s5879_s9 + $0x38] sm:$0xff] %v4090_v49   ;;  %v4890_v15 = vadd.f32 %v3288_v52, %v1960_v2  ;;  %v4632_v43 = vpop.f32.mrb[26].mxu1  ;;  %v4843_v47 = vpop.f32.mrb[28].mxu0 }
 0x22c   : > { %v3404_v46 = vadd.f32 %v4889_v24, %v5869_v59  ;;  %v4891_v51 = vadd.f32 %v4840_v32, %v4632_v43  ;;  %v1963_v14 = vpop.f32.mrb[27].mxu1  ;;  %v3304_v42 = vpop.f32.mrb[29].mxu0 }
 0x22d   : > { %v3402_v26 = vadd.f32 %v4890_v15, %v5869_v59  ;;  %v4892_v63 = vadd.f32 %v3291_v35, %v1963_v14  ;;  %v4844_v20 = vpop.f32.mrb[30].mxu0 }
 0x22e   : > { %3440 = vst [vmem:[#allocation3 + $0xd0] sm:$0xff] %v3404_v46  ;;  %v3405_v53 = vadd.f32 %v4891_v51, %v5869_v59  ;;  %v3307_v56 = vpop.f32.mrb[31].mxu0 }
 0x22f   : > { %3438 = vst [vmem:[#allocation3 + $0xc0] sm:$0xff] %v3402_v26  ;;  %v3403_v1 = vadd.f32 %v4892_v63, %v5869_v59  ;;  %v3579_v6 = vld [vmem:[#allocation3 + $0xb4] sm:$0xff] }
 0x230   : > { %v3566_v57 = vld [vmem:[#allocation3 + $0xa2] sm:$0xff]  ;;  %v3567_v44 = vld [vmem:[#allocation3 + $0xaa] sm:$0xff] }
 0x231   : > { %v4100_v61 = vpack.c.bf16 %v3567_v44, %v3566_v57  ;;  %3439 = vst [vmem:[#allocation3 + $0xc8] sm:$0xff] %v3403_v1  ;;  %v4635_v60 = vpop.f32.mrb[28].mxu1 }
 0x232   : > { %v4893_v34 = vadd.f32 %v4843_v47, %v4635_v60  ;;  %v1976_v3 = vpop.f32.mrb[29].mxu1 }
 0x233   : > { %4140 = vst [vmem:[%s5879_s9 + $0x48] sm:$0xff] %v4100_v61   ;;  %v4894_v48 = vadd.f32 %v3304_v42, %v1976_v3  ;;  %v4636_v25 = vpop.f32.mrb[30].mxu1  ;;  %v4847_v4 = vpop.f32.mrb[32].mxu0 }
 0x234   : > { %v3408_v31 = vadd.f32 %v4893_v34, %v5869_v59  ;;  %v4895_v5 = vadd.f32 %v4844_v20, %v4636_v25  ;;  %v1979_v18 = vpop.f32.mrb[31].mxu1  ;;  %v3320_v54 = vpop.f32.mrb[33].mxu0 }
 0x235   : > { %v3406_v50 = vadd.f32 %v4894_v48, %v5869_v59  ;;  %v4896_v0 = vadd.f32 %v3307_v56, %v1979_v18  ;;  %v4848_v10 = vpop.f32.mrb[34].mxu0 }
 0x236   : > { %v3580_v7 = vld [vmem:[#allocation3 + $0xbc] sm:$0xff]  ;;  %3444 = vst [vmem:[#allocation3 + $0xf0] sm:$0xff] %v3408_v31  ;;  %v3409_v9 = vadd.f32 %v4895_v5, %v5869_v59  ;;  %v3323_v36 = vpop.f32.mrb[35].mxu0 }
 0x237   : > { %v4105_v11 = vpack.c.bf16 %v3580_v7, %v3579_v6  ;;  %v4115_v17 = vpack.c.bf16 %v3406_v50, %v3405_v53  ;;  %v3407_v8 = vadd.f32 %v4896_v0, %v5869_v59 }
 0x238   : > { %v3592_v19 = vld [vmem:[#allocation3 + $0xc6] sm:$0xff]  ;;  %v3593_v58 = vld [vmem:[#allocation3 + $0xce] sm:$0xff]  ;;  %3445 = vst [vmem:[#allocation3 + $0xf8] sm:$0xff] %v3409_v9 }
 0x239   : > { %4141 = vst [vmem:[%s5879_s9 + $0x50] sm:$0xff] %v4105_v11   ;;  %v4110_v16 = vpack.c.bf16 %v3593_v58, %v3592_v19  ;;  %4143 = vst [vmem:[%s5879_s9 + $0x60] sm:$0xff] %v4115_v17   ;;  %v4639_v27 = vpop.f32.mrb[32].mxu1 }
 0x23a   : > { %3443 = vst [vmem:[#allocation3 + $0xe8] sm:$0xff] %v3407_v8  ;;  %v4897_v41 = vadd.f32 %v4847_v4, %v4639_v27  ;;  %v1992_v55 = vpop.f32.mrb[33].mxu1 }
 0x23b   : > { %4142 = vst [vmem:[%s5879_s9 + $0x58] sm:$0xff] %v4110_v16   ;;  %v4898_v12 = vadd.f32 %v3320_v54, %v1992_v55  ;;  %v4640_v33 = vpop.f32.mrb[34].mxu1 }
 0x23c   : > { %v3412_v21 = vadd.f32 %v4897_v41, %v5869_v59  ;;  %v4899_v22 = vadd.f32 %v4848_v10, %v4640_v33  ;;  %v1995_v45 = vpop.f32.mrb[35].mxu1 }
 0x23d   : > { %v3410_v23 = vadd.f32 %v4898_v12, %v5869_v59  ;;  %v4900_v62 = vadd.f32 %v3323_v36, %v1995_v45 }
 0x23e   : > { %3448 = vst [vmem:[#allocation3 + $0x110] sm:$0xff] %v3412_v21  ;;  %v3413_v28 = vadd.f32 %v4899_v22, %v5869_v59 }
 0x23f   : > { %v3619_v37 = vld [vmem:[#allocation3 + $0xf2] sm:$0xff]  ;;  %3446 = vst [vmem:[#allocation3 + $0x100] sm:$0xff] %v3410_v23  ;;  %v3411_v52 = vadd.f32 %v4900_v62, %v5869_v59 }
 0x240   : > { %3449 = vst [vmem:[#allocation3 + $0x118] sm:$0xff] %v3413_v28 }
 0x241   : > { %v3618_v29 = vld [vmem:[#allocation3 + $0xea] sm:$0xff]  ;;  %3447 = vst [vmem:[#allocation3 + $0x108] sm:$0xff] %v3411_v52 }
 0x242   : > { %v4120_v30 = vpack.c.bf16 %v3619_v37, %v3618_v29 }
 0x244   : > { %4144 = vst [vmem:[%s5879_s9 + $0x68] sm:$0xff] %v4120_v30  }
 0x246   : > { %v3631_v13 = vld [vmem:[#allocation3 + $0xfc] sm:$0xff] }
 0x247   : > { %v3645_v32 = vld [vmem:[#allocation3 + $0x116] sm:$0xff] }
 0x248   : > { %v3632_v35 = vld [vmem:[#allocation3 + $0x104] sm:$0xff]  ;;  %v3644_v38 = vld [vmem:[#allocation3 + $0x10e] sm:$0xff] }
 0x249   : > { %v4125_v39 = vpack.c.bf16 %v3632_v35, %v3631_v13  ;;  %v4130_v49 = vpack.c.bf16 %v3645_v32, %v3644_v38 }
 0x24b   : > { %4145 = vst [vmem:[%s5879_s9 + $0x70] sm:$0xff] %v4125_v39   ;;  %4146 = vst [vmem:[%s5879_s9 + $0x78] sm:$0xff] %v4130_v49  }
 0x24c PF: > { %s15_s18 = sadd.s32 1, %s5249_s18  }
 0x24d   : > { %p12_p4 = scmp.ge.s32.totalorder %s15_s18, 4  }
 0x24f   :  { %14 = sbr.rel (!%p12_p4) target bundleno = 1 (0x1), region = 108 }

// kernel: wide_basic_forward.7
= control target key start
LH: loop header
LB: loop body
LE: loop exit
PB: predicated region body
PF: predicated region fallthrough
CT: control target
= control target key end

     0   :  { %s6431_s24 = smov 0   ;;  %s7506_s0 = inlined_call_operand.vmem [shape: bf16[2,16,16,128], index: 0, kind: input, shape index: {}]   ;;  %s7507_s1 = inlined_call_operand.vmem [shape: f32[1,128], index: 1, kind: input, shape index: {}]   ;;  %s7508_s2 = inlined_call_operand.vmem [shape: f32[1,128], index: 2, kind: input, shape index: {}]   ;;  %s7509_s3 = inlined_call_operand.vmem [shape: bf16[9,128,128], index: 3, kind: input, shape index: {}]   ;;  %s7510_s4 = inlined_call_operand.vmem [shape: f32[1,128], index: 4, kind: input, shape index: {}]   ;;  %s7511_s5 = inlined_call_operand.vmem [shape: f32[2,16,16,128], index: 5, kind: input, shape index: {}]   ;;  %s7512_s6 = inlined_call_operand.vmem [shape: bf16[128,128], index: 6, kind: input, shape index: {}]   ;;  %s7513_s7 = inlined_call_operand.vmem [shape: f32[2,8,8,128], index: 7, kind: output, shape index: {}]  }
   0x1 LB: > { %s4572_s25 = sadd.s32 4294967295, %s6387_s24   ;;  %p4576_p0 = scmp.ge.s32.totalorder %s6387_s24, 1  ;;  %s6387_s24 = sphi %s6431_s24, %s17_s24  }
   0x2   : > { %p247_p1 = scmp.lt.s32.totalorder %s6387_s24, 3 }
   0x4   : > { %p248_p2 = pnand %p4576_p0, %p247_p1 }
   0x5   : > { %v6233_v0 = vld [vmem:[%s7509_s3 + $0x40] sm:$0xff] (!%p248_p2)   ;;  %v6389_v2 = vmov (!%p248_p2), 0.0   ;;  %v6235_v3 = vld [vmem:[%s7509_s3 + $0x48] sm:$0xff] (!%p248_p2)   ;;  %v6237_v5 = vld [vmem:[%s7509_s3 + $0x50] sm:$0xff] (!%p248_p2)   ;;  %p284_p3 = scmp.lt.s32.totalorder (!%p248_p2), %s4572_s25, 1  ;;  %vm6390_vm0 = vmmov (!%p248_p2), 0  }
   0x6   : > { %251 = sbr.rel (%p248_p2) target bundleno = 703 (0x2bf), region = 48  ;;  %v6234_v1 = vld [vmem:[%s7509_s3 + $0x80] sm:$0xff] (!%p248_p2)   ;;  %300 = vst [vmem:[#allocation2] sm:$0xff] (!%p248_p2), %v6389_v2  ;;  %301 = vst [vmem:[#allocation2 + $0x8] sm:$0xff] (!%p248_p2), %v6389_v2  ;;  %5291 = vmatprep.subr.bf16.mxu1 (!%p248_p2), %v6233_v0  ;;  %v6236_v4 = vld [vmem:[%s7509_s3 + $0x88] sm:$0xff] (!%p248_p2)  }
   0x7   : > { %302 = vst [vmem:[#allocation2 + $0x10] sm:$0xff] (!%p248_p2), %v6389_v2  ;;  %303 = vst [vmem:[#allocation2 + $0x18] sm:$0xff] (!%p248_p2), %v6389_v2  ;;  %5395 = vmatprep.subr.bf16.mxu0 (!%p248_p2), %v6234_v1  ;;  %5292 = vmatpush3.bf16.msra.mxu1 (!%p248_p2), %v6233_v0  ;;  %v6238_v6 = vld [vmem:[%s7509_s3 + $0x90] sm:$0xff] (!%p248_p2)   ;;  %v6239_v7 = vld [vmem:[%s7509_s3 + $0x58] sm:$0xff] (!%p248_p2)  }
   0x8   : > { %304 = vst [vmem:[#allocation2 + $0x20] sm:$0xff] (!%p248_p2), %v6389_v2  ;;  %305 = vst [vmem:[#allocation2 + $0x28] sm:$0xff] (!%p248_p2), %v6389_v2  ;;  %5396 = vmatpush3.bf16.msra.mxu0 (!%p248_p2), %v6234_v1  ;;  %5293 = vmatprep.subr.bf16.mxu1 (!%p248_p2), %v6235_v3  ;;  %v6240_v8 = vld [vmem:[%s7509_s3 + $0x98] sm:$0xff] (!%p248_p2)   ;;  %v6241_v9 = vld [vmem:[%s7509_s3 + $0x60] sm:$0xff] (!%p248_p2)  }
   0x9   : > { %306 = vst [vmem:[#allocation2 + $0x30] sm:$0xff] (!%p248_p2), %v6389_v2  ;;  %307 = vst [vmem:[#allocation2 + $0x38] sm:$0xff] (!%p248_p2), %v6389_v2  ;;  %5397 = vmatprep.subr.bf16.mxu0 (!%p248_p2), %v6236_v4  ;;  %v6242_v10 = vld [vmem:[%s7509_s3 + $0xa0] sm:$0xff] (!%p248_p2)   ;;  %v6243_v11 = vld [vmem:[%s7509_s3 + $0x68] sm:$0xff] (!%p248_p2)  }
   0xa   : > { %308 = vst [vmem:[#allocation2 + $0x40] sm:$0xff] (!%p248_p2), %v6389_v2  ;;  %309 = vst [vmem:[#allocation2 + $0x48] sm:$0xff] (!%p248_p2), %v6389_v2  ;;  %v6244_v15 = vld [vmem:[%s7509_s3 + $0xa8] sm:$0xff] (!%p248_p2)   ;;  %v6490_v18 = vld [vmem:[%s7507_s1] ss:$0 sm:$0xff] (!%p248_p2) }
   0xb   : > { %310 = vst [vmem:[#allocation2 + $0x50] sm:$0xff] (!%p248_p2), %v6389_v2  ;;  %311 = vst [vmem:[#allocation2 + $0x58] sm:$0xff] (!%p248_p2), %v6389_v2  ;;  %5294 = vmatpush3.bf16.msra.mxu1 (!%p248_p2), %v6235_v3  ;;  %v6245_v21 = vld [vmem:[%s7509_s3 + $0x70] sm:$0xff] (!%p248_p2)   ;;  %v6501_v26 = vld [vmem:[%s7508_s2] ss:$0 sm:$0xff] (!%p248_p2) }
   0xc   : > { %312 = vst [vmem:[#allocation2 + $0x60] sm:$0xff] (!%p248_p2), %v6389_v2  ;;  %313 = vst [vmem:[#allocation2 + $0x68] sm:$0xff] (!%p248_p2), %v6389_v2  ;;  %5398 = vmatpush3.bf16.msra.mxu0 (!%p248_p2), %v6236_v4  ;;  %5295 = vmatprep.subr.bf16.mxu1 (!%p248_p2), %v6237_v5  ;;  %v6246_v31 = vld [vmem:[%s7509_s3 + $0xb0] sm:$0xff] (!%p248_p2)   ;;  %v6247_v40 = vld [vmem:[%s7509_s3 + $0x78] sm:$0xff] (!%p248_p2)  }
   0xd   : > { %314 = vst [vmem:[#allocation2 + $0x70] sm:$0xff] %v6389_v2  ;;  %315 = vst [vmem:[#allocation2 + $0x78] sm:$0xff] %v6389_v2  ;;  %s7515_s25 = smov (!%p284_p3, %s4572_s25), 1  ;;  %5399 = vmatprep.subr.bf16.mxu0 %v6238_v6  ;;  %v632_v12 = vld [vmem:[#allocation2 + $0x1] sm:$0xff]  ;;  %v6248_v45 = vld [vmem:[%s7509_s3 + $0xb8] sm:$0xff]  }
   0xe   : > { %316 = vst [vmem:[#allocation2 + $0x80] sm:$0xff] %v6389_v2  ;;  %317 = vst [vmem:[#allocation2 + $0x88] sm:$0xff] %v6389_v2  ;;  %s4903_s21 = sshll.u32 %s7515_s25, 7  ;;  %v633_v13 = vld [vmem:[#allocation2 + $0x9] sm:$0xff]  ;;  %v6533_v61 = vld [vmem:[%s7509_s3] sm:$0xff]   ;;  %s4904_s16 = sshll.u32 %s7515_s25, 8 }
   0xf   : > { %318 = vst [vmem:[#allocation2 + $0x90] sm:$0xff] %v6389_v2  ;;  %319 = vst [vmem:[#allocation2 + $0x98] sm:$0xff] %v6389_v2  ;;  %5296 = vmatpush3.bf16.msra.mxu1 %v6237_v5  ;;  %s6482_s30 = scalar_lea.vmem %s7506_s0, %s4903_s21  ;;  %v1153_v14 = vld [vmem:[#allocation2 + $0x2] sm:$0xff]  ;;  %v668_v16 = vpack.c.bf16 %v633_v13, %v632_v12  ;;  %v1154_v17 = vld [vmem:[#allocation2 + $0xa] sm:$0xff]  ;;  %s6921_s19 = scalar_lea.vmem %s7511_s5, %s4904_s16 }
  0x10   : > { %320 = vst [vmem:[#allocation2 + $0xa0] sm:$0xff] %v6389_v2  ;;  %321 = vst [vmem:[#allocation2 + $0xa8] sm:$0xff] %v6389_v2  ;;  %5400 = vmatpush3.bf16.msra.mxu0 %v6238_v6  ;;  %5297 = vmatprep.subr.bf16.mxu1 %v6239_v7  ;;  %v1189_v19 = vpack.c.bf16 %v1154_v17, %v1153_v14  ;;  %v4907_v20 = vld [vmem:[%s6482_s30] sm:$0xff]   ;;  %v4970_v24 = vld [vmem:[%s6482_s30 + $0x8] sm:$0xff]   ;;  %s4905_s18 = sshll.u32 %s7515_s25, 6 }
  0x11   : > { %322 = vst [vmem:[#allocation2 + $0xb0] sm:$0xff] %v6389_v2  ;;  %323 = vst [vmem:[#allocation2 + $0xb8] sm:$0xff] %v6389_v2  ;;  %5401 = vmatprep.subr.bf16.mxu0 %v6240_v8  ;;  %5307 = vmatprep.mubr.bf16.mxu1 %v668_v16  ;;  %v4908_v22 = vunpack.c.l.bf16 %v4907_v20  ;;  %v4909_v23 = vunpack.c.h.bf16 %v4907_v20  ;;  %v4971_v25 = vld [vmem:[%s6482_s30 + $0x10] sm:$0xff]   ;;  %v4912_v27 = vunpack.c.l.bf16 %v4970_v24  ;;  %v4913_v28 = vunpack.c.h.bf16 %v4970_v24  ;;  %v4972_v38 = vld [vmem:[%s6482_s30 + $0x18] sm:$0xff]   ;;  %s7451_s22 = scalar_lea.vmem %s7513_s7, %s4905_s18 }
  0x12   : > { %324 = vst [vmem:[#allocation2 + $0xc0] sm:$0xff] %v6389_v2  ;;  %325 = vst [vmem:[#allocation2 + $0xc8] sm:$0xff] %v6389_v2  ;;  %v4916_v29 = vunpack.c.l.bf16 %v4971_v25  ;;  %v4917_v30 = vunpack.c.h.bf16 %v4971_v25  ;;  %5411 = vmatprep.mubr.bf16.mxu0 %v1189_v19  ;;  %v4973_v39 = vld [vmem:[%s6482_s30 + $0x20] sm:$0xff]   ;;  %v4920_v43 = vunpack.c.l.bf16 %v4972_v38  ;;  %v4921_v44 = vunpack.c.h.bf16 %v4972_v38  ;;  %v4974_v54 = vld [vmem:[%s6482_s30 + $0x28] sm:$0xff]  }
  0x13   : > { %326 = vst [vmem:[#allocation2 + $0xd0] sm:$0xff] %v6389_v2  ;;  %327 = vst [vmem:[#allocation2 + $0xd8] sm:$0xff] %v6389_v2  ;;  %5298 = vmatpush3.bf16.msra.mxu1 %v6239_v7  ;;  %v353_v32 = vmul.f32 %v4908_v22, %v6490_v18  ;;  %v354_v33 = vmul.f32 %v4909_v23, %v6490_v18  ;;  %v372_v34 = vmul.f32 %v4912_v27, %v6490_v18  ;;  %v4975_v55 = vld [vmem:[%s6482_s30 + $0x30] sm:$0xff]   ;;  %v4976_v5 = vld [vmem:[%s6482_s30 + $0x38] sm:$0xff]  }
  0x14   : > { %328 = vst [vmem:[#allocation2 + $0xe0] sm:$0xff] %v6389_v2  ;;  %329 = vst [vmem:[#allocation2 + $0xe8] sm:$0xff] %v6389_v2  ;;  %5402 = vmatpush3.bf16.msra.mxu0 %v6240_v8  ;;  %5299 = vmatprep.subr.bf16.mxu1 %v6241_v9  ;;  %v373_v35 = vmul.f32 %v4913_v28, %v6490_v18  ;;  %v385_v36 = vmul.f32 %v4916_v29, %v6490_v18  ;;  %v4924_v49 = vunpack.c.l.bf16 %v4973_v39  ;;  %v6546_v6 = vld [vmem:[%s7509_s3 + $0xc0] sm:$0xff]  }
  0x15   : > { %330 = vst [vmem:[#allocation2 + $0xf0] sm:$0xff] %v6389_v2  ;;  %331 = vst [vmem:[#allocation2 + $0xf8] sm:$0xff] %v6389_v2  ;;  %5403 = vmatprep.subr.bf16.mxu0 %v6242_v10  ;;  %v386_v37 = vmul.f32 %v4917_v30, %v6490_v18  ;;  %v361_v41 = vadd.f32 %v6501_v26, %v353_v32  ;;  %v362_v42 = vadd.f32 %v6501_v26, %v354_v33  ;;  %v6570_v30 = vld [vmem:[%s6482_s30 + $0x48] sm:$0xff]  }
  0x16   : > { %332 = vst [vmem:[#allocation2 + $0x100] sm:$0xff] %v6389_v2  ;;  %333 = vst [vmem:[#allocation2 + $0x108] sm:$0xff] %v6389_v2  ;;  %v374_v46 = vadd.f32 %v6501_v26, %v372_v34  ;;  %v375_v47 = vadd.f32 %v6501_v26, %v373_v35  ;;  %v387_v48 = vadd.f32 %v6501_v26, %v385_v36  ;;  %v4925_v0 = vunpack.c.h.bf16 %v4973_v39  ;;  %v6575_v34 = vld [vmem:[%s7509_s3 + $0xc8] sm:$0xff]  }
  0x17   : > { %334 = vst [vmem:[#allocation2 + $0x110] sm:$0xff] %v6389_v2  ;;  %335 = vst [vmem:[#allocation2 + $0x118] sm:$0xff] %v6389_v2  ;;  %5300 = vmatpush3.bf16.msra.mxu1 %v6241_v9  ;;  %v363_v50 = vmax.f32 %v361_v41, 0.0  ;;  %v364_v51 = vmax.f32 %v362_v42, 0.0  ;;  %v388_v52 = vadd.f32 %v6501_v26, %v386_v37  ;;  %v398_v53 = vmul.f32 %v4920_v43, %v6490_v18 }
  0x18   : > { %336 = vst [vmem:[#allocation2 + $0x120] sm:$0xff] %v6389_v2  ;;  %337 = vst [vmem:[#allocation2 + $0x128] sm:$0xff] %v6389_v2  ;;  %5404 = vmatpush3.bf16.msra.mxu0 %v6242_v10  ;;  %5301 = vmatprep.subr.bf16.mxu1 %v6243_v11  ;;  %v376_v56 = vmax.f32 %v374_v46, 0.0  ;;  %v377_v57 = vmax.f32 %v375_v47, 0.0  ;;  %v389_v58 = vmax.f32 %v387_v48, 0.0  ;;  %v399_v59 = vmul.f32 %v4921_v44, %v6490_v18 }
  0x19   : > { %338 = vst [vmem:[#allocation2 + $0x130] sm:$0xff] %v6389_v2  ;;  %339 = vst [vmem:[#allocation2 + $0x138] sm:$0xff] %v6389_v2  ;;  %5405 = vmatprep.subr.bf16.mxu0 %v6244_v15  ;;  %v390_v60 = vmax.f32 %v388_v52, 0.0  ;;  %v6536_v62 = vadd.f32 %v6501_v26, %v398_v53  ;;  %v411_v63 = vmul.f32 %v4924_v49, %v6490_v18  ;;  %v4929_v3 = vunpack.c.h.bf16 %v4974_v54 }
  0x1a   : > { %340 = vst [vmem:[#allocation2 + $0x140] sm:$0xff] %v6389_v2  ;;  %365 = vst [vmem:[#allocation2 + $0x13] sm:$0xff] %v363_v50  ;;  %v6540_v1 = vadd.f32 %v6501_v26, %v399_v59  ;;  %v4928_v2 = vunpack.c.l.bf16 %v4974_v54  ;;  %v4932_v4 = vunpack.c.l.bf16 %v4975_v55  ;;  %v412_v9 = vmul.f32 %v4925_v0, %v6490_v18  ;;  %v6253_v50 = vld [vmem:[%s7509_s3 + $0x8] sm:$0xff]   ;;  %v4979_v59 = vld [vmem:[%s6482_s30 + $0x50] sm:$0xff]  }
  0x1b   : > { %5302 = vmatpush3.bf16.msra.mxu1 %v6243_v11  ;;  %366 = vst [vmem:[#allocation2 + $0x1b] sm:$0xff] %v364_v51  ;;  %378 = vst [vmem:[#allocation2 + $0x25] sm:$0xff] %v376_v56  ;;  %v402_v7 = vmax.f32 %v6536_v62, 0.0  ;;  %v413_v8 = vadd.f32 %v6501_v26, %v411_v63  ;;  %v4933_v10 = vunpack.c.h.bf16 %v4975_v55  ;;  %v425_v13 = vmul.f32 %v4929_v3, %v6490_v18 }
  0x1c   : > { %5406 = vmatpush3.bf16.msra.mxu0 %v6244_v15  ;;  %5303 = vmatprep.subr.bf16.mxu1 %v6245_v21  ;;  %379 = vst [vmem:[#allocation2 + $0x2d] sm:$0xff] %v377_v57  ;;  %391 = vst [vmem:[#allocation2 + $0x37] sm:$0xff] %v389_v58  ;;  %v403_v11 = vmax.f32 %v6540_v1, 0.0  ;;  %v424_v12 = vmul.f32 %v4928_v2, %v6490_v18  ;;  %v437_v14 = vmul.f32 %v4932_v4, %v6490_v18  ;;  %v4977_v15 = vld [vmem:[%s6482_s30 + $0x40] sm:$0xff]   ;;  %v6252_v4 = vld [vmem:[%s7509_s3 + $0xd0] sm:$0xff]  }
  0x1d   : > { %5407 = vmatprep.subr.bf16.mxu0 %v6246_v31  ;;  %392 = vst [vmem:[#allocation2 + $0x3f] sm:$0xff] %v390_v60  ;;  %404 = vst [vmem:[#allocation2 + $0x49] sm:$0xff] %v402_v7  ;;  %v415_v16 = vmax.f32 %v413_v8, 0.0  ;;  %v414_v17 = vadd.f32 %v6501_v26, %v412_v9  ;;  %v438_v19 = vmul.f32 %v4933_v10, %v6490_v18  ;;  %v4936_v20 = vunpack.c.l.bf16 %v4976_v5  ;;  %v4980_v10 = vld [vmem:[%s6482_s30 + $0x58] sm:$0xff]  }
  0x1e   : > { %405 = vst [vmem:[#allocation2 + $0x51] sm:$0xff] %v403_v11  ;;  %v427_v22 = vadd.f32 %v6501_v26, %v425_v13  ;;  %v439_v23 = vadd.f32 %v6501_v26, %v437_v14  ;;  %v4937_v24 = vunpack.c.h.bf16 %v4976_v5  ;;  %v4940_v29 = vunpack.c.l.bf16 %v4977_v15 }
  0x1f   : > { %5304 = vmatpush3.bf16.msra.mxu1 %v6245_v21  ;;  %v426_v21 = vadd.f32 %v6501_v26, %v424_v12  ;;  %417 = vst [vmem:[#allocation2 + $0x5b] sm:$0xff] %v415_v16  ;;  %v416_v25 = vmax.f32 %v414_v17, 0.0  ;;  %v440_v27 = vadd.f32 %v6501_v26, %v438_v19  ;;  %v450_v28 = vmul.f32 %v4936_v20, %v6490_v18  ;;  %v4981_v16 = vld [vmem:[%s6482_s30 + $0x60] sm:$0xff]  }
  0x20   : > { %5408 = vmatpush3.bf16.msra.mxu0 %v6246_v31  ;;  %5305 = vmatprep.subr.bf16.mxu1 %v6247_v40  ;;  %v429_v36 = vmax.f32 %v427_v22, 0.0  ;;  %v441_v37 = vmax.f32 %v439_v23, 0.0  ;;  %v451_v38 = vmul.f32 %v4937_v24, %v6490_v18  ;;  %v463_v52 = vmul.f32 %v4940_v29, %v6490_v18 }
  0x21   : > { %5409 = vmatprep.subr.bf16.mxu0 %v6248_v45  ;;  %v634_v31 = vld [vmem:[#allocation2 + $0x11] sm:$0xff]  ;;  %v428_v35 = vmax.f32 %v426_v21, 0.0  ;;  %418 = vst [vmem:[#allocation2 + $0x63] sm:$0xff] %v416_v25  ;;  %v442_v43 = vmax.f32 %v440_v27, 0.0  ;;  %v6579_v44 = vadd.f32 %v6501_v26, %v450_v28  ;;  %v4944_v58 = vunpack.c.l.bf16 %v6570_v30 }
  0x22   : > { %v635_v32 = vld [vmem:[#allocation2 + $0x19] sm:$0xff]  ;;  %v636_v41 = vld [vmem:[#allocation2 + $0x21] sm:$0xff]  ;;  %431 = vst [vmem:[#allocation2 + $0x75] sm:$0xff] %v429_v36  ;;  %443 = vst [vmem:[#allocation2 + $0x7f] sm:$0xff] %v441_v37  ;;  %v6587_v51 = vadd.f32 %v6501_v26, %v451_v38  ;;  %v6599_v3 = vadd.f32 %v6501_v26, %v463_v52  ;;  %v4945_v8 = vunpack.c.h.bf16 %v6570_v30  ;;  %v4949_v23 = vunpack.c.h.bf16 %v4979_v59 }
  0x23   : > { %5306 = vmatpush3.bf16.msra.mxu1 %v6247_v40  ;;  %v1155_v33 = vld [vmem:[#allocation2 + $0x12] sm:$0xff]  ;;  %v669_v39 = vpack.c.bf16 %v635_v32, %v634_v31  ;;  %v1156_v40 = vld [vmem:[#allocation2 + $0x1a] sm:$0xff]  ;;  %v637_v42 = vld [vmem:[#allocation2 + $0x29] sm:$0xff]  ;;  %430 = vst [vmem:[#allocation2 + $0x6d] sm:$0xff] %v428_v35  ;;  %v454_v56 = vmax.f32 %v6579_v44, 0.0  ;;  %v476_v9 = vmul.f32 %v4944_v58, %v6490_v18  ;;  %v4952_v62 = vunpack.c.l.bf16 %v4980_v10 }
  0x24   : > { %5410 = vmatpush3.bf16.msra.mxu0 %v6248_v45  ;;  %5343 = vmatprep.subr.bf16.mxu1 %v6533_v61  ;;  %v4941_v45 = vunpack.c.h.bf16 %v4977_v15  ;;  %v6581_v46 = vpack.c.bf16 %v1156_v40, %v1155_v33  ;;  %v670_v47 = vpack.c.bf16 %v637_v42, %v636_v41  ;;  %v1157_v48 = vld [vmem:[#allocation2 + $0x22] sm:$0xff]  ;;  %v1158_v49 = vld [vmem:[#allocation2 + $0x2a] sm:$0xff]  ;;  %v639_v55 = vld [vmem:[#allocation2 + $0x39] sm:$0xff]  ;;  %444 = vst [vmem:[#allocation2 + $0x87] sm:$0xff] %v442_v43  ;;  %v455_v2 = vmax.f32 %v6587_v51, 0.0 }
  0x25   : > { %5447 = vmatprep.subr.bf16.mxu0 %v6546_v6  ;;  %v6590_v53 = vpack.c.bf16 %v1158_v49, %v1157_v48  ;;  %v638_v54 = vld [vmem:[#allocation2 + $0x31] sm:$0xff]  ;;  %v1160_v63 = vld [vmem:[#allocation2 + $0x3a] sm:$0xff]  ;;  %456 = vst [vmem:[#allocation2 + $0x91] sm:$0xff] %v454_v56  ;;  %v467_v14 = vmax.f32 %v6599_v3, 0.0  ;;  %v4948_v15 = vunpack.c.l.bf16 %v4979_v59  ;;  %v477_v21 = vmul.f32 %v4945_v8, %v6490_v18  ;;  %v6640_v30 = vld [vmem:[%s6482_s30 + $0x68] sm:$0xff]  }
  0x26   : > { %5308 = vmatmul.mubr.bf16.vlgmr.msra.gmra.mrb[0].mxu1 %v669_v39  ;;  %v464_v57 = vmul.f32 %v4941_v45, %v6490_v18  ;;  %v1159_v60 = vld [vmem:[#allocation2 + $0x32] sm:$0xff]  ;;  %v640_v0 = vld [vmem:[#allocation2 + $0x41] sm:$0xff]  ;;  %v671_v12 = vpack.c.bf16 %v639_v55, %v638_v54  ;;  %v1162_v13 = vld [vmem:[#allocation2 + $0x4a] sm:$0xff]  ;;  %457 = vst [vmem:[#allocation2 + $0x99] sm:$0xff] %v455_v2  ;;  %v478_v22 = vadd.f32 %v6501_v26, %v476_v9  ;;  %v4953_v28 = vunpack.c.h.bf16 %v4980_v10 }
  0x27   : > { %5412 = vmatmul.mubr.bf16.vlgmr.msra.gmra.mrb[0].mxu0 %v6581_v46  ;;  %5311 = vmatprep.mubr.bf16.mxu1 %v670_v47  ;;  %v6620_v17 = vpack.c.bf16 %v1160_v63, %v1159_v60  ;;  %v672_v19 = vpack.c.bf16 %v402_v7, %v640_v0  ;;  %469 = vst [vmem:[#allocation2 + $0xa3] sm:$0xff] %v467_v14  ;;  %v643_v25 = vld [vmem:[#allocation2 + $0x59] sm:$0xff]  ;;  %v4956_v29 = vunpack.c.l.bf16 %v4981_v16  ;;  %v4957_v36 = vunpack.c.h.bf16 %v4981_v16  ;;  %v4983_v54 = vld [vmem:[%s6482_s30 + $0x70] sm:$0xff]  }
  0x28   : > { %5448 = vmatpush3.bf16.msra.mxu0 %v6546_v6  ;;  %5415 = vmatprep.mubr.bf16.mxu0 %v6590_v53  ;;  %v6609_v5 = vadd.f32 %v6501_v26, %v464_v57  ;;  %v1161_v6 = vld [vmem:[#allocation2 + $0x42] sm:$0xff]  ;;  %v489_v24 = vmul.f32 %v4948_v15, %v6490_v18  ;;  %v479_v27 = vadd.f32 %v6501_v26, %v477_v21  ;;  %v1163_v31 = vld [vmem:[#allocation2 + $0x52] sm:$0xff]  ;;  %v1164_v32 = vld [vmem:[#allocation2 + $0x5a] sm:$0xff]  ;;  %v4960_v47 = vunpack.c.l.bf16 %v6640_v30 }
  0x29   : > { %5449 = vmatprep.subr.bf16.mxu0 %v6575_v34  ;;  %5344 = vmatpush3.bf16.msra.mxu1 %v6533_v61  ;;  %v6255_v61 = vld [vmem:[%s7509_s3 + $0x10] sm:$0xff]   ;;  %v6634_v7 = vpack.c.bf16 %v1162_v13, %v1161_v6  ;;  %v6254_v33 = vld [vmem:[%s7509_s3 + $0xd8] sm:$0xff]   ;;  %v490_v35 = vmul.f32 %v4949_v23, %v6490_v18  ;;  %v6646_v37 = vld [vmem:[#allocation2 + $0x61] sm:$0xff]  ;;  %v673_v42 = vpack.c.bf16 %v643_v25, %v403_v11  ;;  %v4961_v9 = vunpack.c.h.bf16 %v6640_v30 }
  0x2a   : > { %5345 = vmatprep.subr.bf16.mxu1 %v6253_v50  ;;  %v468_v20 = vmax.f32 %v6609_v5, 0.0  ;;  %v6648_v38 = vld [vmem:[#allocation2 + $0x69] sm:$0xff]  ;;  %v481_v39 = vmax.f32 %v479_v27, 0.0  ;;  %v6257_v40 = vld [vmem:[%s7509_s3 + $0x18] sm:$0xff]   ;;  %v491_v41 = vadd.f32 %v6501_v26, %v489_v24  ;;  %v502_v45 = vmul.f32 %v4952_v62, %v6490_v18  ;;  %v6259_v0 = vld [vmem:[%s7509_s3 + $0x20] sm:$0xff]  }
  0x2b   : > { %v492_v43 = vadd.f32 %v6501_v26, %v490_v35  ;;  %v6661_v48 = vpack.c.bf16 %v1164_v32, %v1163_v31  ;;  %v1165_v49 = vld [vmem:[#allocation2 + $0x62] sm:$0xff]  ;;  %v503_v11 = vmul.f32 %v4953_v28, %v6490_v18  ;;  %v515_v52 = vmul.f32 %v4956_v29, %v6490_v18  ;;  %v1166_v57 = vld [vmem:[#allocation2 + $0x6a] sm:$0xff]  ;;  %v4984_v15 = vld [vmem:[%s6482_s30 + $0x78] sm:$0xff]  }
  0x2c   : > { %5450 = vmatpush3.bf16.msra.mxu0 %v6575_v34  ;;  %470 = vst [vmem:[#allocation2 + $0xab] sm:$0xff] %v468_v20  ;;  %v480_v34 = vmax.f32 %v478_v22, 0.0  ;;  %483 = vst [vmem:[#allocation2 + $0xbd] sm:$0xff] %v481_v39  ;;  %v493_v1 = vmax.f32 %v491_v41, 0.0  ;;  %v674_v55 = vpack.c.bf16 %v6648_v38, %v6646_v37  ;;  %v6672_v59 = vadd.f32 %v6501_v26, %v502_v45  ;;  %v6258_v21 = vld [vmem:[%s7509_s3 + $0xe8] sm:$0xff]   ;;  %v646_v30 = vld [vmem:[#allocation2 + $0x71] sm:$0xff] }
  0x2d   : > { %5451 = vmatprep.subr.bf16.mxu0 %v6252_v4  ;;  %5346 = vmatpush3.bf16.msra.mxu1 %v6253_v50  ;;  %v6256_v50 = vld [vmem:[%s7509_s3 + $0xe0] sm:$0xff]   ;;  %v494_v58 = vmax.f32 %v492_v43, 0.0  ;;  %v516_v60 = vmul.f32 %v4957_v36, %v6490_v18  ;;  %v6676_v63 = vadd.f32 %v6501_v26, %v503_v11  ;;  %v528_v8 = vmul.f32 %v4960_v47, %v6490_v18  ;;  %v6261_v25 = vld [vmem:[%s7509_s3 + $0x28] sm:$0xff]   ;;  %v1167_v32 = vld [vmem:[#allocation2 + $0x72] sm:$0xff] }
  0x2e   : > { %5312 = vmatmul.mubr.bf16.gmra.mrb[4].mxu1 %v671_v12  ;;  %5347 = vmatprep.subr.bf16.mxu1 %v6255_v61  ;;  %482 = vst [vmem:[#allocation2 + $0xb5] sm:$0xff] %v480_v34  ;;  %495 = vst [vmem:[#allocation2 + $0xc7] sm:$0xff] %v493_v1  ;;  %v506_v10 = vmax.f32 %v6672_v59, 0.0  ;;  %v4964_v6 = vunpack.c.l.bf16 %v4983_v54  ;;  %v4965_v13 = vunpack.c.h.bf16 %v4983_v54  ;;  %v6687_v16 = vpack.c.bf16 %v1166_v57, %v1165_v49  ;;  %v647_v31 = vld [vmem:[#allocation2 + $0x79] sm:$0xff]  ;;  %v648_v38 = vld [vmem:[#allocation2 + $0x81] sm:$0xff] }
  0x2f   : > { %5416 = vmatmul.mubr.bf16.gmra.mrb[4].mxu0 %v6620_v17  ;;  %5315 = vmatprep.mubr.bf16.mxu1 %v672_v19  ;;  %496 = vst [vmem:[#allocation2 + $0xcf] sm:$0xff] %v494_v58  ;;  %v518_v12 = vadd.f32 %v6501_v26, %v516_v60  ;;  %v507_v19 = vmax.f32 %v6676_v63, 0.0  ;;  %v530_v23 = vadd.f32 %v6501_v26, %v528_v8  ;;  %v4968_v28 = vunpack.c.l.bf16 %v4984_v15  ;;  %v1168_v37 = vld [vmem:[#allocation2 + $0x7a] sm:$0xff]  ;;  %v649_v39 = vld [vmem:[#allocation2 + $0x89] sm:$0xff]  ;;  %v1171_v8 = vld [vmem:[#allocation2 + $0x92] sm:$0xff] }
  0x30   : > { %5419 = vmatprep.mubr.bf16.mxu0 %v6634_v7  ;;  %5452 = vmatpush3.bf16.msra.mxu0 %v6252_v4  ;;  %v517_v4 = vadd.f32 %v6501_v26, %v515_v52  ;;  %508 = vst [vmem:[#allocation2 + $0xd9] sm:$0xff] %v506_v10  ;;  %v529_v24 = vmul.f32 %v4961_v9, %v6490_v18  ;;  %v4969_v29 = vunpack.c.h.bf16 %v4984_v15  ;;  %v1169_v41 = vld [vmem:[#allocation2 + $0x82] sm:$0xff]  ;;  %v6263_v11 = vld [vmem:[%s7509_s3 + $0x30] sm:$0xff]   ;;  %v6262_v60 = vld [vmem:[%s7509_s3 + $0xf8] sm:$0xff]  }
  0x31   : > { %5453 = vmatprep.subr.bf16.mxu0 %v6254_v33  ;;  %5348 = vmatpush3.bf16.msra.mxu1 %v6255_v61  ;;  %v520_v22 = vmax.f32 %v518_v12, 0.0  ;;  %v541_v62 = vmul.f32 %v4964_v6, %v6490_v18  ;;  %509 = vst [vmem:[#allocation2 + $0xe1] sm:$0xff] %v507_v19  ;;  %v542_v27 = vmul.f32 %v4965_v13, %v6490_v18  ;;  %v532_v34 = vmax.f32 %v530_v23, 0.0  ;;  %v1172_v9 = vld [vmem:[#allocation2 + $0x9a] sm:$0xff]  ;;  %v1173_v6 = vld [vmem:[#allocation2 + $0xa2] sm:$0xff] }
  0x32   : > { %5349 = vmatprep.subr.bf16.mxu1 %v6257_v40  ;;  %v519_v61 = vmax.f32 %v517_v4, 0.0  ;;  %v531_v35 = vadd.f32 %v6501_v26, %v529_v24  ;;  %v554_v47 = vmul.f32 %v4968_v28, %v6490_v18  ;;  %v675_v49 = vpack.c.bf16 %v647_v31, %v646_v30  ;;  %v6734_v15 = vld [vmem:[%s7509_s3 + $0x100] sm:$0xff]  }
  0x33   : > { %522 = vst [vmem:[#allocation2 + $0xf3] sm:$0xff] %v520_v22  ;;  %v543_v36 = vadd.f32 %v6501_v26, %v541_v62  ;;  %534 = vst [vmem:[#allocation2 + $0xfd] sm:$0xff] %v532_v34  ;;  %v6717_v52 = vpack.c.bf16 %v1168_v37, %v1167_v32  ;;  %v676_v54 = vpack.c.bf16 %v649_v39, %v648_v38  ;;  %v653_v12 = vld [vmem:[#allocation2 + $0xa9] sm:$0xff] }
  0x34   : > { %5454 = vmatpush3.bf16.msra.mxu0 %v6254_v33  ;;  %521 = vst [vmem:[#allocation2 + $0xeb] sm:$0xff] %v519_v61  ;;  %v6260_v33 = vld [vmem:[%s7509_s3 + $0xf0] sm:$0xff]   ;;  %v533_v43 = vmax.f32 %v531_v35, 0.0  ;;  %v677_v61 = vpack.c.bf16 %v455_v2, %v454_v56  ;;  %v6745_v22 = vpack.c.bf16 %v1172_v9, %v1171_v8  ;;  %v6763_v38 = vpack.c.bf16 %v468_v20, %v467_v14  ;;  %v565_v8 = vld [vmem:[#allocation2 + $0x18] sm:$0xff]  ;;  %v566_v9 = vld [vmem:[#allocation2 + $0x20] sm:$0xff] }
  0x35   : > { %5455 = vmatprep.subr.bf16.mxu0 %v6256_v50  ;;  %5350 = vmatpush3.bf16.msra.mxu1 %v6257_v40  ;;  %v544_v40 = vadd.f32 %v6501_v26, %v542_v27  ;;  %v545_v45 = vmax.f32 %v543_v36, 0.0  ;;  %v1174_v13 = vld [vmem:[#allocation2 + $0xaa] sm:$0xff]  ;;  %v655_v62 = vld [vmem:[#allocation2 + $0xb9] sm:$0xff]  ;;  %v656_v2 = vld [vmem:[#allocation2 + $0xc1] sm:$0xff] }
  0x36   : > { %5316 = vmatmul.mubr.bf16.gmra.mrb[8].mxu1 %v673_v42  ;;  %5351 = vmatprep.subr.bf16.mxu1 %v6259_v0  ;;  %v1170_v42 = vld [vmem:[#allocation2 + $0x8a] sm:$0xff]  ;;  %535 = vst [vmem:[#allocation2 + $0x105] sm:$0xff] %v533_v43  ;;  %v6747_v24 = vpack.c.bf16 %v1174_v13, %v1173_v6  ;;  %v1175_v51 = vld [vmem:[#allocation2 + $0xb2] sm:$0xff]  ;;  %v1176_v56 = vld [vmem:[#allocation2 + $0xba] sm:$0xff] }
  0x37   : > { %5420 = vmatmul.mubr.bf16.gmra.mrb[8].mxu0 %v6661_v48  ;;  %5319 = vmatprep.mubr.bf16.mxu1 %v674_v55  ;;  %v546_v1 = vmax.f32 %v544_v40, 0.0  ;;  %547 = vst [vmem:[#allocation2 + $0x10f] sm:$0xff] %v545_v45  ;;  %v556_v55 = vadd.f32 %v6501_v26, %v554_v47  ;;  %v6720_v57 = vpack.c.bf16 %v1170_v42, %v1169_v41  ;;  %v654_v44 = vld [vmem:[#allocation2 + $0xb1] sm:$0xff]  ;;  %v1177_v27 = vld [vmem:[#allocation2 + $0xc2] sm:$0xff] }
  0x38   : > { %5423 = vmatprep.mubr.bf16.mxu0 %v6687_v16  ;;  %5456 = vmatpush3.bf16.msra.mxu0 %v6256_v50  ;;  %v555_v50 = vmul.f32 %v4969_v29, %v6490_v18  ;;  %v1178_v28 = vld [vmem:[#allocation2 + $0xca] sm:$0xff]  ;;  %v679_v29 = vpack.c.bf16 %v655_v62, %v654_v44  ;;  %v6753_v30 = vpack.c.bf16 %v1176_v56, %v1175_v51  ;;  %v1179_v34 = vld [vmem:[#allocation2 + $0xd2] sm:$0xff]  ;;  %v1180_v35 = vld [vmem:[#allocation2 + $0xda] sm:$0xff] }
  0x39   : > { %5457 = vmatprep.subr.bf16.mxu0 %v6258_v21  ;;  %5352 = vmatpush3.bf16.msra.mxu1 %v6259_v0  ;;  %548 = vst [vmem:[#allocation2 + $0x117] sm:$0xff] %v546_v1  ;;  %v558_v18 = vmax.f32 %v556_v55, 0.0  ;;  %v6264_v0 = vld [vmem:[%s7509_s3 + $0x38] sm:$0xff]   ;;  %v6755_v32 = vpack.c.bf16 %v1178_v28, %v1177_v27  ;;  %v1181_v37 = vld [vmem:[#allocation2 + $0xe2] sm:$0xff]  ;;  %v6767_v41 = vpack.c.bf16 %v1180_v35, %v1179_v34  ;;  %v6268_v51 = vld [vmem:[%s7509_s3 + $0x110] sm:$0xff]  }
  0x3a   : > { %5353 = vmatprep.subr.bf16.mxu1 %v6261_v25  ;;  %v557_v58 = vadd.f32 %v6501_v26, %v555_v50  ;;  %v652_v26 = vld [vmem:[#allocation2 + $0xa1] sm:$0xff]  ;;  %v663_v3 = vld [vmem:[#allocation2 + $0xf9] sm:$0xff]  ;;  %v576_v35 = vld [vmem:[#allocation2 + $0x70] sm:$0xff] }
  0x3b   : > { %560 = vst [vmem:[#allocation2 + $0x121] sm:$0xff] %v558_v18  ;;  %v678_v23 = vpack.c.bf16 %v653_v12, %v652_v26  ;;  %v661_v36 = vld [vmem:[#allocation2 + $0xe9] sm:$0xff]  ;;  %v662_v45 = vld [vmem:[#allocation2 + $0xf1] sm:$0xff]  ;;  %v1184_v5 = vld [vmem:[#allocation2 + $0xfa] sm:$0xff] }
  0x3c   : > { %5458 = vmatpush3.bf16.msra.mxu0 %v6258_v21  ;;  %v559_v4 = vmax.f32 %v557_v58, 0.0  ;;  %v6743_v21 = vld [vmem:[%s7509_s3 + $0x200] sm:$0xff]   ;;  %v1182_v39 = vld [vmem:[#allocation2 + $0xea] sm:$0xff]  ;;  %v682_v42 = vpack.c.bf16 %v661_v36, %v507_v19  ;;  %v1183_v47 = vld [vmem:[#allocation2 + $0xf2] sm:$0xff] }
  0x3d   : > { %5459 = vmatprep.subr.bf16.mxu0 %v6260_v33  ;;  %5354 = vmatpush3.bf16.msra.mxu1 %v6261_v25  ;;  %v657_v25 = vld [vmem:[#allocation2 + $0xc9] sm:$0xff]  ;;  %v6771_v43 = vpack.c.bf16 %v1182_v39, %v1181_v37  ;;  %v664_v14 = vld [vmem:[#allocation2 + $0x101] sm:$0xff]  ;;  %v6775_v1 = vpack.c.bf16 %v1184_v5, %v1183_v47  ;;  %v569_v44 = vld [vmem:[#allocation2 + $0x38] sm:$0xff] }
  0x3e   : > { %5320 = vmatmul.mubr.bf16.gmra.mrb[12].mxu1 %v675_v49  ;;  %5355 = vmatprep.subr.bf16.mxu1 %v6263_v11  ;;  %561 = vst [vmem:[#allocation2 + $0x129] sm:$0xff] %v559_v4  ;;  %v680_v31 = vpack.c.bf16 %v657_v25, %v656_v2  ;;  %v665_v20 = vld [vmem:[#allocation2 + $0x109] sm:$0xff]  ;;  %v683_v49 = vpack.c.bf16 %v663_v3, %v662_v45  ;;  %v6783_v18 = vld [vmem:[#allocation2] sm:$0xff]  ;;  %v573_v25 = vld [vmem:[#allocation2 + $0x58] sm:$0xff] }
  0x3f   : > { %5424 = vmatmul.mubr.bf16.gmra.mrb[12].mxu0 %v6717_v52  ;;  %5323 = vmatprep.mubr.bf16.mxu1 %v676_v54  ;;  %v1185_v59 = vld [vmem:[#allocation2 + $0x102] sm:$0xff]  ;;  %v684_v63 = vpack.c.bf16 %v665_v20, %v664_v14  ;;  %v564_v4 = vld [vmem:[#allocation2 + $0x10] sm:$0xff]  ;;  %v577_v36 = vld [vmem:[#allocation2 + $0x78] sm:$0xff] }
  0x40   : > { %5427 = vmatprep.mubr.bf16.mxu0 %v6720_v57  ;;  %5460 = vmatpush3.bf16.msra.mxu0 %v6260_v33  ;;  %v658_v33 = vld [vmem:[#allocation2 + $0xd1] sm:$0xff]  ;;  %v667_v50 = vld [vmem:[#allocation2 + $0x119] sm:$0xff]  ;;  %v567_v26 = vld [vmem:[#allocation2 + $0x28] sm:$0xff]  ;;  %v599_v12 = vpack.c.bf16 %v565_v8, %v564_v4 }
  0x41   : > { %5461 = vmatprep.subr.bf16.mxu0 %v6262_v60  ;;  %5356 = vmatpush3.bf16.msra.mxu1 %v6263_v11  ;;  %v681_v40 = vpack.c.bf16 %v506_v10, %v658_v33  ;;  %v1186_v10 = vld [vmem:[#allocation2 + $0x10a] sm:$0xff]  ;;  %v1187_v54 = vld [vmem:[#allocation2 + $0x112] sm:$0xff]  ;;  %v600_v6 = vpack.c.bf16 %v567_v26, %v566_v9  ;;  %v570_v62 = vld [vmem:[#allocation2 + $0x40] sm:$0xff] }
  0x42   : > { %5357 = vmatprep.subr.bf16.mxu1 %v6264_v0  ;;  %v6777_v19 = vpack.c.bf16 %v1186_v10, %v1185_v59  ;;  %v666_v11 = vld [vmem:[#allocation2 + $0x111] sm:$0xff]  ;;  %v1188_v55 = vld [vmem:[#allocation2 + $0x11a] sm:$0xff]  ;;  %v6266_v13 = vld [vmem:[%s7509_s3 + $0x108] sm:$0xff]  }
  0x43   : > { %v685_v58 = vpack.c.bf16 %v667_v50, %v666_v11  ;;  %v574_v27 = vld [vmem:[#allocation2 + $0x60] sm:$0xff]  ;;  %v575_v28 = vld [vmem:[#allocation2 + $0x68] sm:$0xff]  ;;  %v6281_v47 = vld [vmem:[%s7509_s3 + $0x238] sm:$0xff]  }
  0x44   : > { %5462 = vmatpush3.bf16.msra.mxu0 %v6262_v60  ;;  %v6781_v60 = vpack.c.bf16 %v1188_v55, %v1187_v54  ;;  %v604_v33 = vpack.c.bf16 %v575_v28, %v574_v27  ;;  %v6277_v34 = vld [vmem:[%s7509_s3 + $0x228] sm:$0xff]   ;;  %v578_v37 = vld [vmem:[#allocation2 + $0x80] sm:$0xff]  ;;  %v580_v3 = vld [vmem:[#allocation2 + $0x90] sm:$0xff] }
  0x45   : > { %5358 = vmatpush3.bf16.msra.mxu1 %v6264_v0  ;;  %5499 = vmatprep.subr.bf16.mxu0 %v6734_v15  ;;  %v598_v0 = vpack.c.bf16 %v6783_v18, %v6783_v18  ;;  %v579_v39 = vld [vmem:[#allocation2 + $0x88] sm:$0xff]  ;;  %v581_v5 = vld [vmem:[#allocation2 + $0x98] sm:$0xff]  ;;  %v582_v14 = vld [vmem:[#allocation2 + $0xa0] sm:$0xff] }
  0x46   : > { %5324 = vmatmul.mubr.bf16.gmra.mrb[16].mxu1 %v677_v61  ;;  %5919 = vmatprep.subr.bf16.mxu1 %v6743_v21  ;;  %v6269_v61 = vld [vmem:[%s7509_s3 + $0x208] sm:$0xff]   ;;  %v606_v45 = vpack.c.bf16 %v579_v39, %v578_v37  ;;  %v6844_v59 = vld [vmem:[%s7509_s3 + $0x140] sm:$0xff]   ;;  %v607_v10 = vpack.c.bf16 %v581_v5, %v580_v3  ;;  %v588_v55 = vld [vmem:[#allocation2 + $0xd0] sm:$0xff] }
  0x47   : > { %5428 = vmatmul.mubr.bf16.gmra.mrb[16].mxu0 %v6745_v22  ;;  %5327 = vmatprep.mubr.bf16.mxu1 %v678_v23  ;;  %v568_v23 = vld [vmem:[#allocation2 + $0x30] sm:$0xff]  ;;  %v583_v20 = vld [vmem:[#allocation2 + $0xa8] sm:$0xff]  ;;  %v593_v9 = vld [vmem:[#allocation2 + $0xf8] sm:$0xff] }
  0x48   : > { %5431 = vmatprep.mubr.bf16.mxu0 %v6747_v24  ;;  %v601_v56 = vpack.c.bf16 %v569_v44, %v568_v23  ;;  %v587_v11 = vld [vmem:[#allocation2 + $0xc8] sm:$0xff]  ;;  %v594_v26 = vld [vmem:[#allocation2 + $0x100] sm:$0xff]  ;;  %v1817_v44 = vld [vmem:[#allocation2 + $0x13] sm:$0xff] }
  0x49   : > { %v591_v4 = vld [vmem:[#allocation2 + $0xe8] sm:$0xff]  ;;  %v3155_v37 = vld [vmem:[#allocation2 + $0x76] sm:$0xff]  ;;  %v3156_v39 = vld [vmem:[#allocation2 + $0x7e] sm:$0xff] }
  0x4a   : > { %v1520_v23 = vld [vmem:[#allocation2 + $0x12a] sm:$0xff] }
  0x4b   : > { %v3153_v27 = vld [vmem:[#allocation2 + $0x66] sm:$0xff]  ;;  %v3154_v28 = vld [vmem:[#allocation2 + $0x6e] sm:$0xff] }
  0x4e   : > { %5328 = vmatmul.mubr.bf16.gmra.mrb[20].mxu1 %v679_v29  ;;  %v6272_v29 = vld [vmem:[%s7509_s3 + $0x120] sm:$0xff]  }
  0x4f   : > { %5432 = vmatmul.mubr.bf16.gmra.mrb[20].mxu0 %v6753_v30  ;;  %5331 = vmatprep.mubr.bf16.mxu1 %v680_v31 }
  0x50   : > { %5435 = vmatprep.mubr.bf16.mxu0 %v6755_v32 }
  0x56   : > { %5332 = vmatmul.mubr.bf16.gmra.mrb[24].mxu1 %v681_v40  ;;  %v6276_v40 = vld [vmem:[%s7509_s3 + $0x130] sm:$0xff]  }
  0x57   : > { %5436 = vmatmul.mubr.bf16.gmra.mrb[24].mxu0 %v6767_v41  ;;  %5335 = vmatprep.mubr.bf16.mxu1 %v682_v42  ;;  %v605_v42 = vpack.c.bf16 %v577_v36, %v576_v35  ;;  %v1824_v35 = vld [vmem:[#allocation2 + $0x4b] sm:$0xff]  ;;  %v1825_v36 = vld [vmem:[#allocation2 + $0x53] sm:$0xff] }
  0x58   : > { %5439 = vmatprep.mubr.bf16.mxu0 %v6771_v43 }
  0x5e   : > { %5336 = vmatmul.mubr.bf16.gmra.mrb[28].mxu1 %v683_v49  ;;  %v608_v49 = vpack.c.bf16 %v583_v20, %v582_v14  ;;  %v6286_v14 = vld [vmem:[%s7509_s3 + $0x158] sm:$0xff]   ;;  %v6287_v20 = vld [vmem:[%s7512_s6 + $0x10] sm:$0xff]  }
  0x5f   : > { %5440 = vmatmul.mubr.bf16.gmra.mrb[28].mxu0 %v6775_v1  ;;  %5339 = vmatprep.mubr.bf16.mxu1 %v684_v63  ;;  %v586_v63 = vld [vmem:[#allocation2 + $0xc0] sm:$0xff] }
  0x60   : > { %5443 = vmatprep.mubr.bf16.mxu0 %v6777_v19  ;;  %v610_v54 = vpack.c.bf16 %v587_v11, %v586_v63  ;;  %v3161_v63 = vld [vmem:[#allocation2 + $0xa6] sm:$0xff]  ;;  %v3162_v11 = vld [vmem:[#allocation2 + $0xae] sm:$0xff] }
  0x66   : > { %5340 = vmatmul.mubr.bf16.gmra.mrb[32].mxu1 %v685_v58  ;;  %v589_v58 = vld [vmem:[#allocation2 + $0xd8] sm:$0xff] }
  0x67   : > { %5444 = vmatmul.mubr.bf16.gmra.mrb[32].mxu0 %v6781_v60  ;;  %5359 = vmatprep.mubr.bf16.mxu1 %v598_v0  ;;  %v590_v0 = vld [vmem:[#allocation2 + $0xe0] sm:$0xff] }
  0x68   : > { %5463 = vmatprep.mubr.bf16.mxu0 %v6581_v46  ;;  %v571_v46 = vld [vmem:[#allocation2 + $0x48] sm:$0xff]  ;;  %v612_v8 = vpack.c.bf16 %v591_v4, %v590_v0 }
  0x69   : > { %v602_v2 = vpack.c.bf16 %v571_v46, %v570_v62  ;;  %v1818_v62 = vld [vmem:[#allocation2 + $0x1b] sm:$0xff]  ;;  %v3150_v46 = vld [vmem:[#allocation2 + $0x4e] sm:$0xff] }
  0x6e   : > { %5360 = vmatmul.mubr.bf16.vlgmr.msra.gmra.mrb[0].mxu1 %v599_v12  ;;  %v595_v12 = vld [vmem:[#allocation2 + $0x108] sm:$0xff] }
  0x6f   : > { %5464 = vmatmul.mubr.bf16.vlgmr.msra.gmra.mrb[0].mxu0 %v6590_v53  ;;  %5363 = vmatprep.mubr.bf16.mxu1 %v600_v6  ;;  %v6271_v53 = vld [vmem:[%s7509_s3 + $0x210] sm:$0xff]   ;;  %v614_v6 = vpack.c.bf16 %v595_v12, %v594_v26  ;;  %v1831_v26 = vld [vmem:[#allocation2 + $0x83] sm:$0xff] }
  0x70   : > { %5500 = vmatpush3.bf16.msra.mxu0 %v6734_v15  ;;  %5467 = vmatprep.mubr.bf16.mxu0 %v6620_v17  ;;  %v6270_v17 = vld [vmem:[%s7509_s3 + $0x118] sm:$0xff]   ;;  %v1832_v12 = vld [vmem:[#allocation2 + $0x8b] sm:$0xff] }
  0x71   : > { %5501 = vmatprep.subr.bf16.mxu0 %v6266_v13  ;;  %5927 = vmatpush3.bf16.msra.mxu1 %v6743_v21  ;;  %v6273_v15 = vld [vmem:[%s7509_s3 + $0x218] sm:$0xff]   ;;  %v572_v21 = vld [vmem:[#allocation2 + $0x50] sm:$0xff] }
  0x72   : > { %5920 = vmatprep.subr.bf16.mxu1 %v6269_v61  ;;  %v603_v31 = vpack.c.bf16 %v573_v25, %v572_v21  ;;  %v1822_v21 = vld [vmem:[#allocation2 + $0x3b] sm:$0xff] }
  0x73   : > { %v3152_v25 = vld [vmem:[#allocation2 + $0x5e] sm:$0xff] }
  0x74   : > { %5502 = vmatpush3.bf16.msra.mxu0 %v6266_v13  ;;  %v596_v13 = vld [vmem:[#allocation2 + $0x110] sm:$0xff] }
  0x75   : > { %5503 = vmatprep.subr.bf16.mxu0 %v6268_v51  ;;  %5928 = vmatpush3.bf16.msra.mxu1 %v6269_v61  ;;  %v597_v61 = vld [vmem:[#allocation2 + $0x118] sm:$0xff] }
  0x76   : > { %5364 = vmatmul.mubr.bf16.gmra.mrb[4].mxu1 %v601_v56  ;;  %5921 = vmatprep.subr.bf16.mxu1 %v6271_v53 }
  0x77   : > { %5468 = vmatmul.mubr.bf16.gmra.mrb[4].mxu0 %v6634_v7  ;;  %5367 = vmatprep.mubr.bf16.mxu1 %v602_v2  ;;  %v6275_v7 = vld [vmem:[%s7509_s3 + $0x220] sm:$0xff]  }
  0x78   : > { %5471 = vmatprep.mubr.bf16.mxu0 %v6661_v48  ;;  %5504 = vmatpush3.bf16.msra.mxu0 %v6268_v51  ;;  %v6274_v48 = vld [vmem:[%s7509_s3 + $0x128] sm:$0xff]   ;;  %v615_v51 = vpack.c.bf16 %v597_v61, %v596_v13  ;;  %v1833_v13 = vld [vmem:[#allocation2 + $0x93] sm:$0xff] }
  0x79   : > { %5505 = vmatprep.subr.bf16.mxu0 %v6270_v17  ;;  %5929 = vmatpush3.bf16.msra.mxu1 %v6271_v53  ;;  %v1853_v53 = vpack.c.bf16 %v1818_v62, %v1817_v44  ;;  %v1819_v2 = vld [vmem:[#allocation2 + $0x23] sm:$0xff]  ;;  %v6292_v44 = vld [vmem:[%s7509_s3 + $0x170] sm:$0xff]  }
  0x7a   : > { %5922 = vmatprep.subr.bf16.mxu1 %v6273_v15  ;;  %v3165_v61 = vld [vmem:[#allocation2 + $0xc6] sm:$0xff] }
  0x7b   : > { %v6293_v62 = vld [vmem:[%s7512_s6 + $0x28] sm:$0xff]  }
  0x7c   : > { %5506 = vmatpush3.bf16.msra.mxu0 %v6270_v17  ;;  %v1820_v17 = vld [vmem:[#allocation2 + $0x2b] sm:$0xff] }
  0x7d   : > { %5507 = vmatprep.subr.bf16.mxu0 %v6272_v29  ;;  %5930 = vmatpush3.bf16.msra.mxu1 %v6273_v15  ;;  %v1821_v15 = vld [vmem:[#allocation2 + $0x33] sm:$0xff] }
  0x7e   : > { %5368 = vmatmul.mubr.bf16.gmra.mrb[8].mxu1 %v603_v31  ;;  %5923 = vmatprep.subr.bf16.mxu1 %v6275_v7  ;;  %v6282_v31 = vld [vmem:[%s7509_s3 + $0x148] sm:$0xff]  }
  0x7f   : > { %5472 = vmatmul.mubr.bf16.gmra.mrb[8].mxu0 %v6687_v16  ;;  %5371 = vmatprep.mubr.bf16.mxu1 %v604_v33  ;;  %v6279_v16 = vld [vmem:[%s7509_s3 + $0x230] sm:$0xff]   ;;  %v6283_v33 = vld [vmem:[%s7512_s6] sm:$0xff]  }
  0x80   : > { %5475 = vmatprep.mubr.bf16.mxu0 %v6717_v52  ;;  %5508 = vmatpush3.bf16.msra.mxu0 %v6272_v29  ;;  %v6278_v52 = vld [vmem:[%s7509_s3 + $0x138] sm:$0xff]  }
  0x81   : > { %5509 = vmatprep.subr.bf16.mxu0 %v6274_v48  ;;  %5931 = vmatpush3.bf16.msra.mxu1 %v6275_v7  ;;  %v3185_v7 = vpack.c.bf16 %v3154_v28, %v3153_v27  ;;  %v6296_v27 = vld [vmem:[%s7512_s6 + $0x38] sm:$0xff]   ;;  %v6911_v28 = vld [vmem:[%s7509_s3 + $0x180] sm:$0xff]  }
  0x82   : > { %5924 = vmatprep.subr.bf16.mxu1 %v6277_v34 }
  0x84   : > { %5510 = vmatpush3.bf16.msra.mxu0 %v6274_v48  ;;  %v1855_v48 = vpack.c.bf16 %v1822_v21, %v1821_v15  ;;  %v1837_v15 = vld [vmem:[#allocation2 + $0xb3] sm:$0xff]  ;;  %v3169_v21 = vld [vmem:[#allocation2 + $0xe6] sm:$0xff] }
  0x85   : > { %5511 = vmatprep.subr.bf16.mxu0 %v6276_v40  ;;  %5932 = vmatpush3.bf16.msra.mxu1 %v6277_v34  ;;  %v1823_v34 = vld [vmem:[#allocation2 + $0x43] sm:$0xff] }
  0x86   : > { %5372 = vmatmul.mubr.bf16.gmra.mrb[12].mxu1 %v605_v42  ;;  %5925 = vmatprep.subr.bf16.mxu1 %v6279_v16  ;;  %v3157_v42 = vld [vmem:[#allocation2 + $0x86] sm:$0xff]  ;;  %v1856_v3 = vpack.c.bf16 %v1824_v35, %v1823_v34 }
  0x87   : > { %5476 = vmatmul.mubr.bf16.gmra.mrb[12].mxu0 %v6720_v57  ;;  %5375 = vmatprep.mubr.bf16.mxu1 %v606_v45  ;;  %v584_v57 = vld [vmem:[#allocation2 + $0xb0] sm:$0xff]  ;;  %v3173_v35 = vld [vmem:[#allocation2 + $0x106] sm:$0xff] }
  0x88   : > { %5479 = vmatprep.mubr.bf16.mxu0 %v6745_v22  ;;  %5512 = vmatpush3.bf16.msra.mxu0 %v6276_v40  ;;  %v585_v22 = vld [vmem:[#allocation2 + $0xb8] sm:$0xff]  ;;  %v6284_v45 = vld [vmem:[%s7509_s3 + $0x150] sm:$0xff]  }
  0x89   : > { %5513 = vmatprep.subr.bf16.mxu0 %v6278_v52  ;;  %5933 = vmatpush3.bf16.msra.mxu1 %v6279_v16  ;;  %v609_v50 = vpack.c.bf16 %v585_v22, %v584_v57  ;;  %v1826_v40 = vld [vmem:[#allocation2 + $0x5b] sm:$0xff]  ;;  %v3158_v16 = vld [vmem:[#allocation2 + $0x8e] sm:$0xff]  ;;  %v1827_v57 = vld [vmem:[#allocation2 + $0x63] sm:$0xff] }
  0x8a   : > { %5926 = vmatprep.subr.bf16.mxu1 %v6281_v47  ;;  %v3187_v5 = vpack.c.bf16 %v3158_v16, %v3157_v42  ;;  %v1828_v22 = vld [vmem:[#allocation2 + $0x6b] sm:$0xff] }
  0x8b   : > { %v1858_v4 = vpack.c.bf16 %v1828_v22, %v1827_v57  ;;  %v1840_v34 = vld [vmem:[#allocation2 + $0xcb] sm:$0xff]  ;;  %v6371_v57 = vld [vmem:[#allocation2 + $0xf3] sm:$0xff] }
  0x8c   : > { %5514 = vmatpush3.bf16.msra.mxu0 %v6278_v52  ;;  %v6285_v52 = vld [vmem:[%s7512_s6 + $0x8] sm:$0xff]  }
  0x8d   : > { %5551 = vmatprep.subr.bf16.mxu0 %v6844_v59  ;;  %5934 = vmatpush3.bf16.msra.mxu1 %v6281_v47  ;;  %v3186_v47 = vpack.c.bf16 %v3156_v39, %v3155_v37  ;;  %v1841_v37 = vld [vmem:[#allocation2 + $0xd3] sm:$0xff]  ;;  %v1842_v39 = vld [vmem:[#allocation2 + $0xdb] sm:$0xff] }
  0x8e   : > { %5376 = vmatmul.mubr.bf16.gmra.mrb[16].mxu1 %v607_v10  ;;  %5759 = vmatprep.subr.bf16.mxu1 %v6783_v18  ;;  %v3159_v10 = vld [vmem:[#allocation2 + $0x96] sm:$0xff] }
  0x8f   : > { %5480 = vmatmul.mubr.bf16.gmra.mrb[16].mxu0 %v6747_v24  ;;  %5379 = vmatprep.mubr.bf16.mxu1 %v608_v49  ;;  %v611_v24 = vpack.c.bf16 %v589_v58, %v588_v55  ;;  %v3160_v49 = vld [vmem:[#allocation2 + $0x9e] sm:$0xff] }
  0x90   : > { %5483 = vmatprep.mubr.bf16.mxu0 %v6753_v30  ;;  %v592_v30 = vld [vmem:[#allocation2 + $0xf0] sm:$0xff]  ;;  %v6288_v55 = vld [vmem:[%s7509_s3 + $0x160] sm:$0xff]   ;;  %v6289_v58 = vld [vmem:[%s7512_s6 + $0x18] sm:$0xff]   ;;  %v3188_v0 = vpack.c.bf16 %v3160_v49, %v3159_v10 }
  0x96   : > { %5380 = vmatmul.mubr.bf16.gmra.mrb[20].mxu1 %v609_v50  ;;  %v1829_v50 = vld [vmem:[#allocation2 + $0x73] sm:$0xff] }
  0x97   : > { %5484 = vmatmul.mubr.bf16.gmra.mrb[20].mxu0 %v6755_v32  ;;  %5383 = vmatprep.mubr.bf16.mxu1 %v610_v54  ;;  %v613_v32 = vpack.c.bf16 %v593_v9, %v592_v30  ;;  %v1830_v54 = vld [vmem:[#allocation2 + $0x7b] sm:$0xff] }
  0x98   : > { %5487 = vmatprep.mubr.bf16.mxu0 %v6767_v41  ;;  %v1519_v41 = vld [vmem:[#allocation2 + $0x122] sm:$0xff]  ;;  %v1859_v30 = vpack.c.bf16 %v1830_v54, %v1829_v50  ;;  %v1848_v54 = vld [vmem:[#allocation2 + $0x10b] sm:$0xff] }
  0x99   : > { %v6291_v9 = vld [vmem:[%s7512_s6 + $0x20] sm:$0xff]  }
  0x9a   : > { %v1847_v50 = vld [vmem:[#allocation2 + $0x103] sm:$0xff] }
  0x9e   : > { %5384 = vmatmul.mubr.bf16.gmra.mrb[24].mxu1 %v611_v24  ;;  %v3189_v24 = vpack.c.bf16 %v3162_v11, %v3161_v63  ;;  %v3179_v63 = vld [vmem:[#allocation2 + $0x136] sm:$0xff]  ;;  %v3180_v11 = vld [vmem:[#allocation2 + $0x13e] sm:$0xff] }
  0x9f   : > { %5488 = vmatmul.mubr.bf16.gmra.mrb[24].mxu0 %v6771_v43  ;;  %5387 = vmatprep.mubr.bf16.mxu1 %v612_v8  ;;  %v3149_v43 = vld [vmem:[#allocation2 + $0x46] sm:$0xff] }
  0xa0   : > { %5491 = vmatprep.mubr.bf16.mxu0 %v6775_v1  ;;  %v1538_v1 = vpack.c.bf16 %v1520_v23, %v1519_v41  ;;  %v3183_v56 = vpack.c.bf16 %v3150_v46, %v3149_v43  ;;  %v6290_v8 = vld [vmem:[%s7509_s3 + $0x168] sm:$0xff]   ;;  %v1834_v23 = vld [vmem:[#allocation2 + $0x9b] sm:$0xff]  ;;  %v1860_v46 = vpack.c.bf16 %v1832_v12, %v1831_v26 }
  0xa1   : > { %v3166_v41 = vld [vmem:[#allocation2 + $0xce] sm:$0xff] }
  0xa2   : > { %v1852_v26 = vld [vmem:[#allocation2 + $0x12b] sm:$0xff]  ;;  %v2149_v12 = vld [vmem:[#allocation2 + $0x14] sm:$0xff] }
  0xa6   : > { %5388 = vmatmul.mubr.bf16.gmra.mrb[28].mxu1 %v613_v32  ;;  %v3163_v32 = vld [vmem:[#allocation2 + $0xb6] sm:$0xff] }
  0xa7   : > { %5492 = vmatmul.mubr.bf16.gmra.mrb[28].mxu0 %v6777_v19  ;;  %5391 = vmatprep.mubr.bf16.mxu1 %v614_v6  ;;  %v3151_v19 = vld [vmem:[#allocation2 + $0x56] sm:$0xff]  ;;  %v3164_v6 = vld [vmem:[#allocation2 + $0xbe] sm:$0xff] }
  0xa8   : > { %5495 = vmatprep.mubr.bf16.mxu0 %v6781_v60  ;;  %v3184_v29 = vpack.c.bf16 %v3152_v25, %v3151_v19  ;;  %v1854_v60 = vpack.c.bf16 %v1820_v17, %v1819_v2  ;;  %v3190_v43 = vpack.c.bf16 %v3164_v6, %v3163_v32  ;;  %v3167_v2 = vld [vmem:[#allocation2 + $0xd6] sm:$0xff]  ;;  %v3168_v17 = vld [vmem:[#allocation2 + $0xde] sm:$0xff]  ;;  %v3170_v19 = vld [vmem:[#allocation2 + $0xee] sm:$0xff] }
  0xa9   : > { %v1838_v25 = vld [vmem:[#allocation2 + $0xbb] sm:$0xff] }
  0xaa   : > { %v2150_v32 = vld [vmem:[#allocation2 + $0x1c] sm:$0xff] }
  0xae   : > { %5392 = vmatmul.mubr.bf16.gmra.mrb[32].mxu1 %v615_v51  ;;  %v3191_v51 = vpack.c.bf16 %v3166_v41, %v3165_v61  ;;  %v6298_v61 = vld [vmem:[%s7512_s6] sm:$0xff]   ;;  %v2185_v41 = vpack.c.bf16 %v2150_v32, %v2149_v12 }
  0xaf   : > { %5496 = vmatmul.mubr.bf16.gmra.mrb[32].mxu0 %v1538_v1  ;;  %5727 = vmatprep.mubr.bf16.mxu1 %v3183_v56  ;;  %v1861_v1 = vpack.c.bf16 %v1834_v23, %v1833_v13  ;;  %v6294_v56 = vld [vmem:[%s7509_s3 + $0x178] sm:$0xff]   ;;  %v6299_v23 = vld [vmem:[%s7512_s6 + $0x8] sm:$0xff]   ;;  %v6315_v12 = vld [vmem:[%s7512_s6 + $0x20] sm:$0xff]  }
  0xb0   : > { %5515 = vmatprep.mubr.bf16.mxu0 %v1853_v53  ;;  %v6295_v53 = vld [vmem:[%s7512_s6 + $0x30] sm:$0xff]  }
  0xb6   : > { %5728 = vmatmul.mubr.bf16.vlgmr.msra.gmra.mrb[36].mxu1 %v3184_v29  ;;  %v3192_v29 = vpack.c.bf16 %v3168_v17, %v3167_v2  ;;  %v6301_v2 = vld [vmem:[%s7509_s3 + $0x188] sm:$0xff]  }
  0xb7   : > { %5516 = vmatmul.mubr.bf16.vlgmr.msra.gmra.mrb[0].mxu0 %v1854_v60  ;;  %5731 = vmatprep.mubr.bf16.mxu1 %v3185_v7  ;;  %v3193_v60 = vpack.c.bf16 %v3170_v19, %v3169_v21  ;;  %v1839_v7 = vld [vmem:[#allocation2 + $0xc3] sm:$0xff]  ;;  %v2157_v21 = vld [vmem:[#allocation2 + $0x54] sm:$0xff] }
  0xb8   : > { %5552 = vmatpush3.bf16.msra.mxu0 %v6844_v59  ;;  %5519 = vmatprep.mubr.bf16.mxu0 %v1855_v48  ;;  %v1857_v59 = vpack.c.bf16 %v1826_v40, %v1825_v36  ;;  %v3172_v48 = vld [vmem:[#allocation2 + $0xfe] sm:$0xff]  ;;  %v3174_v36 = vld [vmem:[#allocation2 + $0x10e] sm:$0xff]  ;;  %v1864_v42 = vpack.c.bf16 %v1840_v34, %v1839_v7 }
  0xb9   : > { %5553 = vmatprep.subr.bf16.mxu0 %v6282_v31  ;;  %5760 = vmatpush3.bf16.msra.mxu1 %v6283_v33  ;;  %v3171_v33 = vld [vmem:[#allocation2 + $0xf6] sm:$0xff]  ;;  %v3195_v16 = vpack.c.bf16 %v3174_v36, %v3173_v35  ;;  %v2155_v17 = vld [vmem:[#allocation2 + $0x44] sm:$0xff] }
  0xba   : > { %5761 = vmatprep.subr.bf16.mxu1 %v6783_v18  ;;  %v3194_v40 = vpack.c.bf16 %v3172_v48, %v3171_v33  ;;  %v2158_v19 = vld [vmem:[#allocation2 + $0x5c] sm:$0xff]  ;;  %v2159_v7 = vld [vmem:[#allocation2 + $0x64] sm:$0xff]  ;;  %v2160_v33 = vld [vmem:[#allocation2 + $0x6c] sm:$0xff] }
  0xbb   : > { %v2161_v48 = vld [vmem:[#allocation2 + $0x74] sm:$0xff]  ;;  %v2162_v34 = vld [vmem:[#allocation2 + $0x7c] sm:$0xff]  ;;  %v6979_v36 = vpack.c.bf16 %v2160_v33, %v2159_v7  ;;  %v2183_v7 = vld [vmem:[#allocation2 + $0x124] sm:$0xff] }
  0xbc   : > { %5554 = vmatpush3.bf16.msra.mxu0 %v6282_v31  ;;  %v1863_v31 = vpack.c.bf16 %v1838_v25, %v1837_v15  ;;  %v2156_v15 = vld [vmem:[#allocation2 + $0x4c] sm:$0xff]  ;;  %v6310_v35 = vld [vmem:[%s7509_s3 + $0x1a0] sm:$0xff]  }
  0xbd   : > { %5555 = vmatprep.subr.bf16.mxu0 %v6284_v45  ;;  %5762 = vmatpush3.bf16.msra.mxu1 %v6285_v52  ;;  %v3175_v52 = vld [vmem:[#allocation2 + $0x116] sm:$0xff]  ;;  %v2184_v33 = vld [vmem:[#allocation2 + $0x12c] sm:$0xff] }
  0xbe   : > { %5732 = vmatmul.mubr.bf16.gmra.mrb[40].mxu1 %v3186_v47  ;;  %5763 = vmatprep.subr.bf16.mxu1 %v6783_v18  ;;  %v3176_v47 = vld [vmem:[#allocation2 + $0x11e] sm:$0xff]  ;;  %v6304_v25 = vld [vmem:[%s7509_s3 + $0x190] sm:$0xff]  }
  0xbf   : > { %5520 = vmatmul.mubr.bf16.gmra.mrb[4].mxu0 %v1856_v3  ;;  %5735 = vmatprep.mubr.bf16.mxu1 %v3187_v5  ;;  %v3177_v3 = vld [vmem:[#allocation2 + $0x126] sm:$0xff]  ;;  %v3178_v5 = vld [vmem:[#allocation2 + $0x12e] sm:$0xff] }
  0xc0   : > { %5523 = vmatprep.mubr.bf16.mxu0 %v1857_v59  ;;  %5556 = vmatpush3.bf16.msra.mxu0 %v6284_v45  ;;  %v1865_v45 = vpack.c.bf16 %v1842_v39, %v1841_v37  ;;  %v6370_v59 = vld [vmem:[#allocation2 + $0xeb] sm:$0xff]  ;;  %v3197_v49 = vpack.c.bf16 %v3178_v5, %v3177_v3  ;;  %v6984_v39 = vpack.c.bf16 %v2162_v34, %v2161_v48  ;;  %v2166_v3 = vld [vmem:[#allocation2 + $0x9c] sm:$0xff] }
  0xc1   : > { %5557 = vmatprep.subr.bf16.mxu0 %v6286_v14  ;;  %5764 = vmatpush3.bf16.msra.mxu1 %v6287_v20  ;;  %v3196_v20 = vpack.c.bf16 %v3176_v47, %v3175_v52  ;;  %v6306_v37 = vld [vmem:[%s7512_s6 + $0x30] sm:$0xff]   ;;  %v2163_v52 = vld [vmem:[#allocation2 + $0x84] sm:$0xff]  ;;  %v7086_v48 = vpack.c.bf16 %v2184_v33, %v2183_v7 }
  0xc2   : > { %5765 = vmatprep.subr.bf16.mxu1 %v6783_v18  ;;  %v2164_v47 = vld [vmem:[#allocation2 + $0x8c] sm:$0xff] }
  0xc3   : > { %v6324_v34 = vld [vmem:[%s7512_s6 + $0x10] sm:$0xff]  }
  0xc4   : > { %5558 = vmatpush3.bf16.msra.mxu0 %v6286_v14  ;;  %v1846_v14 = vld [vmem:[#allocation2 + $0xfb] sm:$0xff] }
  0xc5   : > { %5559 = vmatprep.subr.bf16.mxu0 %v6288_v55  ;;  %5766 = vmatpush3.bf16.msra.mxu1 %v6289_v58  ;;  %v1867_v22 = vpack.c.bf16 %v1846_v14, %v6371_v57  ;;  %v1850_v58 = vld [vmem:[#allocation2 + $0x11b] sm:$0xff]  ;;  %v6317_v14 = vld [vmem:[%s7509_s3 + $0x1b0] sm:$0xff]   ;;  %v6311_v57 = vld [vmem:[%s7512_s6 + $0x8] sm:$0xff]  }
  0xc6   : > { %5736 = vmatmul.mubr.bf16.gmra.mrb[44].mxu1 %v3188_v0  ;;  %5767 = vmatprep.subr.bf16.mxu1 %v6783_v18  ;;  %v3198_v0 = vpack.c.bf16 %v3180_v11, %v3179_v63  ;;  %v2168_v63 = vld [vmem:[#allocation2 + $0xac] sm:$0xff]  ;;  %v2169_v11 = vld [vmem:[#allocation2 + $0xb4] sm:$0xff] }
  0xc7   : > { %5524 = vmatmul.mubr.bf16.gmra.mrb[8].mxu0 %v1858_v4  ;;  %5739 = vmatprep.mubr.bf16.mxu1 %v3189_v24  ;;  %v1868_v4 = vpack.c.bf16 %v1848_v54, %v1847_v50  ;;  %v2170_v50 = vld [vmem:[#allocation2 + $0xbc] sm:$0xff] }
  0xc8   : > { %5527 = vmatprep.mubr.bf16.mxu0 %v1859_v30  ;;  %5560 = vmatpush3.bf16.msra.mxu0 %v6288_v55  ;;  %v1849_v55 = vld [vmem:[#allocation2 + $0x113] sm:$0xff]  ;;  %v3557_v30 = vld [vmem:[%s6921_s19 + $0x8] sm:$0xff]  ;;  %v7023_v54 = vld [vmem:[%s7509_s3 + $0x1c0] sm:$0xff]  }
  0xc9   : > { %5561 = vmatprep.subr.bf16.mxu0 %v6290_v8  ;;  %5768 = vmatpush3.bf16.msra.mxu1 %v6291_v9  ;;  %v1869_v24 = vpack.c.bf16 %v1850_v58, %v1849_v55  ;;  %v1851_v9 = vld [vmem:[#allocation2 + $0x123] sm:$0xff]  ;;  %v6312_v58 = vld [vmem:[%s7512_s6 + $0x10] sm:$0xff]  }
  0xca   : > { %5769 = vmatprep.subr.bf16.mxu1 %v6783_v18  ;;  %v1870_v13 = vpack.c.bf16 %v1852_v26, %v1851_v9  ;;  %v2174_v9 = vld [vmem:[#allocation2 + $0xdc] sm:$0xff] }
  0xcc   : > { %5562 = vmatpush3.bf16.msra.mxu0 %v6290_v8  ;;  %v3556_v8 = vld [vmem:[%s6921_s19] sm:$0xff] }
  0xcd   : > { %5563 = vmatprep.subr.bf16.mxu0 %v6292_v44  ;;  %5770 = vmatpush3.bf16.msra.mxu1 %v6293_v62  ;;  %v3558_v6 = vpack.c.bf16 %v3557_v30, %v3556_v8  ;;  %v2152_v62 = vld [vmem:[#allocation2 + $0x2c] sm:$0xff]  ;;  %v2173_v30 = vld [vmem:[#allocation2 + $0xd4] sm:$0xff] }
  0xce   : > { %5740 = vmatmul.mubr.bf16.gmra.mrb[48].mxu1 %v3190_v43  ;;  %5771 = vmatprep.subr.bf16.mxu1 %v6783_v18  ;;  %v2153_v43 = vld [vmem:[#allocation2 + $0x34] sm:$0xff]  ;;  %v2172_v8 = vld [vmem:[#allocation2 + $0xcc] sm:$0xff]  ;;  %v7045_v32 = vpack.c.bf16 %v2174_v9, %v2173_v30 }
  0xcf   : > { %5528 = vmatmul.mubr.bf16.gmra.mrb[12].mxu0 %v1860_v46  ;;  %5743 = vmatprep.mubr.bf16.mxu1 %v3191_v51  ;;  %v2154_v46 = vld [vmem:[#allocation2 + $0x3c] sm:$0xff] }
  0xd0   : > { %5531 = vmatprep.mubr.bf16.mxu0 %v1861_v1  ;;  %5564 = vmatpush3.bf16.msra.mxu0 %v6292_v44  ;;  %v2151_v44 = vld [vmem:[#allocation2 + $0x24] sm:$0xff]  ;;  %v6300_v1 = vld [vmem:[%s7512_s6 + $0x10] sm:$0xff]  }
  0xd1   : > { %5565 = vmatprep.subr.bf16.mxu0 %v6294_v56  ;;  %5772 = vmatpush3.bf16.msra.mxu1 %v6295_v53  ;;  %v6936_v51 = vpack.c.bf16 %v2152_v62, %v2151_v44  ;;  %v6943_v53 = vld [vmem:[#allocation2] sm:$0xff]  ;;  %v6318_v62 = vld [vmem:[%s7512_s6 + $0x30] sm:$0xff]  }
  0xd2   : > { %5773 = vmatprep.subr.bf16.mxu1 %v6783_v18 }
  0xd4   : > { %5566 = vmatpush3.bf16.msra.mxu0 %v6294_v56  ;;  %v6941_v56 = vpack.c.bf16 %v2154_v46, %v2153_v43  ;;  %v6319_v46 = vld [vmem:[%s7512_s6 + $0x38] sm:$0xff]  }
  0xd5   : > { %5774 = vmatpush3.bf16.msra.mxu1 %v6296_v27  ;;  %5603 = vmatprep.subr.bf16.mxu0 %v6911_v28  ;;  %v6959_v27 = vpack.c.bf16 %v2156_v15, %v2155_v17  ;;  %v2180_v17 = vld [vmem:[#allocation2 + $0x10c] sm:$0xff]  ;;  %v2181_v15 = vld [vmem:[#allocation2 + $0x114] sm:$0xff] }
  0xd6   : > { %5744 = vmatmul.mubr.bf16.gmra.mrb[52].mxu1 %v3192_v29  ;;  %5779 = vmatprep.subr.bf16.mxu1 %v6783_v18  ;;  %v6964_v29 = vpack.c.bf16 %v2158_v19, %v2157_v21  ;;  %v2182_v21 = vld [vmem:[#allocation2 + $0x11c] sm:$0xff] }
  0xd7   : > { %5532 = vmatmul.mubr.bf16.gmra.mrb[16].mxu0 %v6763_v38  ;;  %5747 = vmatprep.mubr.bf16.mxu1 %v3193_v60  ;;  %v1843_v38 = vld [vmem:[#allocation2 + $0xe3] sm:$0xff]  ;;  %v6307_v60 = vld [vmem:[%s7509_s3 + $0x198] sm:$0xff]  }
  0xd8   : > { %5535 = vmatprep.mubr.bf16.mxu0 %v1863_v31  ;;  %v1866_v10 = vpack.c.bf16 %v6370_v59, %v1843_v38  ;;  %v6305_v31 = vld [vmem:[%s7512_s6 + $0x28] sm:$0xff]   ;;  %v2165_v38 = vld [vmem:[#allocation2 + $0x94] sm:$0xff]  ;;  %v6309_v59 = vld [vmem:[%s7512_s6] sm:$0xff]  }
  0xde   : > { %5748 = vmatmul.mubr.bf16.gmra.mrb[56].mxu1 %v3194_v40  ;;  %v6314_v40 = vld [vmem:[%s7509_s3 + $0x1a8] sm:$0xff]  }
  0xdf   : > { %5536 = vmatmul.mubr.bf16.gmra.mrb[20].mxu0 %v1864_v42  ;;  %5751 = vmatprep.mubr.bf16.mxu1 %v3195_v16  ;;  %v6308_v42 = vld [vmem:[%s7512_s6 + $0x38] sm:$0xff]   ;;  %v4824_v16 = vld [vmem:[%s6921_s19 + $0x20] sm:$0xff] }
  0xe0   : > { %5539 = vmatprep.mubr.bf16.mxu0 %v1865_v45  ;;  %v4825_v45 = vld [vmem:[%s6921_s19 + $0x28] sm:$0xff] }
  0xe1   : > { %v3673_v5 = vpack.c.bf16 %v4825_v45, %v4824_v16  ;;  %v6326_v16 = vld [vmem:[%s7512_s6 + $0x20] sm:$0xff]  }
  0xe6   : > { %5752 = vmatmul.mubr.bf16.gmra.mrb[60].mxu1 %v3196_v20  ;;  %v7001_v20 = vpack.c.bf16 %v2164_v47, %v2163_v52  ;;  %v6327_v52 = vld [vmem:[%s7509_s3 + $0x1c8] sm:$0xff]  }
  0xe7   : > { %5540 = vmatmul.mubr.bf16.gmra.mrb[24].mxu0 %v1866_v10  ;;  %5755 = vmatprep.mubr.bf16.mxu1 %v3197_v49  ;;  %v7006_v10 = vpack.c.bf16 %v2166_v3, %v2165_v38  ;;  %v6320_v49 = vld [vmem:[%s7509_s3 + $0x1b8] sm:$0xff]  }
  0xe8   : > { %5543 = vmatprep.mubr.bf16.mxu0 %v1867_v22  ;;  %v2167_v22 = vld [vmem:[#allocation2 + $0xa4] sm:$0xff] }
  0xe9   : > { %v7025_v55 = vpack.c.bf16 %v2168_v63, %v2167_v22  ;;  %v6336_v63 = vld [vmem:[%s7509_s3 + $0x1e0] sm:$0xff]  }
  0xee   : > { %5756 = vmatmul.mubr.bf16.gmra.mrb[64].mxu1 %v3198_v0  ;;  %v7030_v0 = vpack.c.bf16 %v2170_v50, %v2169_v11 }
  0xef   : > { %5544 = vmatmul.mubr.bf16.gmra.mrb[28].mxu0 %v1868_v4  ;;  %5775 = vmatprep.mubr.msk.bf16.mxu1 %vm6390_vm0, %v6783_v18  ;;  %v6313_v4 = vld [vmem:[%s7512_s6 + $0x18] sm:$0xff]  }
  0xf0   : > { %5547 = vmatprep.mubr.bf16.mxu0 %v1869_v24  ;;  %v2171_v24 = vld [vmem:[#allocation2 + $0xc4] sm:$0xff] }
  0xf1   : > { %v7040_v26 = vpack.c.bf16 %v2172_v8, %v2171_v24 }
  0xf6   : > { %5776 = vmatmul.mubr.bf16.vlgmr.msra.gmra.mrb[68].mxu1 %v3558_v6  ;;  %v6316_v6 = vld [vmem:[%s7512_s6 + $0x28] sm:$0xff]  }
  0xf7   : > { %5548 = vmatmul.mubr.bf16.gmra.mrb[32].mxu0 %v1870_v13  ;;  %5780 = vmatpush3.bf16.msra.mxu1 %v6298_v61  ;;  %v2175_v13 = vld [vmem:[#allocation2 + $0xe4] sm:$0xff]  ;;  %v2176_v61 = vld [vmem:[#allocation2 + $0xec] sm:$0xff] }
  0xf8   : > { %5567 = vmatprep.mubr.bf16.mxu0 %v2185_v41  ;;  %5781 = vmatprep.subr.bf16.mxu1 %v6783_v18  ;;  %v2177_v41 = vld [vmem:[#allocation2 + $0xf4] sm:$0xff]  ;;  %v7054_v44 = vpack.c.bf16 %v2176_v61, %v2175_v13 }
  0xf9   : > { %5795 = vmatprep.mubr.msk.bf16.mxu1 %vm6390_vm0, %v6783_v18  ;;  %v6302_v18 = vld [vmem:[%s7512_s6 + $0x18] sm:$0xff]  }
  0xfb   : > { %5782 = vmatpush3.bf16.msra.mxu1 %v6299_v23  ;;  %v2178_v23 = vld [vmem:[#allocation2 + $0xfc] sm:$0xff] }
  0xfc   : > { %5783 = vmatprep.subr.bf16.mxu1 %v6943_v53  ;;  %v7059_v43 = vpack.c.bf16 %v2178_v23, %v2177_v41 }
  0xff   : > { %5568 = vmatmul.mubr.bf16.vlgmr.msra.gmra.mrb[0].mxu0 %v6936_v51  ;;  %5784 = vmatpush3.bf16.msra.mxu1 %v6300_v1  ;;  %v4834_v1 = vld [vmem:[%s6921_s19 + $0x40] sm:$0xff] }
 0x100   : > { %5604 = vmatpush3.bf16.msra.mxu0 %v6911_v28  ;;  %5571 = vmatprep.mubr.bf16.mxu0 %v6941_v56  ;;  %v6303_v28 = vld [vmem:[%s7512_s6 + $0x20] sm:$0xff]  }
 0x101   : > { %5605 = vmatprep.subr.bf16.mxu0 %v6301_v2  ;;  %5785 = vmatprep.subr.bf16.mxu1 %v6943_v53 }
 0x103   : > { %5786 = vmatpush3.bf16.msra.mxu1 %v6302_v18  ;;  %v2179_v18 = vld [vmem:[#allocation2 + $0x104] sm:$0xff] }
 0x104   : > { %5606 = vmatpush3.bf16.msra.mxu0 %v6301_v2  ;;  %5787 = vmatprep.subr.bf16.mxu1 %v6943_v53  ;;  %v4835_v2 = vld [vmem:[%s6921_s19 + $0x48] sm:$0xff] }
 0x105   : > { %5607 = vmatprep.subr.bf16.mxu0 %v6304_v25  ;;  %v3788_v19 = vpack.c.bf16 %v4835_v2, %v4834_v1 }
 0x107   : > { %5572 = vmatmul.mubr.bf16.gmra.mrb[4].mxu0 %v6959_v27  ;;  %5788 = vmatpush3.bf16.msra.mxu1 %v6303_v28  ;;  %v6321_v28 = vld [vmem:[%s7512_s6] sm:$0xff]  }
 0x108   : > { %5575 = vmatprep.mubr.bf16.mxu0 %v6964_v29  ;;  %5608 = vmatpush3.bf16.msra.mxu0 %v6304_v25  ;;  %v7070_v25 = vpack.c.bf16 %v2180_v17, %v2179_v18  ;;  %v4854_v17 = vld [vmem:[%s6921_s19 + $0x80] sm:$0xff] }
 0x109   : > { %5789 = vmatprep.subr.bf16.mxu1 %v6943_v53  ;;  %5609 = vmatprep.subr.bf16.mxu0 %v6307_v60 }
 0x10b   : > { %5790 = vmatpush3.bf16.msra.mxu1 %v6305_v31  ;;  %v6322_v31 = vld [vmem:[%s7512_s6 + $0x8] sm:$0xff]  }
 0x10c   : > { %5791 = vmatprep.subr.bf16.mxu1 %v6943_v53  ;;  %5610 = vmatpush3.bf16.msra.mxu0 %v6307_v60  ;;  %v7075_v60 = vpack.c.bf16 %v2182_v21, %v2181_v15  ;;  %v4855_v15 = vld [vmem:[%s6921_s19 + $0x88] sm:$0xff] }
 0x10d   : > { %5611 = vmatprep.subr.bf16.mxu0 %v6310_v35 }
 0x10f   : > { %5576 = vmatmul.mubr.bf16.gmra.mrb[8].mxu0 %v6979_v36  ;;  %5792 = vmatpush3.bf16.msra.mxu1 %v6306_v37 }
 0x110   : > { %5579 = vmatprep.mubr.bf16.mxu0 %v6984_v39  ;;  %5793 = vmatprep.subr.bf16.mxu1 %v6943_v53 }
 0x111   : > { %5612 = vmatpush3.bf16.msra.mxu0 %v6310_v35  ;;  %v6325_v35 = vld [vmem:[%s7512_s6 + $0x18] sm:$0xff]  }
 0x112   : > { %5613 = vmatprep.subr.bf16.mxu0 %v6314_v40 }
 0x113   : > { %5794 = vmatpush3.bf16.msra.mxu1 %v6308_v42 }
 0x114   : > { %5799 = vmatprep.subr.bf16.mxu1 %v6943_v53 }
 0x115   : > { %5614 = vmatpush3.bf16.msra.mxu0 %v6314_v40 }
 0x116   : > { %5796 = vmatmul.mubr.bf16.vlgmr.msra.gmra.mrb[72].mxu1 %v3673_v5  ;;  %5615 = vmatprep.subr.bf16.mxu0 %v6317_v14  ;;  %v6329_v5 = vld [vmem:[%s7512_s6 + $0x30] sm:$0xff]  }
 0x117   : > { %5580 = vmatmul.mubr.bf16.gmra.mrb[12].mxu0 %v7001_v20  ;;  %5800 = vmatpush3.bf16.msra.mxu1 %v6309_v59  ;;  %v6331_v59 = vld [vmem:[%s7512_s6 + $0x38] sm:$0xff]  }
 0x118   : > { %5583 = vmatprep.mubr.bf16.mxu0 %v7006_v10  ;;  %5801 = vmatprep.subr.bf16.mxu1 %v6943_v53 }
 0x119   : > { %5616 = vmatpush3.bf16.msra.mxu0 %v6317_v14  ;;  %5815 = vmatprep.mubr.msk.bf16.mxu1 %vm6390_vm0, %v6943_v53  ;;  %v6333_v14 = vld [vmem:[%s7509_s3 + $0x1d8] sm:$0xff]  }
 0x11a   : > { %5617 = vmatprep.subr.bf16.mxu0 %v6320_v49 }
 0x11b   : > { %5802 = vmatpush3.bf16.msra.mxu1 %v6311_v57  ;;  %v4845_v57 = vld [vmem:[%s6921_s19 + $0x68] sm:$0xff] }
 0x11c   : > { %5803 = vmatprep.subr.bf16.mxu1 %v6943_v53 }
 0x11d   : > { %5618 = vmatpush3.bf16.msra.mxu0 %v6320_v49  ;;  %v4844_v49 = vld [vmem:[%s6921_s19 + $0x60] sm:$0xff] }
 0x11e   : > { %5655 = vmatprep.subr.bf16.mxu0 %v7023_v54  ;;  %v3903_v11 = vpack.c.bf16 %v4845_v57, %v4844_v49  ;;  %v2815_v57 = vld [vmem:[#allocation2 + $0x35] sm:$0xff] }
 0x11f   : > { %5584 = vmatmul.mubr.bf16.gmra.mrb[16].mxu0 %v7025_v55  ;;  %5804 = vmatpush3.bf16.msra.mxu1 %v6312_v58 }
 0x120   : > { %5587 = vmatprep.mubr.bf16.mxu0 %v7030_v0  ;;  %5805 = vmatprep.subr.bf16.mxu1 %v6943_v53 }
 0x123   : > { %5806 = vmatpush3.bf16.msra.mxu1 %v6313_v4  ;;  %v6334_v4 = vld [vmem:[%s7512_s6 + $0x8] sm:$0xff]  }
 0x124   : > { %5807 = vmatprep.subr.bf16.mxu1 %v6943_v53 }
 0x127   : > { %5588 = vmatmul.mubr.bf16.gmra.mrb[20].mxu0 %v7040_v26  ;;  %5808 = vmatpush3.bf16.msra.mxu1 %v6315_v12  ;;  %v6346_v12 = vld [vmem:[%s7509_s3 + $0x1f8] sm:$0xff]  }
 0x128   : > { %5591 = vmatprep.mubr.bf16.mxu0 %v7045_v32  ;;  %5809 = vmatprep.subr.bf16.mxu1 %v6943_v53 }
 0x12b   : > { %5810 = vmatpush3.bf16.msra.mxu1 %v6316_v6  ;;  %v6337_v6 = vld [vmem:[%s7512_s6 + $0x18] sm:$0xff]  }
 0x12c   : > { %5811 = vmatprep.subr.bf16.mxu1 %v6943_v53 }
 0x12f   : > { %5592 = vmatmul.mubr.bf16.gmra.mrb[24].mxu0 %v7054_v44  ;;  %5812 = vmatpush3.bf16.msra.mxu1 %v6318_v62  ;;  %v6339_v62 = vld [vmem:[%s7512_s6 + $0x28] sm:$0xff]  }
 0x130   : > { %5595 = vmatprep.mubr.bf16.mxu0 %v7059_v43  ;;  %5813 = vmatprep.subr.bf16.mxu1 %v6943_v53 }
 0x133   : > { %5814 = vmatpush3.bf16.msra.mxu1 %v6319_v46 }
 0x134   : > { %5819 = vmatprep.subr.bf16.mxu1 %v6943_v53 }
 0x136   : > { %5816 = vmatmul.mubr.bf16.vlgmr.msra.gmra.mrb[76].mxu1 %v3788_v19 }
 0x137   : > { %5596 = vmatmul.mubr.bf16.gmra.mrb[28].mxu0 %v7070_v25  ;;  %5820 = vmatpush3.bf16.msra.mxu1 %v6321_v28  ;;  %v4018_v28 = vpack.c.bf16 %v4855_v15, %v4854_v17 }
 0x138   : > { %5599 = vmatprep.mubr.bf16.mxu0 %v7075_v60  ;;  %5821 = vmatprep.subr.bf16.mxu1 %v6943_v53 }
 0x139   : > { %5835 = vmatprep.mubr.msk.bf16.mxu1 %vm6390_vm0, %v6943_v53 }
 0x13b   : > { %5822 = vmatpush3.bf16.msra.mxu1 %v6322_v31 }
 0x13c   : > { %5823 = vmatprep.subr.bf16.mxu1 %v6943_v53 }
 0x13f   : > { %5600 = vmatmul.mubr.bf16.gmra.mrb[32].mxu0 %v7086_v48  ;;  %5824 = vmatpush3.bf16.msra.mxu1 %v6324_v34 }
 0x140   : > { %5619 = vmatprep.mubr.bf16.mxu0 %v6936_v51  ;;  %5825 = vmatprep.subr.bf16.mxu1 %v6943_v53  ;;  %v6328_v51 = vld [vmem:[%s7512_s6 + $0x28] sm:$0xff]  }
 0x141   : > { %v5361_v37 = vpop.f32.mrb[0].mxu1 }
 0x142   : > { %v7098_v40 = vpop.f32.mrb[1].mxu1 }
 0x143   : > { %v5362_v42 = vpop.f32.mrb[2].mxu1  ;;  %5826 = vmatpush3.bf16.msra.mxu1 %v6325_v35 }
 0x144   : > { %v7103_v45 = vpop.f32.mrb[3].mxu1  ;;  %5827 = vmatprep.subr.bf16.mxu1 %v6943_v53  ;;  %v2515_v42 = vld [vmem:[#allocation2 + $0x134] sm:$0xff] }
 0x147   : > { %5620 = vmatmul.mubr.bf16.vlgmr.msra.gmra.mrb[0].mxu0 %v6941_v56  ;;  %5828 = vmatpush3.bf16.msra.mxu1 %v6326_v16  ;;  %v6330_v56 = vld [vmem:[%s7509_s3 + $0x1d0] sm:$0xff]   ;;  %v2516_v16 = vld [vmem:[#allocation2 + $0x13c] sm:$0xff] }
 0x148   : > { %5656 = vmatpush3.bf16.msra.mxu0 %v7023_v54  ;;  %5623 = vmatprep.mubr.bf16.mxu0 %v6959_v27  ;;  %v6332_v54 = vld [vmem:[%s7512_s6] sm:$0xff]  }
 0x149   : > { %v7115_v47 = vpop.f32.mrb[4].mxu1  ;;  %5657 = vmatprep.subr.bf16.mxu0 %v6327_v52  ;;  %5829 = vmatprep.subr.bf16.mxu1 %v6943_v53 }
 0x14a   : > { %v7121_v38 = vpop.f32.mrb[5].mxu1 }
 0x14b   : > { %v5366_v3 = vpop.f32.mrb[6].mxu1  ;;  %5830 = vmatpush3.bf16.msra.mxu1 %v6328_v51  ;;  %v2813_v51 = vld [vmem:[#allocation2 + $0x25] sm:$0xff] }
 0x14c   : > { %v7126_v27 = vpop.f32.mrb[7].mxu1  ;;  %5658 = vmatpush3.bf16.msra.mxu0 %v6327_v52  ;;  %5831 = vmatprep.subr.bf16.mxu1 %v6943_v53 }
 0x14d   : > { %5659 = vmatprep.subr.bf16.mxu0 %v6330_v56 }
 0x14f   : > { %5624 = vmatmul.mubr.bf16.gmra.mrb[4].mxu0 %v6964_v29  ;;  %5832 = vmatpush3.bf16.msra.mxu1 %v6329_v5 }
 0x150   : > { %5627 = vmatprep.mubr.bf16.mxu0 %v6979_v36  ;;  %5660 = vmatpush3.bf16.msra.mxu0 %v6330_v56  ;;  %v6340_v36 = vld [vmem:[%s7509_s3 + $0x1e8] sm:$0xff]  }
 0x151   : > { %v7139_v22 = vpop.f32.mrb[8].mxu1  ;;  %5833 = vmatprep.subr.bf16.mxu1 %v6943_v53  ;;  %5661 = vmatprep.subr.bf16.mxu0 %v6333_v14  ;;  %v2814_v56 = vld [vmem:[#allocation2 + $0x2d] sm:$0xff] }
 0x152   : > { %v1042_v29 = vpop.f32.mrb[9].mxu1  ;;  %v2849_v49 = vpack.c.bf16 %v2814_v56, %v2813_v51  ;;  %v6355_v56 = vld [vmem:[%s7512_s6 + $0x10] sm:$0xff]  }
 0x153   : > { %v5370_v50 = vpop.f32.mrb[10].mxu1  ;;  %5834 = vmatpush3.bf16.msra.mxu1 %v6331_v59  ;;  %v2817_v29 = vld [vmem:[#allocation2 + $0x45] sm:$0xff] }
 0x154   : > { %v7148_v58 = vpop.f32.mrb[11].mxu1  ;;  %5839 = vmatprep.subr.bf16.mxu1 %v6943_v53  ;;  %5662 = vmatpush3.bf16.msra.mxu0 %v6333_v14  ;;  %v2534_v14 = vpack.c.bf16 %v2516_v16, %v2515_v42  ;;  %v6376_v16 = vld [vmem:[%s7509_s3 + $0x218] sm:$0xff]  }
 0x155   : > { %5663 = vmatprep.subr.bf16.mxu0 %v6336_v63 }
 0x156   : > { %5836 = vmatmul.mubr.bf16.vlgmr.msra.gmra.mrb[80].mxu1 %v3903_v11  ;;  %v2818_v11 = vld [vmem:[#allocation2 + $0x4d] sm:$0xff] }
 0x157   : > { %5628 = vmatmul.mubr.bf16.gmra.mrb[8].mxu0 %v6984_v39  ;;  %5840 = vmatpush3.bf16.msra.mxu1 %v6332_v54  ;;  %v6343_v39 = vld [vmem:[%s7509_s3 + $0x1f0] sm:$0xff]  }
 0x158   : > { %5631 = vmatprep.mubr.bf16.mxu0 %v7001_v20  ;;  %5841 = vmatprep.subr.bf16.mxu1 %v6943_v53  ;;  %v6335_v20 = vld [vmem:[%s7512_s6 + $0x10] sm:$0xff]  }
 0x159   : > { %v7160_v24 = vpop.f32.mrb[12].mxu1  ;;  %5664 = vmatpush3.bf16.msra.mxu0 %v6336_v63  ;;  %5855 = vmatprep.mubr.msk.bf16.mxu1 %vm6390_vm0, %v6943_v53  ;;  %v2816_v63 = vld [vmem:[#allocation2 + $0x3d] sm:$0xff] }
 0x15a   : > { %v1058_v8 = vpop.f32.mrb[13].mxu1  ;;  %5665 = vmatprep.subr.bf16.mxu0 %v6340_v36 }
 0x15b   : > { %v7167_v30 = vpop.f32.mrb[14].mxu1  ;;  %5842 = vmatpush3.bf16.msra.mxu1 %v6334_v4  ;;  %v6351_v4 = vld [vmem:[%s7512_s6 + $0x30] sm:$0xff]  }
 0x15c   : > { %v7172_v9 = vpop.f32.mrb[15].mxu1  ;;  %5843 = vmatprep.subr.bf16.mxu1 %v6943_v53 }
 0x15d   : > { %5666 = vmatpush3.bf16.msra.mxu0 %v6340_v36  ;;  %v2850_v36 = vpack.c.bf16 %v2816_v63, %v2815_v57  ;;  %v2827_v57 = vld [vmem:[#allocation2 + $0x95] sm:$0xff]  ;;  %v2828_v63 = vld [vmem:[#allocation2 + $0x9d] sm:$0xff] }
 0x15e   : > { %5667 = vmatprep.subr.bf16.mxu0 %v6343_v39 }
 0x15f   : > { %5632 = vmatmul.mubr.bf16.gmra.mrb[12].mxu0 %v7006_v10  ;;  %5844 = vmatpush3.bf16.msra.mxu1 %v6335_v20  ;;  %v6338_v10 = vld [vmem:[%s7512_s6 + $0x20] sm:$0xff]  }
 0x160   : > { %5635 = vmatprep.mubr.bf16.mxu0 %v7025_v55  ;;  %5845 = vmatprep.subr.bf16.mxu1 %v6943_v53  ;;  %v7195_v55 = vld [vmem:[%s7509_s3 + $0x200] sm:$0xff]  }
 0x161   : > { %v7184_v13 = vpop.f32.mrb[16].mxu1  ;;  %5668 = vmatpush3.bf16.msra.mxu0 %v6343_v39  ;;  %v2851_v39 = vpack.c.bf16 %v2818_v11, %v2817_v29  ;;  %v2829_v29 = vld [vmem:[#allocation2 + $0xa5] sm:$0xff]  ;;  %v2830_v11 = vld [vmem:[#allocation2 + $0xad] sm:$0xff] }
 0x162   : > { %v1074_v61 = vpop.f32.mrb[17].mxu1  ;;  %5669 = vmatprep.subr.bf16.mxu0 %v6346_v12 }
 0x163   : > { %v7186_v41 = vpop.f32.mrb[18].mxu1  ;;  %5846 = vmatpush3.bf16.msra.mxu1 %v6337_v6  ;;  %v4864_v6 = vld [vmem:[%s6921_s19 + $0xa0] sm:$0xff]  ;;  %v4865_v61 = vld [vmem:[%s6921_s19 + $0xa8] sm:$0xff] }
 0x164   : > { %v1077_v23 = vpop.f32.mrb[19].mxu1  ;;  %5847 = vmatprep.subr.bf16.mxu1 %v6943_v53  ;;  %v4133_v17 = vpack.c.bf16 %v4865_v61, %v4864_v6  ;;  %v2857_v61 = vpack.c.bf16 %v2830_v11, %v2829_v29  ;;  %v6361_v29 = vld [vmem:[%s7512_s6] sm:$0xff]  }
 0x165   : > { %5670 = vmatpush3.bf16.msra.mxu0 %v6346_v12  ;;  %v6352_v12 = vld [vmem:[%s7512_s6 + $0x38] sm:$0xff]  }
 0x166   : > { %5707 = vmatprep.subr.bf16.mxu0 %v7195_v55  ;;  %v2820_v23 = vld [vmem:[#allocation2 + $0x5d] sm:$0xff] }
 0x167   : > { %5636 = vmatmul.mubr.bf16.gmra.mrb[16].mxu0 %v7030_v0  ;;  %5848 = vmatpush3.bf16.msra.mxu1 %v6338_v10  ;;  %v6341_v0 = vld [vmem:[%s7512_s6 + $0x30] sm:$0xff]  }
 0x168   : > { %5639 = vmatprep.mubr.bf16.mxu0 %v7040_v26  ;;  %5849 = vmatprep.subr.bf16.mxu1 %v6943_v53  ;;  %v6342_v26 = vld [vmem:[%s7512_s6 + $0x38] sm:$0xff]  }
 0x169   : > { %v7204_v46 = vpop.f32.mrb[20].mxu1  ;;  %v2819_v10 = vld [vmem:[#allocation2 + $0x55] sm:$0xff] }
 0x16a   : > { %v1090_v1 = vpop.f32.mrb[21].mxu1  ;;  %v2852_v15 = vpack.c.bf16 %v2820_v23, %v2819_v10  ;;  %v6379_v23 = vld [vmem:[%s7509_s3 + $0x230] sm:$0xff]  }
 0x16b   : > { %v7206_v2 = vpop.f32.mrb[22].mxu1  ;;  %5850 = vmatpush3.bf16.msra.mxu1 %v6339_v62  ;;  %v6374_v62 = vld [vmem:[%s7509_s3 + $0x208] sm:$0xff]  }
 0x16c   : > { %v1093_v18 = vpop.f32.mrb[23].mxu1  ;;  %5851 = vmatprep.subr.bf16.mxu1 %v6943_v53  ;;  %v2821_v1 = vld [vmem:[#allocation2 + $0x65] sm:$0xff] }
 0x16f   : > { %5640 = vmatmul.mubr.bf16.gmra.mrb[20].mxu0 %v7045_v32  ;;  %5852 = vmatpush3.bf16.msra.mxu1 %v6341_v0  ;;  %v6344_v32 = vld [vmem:[%s7512_s6] sm:$0xff]   ;;  %v2822_v0 = vld [vmem:[#allocation2 + $0x6d] sm:$0xff] }
 0x170   : > { %5643 = vmatprep.mubr.bf16.mxu0 %v7054_v44  ;;  %5853 = vmatprep.subr.bf16.mxu1 %v6943_v53  ;;  %v6345_v44 = vld [vmem:[%s7512_s6 + $0x8] sm:$0xff]  }
 0x171   : > { %v5385_v21 = vpop.f32.mrb[24].mxu1 }
 0x172   : > { %v7220_v19 = vpop.f32.mrb[25].mxu1 }
 0x173   : > { %v7222_v31 = vpop.f32.mrb[26].mxu1  ;;  %5854 = vmatpush3.bf16.msra.mxu1 %v6342_v26 }
 0x174   : > { %v1109_v7 = vpop.f32.mrb[27].mxu1  ;;  %5859 = vmatprep.subr.bf16.mxu1 %v6943_v53 }
 0x175   : > { %v6375_v7 = vld [vmem:[%s7509_s3 + $0x210] sm:$0xff]  }
 0x176   : > { %5856 = vmatmul.mubr.bf16.vlgmr.msra.gmra.mrb[84].mxu1 %v4018_v28  ;;  %v2853_v28 = vpack.c.bf16 %v2822_v0, %v2821_v1  ;;  %v2831_v1 = vld [vmem:[#allocation2 + $0xb5] sm:$0xff]  ;;  %v2832_v0 = vld [vmem:[#allocation2 + $0xbd] sm:$0xff] }
 0x177   : > { %5644 = vmatmul.mubr.bf16.gmra.mrb[24].mxu0 %v7059_v43  ;;  %5860 = vmatpush3.bf16.msra.mxu1 %v6344_v32  ;;  %v6347_v43 = vld [vmem:[%s7512_s6 + $0x10] sm:$0xff]  }
 0x178   : > { %5647 = vmatprep.mubr.bf16.mxu0 %v7070_v25  ;;  %5861 = vmatprep.subr.bf16.mxu1 %v6943_v53  ;;  %v6348_v25 = vld [vmem:[%s7512_s6 + $0x18] sm:$0xff]  }
 0x179   : > { %v5389_v33 = vpop.f32.mrb[28].mxu1  ;;  %5875 = vmatprep.mubr.msk.bf16.mxu1 %vm6390_vm0, %v6943_v53 }
 0x17a   : > { %v7236_v34 = vpop.f32.mrb[29].mxu1  ;;  %v2823_v33 = vld [vmem:[#allocation2 + $0x75] sm:$0xff] }
 0x17b   : > { %v7238_v35 = vpop.f32.mrb[30].mxu1  ;;  %5862 = vmatpush3.bf16.msra.mxu1 %v6345_v44  ;;  %v6354_v44 = vld [vmem:[%s7512_s6 + $0x8] sm:$0xff]  }
 0x17c   : > { %v1125_v37 = vpop.f32.mrb[31].mxu1  ;;  %5863 = vmatprep.subr.bf16.mxu1 %v6943_v53 }
 0x17d   : > { %v2825_v37 = vld [vmem:[#allocation2 + $0x85] sm:$0xff] }
 0x17f   : > { %5648 = vmatmul.mubr.bf16.gmra.mrb[28].mxu0 %v7075_v60  ;;  %5864 = vmatpush3.bf16.msra.mxu1 %v6347_v43  ;;  %v6349_v60 = vld [vmem:[%s7512_s6 + $0x20] sm:$0xff]  }
 0x180   : > { %5651 = vmatprep.mubr.bf16.mxu0 %v7086_v48  ;;  %5865 = vmatprep.subr.bf16.mxu1 %v6943_v53  ;;  %v6350_v48 = vld [vmem:[%s7512_s6 + $0x28] sm:$0xff]   ;;  %v2824_v43 = vld [vmem:[#allocation2 + $0x7d] sm:$0xff] }
 0x181   : > { %v5393_v52 = vpop.f32.mrb[32].mxu1  ;;  %v2854_v51 = vpack.c.bf16 %v2824_v43, %v2823_v33 }
 0x182   : > { %v7250_v3 = vpop.f32.mrb[33].mxu1 }
 0x183   : > { %v5394_v5 = vpop.f32.mrb[34].mxu1  ;;  %5866 = vmatpush3.bf16.msra.mxu1 %v6348_v25  ;;  %v2826_v25 = vld [vmem:[#allocation2 + $0x8d] sm:$0xff] }
 0x184   : > { %v7255_v59 = vpop.f32.mrb[35].mxu1  ;;  %5867 = vmatprep.subr.bf16.mxu1 %v6943_v53 }
 0x187   : > { %5652 = vmatmul.mubr.bf16.gmra.mrb[32].mxu0 %v2534_v14  ;;  %5868 = vmatpush3.bf16.msra.mxu1 %v6349_v60  ;;  %v2855_v14 = vpack.c.bf16 %v2826_v25, %v2825_v37  ;;  %v6360_v37 = vld [vmem:[%s7512_s6 + $0x38] sm:$0xff]   ;;  %v4874_v25 = vld [vmem:[%s6921_s19 + $0xc0] sm:$0xff] }
 0x188   : > { %5671 = vmatprep.mubr.bf16.mxu0 %v2849_v49  ;;  %5869 = vmatprep.subr.bf16.mxu1 %v6943_v53  ;;  %v6377_v49 = vld [vmem:[%s7509_s3 + $0x220] sm:$0xff]  }
 0x189   : > { %v7262_v50 = vpop.f32.mrb[36].mxu1 }
 0x18a   : > { %v7264_v54 = vpop.f32.mrb[37].mxu1 }
 0x18b   : > { %5870 = vmatpush3.bf16.msra.mxu1 %v6350_v48  ;;  %v5730_v8 = vpop.f32.mrb[38].mxu1  ;;  %v6356_v48 = vld [vmem:[%s7512_s6 + $0x18] sm:$0xff]  }
 0x18c   : > { %5871 = vmatprep.subr.bf16.mxu1 %v6943_v53  ;;  %v7270_v20 = vpop.f32.mrb[39].mxu1  ;;  %v6378_v8 = vld [vmem:[%s7509_s3 + $0x228] sm:$0xff]  }
 0x18f   : > { %5672 = vmatmul.mubr.bf16.vlgmr.msra.gmra.mrb[0].mxu0 %v2850_v36  ;;  %5872 = vmatpush3.bf16.msra.mxu1 %v6351_v4 }
 0x190   : > { %5708 = vmatpush3.bf16.msra.mxu0 %v7195_v55  ;;  %5675 = vmatprep.mubr.bf16.mxu0 %v2851_v39  ;;  %v6353_v55 = vld [vmem:[%s7512_s6] sm:$0xff]   ;;  %v2856_v39 = vpack.c.bf16 %v2828_v63, %v2827_v57 }
 0x191   : > { %5709 = vmatprep.subr.bf16.mxu0 %v6374_v62  ;;  %5873 = vmatprep.subr.bf16.mxu1 %v6943_v53  ;;  %v7282_v18 = vpop.f32.mrb[40].mxu1 }
 0x192   : > { %v3330_v26 = vpop.f32.mrb[41].mxu1 }
 0x193   : > { %5874 = vmatpush3.bf16.msra.mxu1 %v6352_v12  ;;  %v5734_v21 = vpop.f32.mrb[42].mxu1  ;;  %v6357_v12 = vld [vmem:[%s7512_s6 + $0x20] sm:$0xff]  }
 0x194   : > { %5710 = vmatpush3.bf16.msra.mxu0 %v6374_v62  ;;  %5879 = vmatprep.subr.bf16.mxu1 %v6943_v53  ;;  %v7288_v32 = vpop.f32.mrb[43].mxu1  ;;  %v6358_v62 = vld [vmem:[%s7512_s6 + $0x28] sm:$0xff]   ;;  %v6380_v21 = vld [vmem:[%s7509_s3 + $0x238] sm:$0xff]  }
 0x195   : > { %5711 = vmatprep.subr.bf16.mxu0 %v6375_v7  ;;  %v2833_v26 = vld [vmem:[#allocation2 + $0xc5] sm:$0xff] }
 0x196   : > { %5876 = vmatmul.mubr.bf16.vlgmr.msra.gmra.mrb[88].mxu1 %v4133_v17  ;;  %v2834_v17 = vld [vmem:[#allocation2 + $0xcd] sm:$0xff] }
 0x197   : > { %5676 = vmatmul.mubr.bf16.gmra.mrb[4].mxu0 %v2852_v15  ;;  %5880 = vmatpush3.bf16.msra.mxu1 %v6353_v55  ;;  %v2859_v33 = vpack.c.bf16 %v2834_v17, %v2833_v26  ;;  %v6363_v26 = vld [vmem:[%s7512_s6 + $0x10] sm:$0xff]  }
 0x198   : > { %5679 = vmatprep.mubr.bf16.mxu0 %v2853_v28  ;;  %5712 = vmatpush3.bf16.msra.mxu0 %v6375_v7  ;;  %v2858_v28 = vpack.c.bf16 %v2832_v0, %v2831_v1  ;;  %v6359_v7 = vld [vmem:[%s7512_s6 + $0x30] sm:$0xff]  }
 0x199   : > { %5881 = vmatprep.subr.bf16.mxu1 %v6943_v53  ;;  %v7297_v42 = vpop.f32.mrb[44].mxu1  ;;  %5713 = vmatprep.subr.bf16.mxu0 %v6376_v16 }
 0x19a   : > { %v3346_v52 = vpop.f32.mrb[45].mxu1  ;;  %5895 = vmatprep.mubr.msk.bf16.mxu1 %vm6390_vm0, %v6943_v53 }
 0x19b   : > { %5882 = vmatpush3.bf16.msra.mxu1 %v6354_v44  ;;  %v7307_v5 = vpop.f32.mrb[46].mxu1  ;;  %v2835_v52 = vld [vmem:[#allocation2 + $0xd5] sm:$0xff] }
 0x19c   : > { %5883 = vmatprep.subr.bf16.mxu1 %v6943_v53  ;;  %v7310_v60 = vpop.f32.mrb[47].mxu1  ;;  %5714 = vmatpush3.bf16.msra.mxu0 %v6376_v16  ;;  %v4875_v16 = vld [vmem:[%s6921_s19 + $0xc8] sm:$0xff] }
 0x19d   : > { %5715 = vmatprep.subr.bf16.mxu0 %v6377_v49  ;;  %v4248_v57 = vpack.c.bf16 %v4875_v16, %v4874_v25 }
 0x19f   : > { %5680 = vmatmul.mubr.bf16.gmra.mrb[8].mxu0 %v2854_v51  ;;  %5884 = vmatpush3.bf16.msra.mxu1 %v6355_v56  ;;  %v2836_v51 = vld [vmem:[#allocation2 + $0xdd] sm:$0xff]  ;;  %v2837_v56 = vld [vmem:[#allocation2 + $0xe5] sm:$0xff] }
 0x1a0   : > { %5683 = vmatprep.mubr.bf16.mxu0 %v2855_v14  ;;  %5885 = vmatprep.subr.bf16.mxu1 %v6943_v53  ;;  %v2838_v14 = vld [vmem:[#allocation2 + $0xed] sm:$0xff]  ;;  %v2860_v63 = vpack.c.bf16 %v2836_v51, %v2835_v52  ;;  %v6365_v51 = vld [vmem:[%s7512_s6 + $0x20] sm:$0xff]  }
 0x1a1   : > { %v7319_v36 = vpop.f32.mrb[48].mxu1  ;;  %5716 = vmatpush3.bf16.msra.mxu0 %v6377_v49 }
 0x1a2   : > { %v3362_v4 = vpop.f32.mrb[49].mxu1  ;;  %5717 = vmatprep.subr.bf16.mxu0 %v6378_v8 }
 0x1a3   : > { %5886 = vmatpush3.bf16.msra.mxu1 %v6356_v48  ;;  %v7327_v6 = vpop.f32.mrb[50].mxu1  ;;  %v2861_v4 = vpack.c.bf16 %v2838_v14, %v2837_v56 }
 0x1a4   : > { %5887 = vmatprep.subr.bf16.mxu1 %v6943_v53  ;;  %v3365_v10 = vpop.f32.mrb[51].mxu1 }
 0x1a5   : > { %5718 = vmatpush3.bf16.msra.mxu0 %v6378_v8  ;;  %v2841_v10 = vld [vmem:[#allocation2 + $0x105] sm:$0xff] }
 0x1a6   : > { %5719 = vmatprep.subr.bf16.mxu0 %v6379_v23 }
 0x1a7   : > { %5684 = vmatmul.mubr.bf16.gmra.mrb[12].mxu0 %v2856_v39  ;;  %5888 = vmatpush3.bf16.msra.mxu1 %v6357_v12  ;;  %v6362_v39 = vld [vmem:[%s7512_s6 + $0x8] sm:$0xff]   ;;  %v2839_v12 = vld [vmem:[#allocation2 + $0xf5] sm:$0xff] }
 0x1a8   : > { %5687 = vmatprep.mubr.bf16.mxu0 %v2857_v61  ;;  %5889 = vmatprep.subr.bf16.mxu1 %v6943_v53  ;;  %v2840_v61 = vld [vmem:[#allocation2 + $0xfd] sm:$0xff] }
 0x1a9   : > { %v7337_v15 = vpop.f32.mrb[52].mxu1  ;;  %5720 = vmatpush3.bf16.msra.mxu0 %v6379_v23  ;;  %v2842_v23 = vld [vmem:[#allocation2 + $0x10d] sm:$0xff]  ;;  %v2862_v0 = vpack.c.bf16 %v2840_v61, %v2839_v12 }
 0x1aa   : > { %v3378_v55 = vpop.f32.mrb[53].mxu1  ;;  %5721 = vmatprep.subr.bf16.mxu0 %v6380_v21 }
 0x1ab   : > { %5890 = vmatpush3.bf16.msra.mxu1 %v6358_v62  ;;  %v7345_v44 = vpop.f32.mrb[54].mxu1  ;;  %v2863_v55 = vpack.c.bf16 %v2842_v23, %v2841_v10  ;;  %v6367_v10 = vld [vmem:[%s7512_s6 + $0x30] sm:$0xff]  }
 0x1ac   : > { %5891 = vmatprep.subr.bf16.mxu1 %v6943_v53  ;;  %v3381_v43 = vpop.f32.mrb[55].mxu1 }
 0x1ad   : > { %5722 = vmatpush3.bf16.msra.mxu0 %v6380_v21  ;;  %v2845_v43 = vld [vmem:[#allocation2 + $0x125] sm:$0xff] }
 0x1af   : > { %5688 = vmatmul.mubr.bf16.gmra.mrb[16].mxu0 %v2858_v28  ;;  %5892 = vmatpush3.bf16.msra.mxu1 %v6359_v7  ;;  %v6364_v28 = vld [vmem:[%s7512_s6 + $0x18] sm:$0xff]  }
 0x1b0   : > { %5691 = vmatprep.mubr.bf16.mxu0 %v2859_v33  ;;  %5893 = vmatprep.subr.bf16.mxu1 %v6943_v53  ;;  %v2843_v7 = vld [vmem:[#allocation2 + $0x115] sm:$0xff]  ;;  %v2844_v33 = vld [vmem:[#allocation2 + $0x11d] sm:$0xff] }
 0x1b1   : > { %v5749_v49 = vpop.f32.mrb[56].mxu1  ;;  %v2864_v52 = vpack.c.bf16 %v2844_v33, %v2843_v7  ;;  %v3148_v7 = vld [vmem:[#allocation2 + $0x3e] sm:$0xff] }
 0x1b2   : > { %v7354_v48 = vpop.f32.mrb[57].mxu1 }
 0x1b3   : > { %5894 = vmatpush3.bf16.msra.mxu1 %v6360_v37  ;;  %v7359_v11 = vpop.f32.mrb[58].mxu1  ;;  %v2846_v37 = vld [vmem:[#allocation2 + $0x12d] sm:$0xff] }
 0x1b4   : > { %5899 = vmatprep.subr.bf16.mxu1 %v6943_v53  ;;  %v3397_v8 = vpop.f32.mrb[59].mxu1  ;;  %v2865_v14 = vpack.c.bf16 %v2846_v37, %v2845_v43 }
 0x1b5   : > { %v3146_v8 = vld [vmem:[#allocation2 + $0x2e] sm:$0xff] }
 0x1b6   : > { %5896 = vmatmul.mubr.bf16.vlgmr.msra.gmra.mrb[92].mxu1 %v4248_v57  ;;  %v6366_v57 = vld [vmem:[%s7512_s6 + $0x28] sm:$0xff]  }
 0x1b7   : > { %5692 = vmatmul.mubr.bf16.gmra.mrb[20].mxu0 %v2860_v63  ;;  %5900 = vmatpush3.bf16.msra.mxu1 %v6361_v29  ;;  %v2847_v63 = vld [vmem:[#allocation2 + $0x135] sm:$0xff]  ;;  %v2848_v29 = vld [vmem:[#allocation2 + $0x13d] sm:$0xff] }
 0x1b8   : > { %5695 = vmatprep.mubr.bf16.mxu0 %v2861_v4  ;;  %5901 = vmatprep.subr.bf16.mxu1 %v6943_v53  ;;  %v3145_v4 = vld [vmem:[#allocation2 + $0x26] sm:$0xff]  ;;  %v2866_v61 = vpack.c.bf16 %v2848_v29, %v2847_v63 }
 0x1b9   : > { %v5753_v62 = vpop.f32.mrb[60].mxu1  ;;  %5915 = vmatprep.mubr.msk.bf16.mxu1 %vm6390_vm0, %v6943_v53 }
 0x1ba   : > { %v7368_v1 = vpop.f32.mrb[61].mxu1  ;;  %v3181_v62 = vpack.c.bf16 %v3146_v8, %v3145_v4 }
 0x1bb   : > { %5902 = vmatpush3.bf16.msra.mxu1 %v6362_v39  ;;  %v7373_v17 = vpop.f32.mrb[62].mxu1 }
 0x1bc   : > { %5903 = vmatprep.subr.bf16.mxu1 %v6943_v53  ;;  %v3413_v21 = vpop.f32.mrb[63].mxu1 }
 0x1bd   : > { %v4885_v21 = vld [vmem:[%s6921_s19 + $0xe8] sm:$0xff] }
 0x1bf   : > { %5696 = vmatmul.mubr.bf16.gmra.mrb[24].mxu0 %v2862_v0  ;;  %5904 = vmatpush3.bf16.msra.mxu1 %v6363_v26  ;;  %v6368_v26 = vld [vmem:[%s7512_s6 + $0x38] sm:$0xff]  }
 0x1c0   : > { %5699 = vmatprep.mubr.bf16.mxu0 %v2863_v55  ;;  %5905 = vmatprep.subr.bf16.mxu1 %v6943_v53  ;;  %v4884_v55 = vld [vmem:[%s6921_s19 + $0xe0] sm:$0xff] }
 0x1c1   : > { %v5757_v25 = vpop.f32.mrb[64].mxu1  ;;  %v4363_v33 = vpack.c.bf16 %v4885_v21, %v4884_v55 }
 0x1c2   : > { %v7380_v16 = vpop.f32.mrb[65].mxu1 }
 0x1c3   : > { %5906 = vmatpush3.bf16.msra.mxu1 %v6364_v28  ;;  %v5758_v56 = vpop.f32.mrb[66].mxu1  ;;  %v3147_v28 = vld [vmem:[#allocation2 + $0x36] sm:$0xff] }
 0x1c4   : > { %5907 = vmatprep.subr.bf16.mxu1 %v6943_v53  ;;  %v7386_v49 = vpop.f32.mrb[67].mxu1  ;;  %v3182_v43 = vpack.c.bf16 %v3148_v7, %v3147_v28 }
 0x1c7   : > { %5700 = vmatmul.mubr.bf16.gmra.mrb[28].mxu0 %v2864_v52  ;;  %5908 = vmatpush3.bf16.msra.mxu1 %v6365_v51 }
 0x1c8   : > { %5703 = vmatprep.mubr.bf16.mxu0 %v2865_v14  ;;  %5909 = vmatprep.subr.bf16.mxu1 %v6943_v53 }
 0x1c9   : > { %v7392_v39 = vpop.f32.mrb[68].mxu1 }
 0x1ca   : > { %v5777_v12 = vpop.f32.mrb[69].mxu1 }
 0x1cb   : > { %5910 = vmatpush3.bf16.msra.mxu1 %v6366_v57  ;;  %v7397_v23 = vpop.f32.mrb[70].mxu1 }
 0x1cc   : > { %5911 = vmatprep.subr.bf16.mxu1 %v6943_v53  ;;  %v5778_v0 = vpop.f32.mrb[71].mxu1 }
 0x1cf   : > { %5704 = vmatmul.mubr.bf16.gmra.mrb[32].mxu0 %v2866_v61  ;;  %5912 = vmatpush3.bf16.msra.mxu1 %v6367_v10 }
 0x1d0   : > { %5723 = vmatprep.mubr.bf16.mxu0 %v3181_v62  ;;  %5913 = vmatprep.subr.bf16.mxu1 %v6943_v53 }
 0x1d3   : > { %5914 = vmatpush3.bf16.msra.mxu1 %v6368_v26 }
 0x1d6   : > { %5916 = vmatmul.mubr.bf16.vlgmr.msra.gmra.mrb[96].mxu1 %v4363_v33  ;;  %v7422_v33 = vld [vmem:[%s7510_s4] ss:$0 sm:$0xff] }
 0x1d7   : > { %5724 = vmatmul.mubr.bf16.vlgmr.msra.gmra.mrb[0].mxu0 %v3182_v43 }
 0x1e9   : > { %v3774_v37 = vpop.f32.mrb[72].mxu1 }
 0x1ea   : > { %v5797_v25 = vpop.f32.mrb[73].mxu1 }
 0x1eb   : > { %v3777_v52 = vpop.f32.mrb[74].mxu1 }
 0x1ec   : > { %v5798_v51 = vpop.f32.mrb[75].mxu1 }
 0x209   : > { %v3889_v56 = vpop.f32.mrb[76].mxu1 }
 0x20a   : > { %v5817_v14 = vpop.f32.mrb[77].mxu1 }
 0x20b   : > { %v3892_v57 = vpop.f32.mrb[78].mxu1 }
 0x20c   : > { %v5818_v63 = vpop.f32.mrb[79].mxu1 }
 0x229   : > { %v7406_v29 = vpop.f32.mrb[80].mxu1 }
 0x22a   : > { %v5837_v4 = vpop.f32.mrb[81].mxu1 }
 0x22b   : > { %v7408_v8 = vpop.f32.mrb[82].mxu1 }
 0x22c   : > { %v5838_v12 = vpop.f32.mrb[83].mxu1 }
 0x249   : > { %v7410_v53 = vpop.f32.mrb[84].mxu1 }
 0x24a   : > { %v5857_v61 = vpop.f32.mrb[85].mxu1 }
 0x24b   : > { %v7412_v10 = vpop.f32.mrb[86].mxu1 }
 0x24c   : > { %v5858_v62 = vpop.f32.mrb[87].mxu1 }
 0x269   : > { %v7414_v0 = vpop.f32.mrb[88].mxu1 }
 0x26a   : > { %v5677_v26 = vpop.f32.mrb[4].mxu0  ;;  %v5877_v55 = vpop.f32.mrb[89].mxu1 }
 0x26b   : > { %v5939_v21 = vadd.f32 %v5677_v26, %v7115_v47  ;;  %v2982_v28 = vpop.f32.mrb[5].mxu0  ;;  %v7417_v7 = vpop.f32.mrb[90].mxu1 }
 0x26c   : > { %v5941_v43 = vadd.f32 %v2982_v28, %v7121_v38  ;;  %v5678_v25 = vpop.f32.mrb[6].mxu0  ;;  %v5878_v51 = vpop.f32.mrb[91].mxu1 }
 0x26d   : > { %v5940_v14 = vadd.f32 %v5939_v21, %v7262_v50  ;;  %v2985_v63 = vpop.f32.mrb[7].mxu0 }
 0x26e   : > { %v5942_v4 = vadd.f32 %v5941_v43, %v7264_v54  ;;  %v5945_v12 = vadd.f32 %v2985_v63, %v7126_v27 }
 0x26f   : > { %v3490_v47 = vadd.f32 %v5940_v14, %v7422_v33 }
 0x270   : > { %v3488_v61 = vadd.f32 %v5942_v4, %v7422_v33  ;;  %v5946_v62 = vadd.f32 %v5945_v12, %v7270_v20 }
 0x271   : > { %3526 = vst [vmem:[#allocation3 + $0x30] sm:$0xff] %v3490_v47 }
 0x272   : > { %3524 = vst [vmem:[#allocation3 + $0x20] sm:$0xff] %v3488_v61  ;;  %v3489_v26 = vadd.f32 %v5946_v62, %v7422_v33  ;;  %v5681_v38 = vpop.f32.mrb[8].mxu0 }
 0x273   : > { %v5947_v55 = vadd.f32 %v5681_v38, %v7139_v22  ;;  %v2998_v28 = vpop.f32.mrb[9].mxu0 }
 0x274   : > { %3525 = vst [vmem:[#allocation3 + $0x28] sm:$0xff] %v3489_v26  ;;  %v5682_v50 = vpop.f32.mrb[10].mxu0 }
 0x275   : > { %v5948_v54 = vadd.f32 %v5947_v55, %v7282_v18  ;;  %v3001_v21 = vpop.f32.mrb[11].mxu0 }
 0x276   : > { %v5953_v27 = vadd.f32 %v3001_v21, %v7148_v58 }
 0x277   : > { %v3494_v43 = vadd.f32 %v5948_v54, %v7422_v33 }
 0x278   : > { %v5954_v25 = vadd.f32 %v5953_v27, %v7288_v32 }
 0x279   : > { %v3897_v20 = vadd.f32 %v3892_v57, %v3494_v43 }
 0x27a   : > { %v3493_v51 = vadd.f32 %v5954_v25, %v7422_v33  ;;  %v5685_v14 = vpop.f32.mrb[12].mxu0 }
 0x27b   : > { %v3674_v63 = vld [vmem:[#allocation3 + $0x24] sm:$0xff]  ;;  %v3675_v4 = vld [vmem:[#allocation3 + $0x2c] sm:$0xff]  ;;  %3899 = vst [vmem:[#allocation3 + $0x50] sm:$0xff] %v3897_v20  ;;  %v5955_v22 = vadd.f32 %v5685_v14, %v7160_v24  ;;  %v3014_v12 = vpop.f32.mrb[13].mxu0 }
 0x27c   : > { %v3781_v47 = vadd.f32 %v3774_v37, %v3674_v63  ;;  %v3782_v18 = vadd.f32 %v3777_v52, %v3675_v4  ;;  %v3896_v61 = vadd.f32 %v3889_v56, %v3493_v51  ;;  %v5686_v62 = vpop.f32.mrb[14].mxu0 }
 0x27d   : > { %v5956_v58 = vadd.f32 %v5955_v22, %v7297_v42  ;;  %v5959_v26 = vadd.f32 %v5686_v62, %v7167_v30  ;;  %v3017_v32 = vpop.f32.mrb[15].mxu0 }
 0x27e   : > { %3783 = vst [vmem:[#allocation3 + $0x24] sm:$0xff] %v3781_v47  ;;  %3784 = vst [vmem:[#allocation3 + $0x2c] sm:$0xff] %v3782_v18  ;;  %v5961_v57 = vadd.f32 %v3017_v32, %v7172_v9 }
 0x27f   : > { %3898 = vst [vmem:[#allocation3 + $0x48] sm:$0xff] %v3896_v61  ;;  %v3498_v38 = vadd.f32 %v5956_v58, %v7422_v33  ;;  %v5960_v55 = vadd.f32 %v5959_v26, %v7307_v5 }
 0x280   : > { %v5962_v24 = vadd.f32 %v5961_v57, %v7310_v60 }
 0x281   : > { %3534 = vst [vmem:[#allocation3 + $0x70] sm:$0xff] %v3498_v38  ;;  %v3499_v37 = vadd.f32 %v5960_v55, %v7422_v33 }
 0x282   : > { %v3497_v42 = vadd.f32 %v5962_v24, %v7422_v33  ;;  %v5689_v52 = vpop.f32.mrb[16].mxu0 }
 0x283   : > { %3535 = vst [vmem:[#allocation3 + $0x78] sm:$0xff] %v3499_v37  ;;  %v5963_v30 = vadd.f32 %v5689_v52, %v7184_v13  ;;  %v3030_v9 = vpop.f32.mrb[17].mxu0 }
 0x284   : > { %3533 = vst [vmem:[#allocation3 + $0x68] sm:$0xff] %v3497_v42  ;;  %v5690_v5 = vpop.f32.mrb[18].mxu0 }
 0x285   : > { %v4478_v60 = vld [vmem:[#allocation3 + $0x24] ss:$2 sm:$0xff]  ;;  %v5964_v28 = vadd.f32 %v5963_v30, %v7319_v36  ;;  %v5967_v50 = vadd.f32 %v5690_v5, %v7186_v41  ;;  %v3033_v54 = vpop.f32.mrb[19].mxu0 }
 0x286   : > { %v4482_v56 = vld [vmem:[#allocation3 + $0x48] ss:$2 sm:$0xff]  ;;  %4894 = vst [vmem:[%s7451_s22 + $0x8] sm:$0xff] %v4478_v60 }
 0x287   : > { %4895 = vst [vmem:[%s7451_s22 + $0x10] sm:$0xff] %v4482_v56  ;;  %v3502_v21 = vadd.f32 %v5964_v28, %v7422_v33  ;;  %v5968_v27 = vadd.f32 %v5967_v50, %v7327_v6 }
 0x289   : > { %v4126_v43 = vadd.f32 %v7410_v53, %v3502_v21  ;;  %v3503_v13 = vadd.f32 %v5968_v27, %v7422_v33  ;;  %v4349_v25 = vpop.f32.mrb[92].mxu1 }
 0x28a   : > { %v3905_v20 = vld [vmem:[#allocation3 + $0x74] sm:$0xff]  ;;  %v5693_v51 = vpop.f32.mrb[20].mxu0  ;;  %v5897_v14 = vpop.f32.mrb[93].mxu1 }
 0x28b   : > { %v4012_v63 = vadd.f32 %v7408_v8, %v3905_v20  ;;  %v3904_v36 = vld [vmem:[#allocation3 + $0x6c] sm:$0xff]  ;;  %4128 = vst [vmem:[#allocation3 + $0x90] sm:$0xff] %v4126_v43  ;;  %v4127_v41 = vadd.f32 %v7412_v10, %v3503_v13  ;;  %v5971_v4 = vadd.f32 %v5693_v51, %v7204_v46  ;;  %v3046_v22 = vpop.f32.mrb[21].mxu0  ;;  %v4352_v12 = vpop.f32.mrb[94].mxu1 }
 0x28c   : > { %v4011_v6 = vadd.f32 %v7406_v29, %v3904_v36  ;;  %v5694_v47 = vpop.f32.mrb[22].mxu0  ;;  %v5898_v53 = vpop.f32.mrb[95].mxu1 }
 0x28d   : > { %4014 = vst [vmem:[#allocation3 + $0x74] sm:$0xff] %v4012_v63  ;;  %4129 = vst [vmem:[#allocation3 + $0x98] sm:$0xff] %v4127_v41  ;;  %v5972_v18 = vadd.f32 %v5971_v4, %v7337_v15  ;;  %v5975_v61 = vadd.f32 %v5694_v47, %v7206_v2  ;;  %v3049_v8 = vpop.f32.mrb[23].mxu0 }
 0x28e   : > { %4013 = vst [vmem:[#allocation3 + $0x6c] sm:$0xff] %v4011_v6 }
 0x28f   : > { %v3506_v10 = vadd.f32 %v5972_v18, %v7422_v33  ;;  %v5976_v46 = vadd.f32 %v5975_v61, %v7345_v44 }
 0x291   : > { %3542 = vst [vmem:[#allocation3 + $0xb0] sm:$0xff] %v3506_v10  ;;  %v3507_v62 = vadd.f32 %v5976_v46, %v7422_v33 }
 0x292   : > { %v5697_v29 = vpop.f32.mrb[24].mxu0 }
 0x293   : > { %3543 = vst [vmem:[#allocation3 + $0xb8] sm:$0xff] %v3507_v62  ;;  %v3062_v58 = vpop.f32.mrb[25].mxu0 }
 0x294   : > { %v4490_v26 = vld [vmem:[#allocation3 + $0x90] ss:$2 sm:$0xff]  ;;  %v5981_v32 = vadd.f32 %v3062_v58, %v7220_v19  ;;  %v5698_v57 = vpop.f32.mrb[26].mxu0 }
 0x295   : > { %v4486_v15 = vld [vmem:[#allocation3 + $0x6c] ss:$2 sm:$0xff]  ;;  %4897 = vst [vmem:[%s7451_s22 + $0x20] sm:$0xff] %v4490_v26  ;;  %v5983_v2 = vadd.f32 %v5698_v57, %v7222_v31  ;;  %v3065_v38 = vpop.f32.mrb[27].mxu0 }
 0x296   : > { %4896 = vst [vmem:[%s7451_s22 + $0x18] sm:$0xff] %v4486_v15  ;;  %v5982_v55 = vadd.f32 %v5981_v32, %v7354_v48 }
 0x297   : > { %v5984_v44 = vadd.f32 %v5983_v2, %v7359_v11 }
 0x298   : > { %v3508_v24 = vadd.f32 %v5982_v55, %v7422_v33 }
 0x299   : > { %v3511_v37 = vadd.f32 %v5984_v44, %v7422_v33 }
 0x29a   : > { %v4134_v42 = vld [vmem:[#allocation3 + $0xb4] sm:$0xff]  ;;  %3544 = vst [vmem:[#allocation3 + $0xc0] sm:$0xff] %v3508_v24  ;;  %v5701_v52 = vpop.f32.mrb[28].mxu0 }
 0x29b   : > { %v4241_v19 = vadd.f32 %v7414_v0, %v4134_v42  ;;  %v4356_v30 = vadd.f32 %v4349_v25, %v3511_v37  ;;  %v3078_v9 = vpop.f32.mrb[29].mxu0 }
 0x29c   : > { %v5989_v5 = vadd.f32 %v3078_v9, %v7236_v34  ;;  %v5702_v31 = vpop.f32.mrb[30].mxu0 }
 0x29d   : > { %4243 = vst [vmem:[#allocation3 + $0xb4] sm:$0xff] %v4241_v19  ;;  %4358 = vst [vmem:[#allocation3 + $0xd8] sm:$0xff] %v4356_v30  ;;  %v5991_v48 = vadd.f32 %v5702_v31, %v7238_v35  ;;  %v3081_v60 = vpop.f32.mrb[31].mxu0 }
 0x29e   : > { %v5990_v11 = vadd.f32 %v5989_v5, %v7368_v1 }
 0x29f   : > { %v5992_v56 = vadd.f32 %v5991_v48, %v7373_v17 }
 0x2a0   : > { %v3512_v28 = vadd.f32 %v5990_v11, %v7422_v33 }
 0x2a1   : > { %v4135_v50 = vld [vmem:[#allocation3 + $0xbc] sm:$0xff]  ;;  %v3515_v54 = vadd.f32 %v5992_v56, %v7422_v33 }
 0x2a2   : > { %v4242_v0 = vadd.f32 %v7417_v7, %v4135_v50  ;;  %v4357_v21 = vadd.f32 %v4352_v12, %v3512_v28  ;;  %v5705_v27 = vpop.f32.mrb[32].mxu0 }
 0x2a3   : > { %3551 = vst [vmem:[#allocation3 + $0xf8] sm:$0xff] %v3515_v54  ;;  %v3094_v34 = vpop.f32.mrb[33].mxu0 }
 0x2a4   : > { %4244 = vst [vmem:[#allocation3 + $0xbc] sm:$0xff] %v4242_v0  ;;  %4359 = vst [vmem:[#allocation3 + $0xe0] sm:$0xff] %v4357_v21  ;;  %v5997_v35 = vadd.f32 %v3094_v34, %v7250_v3  ;;  %v5706_v43 = vpop.f32.mrb[34].mxu0 }
 0x2a5   : > { %v3097_v1 = vpop.f32.mrb[35].mxu0 }
 0x2a6   : > { %v5998_v17 = vadd.f32 %v5997_v35, %v7380_v16  ;;  %v6001_v13 = vadd.f32 %v3097_v1, %v7255_v59 }
 0x2a8   : > { %v3516_v25 = vadd.f32 %v5998_v17, %v7422_v33  ;;  %v6002_v7 = vadd.f32 %v6001_v13, %v7386_v49 }
 0x2a9   : > { %v4464_v20 = vpop.f32.mrb[96].mxu1 }
 0x2aa   : > { %3552 = vst [vmem:[#allocation3 + $0x100] sm:$0xff] %v3516_v25  ;;  %v3517_v51 = vadd.f32 %v6002_v7, %v7422_v33  ;;  %v5725_v14 = vpop.f32.mrb[0].mxu0  ;;  %v5917_v63 = vpop.f32.mrb[97].mxu1 }
 0x2ab   : > { %v4494_v36 = vld [vmem:[#allocation3 + $0xb4] ss:$2 sm:$0xff]  ;;  %v3298_v41 = vpop.f32.mrb[1].mxu0  ;;  %v4467_v4 = vpop.f32.mrb[98].mxu1 }
 0x2ac   : > { %v4498_v3 = vld [vmem:[#allocation3 + $0xd8] ss:$2 sm:$0xff]  ;;  %4898 = vst [vmem:[%s7451_s22 + $0x28] sm:$0xff] %v4494_v36  ;;  %3553 = vst [vmem:[#allocation3 + $0x108] sm:$0xff] %v3517_v51  ;;  %v5936_v16 = vadd.f32 %v3298_v41, %v7098_v40  ;;  %v5726_v59 = vpop.f32.mrb[2].mxu0  ;;  %v5918_v22 = vpop.f32.mrb[99].mxu1 }
 0x2ad   : > { %4899 = vst [vmem:[%s7451_s22 + $0x30] sm:$0xff] %v4498_v3  ;;  %v3301_v12 = vpop.f32.mrb[3].mxu0 }
 0x2ae   : > { %v3484_v49 = vadd.f32 %v5936_v16, %v7422_v33  ;;  %v5938_v6 = vadd.f32 %v3301_v12, %v7103_v45 }
 0x2b0   : > { %v3666_v47 = vadd.f32 %v7392_v39, %v3484_v49  ;;  %v3485_v53 = vadd.f32 %v5938_v6, %v7422_v33 }
 0x2b1   : > { %v4364_v18 = vld [vmem:[#allocation3 + $0xfc] sm:$0xff] }
 0x2b2   : > { %3668 = vst [vmem:[#allocation3] sm:$0xff] %v3666_v47  ;;  %v3667_v61 = vadd.f32 %v7397_v23, %v3485_v53  ;;  %v4471_v8 = vadd.f32 %v4464_v20, %v4364_v18 }
 0x2b3   : > { %v4365_v10 = vld [vmem:[#allocation3 + $0x104] sm:$0xff] }
 0x2b4   : > { %3669 = vst [vmem:[#allocation3 + $0x8] sm:$0xff] %v3667_v61  ;;  %4473 = vst [vmem:[#allocation3 + $0xfc] sm:$0xff] %v4471_v8  ;;  %v4472_v40 = vadd.f32 %v4467_v4, %v4365_v10 }
 0x2b6   : > { %4474 = vst [vmem:[#allocation3 + $0x104] sm:$0xff] %v4472_v40 }
 0x2bb   : > { %v4475_v46 = vld [vmem:[#allocation3] ss:$2 sm:$0xff] }
 0x2bc   : > { %4476 = vst [vmem:[%s7451_s22] sm:$0xff] %v4475_v46 }
 0x2bd   : > { %v4502_v62 = vld [vmem:[#allocation3 + $0xfc] ss:$2 sm:$0xff] }
 0x2be   : > { %4900 = vst [vmem:[%s7451_s22 + $0x38] sm:$0xff] %v4502_v62 }
 0x2bf PF: > { %s17_s24 = sadd.s32 1, %s6387_s24  }
 0x2c0   : > { %p14_p4 = scmp.ge.s32.totalorder %s17_s24, 4  }
 0x2c2   :  { %16 = sbr.rel (!%p14_p4) target bundleno = 1 (0x1), region = 125 }

</bundles_post_ra>
